<compile_context>
chip_gen: v7x
topology: tpu7x:2x2x1
jax: 0.10.0
libtpu: 0.0.40
codegen_flags: <defaults>
</compile_context>

<pallas_src>
import numpy as np
import jax
import jax.numpy as jnp
from jax.experimental import pallas as pl
from jax.experimental.pallas import tpu as pltpu


def gmf_kernel(idx_ref, tab_ref, b_ref, o_ref):
    """One grid step = TB batch elements; batch lives on the lane axis.

    idx_ref : (2, TB) int32 — row 0: user idx, row 1: item idx + n_user
    tab_ref : (2D, n_user+n_item) f32 — block-diagonal, VMEM-resident:
                rows [0:D)  x cols [0:n_user)     = (w ⊙ U)^T  (Linear w folded)
                rows [D:2D) x cols [n_user:n_tab) = I^T
    b_ref   : (1, 1) f32 — Linear bias (SMEM scalar)
    o_ref   : (1, TB) f32 — sigmoid(logits), lane-dense output tile
    """
    tb = idx_ref.shape[1]
    two_d, n_tab = tab_ref.shape
    d = two_d // 2

    u_idx = idx_ref[0:1, :]                      # (1, TB)
    i_idx = idx_ref[1:2, :]                      # (1, TB), already offset by n_user

    # Combined one-hot selector (exactly 2 ones per column): VPU compares + OR.
    row = jax.lax.broadcasted_iota(jnp.int32, (n_tab, tb), 0)
    sel = ((row == u_idx) | (row == i_idx)).astype(jnp.float32)   # (n_tab, TB)

    # Single fused gather matmul on the MXU: (2D, n_tab) @ (n_tab, TB) -> (2D, TB)
    g = jnp.dot(tab_ref[...], sel, preferred_element_type=jnp.float32)

    # Linear weight already folded into the user rows -> plain sublane reduce.
    prod = g[:d, :] * g[d:, :]                           # (D, TB)   VPU
    logit = jnp.sum(prod, axis=0, keepdims=True)         # (1, TB)   XLU
    logit = logit + b_ref[0, 0]                          # SMEM scalar bias
    o_ref[...] = jax.nn.sigmoid(logit)                   # (1, TB)   EUP


def gmf_forward(u_idx, i_idx, u_table, i_table, w, b, *, tb=2048):
    """GMF forward. u_idx/i_idx: (B,) int; returns (B, 1) float32."""
    B = u_idx.shape[0]
    n_user, D = u_table.shape
    n_item, _ = i_table.shape
    n_tab = n_user + n_item

    num_tiles = pl.cdiv(B, tb)
    B_pad = num_tiles * tb

    # Merged index operand: row 0 = user idx, row 1 = item idx + n_user.
    # Padded lanes hit valid columns (user 0 / item 0) and are dropped below.
    u_p = jnp.zeros((B_pad,), jnp.int32).at[:B].set(u_idx.astype(jnp.int32))
    i_p = jnp.zeros((B_pad,), jnp.int32).at[:B].set(i_idx.astype(jnp.int32))
    idx_p = jnp.stack([u_p, i_p + n_user], axis=0)        # (2, B_pad)

    # Block-diagonal transposed table with the Linear weight pre-folded into
    # the user half (one-time D*n_user op; not a per-batch pre-scale).
    w_row = w.reshape(1, D).astype(jnp.float32)
    combo = jnp.zeros((2 * D, n_tab), jnp.float32)
    combo = combo.at[:D, :n_user].set((u_table.astype(jnp.float32) * w_row).T)
    combo = combo.at[D:, n_user:].set(i_table.astype(jnp.float32).T)

    b_2d = b.reshape(1, 1).astype(jnp.float32)            # SMEM scalar

    cost = pl.CostEstimate(
        flops=2 * B_pad * (2 * D) * n_tab + 2 * B_pad * D,
        transcendentals=2 * B_pad,                         # sigmoid = exp + recip
        bytes_accessed=4 * (2 * D * n_tab) + 8 * B_pad + 4 * B_pad + 4,
    )

    idx_spec = pl.BlockSpec((2, tb), lambda t: (0, t))               # batch tile
    out_spec = pl.BlockSpec((1, tb), lambda t: (0, t))               # lane-dense out
    bias_spec = pl.BlockSpec(memory_space=pltpu.MemorySpace.SMEM)    # bias scalar

    def build(table_spec):
        return pl.pallas_call(
            gmf_kernel,
            out_shape=jax.ShapeDtypeStruct((1, B_pad), jnp.float32),
            grid=(num_tiles,),
            in_specs=[idx_spec, table_spec, bias_spec],
            out_specs=out_spec,
            compiler_params=pltpu.CompilerParams(
                dimension_semantics=("parallel",),   # shard batch tiles across TCs
                vmem_limit_bytes=32 * 1024 * 1024,   # explicit; safe on v5e..v7x
            ),
            cost_estimate=cost,
        )

    try:
        # Grid-invariant table -> single pipeline buffer (halves its VMEM cost).
        table_spec = pl.BlockSpec((2 * D, n_tab), lambda t: (0, 0),
                                  pipeline_mode=pl.Buffered(buffer_count=1))
        out = build(table_spec)(idx_p, combo, b_2d)
    except Exception:
        # Fallback for jax versions without single-buffered BlockSpec support.
        table_spec = pl.BlockSpec((2 * D, n_tab), lambda t: (0, 0))
        out = build(table_spec)(idx_p, combo, b_2d)

    return out[0, :B][:, None]                             # (B, 1)


def gmf_reference(u_idx, i_idx, u_table, i_table, w, b):
    ue = u_table[u_idx]
    ie = i_table[i_idx]
    prod = ue * ie
    logit = prod @ w.T + b                 # (B, 1) + (1,)
    return jax.nn.sigmoid(logit)


if __name__ == "__main__":
    # Small, deterministic configuration consistent with GMF(n_user, n_item, gmf_dim).
    n_user, n_item, gmf_dim = 64, 128, 32
    batch = 300                            # exercises padding

    key = jax.random.PRNGKey(0)
    k_u, k_i, k_w, k_b, k_ui, k_ii = jax.random.split(key, 6)

    # Deterministic parameter init (shapes match nn.Embedding / nn.Linear).
    u_table = jax.random.normal(k_u, (n_user, gmf_dim), dtype=jnp.float32)
    i_table = jax.random.normal(k_i, (n_item, gmf_dim), dtype=jnp.float32)
    bound = 1.0 / np.sqrt(gmf_dim)
    w = jax.random.uniform(k_w, (1, gmf_dim), minval=-bound, maxval=bound,
                           dtype=jnp.float32)              # Linear weight (1, D)
    b = jax.random.uniform(k_b, (1,), minval=-bound, maxval=bound,
                           dtype=jnp.float32)              # Linear bias (1,)

    # Deterministic integer index inputs (the module's forward args u, i).
    u_idx = jax.random.randint(k_ui, (batch,), 0, n_user, dtype=jnp.int32)
    i_idx = jax.random.randint(k_ii, (batch,), 0, n_item, dtype=jnp.int32)

    ref = gmf_reference(u_idx, i_idx, u_table, i_table, w, b)

    # Default (large) batch tile: one grid step for this demo batch.
    out = gmf_forward(u_idx, i_idx, u_table, i_table, w, b)
    out = jax.block_until_ready(out)
    assert out.shape == (batch, 1)
    assert np.allclose(np.asarray(out), np.asarray(ref), atol=1e-5, rtol=1e-5)

    # Smaller tile to exercise the multi-step grid (+ padding) path.
    out2 = gmf_forward(u_idx, i_idx, u_table, i_table, w, b, tb=128)
    out2 = jax.block_until_ready(out2)
    assert np.allclose(np.asarray(out2), np.asarray(ref), atol=1e-5, rtol=1e-5)

    print("KERNEL_OK")
</pallas_src>

<mosaic_0001>
module attributes {stable_mosaic.version = 11 : i64} {
  func.func @gmf_kernel(%arg0: i32, %arg1: memref<2x2048xi32, #tpu.memory_space<vmem>>, %arg2: memref<64x192xf32, #tpu.memory_space<vmem>>, %arg3: memref<1x1xf32, #tpu.memory_space<smem>>, %arg4: memref<1x2048xf32, #tpu.memory_space<vmem>>) attributes {dimension_semantics = [#tpu.dimension_semantics<parallel>], iteration_bounds = array<i64: 1>, scalar_prefetch = 0 : i64, scratch_operands = 0 : i64, tpu.core_type = #tpu.core_type<tc>, window_params = [{transform_indices = @transform_0, window_bounds = array<i64: 2, 2048>}, {pipeline_mode = #tpu.pipeline_mode<synchronous>, transform_indices = @transform_1, window_bounds = array<i64: 64, 192>}, {transform_indices = @transform_2, window_bounds = array<i64: 1, 1>}, {transform_indices = @transform_3, window_bounds = array<i64: 1, 2048>}]} {
    %c0 = arith.constant 0 : index
    %c0_0 = arith.constant 0 : index
    %0 = vector.load %arg1[%c0, %c0_0] : memref<2x2048xi32, #tpu.memory_space<vmem>>, vector<1x2048xi32>
    %c1 = arith.constant 1 : index
    %c0_1 = arith.constant 0 : index
    %1 = vector.load %arg1[%c1, %c0_1] : memref<2x2048xi32, #tpu.memory_space<vmem>>, vector<1x2048xi32>
    %2 = tpu.iota {dimensions = array<i32: 0>} : vector<192x2048xi32>
    %3 = vector.broadcast %0 : vector<1x2048xi32> to vector<192x2048xi32>
    %4 = arith.cmpi eq, %2, %3 : vector<192x2048xi32>
    %5 = vector.broadcast %1 : vector<1x2048xi32> to vector<192x2048xi32>
    %6 = arith.cmpi eq, %2, %5 : vector<192x2048xi32>
    %7 = arith.ori %4, %6 : vector<192x2048xi1>
    %8 = arith.extui %7 : vector<192x2048xi1> to vector<192x2048xi32>
    %9 = arith.sitofp %8 : vector<192x2048xi32> to vector<192x2048xf32>
    %c0_2 = arith.constant 0 : index
    %c0_3 = arith.constant 0 : index
    %10 = vector.load %arg2[%c0_2, %c0_3] : memref<64x192xf32, #tpu.memory_space<vmem>>, vector<64x192xf32>
    %cst = arith.constant dense<0.000000e+00> : vector<64x2048xf32>
    %11 = tpu.matmul %10, %9, %cst {dimension_numbers = #tpu.dot_dimension_numbers<[1], [0], [0], [1], [0, 0, 1, 1], [], []>} : vector<64x192xf32>, vector<192x2048xf32>, vector<64x2048xf32> -> vector<64x2048xf32>
    %12 = vector.extract_strided_slice %11 {offsets = [0, 0], sizes = [32, 2048], strides = [1, 1]} : vector<64x2048xf32> to vector<32x2048xf32>
    %13 = vector.extract_strided_slice %11 {offsets = [32, 0], sizes = [32, 2048], strides = [1, 1]} : vector<64x2048xf32> to vector<32x2048xf32>
    %14 = arith.mulf %12, %13 : vector<32x2048xf32>
    %cst_4 = arith.constant dense<0.000000e+00> : vector<2048xf32>
    %15 = vector.multi_reduction <add>, %14, %cst_4 [0] : vector<32x2048xf32> to vector<2048xf32>
    %16 = vector.shape_cast %15 : vector<2048xf32> to vector<1x2048xf32>
    %c0_5 = arith.constant 0 : index
    %c0_6 = arith.constant 0 : index
    %17 = memref.load %arg3[%c0_5, %c0_6] : memref<1x1xf32, #tpu.memory_space<smem>>
    %18 = vector.broadcast %17 : f32 to vector<1x2048xf32>
    %19 = arith.addf %16, %18 : vector<1x2048xf32>
    %20 = arith.negf %19 : vector<1x2048xf32>
    %21 = math.exp %20 : vector<1x2048xf32>
    %cst_7 = arith.constant 1.000000e+00 : f32
    %22 = vector.broadcast %cst_7 : f32 to vector<1x2048xf32>
    %23 = arith.addf %22, %21 : vector<1x2048xf32>
    %24 = arith.divf %22, %23 : vector<1x2048xf32>
    %c0_8 = arith.constant 0 : index
    %c0_9 = arith.constant 0 : index
    %25 = vector.load %arg4[%c0_8, %c0_9] : memref<1x2048xf32, #tpu.memory_space<vmem>>, vector<1x2048xf32>
    tpu.vector_store %arg4[%c0_8, %c0_9], %24 {strides = array<i32>} : memref<1x2048xf32, #tpu.memory_space<vmem>>, vector<1x2048xf32>,
    return
  }
  func.func @transform_0(%arg0: i32) -> (i32, i32) {
    %c0_i32 = arith.constant 0 : i32
    %c0_i32_0 = arith.constant 0 : i32
    return %c0_i32, %arg0 : i32, i32
  }
  func.func @transform_1(%arg0: i32) -> (i32, i32) {
    %c0_i32 = arith.constant 0 : i32
    %c0_i32_0 = arith.constant 0 : i32
    %c0_i32_1 = arith.constant 0 : i32
    return %c0_i32, %c0_i32_0 : i32, i32
  }
  func.func @transform_2(%arg0: i32) -> (i32, i32) {
    %c0_i32 = arith.constant 0 : i32
    %c0_i32_0 = arith.constant 0 : i32
    %c0_i32_1 = arith.constant 0 : i32
    return %c0_i32, %c0_i32_0 : i32, i32
  }
  func.func @transform_3(%arg0: i32) -> (i32, i32) {
    %c0_i32 = arith.constant 0 : i32
    %c0_i32_0 = arith.constant 0 : i32
    return %c0_i32, %arg0 : i32, i32
  }
}

module attributes {stable_mosaic.version = 11 : i64} {
  func.func @gmf_kernel(%arg0: i32, %arg1: memref<2x2048xi32, #tpu.memory_space<vmem>>, %arg2: memref<64x192xf32, #tpu.memory_space<vmem>>, %arg3: memref<1x1xf32, #tpu.memory_space<smem>>, %arg4: memref<1x2048xf32, #tpu.memory_space<vmem>>) attributes {dimension_semantics = [#tpu.dimension_semantics<parallel>], iteration_bounds = array<i64: 1>, scalar_prefetch = 0 : i64, scratch_operands = 0 : i64, tpu.core_type = #tpu.core_type<tc>, window_params = [{transform_indices = @transform_0, window_bounds = array<i64: 2, 2048>}, {pipeline_mode = #tpu.pipeline_mode<synchronous>, transform_indices = @transform_1, window_bounds = array<i64: 64, 192>}, {transform_indices = @transform_2, window_bounds = array<i64: 1, 1>}, {transform_indices = @transform_3, window_bounds = array<i64: 1, 2048>}]} {
    %c0 = arith.constant 0 : index
    %c0_0 = arith.constant 0 : index
    %0 = vector.load %arg1[%c0, %c0_0] : memref<2x2048xi32, #tpu.memory_space<vmem>>, vector<1x2048xi32>
    %c1 = arith.constant 1 : index
    %c0_1 = arith.constant 0 : index
    %1 = vector.load %arg1[%c1, %c0_1] : memref<2x2048xi32, #tpu.memory_space<vmem>>, vector<1x2048xi32>
    %2 = tpu.iota {dimensions = array<i32: 0>} : vector<192x2048xi32>
    %3 = vector.broadcast %0 : vector<1x2048xi32> to vector<192x2048xi32>
    %4 = arith.cmpi eq, %2, %3 : vector<192x2048xi32>
    %5 = vector.broadcast %1 : vector<1x2048xi32> to vector<192x2048xi32>
    %6 = arith.cmpi eq, %2, %5 : vector<192x2048xi32>
    %7 = arith.ori %4, %6 : vector<192x2048xi1>
    %8 = arith.extui %7 : vector<192x2048xi1> to vector<192x2048xi32>
    %9 = arith.sitofp %8 : vector<192x2048xi32> to vector<192x2048xf32>
    %c0_2 = arith.constant 0 : index
    %c0_3 = arith.constant 0 : index
    %10 = vector.load %arg2[%c0_2, %c0_3] : memref<64x192xf32, #tpu.memory_space<vmem>>, vector<64x192xf32>
    %cst = arith.constant dense<0.000000e+00> : vector<64x2048xf32>
    %11 = tpu.matmul %10, %9, %cst {dimension_numbers = #tpu.dot_dimension_numbers<[1], [0], [0], [1], [0, 0, 1, 1], [], []>} : vector<64x192xf32>, vector<192x2048xf32>, vector<64x2048xf32> -> vector<64x2048xf32>
    %12 = vector.extract_strided_slice %11 {offsets = [0, 0], sizes = [32, 2048], strides = [1, 1]} : vector<64x2048xf32> to vector<32x2048xf32>
    %13 = vector.extract_strided_slice %11 {offsets = [32, 0], sizes = [32, 2048], strides = [1, 1]} : vector<64x2048xf32> to vector<32x2048xf32>
    %14 = arith.mulf %12, %13 : vector<32x2048xf32>
    %cst_4 = arith.constant dense<0.000000e+00> : vector<2048xf32>
    %15 = vector.multi_reduction <add>, %14, %cst_4 [0] : vector<32x2048xf32> to vector<2048xf32>
    %16 = vector.shape_cast %15 : vector<2048xf32> to vector<1x2048xf32>
    %c0_5 = arith.constant 0 : index
    %c0_6 = arith.constant 0 : index
    %17 = memref.load %arg3[%c0_5, %c0_6] : memref<1x1xf32, #tpu.memory_space<smem>>
    %18 = vector.broadcast %17 : f32 to vector<1x2048xf32>
    %19 = arith.addf %16, %18 : vector<1x2048xf32>
    %20 = arith.negf %19 : vector<1x2048xf32>
    %21 = math.exp %20 : vector<1x2048xf32>
    %cst_7 = arith.constant 1.000000e+00 : f32
    %22 = vector.broadcast %cst_7 : f32 to vector<1x2048xf32>
    %23 = arith.addf %22, %21 : vector<1x2048xf32>
    %24 = arith.divf %22, %23 : vector<1x2048xf32>
    %c0_8 = arith.constant 0 : index
    %c0_9 = arith.constant 0 : index
    %25 = vector.load %arg4[%c0_8, %c0_9] : memref<1x2048xf32, #tpu.memory_space<vmem>>, vector<1x2048xf32>
    tpu.vector_store %arg4[%c0_8, %c0_9], %24 {strides = array<i32>} : memref<1x2048xf32, #tpu.memory_space<vmem>>, vector<1x2048xf32>,
    return
  }
  func.func @transform_0(%arg0: i32) -> (i32, i32) {
    %c0_i32 = arith.constant 0 : i32
    %c0_i32_0 = arith.constant 0 : i32
    return %c0_i32, %arg0 : i32, i32
  }
  func.func @transform_1(%arg0: i32) -> (i32, i32) {
    %c0_i32 = arith.constant 0 : i32
    %c0_i32_0 = arith.constant 0 : i32
    %c0_i32_1 = arith.constant 0 : i32
    return %c0_i32, %c0_i32_0 : i32, i32
  }
  func.func @transform_2(%arg0: i32) -> (i32, i32) {
    %c0_i32 = arith.constant 0 : i32
    %c0_i32_0 = arith.constant 0 : i32
    %c0_i32_1 = arith.constant 0 : i32
    return %c0_i32, %c0_i32_0 : i32, i32
  }
  func.func @transform_3(%arg0: i32) -> (i32, i32) {
    %c0_i32 = arith.constant 0 : i32
    %c0_i32_0 = arith.constant 0 : i32
    return %c0_i32, %arg0 : i32, i32
  }
}

</mosaic_0001>

<bundles_post_ra>
// kernel: tpu_custom_call.1
= control target key start
LH: loop header
LB: loop body
LE: loop exit
PB: predicated region body
PF: predicated region fallthrough
CT: control target
= control target key end

     0   :  { %9 = vsyncpa [#allocation4], 0  ;;  %s7384_s0 = inlined_call_operand.hbm [shape: s32[2,2048], index: 0, kind: input, shape index: {}]   ;;  %s7385_s1 = inlined_call_operand.hbm [shape: f32[64,192], index: 1, kind: input, shape index: {}]   ;;  %s7386_s2 = inlined_call_operand.<no memory space> [shape: f32[1,1], index: 2, kind: input, shape index: {}]   ;;  %s7387_s3 = inlined_call_operand.hbm [shape: f32[1,2048], index: 3, kind: output, shape index: {}]  }
   0x1   :  { %10 = vsyncpa [#allocation7], 0 }
   0x2   :  { %11 = vsyncpa [#allocation5], 0  ;;  %s4929_s12 = smov [#allocation3]   ;;  %s4930_s14 = smov [#allocation6]  }
   0x3   :  { %s18_s13 = sshll.u32 %s4929_s12, 4  ;;  %s27_s15 = sshll.u32 %s4930_s14, 4  ;;  %s19_s13 = int_to_ptr.vmem [resolvable:$true] %s18_s13  ;;  %s4956_s15 = int_to_ptr.vmem [resolvable:$true] %s27_s15 }
   0x4   :  { %s4857_s18 = scalar_lea.hbm %s7384_s0, 512 }
   0x5   :  { %p4858_p0 = scmp.ne.s32.totalorder %s7384_s0, %s4857_s18  ;;  %p4861_p1 = scmp.lt.u32.totalorder %s4857_s18, %s7384_s0 }
   0x7   :  { %p4863_p2 = pnand %p4861_p1, %p4858_p0 }
   0x9   :  { %4866 = shalt.err (!%p4863_p2)
}
   0xa   :  { %s4867_s23 = scalar_lea.vmem %s19_s13, 512  ;;  %p4872_p4 = scmp.lt.s32.totalorder %s19_s13, %s19_s13 }
   0xb   :  { %p4868_p3 = scmp.ne.s32.totalorder %s19_s13, %s4867_s23  ;;  %p4873_p5 = scmp.lt.s32.totalorder %s4867_s23, %s4867_s23 }
   0xd   :  { %p4874_p6 = por %p4873_p5, %p4872_p4 }
   0xf   :  { %p4875_p7 = pnand %p4874_p6, %p4868_p3 }
  0x11   :  { %4878 = shalt.err (!%p4875_p7)
}
  0x12   :  { %21 = dma.hbm_to_vmem [thread:$0]  %s7384_s0, 512, %s19_s13, [#allocation4]  }
  0x13   :  { %s4879_s28 = scalar_lea.hbm %s7385_s1, 2048 }
  0x14   :  { %p4880_p8 = scmp.ne.s32.totalorder %s7385_s1, %s4879_s28  ;;  %p4883_p9 = scmp.lt.u32.totalorder %s4879_s28, %s7385_s1 }
  0x16   :  { %p4885_p10 = pnand %p4883_p9, %p4880_p8 }
  0x18   :  { %4888 = shalt.err (!%p4885_p10)
}
  0x19   :  { %s4889_s6 = scalar_lea.vmem %s4956_s15, 2048  ;;  %p4894_p12 = scmp.lt.s32.totalorder %s4956_s15, %s4956_s15 }
  0x1a   :  { %p4890_p11 = scmp.ne.s32.totalorder %s4956_s15, %s4889_s6  ;;  %p4895_p13 = scmp.lt.s32.totalorder %s4889_s6, %s4889_s6 }
  0x1c   :  { %p4896_p0 = por %p4895_p13, %p4894_p12 }
  0x1e   :  { %p4897_p1 = pnand %p4896_p0, %p4890_p11 }
  0x20   :  { %4900 = shalt.err (!%p4897_p1)
}
  0x21   :  { %s4931_s0 = smov 256   ;;  %s4932_s7 = smov 16  }
  0x22   :  { %33 = dma.hbm_to_vmem [thread:$0]  %s7385_s1, 2048, %s4956_s15, [#allocation7], %s4931_s0, %s4931_s0, %s4932_s7  }
  0x23   :  { %4923 = dma.done.wait [#allocation4], 512  }
  0x24   :  { %4924 = vsyncadd [#allocation4], 4294966784 }
  0x25   :  { %4925 = dma.done.wait [#allocation7], 2048  }
  0x26   :  { %4926 = vsyncadd [#allocation7], 4294965248  ;;  %v49_v0 = vlaneseq  ;;  %v5001_v6 = vld [vmem:[#allocation3] ss:$2 sm:$0xff]  ;;  %v5003_v7 = vld [vmem:[#allocation3 + $0x1] ss:$2 sm:$0xff] }
  0x27   :  { %v4933_v17 = vmov 1.0|1.0   ;;  %v5191_v24 = vld [vmem:[#allocation6 + $0x8] sm:$0xff]  ;;  %v5568_v48 = vld [vmem:[#allocation6] sm:$0xff]  ;;  %v5581_v50 = vld [vmem:[#allocation6 + $0x18] sm:$0xff] }
  0x28   :  { %v4987_v1 = vshrl.u32 %v49_v0, 7  ;;  %v5603_v53 = vld [vmem:[#allocation6 + $0x10] sm:$0xff]  ;;  %v5613_v56 = vld [vmem:[#allocation6 + $0x28] sm:$0xff]  ;;  %v5630_v57 = vld [vmem:[#allocation6 + $0x20] sm:$0xff] }
  0x29   :  { %v5637_v58 = vld [vmem:[#allocation6 + $0x38] sm:$0xff]  ;;  %v5658_v59 = vld [vmem:[#allocation6 + $0x30] sm:$0xff]  ;;  %v5661_v60 = vld [vmem:[#allocation6 + $0x48] sm:$0xff] }
  0x2a   :  { %v4990_v2 = vsub.s32 1, %v4987_v1  ;;  %v4993_v3 = vsub.s32 3, %v4987_v1  ;;  %v4996_v4 = vsub.s32 0, %v4987_v1  ;;  %v4999_v5 = vadd.s32 8, %v4987_v1  ;;  %v5677_v61 = vld [vmem:[#allocation6 + $0x40] sm:$0xff]  ;;  %v5685_v62 = vld [vmem:[#allocation6 + $0x58] sm:$0xff] }
  0x2b   :  { %v5030_v14 = vsub.s32 2, %v4987_v1  ;;  %v5066_v18 = vadd.s32 16, %v4987_v1  ;;  %v5074_v19 = vadd.s32 24, %v4987_v1  ;;  %v5108_v20 = vadd.s32 32, %v4987_v1  ;;  %v5706_v63 = vld [vmem:[#allocation6 + $0x50] sm:$0xff]  ;;  %v5710_v0 = vld [vmem:[#allocation6 + $0x68] sm:$0xff] }
  0x2c   :  { %v5007_v8 = vrot.slane %v5001_v6, %v4990_v2  ;;  %v5011_v9 = vrot.slane %v5003_v7, %v4990_v2  ;;  %v5015_v10 = vrot.slane %v5001_v6, %v4993_v3  ;;  %v5019_v11 = vrot.slane %v5003_v7, %v4993_v3 }
  0x2d   :  { %v5023_v12 = vrot.slane %v5001_v6, %v4996_v4  ;;  %v5027_v13 = vrot.slane %v5003_v7, %v4996_v4  ;;  %v5050_v15 = vrot.slane %v5001_v6, %v5030_v14  ;;  %v5054_v16 = vrot.slane %v5003_v7, %v5030_v14 }
  0x2e   :  { %vm139_vm0 = vcmp.eq.s32.totalorder %v4987_v1, %v5007_v8  ;;  %vm155_vm1 = vcmp.eq.s32.totalorder %v4999_v5, %v5007_v8  ;;  %vm587_vm2 = vcmp.eq.s32.totalorder %v4987_v1, %v5011_v9  ;;  %vm603_vm3 = vcmp.eq.s32.totalorder %v4999_v5, %v5011_v9 }
  0x2f   :  { %vm971_vm4 = vmor %vm139_vm0, %vm587_vm2  ;;  %vm141_vm5 = vcmp.eq.s32.totalorder %v4987_v1, %v5015_v10  ;;  %vm589_vm6 = vcmp.eq.s32.totalorder %v4987_v1, %v5019_v11  ;;  %vm157_vm8 = vcmp.eq.s32.totalorder %v4999_v5, %v5015_v10  ;;  %vm605_vm9 = vcmp.eq.s32.totalorder %v4999_v5, %v5019_v11 }
  0x30   :  { %vm987_vm7 = vmor %vm155_vm1, %vm603_vm3  ;;  %vm138_vm12 = vcmp.eq.s32.totalorder %v4987_v1, %v5023_v12  ;;  %vm586_vm13 = vcmp.eq.s32.totalorder %v4987_v1, %v5027_v13  ;;  %vm154_vm15 = vcmp.eq.s32.totalorder %v4999_v5, %v5023_v12  ;;  %vm602_vm0 = vcmp.eq.s32.totalorder %v4999_v5, %v5027_v13 }
  0x31   :  { %vm4371_vm10 = vmpackc.low %vm987_vm7, %vm971_vm4  ;;  %vm140_vm3 = vcmp.eq.s32.totalorder %v4987_v1, %v5050_v15  ;;  %vm588_vm4 = vcmp.eq.s32.totalorder %v4987_v1, %v5054_v16  ;;  %vm604_vm7 = vcmp.eq.s32.totalorder %v4999_v5, %v5054_v16  ;;  %v5116_v21 = vadd.s32 40, %v4987_v1 }
  0x32   :  { %4372 = vmatprep.subr.msk.bf16.mxu0 %vm4371_vm10, %v4933_v17  ;;  %vm973_vm11 = vmor %vm141_vm5, %vm589_vm6  ;;  %vm156_vm6 = vcmp.eq.s32.totalorder %v4999_v5, %v5050_v15  ;;  %vm171_vm10 = vcmp.eq.s32.totalorder %v5066_v18, %v5007_v8  ;;  %v5150_v22 = vadd.s32 48, %v4987_v1  ;;  %v5158_v23 = vadd.s32 56, %v4987_v1 }
  0x33   :  { %vm989_vm14 = vmor %vm157_vm8, %vm605_vm9  ;;  %v5194_v25 = vadd.s32 64, %v4987_v1  ;;  %v5202_v26 = vadd.s32 72, %v4987_v1  ;;  %v5240_v27 = vadd.s32 80, %v4987_v1  ;;  %v5248_v28 = vadd.s32 88, %v4987_v1 }
  0x34   :  { %vm4419_vm1 = vmpackc.low %vm989_vm14, %vm973_vm11  ;;  %vm619_vm11 = vcmp.eq.s32.totalorder %v5066_v18, %v5011_v9  ;;  %vm635_vm14 = vcmp.eq.s32.totalorder %v5074_v19, %v5011_v9  ;;  %v5282_v29 = vadd.s32 96, %v4987_v1  ;;  %v5290_v30 = vadd.s32 104, %v4987_v1 }
  0x35   :  { %4420 = vmatprep.subr.msk.bf16.mxu1 %vm4419_vm1, %v4933_v17  ;;  %vm970_vm2 = vmor %vm138_vm12, %vm586_vm13  ;;  %vm187_vm13 = vcmp.eq.s32.totalorder %v5074_v19, %v5007_v8  ;;  %vm173_vm1 = vcmp.eq.s32.totalorder %v5066_v18, %v5015_v10  ;;  %v5324_v31 = vadd.s32 112, %v4987_v1  ;;  %v5332_v32 = vadd.s32 120, %v4987_v1 }
  0x36   :  { %vm986_vm5 = vmor %vm154_vm15, %vm602_vm0  ;;  %v5366_v33 = vadd.s32 128, %v4987_v1  ;;  %v5374_v34 = vadd.s32 136, %v4987_v1  ;;  %v5408_v35 = vadd.s32 144, %v4987_v1  ;;  %v5416_v36 = vadd.s32 152, %v4987_v1 }
  0x37   :  { %vm4373_vm8 = vmpackc.low %vm986_vm5, %vm970_vm2  ;;  %vm621_vm2 = vcmp.eq.s32.totalorder %v5066_v18, %v5019_v11  ;;  %vm637_vm5 = vcmp.eq.s32.totalorder %v5074_v19, %v5019_v11  ;;  %v5450_v37 = vadd.s32 160, %v4987_v1  ;;  %v5458_v38 = vadd.s32 168, %v4987_v1 }
  0x38   :  { %4374 = vmatpush1.bf16.msk.msra.mxu0 %vm4373_vm8, %v4933_v17  ;;  %vm972_vm9 = vmor %vm140_vm3, %vm588_vm4  ;;  %vm189_vm4 = vcmp.eq.s32.totalorder %v5074_v19, %v5015_v10  ;;  %vm170_vm8 = vcmp.eq.s32.totalorder %v5066_v18, %v5023_v12  ;;  %v5492_v39 = vadd.s32 176, %v4987_v1  ;;  %v5500_v40 = vadd.s32 184, %v4987_v1 }
  0x39   :  { %vm988_vm12 = vmor %vm156_vm6, %vm604_vm7  ;;  %v5525_v41 = vsub.s32 5, %v4987_v1  ;;  %v5537_v42 = vsub.s32 7, %v4987_v1  ;;  %v5557_v45 = vsub.s32 4, %v4987_v1  ;;  %v5579_v49 = vsub.s32 6, %v4987_v1 }
  0x3a   :  { %vm4421_vm15 = vmpackc.low %vm988_vm12, %vm972_vm9  ;;  %vm618_vm9 = vcmp.eq.s32.totalorder %v5066_v18, %v5027_v13  ;;  %vm634_vm12 = vcmp.eq.s32.totalorder %v5074_v19, %v5027_v13 }
  0x3b   :  { %4422 = vmatpush1.bf16.msk.msra.mxu1 %vm4421_vm15, %v4933_v17  ;;  %vm1003_vm0 = vmor %vm171_vm10, %vm619_vm11  ;;  %vm186_vm11 = vcmp.eq.s32.totalorder %v5074_v19, %v5023_v12  ;;  %vm172_vm15 = vcmp.eq.s32.totalorder %v5066_v18, %v5050_v15  ;;  %v5541_v43 = vrot.slane %v5001_v6, %v5525_v41  ;;  %v5545_v44 = vrot.slane %v5003_v7, %v5525_v41 }
  0x3c   :  { %vm1019_vm3 = vmor %vm187_vm13, %vm635_vm14  ;;  %v5561_v46 = vrot.slane %v5001_v6, %v5537_v42  ;;  %v5565_v47 = vrot.slane %v5003_v7, %v5537_v42  ;;  %v5585_v51 = vrot.slane %v5001_v6, %v5557_v45  ;;  %v5589_v52 = vrot.slane %v5003_v7, %v5557_v45 }
  0x3d   :  { %vm4375_vm6 = vmpackc.low %vm1019_vm3, %vm1003_vm0  ;;  %vm620_vm0 = vcmp.eq.s32.totalorder %v5066_v18, %v5054_v16  ;;  %vm636_vm3 = vcmp.eq.s32.totalorder %v5074_v19, %v5054_v16  ;;  %v5607_v54 = vrot.slane %v5001_v6, %v5579_v49  ;;  %v5611_v55 = vrot.slane %v5003_v7, %v5579_v49  ;;  %v5725_v6 = vld [vmem:[#allocation6 + $0x60] sm:$0xff]  ;;  %v5738_v7 = vld [vmem:[#allocation6 + $0x78] sm:$0xff] }
  0x3e   :  { %4376 = vmatprep.subr.msk.bf16.mxu0 %vm4375_vm6, %v4933_v17  ;;  %vm1005_vm7 = vmor %vm173_vm1, %vm621_vm2  ;;  %vm188_vm2 = vcmp.eq.s32.totalorder %v5074_v19, %v5050_v15  ;;  %vm203_vm6 = vcmp.eq.s32.totalorder %v5108_v20, %v5007_v8 }
  0x3f   :  { %vm1021_vm10 = vmor %vm189_vm4, %vm637_vm5 }
  0x40   :  { %vm4423_vm13 = vmpackc.low %vm1021_vm10, %vm1005_vm7  ;;  %vm651_vm7 = vcmp.eq.s32.totalorder %v5108_v20, %v5011_v9  ;;  %vm667_vm10 = vcmp.eq.s32.totalorder %v5116_v21, %v5011_v9 }
  0x41   :  { %4424 = vmatprep.subr.msk.bf16.mxu1 %vm4423_vm13, %v4933_v17  ;;  %vm1002_vm14 = vmor %vm170_vm8, %vm618_vm9  ;;  %vm219_vm9 = vcmp.eq.s32.totalorder %v5116_v21, %v5007_v8  ;;  %vm205_vm13 = vcmp.eq.s32.totalorder %v5108_v20, %v5015_v10 }
  0x42   :  { %vm1018_vm1 = vmor %vm186_vm11, %vm634_vm12 }
  0x43   :  { %vm4377_vm4 = vmpackc.low %vm1018_vm1, %vm1002_vm14  ;;  %vm653_vm14 = vcmp.eq.s32.totalorder %v5108_v20, %v5019_v11  ;;  %vm669_vm1 = vcmp.eq.s32.totalorder %v5116_v21, %v5019_v11 }
  0x44   :  { %4378 = vmatpush1.bf16.msk.msra.mxu0 %vm4377_vm4, %v4933_v17  ;;  %vm1004_vm5 = vmor %vm172_vm15, %vm620_vm0  ;;  %vm221_vm0 = vcmp.eq.s32.totalorder %v5116_v21, %v5015_v10  ;;  %vm202_vm4 = vcmp.eq.s32.totalorder %v5108_v20, %v5023_v12 }
  0x45   :  { %vm1020_vm8 = vmor %vm188_vm2, %vm636_vm3 }
  0x46   :  { %vm4425_vm11 = vmpackc.low %vm1020_vm8, %vm1004_vm5  ;;  %vm650_vm5 = vcmp.eq.s32.totalorder %v5108_v20, %v5027_v13  ;;  %vm666_vm8 = vcmp.eq.s32.totalorder %v5116_v21, %v5027_v13 }
  0x47   :  { %4426 = vmatpush1.bf16.msk.msra.mxu1 %vm4425_vm11, %v4933_v17  ;;  %vm1035_vm12 = vmor %vm203_vm6, %vm651_vm7  ;;  %vm218_vm7 = vcmp.eq.s32.totalorder %v5116_v21, %v5023_v12  ;;  %vm204_vm11 = vcmp.eq.s32.totalorder %v5108_v20, %v5050_v15 }
  0x48   :  { %vm1051_vm15 = vmor %vm219_vm9, %vm667_vm10 }
  0x49   :  { %vm4379_vm2 = vmpackc.low %vm1051_vm15, %vm1035_vm12  ;;  %vm652_vm12 = vcmp.eq.s32.totalorder %v5108_v20, %v5054_v16  ;;  %vm668_vm15 = vcmp.eq.s32.totalorder %v5116_v21, %v5054_v16 }
  0x4a   :  { %4380 = vmatprep.subr.msk.bf16.mxu0 %vm4379_vm2, %v4933_v17  ;;  %vm1037_vm3 = vmor %vm205_vm13, %vm653_vm14  ;;  %vm220_vm14 = vcmp.eq.s32.totalorder %v5116_v21, %v5050_v15  ;;  %vm235_vm2 = vcmp.eq.s32.totalorder %v5150_v22, %v5007_v8 }
  0x4b   :  { %vm1053_vm6 = vmor %vm221_vm0, %vm669_vm1 }
  0x4c   :  { %vm4427_vm9 = vmpackc.low %vm1053_vm6, %vm1037_vm3  ;;  %vm683_vm3 = vcmp.eq.s32.totalorder %v5150_v22, %v5011_v9  ;;  %vm699_vm6 = vcmp.eq.s32.totalorder %v5158_v23, %v5011_v9 }
  0x4d   :  { %4428 = vmatprep.subr.msk.bf16.mxu1 %vm4427_vm9, %v4933_v17  ;;  %vm1034_vm10 = vmor %vm202_vm4, %vm650_vm5  ;;  %vm251_vm5 = vcmp.eq.s32.totalorder %v5158_v23, %v5007_v8  ;;  %vm237_vm9 = vcmp.eq.s32.totalorder %v5150_v22, %v5015_v10 }
  0x4e   :  { %vm1050_vm13 = vmor %vm218_vm7, %vm666_vm8 }
  0x4f   :  { %vm4381_vm0 = vmpackc.low %vm1050_vm13, %vm1034_vm10  ;;  %vm685_vm10 = vcmp.eq.s32.totalorder %v5150_v22, %v5019_v11  ;;  %vm701_vm13 = vcmp.eq.s32.totalorder %v5158_v23, %v5019_v11 }
  0x50   :  { %4382 = vmatpush1.bf16.msk.msra.mxu0 %vm4381_vm0, %v4933_v17  ;;  %vm1036_vm1 = vmor %vm204_vm11, %vm652_vm12  ;;  %vm253_vm12 = vcmp.eq.s32.totalorder %v5158_v23, %v5015_v10  ;;  %vm234_vm0 = vcmp.eq.s32.totalorder %v5150_v22, %v5023_v12 }
  0x51   :  { %vm1052_vm4 = vmor %vm220_vm14, %vm668_vm15 }
  0x52   :  { %vm4429_vm7 = vmpackc.low %vm1052_vm4, %vm1036_vm1  ;;  %vm682_vm1 = vcmp.eq.s32.totalorder %v5150_v22, %v5027_v13  ;;  %vm698_vm4 = vcmp.eq.s32.totalorder %v5158_v23, %v5027_v13 }
  0x53   :  { %4430 = vmatpush1.bf16.msk.msra.mxu1 %vm4429_vm7, %v4933_v17  ;;  %vm1067_vm8 = vmor %vm235_vm2, %vm683_vm3  ;;  %vm250_vm3 = vcmp.eq.s32.totalorder %v5158_v23, %v5023_v12  ;;  %vm236_vm7 = vcmp.eq.s32.totalorder %v5150_v22, %v5050_v15 }
  0x54   :  { %vm1083_vm11 = vmor %vm251_vm5, %vm699_vm6 }
  0x55   :  { %vm4383_vm14 = vmpackc.low %vm1083_vm11, %vm1067_vm8  ;;  %vm684_vm8 = vcmp.eq.s32.totalorder %v5150_v22, %v5054_v16  ;;  %vm252_vm11 = vcmp.eq.s32.totalorder %v5158_v23, %v5050_v15 }
  0x56   :  { %4384 = vmatprep.subr.msk.bf16.mxu0 %vm4383_vm14, %v4933_v17  ;;  %vm1069_vm15 = vmor %vm237_vm9, %vm685_vm10  ;;  %vm2138_vm9 = vcmask 523264  }
  0x57   :  { %vm1085_vm2 = vmor %vm253_vm12, %vm701_vm13  ;;  %vm700_vm12 = vcmp.eq.s32.totalorder %v5158_v23, %v5054_v16  ;;  %3955 = vmatprep.mubr.msk.f32.mxu0 %vm2138_vm9, %v5191_v24  ;;  %4011 = vmatprep.mubr.msk.f32.mxu1 %vm2138_vm9, %v5191_v24 }
  0x58   :  { %vm4431_vm5 = vmpackc.low %vm1085_vm2, %vm1069_vm15  ;;  %vm267_vm15 = vcmp.eq.s32.totalorder %v5194_v25, %v5007_v8  ;;  %vm283_vm2 = vcmp.eq.s32.totalorder %v5202_v26, %v5007_v8 }
  0x59   :  { %4432 = vmatprep.subr.msk.bf16.mxu1 %vm4431_vm5, %v4933_v17  ;;  %vm1066_vm6 = vmor %vm234_vm0, %vm682_vm1  ;;  %vm715_vm0 = vcmp.eq.s32.totalorder %v5194_v25, %v5011_v9 }
  0x5a   :  { %vm1082_vm10 = vmor %vm250_vm3, %vm698_vm4  ;;  %vm731_vm3 = vcmp.eq.s32.totalorder %v5202_v26, %v5011_v9 }
  0x5b   :  { %vm4385_vm13 = vmpackc.low %vm1082_vm10, %vm1066_vm6  ;;  %vm269_vm6 = vcmp.eq.s32.totalorder %v5194_v25, %v5015_v10  ;;  %vm285_vm10 = vcmp.eq.s32.totalorder %v5202_v26, %v5015_v10 }
  0x5c   :  { %4386 = vmatpush1.bf16.msk.msra.mxu0 %vm4385_vm13, %v4933_v17  ;;  %vm1068_vm14 = vmor %vm236_vm7, %vm684_vm8  ;;  %vm717_vm7 = vcmp.eq.s32.totalorder %v5194_v25, %v5019_v11 }
  0x5d   :  { %vm1084_vm1 = vmor %vm252_vm11, %vm700_vm12  ;;  %vm733_vm11 = vcmp.eq.s32.totalorder %v5202_v26, %v5019_v11 }
  0x5e   :  { %vm4433_vm4 = vmpackc.low %vm1084_vm1, %vm1068_vm14  ;;  %vm266_vm14 = vcmp.eq.s32.totalorder %v5194_v25, %v5023_v12  ;;  %vm282_vm1 = vcmp.eq.s32.totalorder %v5202_v26, %v5023_v12 }
  0x5f   :  { %4434 = vmatpush1.bf16.msk.msra.mxu1 %vm4433_vm4, %v4933_v17  ;;  %vm1099_vm5 = vmor %vm267_vm15, %vm715_vm0  ;;  %vm714_vm15 = vcmp.eq.s32.totalorder %v5194_v25, %v5027_v13 }
  0x60   :  { %vm1115_vm8 = vmor %vm283_vm2, %vm731_vm3  ;;  %vm730_vm2 = vcmp.eq.s32.totalorder %v5202_v26, %v5027_v13 }
  0x61   :  { %vm4387_vm12 = vmpackc.low %vm1115_vm8, %vm1099_vm5  ;;  %vm268_vm5 = vcmp.eq.s32.totalorder %v5194_v25, %v5050_v15  ;;  %vm284_vm8 = vcmp.eq.s32.totalorder %v5202_v26, %v5050_v15 }
  0x62   :  { %4388 = vmatprep.subr.msk.bf16.mxu0 %vm4387_vm12, %v4933_v17  ;;  %vm1101_vm13 = vmor %vm269_vm6, %vm717_vm7  ;;  %vm716_vm6 = vcmp.eq.s32.totalorder %v5194_v25, %v5054_v16 }
  0x63   :  { %vm1117_vm0 = vmor %vm285_vm10, %vm733_vm11  ;;  %vm732_vm10 = vcmp.eq.s32.totalorder %v5202_v26, %v5054_v16 }
  0x64   :  { %vm4435_vm3 = vmpackc.low %vm1117_vm0, %vm1101_vm13  ;;  %vm299_vm13 = vcmp.eq.s32.totalorder %v5240_v27, %v5007_v8  ;;  %vm315_vm0 = vcmp.eq.s32.totalorder %v5248_v28, %v5007_v8 }
  0x65   :  { %4436 = vmatprep.subr.msk.bf16.mxu1 %vm4435_vm3, %v4933_v17  ;;  %vm1098_vm4 = vmor %vm266_vm14, %vm714_vm15  ;;  %vm747_vm14 = vcmp.eq.s32.totalorder %v5240_v27, %v5011_v9 }
  0x66   :  { %vm1114_vm7 = vmor %vm282_vm1, %vm730_vm2  ;;  %vm763_vm1 = vcmp.eq.s32.totalorder %v5248_v28, %v5011_v9 }
  0x67   :  { %vm4389_vm11 = vmpackc.low %vm1114_vm7, %vm1098_vm4  ;;  %vm301_vm4 = vcmp.eq.s32.totalorder %v5240_v27, %v5015_v10  ;;  %vm317_vm7 = vcmp.eq.s32.totalorder %v5248_v28, %v5015_v10 }
  0x68   :  { %4390 = vmatpush1.bf16.msk.msra.mxu0 %vm4389_vm11, %v4933_v17  ;;  %vm1100_vm12 = vmor %vm268_vm5, %vm716_vm6  ;;  %vm749_vm5 = vcmp.eq.s32.totalorder %v5240_v27, %v5019_v11 }
  0x69   :  { %vm1116_vm15 = vmor %vm284_vm8, %vm732_vm10  ;;  %vm765_vm8 = vcmp.eq.s32.totalorder %v5248_v28, %v5019_v11 }
  0x6a   :  { %vm4437_vm2 = vmpackc.low %vm1116_vm15, %vm1100_vm12  ;;  %vm298_vm12 = vcmp.eq.s32.totalorder %v5240_v27, %v5023_v12  ;;  %vm314_vm15 = vcmp.eq.s32.totalorder %v5248_v28, %v5023_v12 }
  0x6b   :  { %4438 = vmatpush1.bf16.msk.msra.mxu1 %vm4437_vm2, %v4933_v17  ;;  %vm1131_vm3 = vmor %vm299_vm13, %vm747_vm14  ;;  %vm746_vm13 = vcmp.eq.s32.totalorder %v5240_v27, %v5027_v13 }
  0x6c   :  { %vm1147_vm6 = vmor %vm315_vm0, %vm763_vm1  ;;  %vm762_vm0 = vcmp.eq.s32.totalorder %v5248_v28, %v5027_v13 }
  0x6d   :  { %vm4391_vm10 = vmpackc.low %vm1147_vm6, %vm1131_vm3  ;;  %vm300_vm3 = vcmp.eq.s32.totalorder %v5240_v27, %v5050_v15  ;;  %vm316_vm6 = vcmp.eq.s32.totalorder %v5248_v28, %v5050_v15 }
  0x6e   :  { %4392 = vmatprep.subr.msk.bf16.mxu0 %vm4391_vm10, %v4933_v17  ;;  %vm1133_vm11 = vmor %vm301_vm4, %vm749_vm5  ;;  %vm748_vm4 = vcmp.eq.s32.totalorder %v5240_v27, %v5054_v16 }
  0x6f   :  { %vm1149_vm14 = vmor %vm317_vm7, %vm765_vm8  ;;  %vm764_vm7 = vcmp.eq.s32.totalorder %v5248_v28, %v5054_v16 }
  0x70   :  { %vm4439_vm1 = vmpackc.low %vm1149_vm14, %vm1133_vm11  ;;  %vm331_vm11 = vcmp.eq.s32.totalorder %v5282_v29, %v5007_v8  ;;  %vm347_vm14 = vcmp.eq.s32.totalorder %v5290_v30, %v5007_v8 }
  0x71   :  { %4440 = vmatprep.subr.msk.bf16.mxu1 %vm4439_vm1, %v4933_v17  ;;  %vm1130_vm2 = vmor %vm298_vm12, %vm746_vm13  ;;  %vm779_vm12 = vcmp.eq.s32.totalorder %v5282_v29, %v5011_v9 }
  0x72   :  { %vm1146_vm5 = vmor %vm314_vm15, %vm762_vm0  ;;  %vm795_vm15 = vcmp.eq.s32.totalorder %v5290_v30, %v5011_v9 }
  0x73   :  { %vm4393_vm8 = vmpackc.low %vm1146_vm5, %vm1130_vm2  ;;  %vm333_vm2 = vcmp.eq.s32.totalorder %v5282_v29, %v5015_v10  ;;  %vm349_vm5 = vcmp.eq.s32.totalorder %v5290_v30, %v5015_v10 }
  0x74   :  { %4394 = vmatpush1.bf16.msk.msra.mxu0 %vm4393_vm8, %v4933_v17  ;;  %vm1132_vm10 = vmor %vm300_vm3, %vm748_vm4  ;;  %vm781_vm3 = vcmp.eq.s32.totalorder %v5282_v29, %v5019_v11 }
  0x75   :  { %vm1148_vm13 = vmor %vm316_vm6, %vm764_vm7  ;;  %vm797_vm6 = vcmp.eq.s32.totalorder %v5290_v30, %v5019_v11 }
  0x76   :  { %vm4441_vm0 = vmpackc.low %vm1148_vm13, %vm1132_vm10  ;;  %vm330_vm10 = vcmp.eq.s32.totalorder %v5282_v29, %v5023_v12  ;;  %vm346_vm13 = vcmp.eq.s32.totalorder %v5290_v30, %v5023_v12 }
  0x77   :  { %4442 = vmatpush1.bf16.msk.msra.mxu1 %vm4441_vm0, %v4933_v17  ;;  %vm1163_vm1 = vmor %vm331_vm11, %vm779_vm12  ;;  %vm778_vm11 = vcmp.eq.s32.totalorder %v5282_v29, %v5027_v13 }
  0x78   :  { %vm1179_vm4 = vmor %vm347_vm14, %vm795_vm15  ;;  %vm794_vm14 = vcmp.eq.s32.totalorder %v5290_v30, %v5027_v13 }
  0x79   :  { %vm4395_vm7 = vmpackc.low %vm1179_vm4, %vm1163_vm1  ;;  %vm332_vm1 = vcmp.eq.s32.totalorder %v5282_v29, %v5050_v15  ;;  %vm348_vm4 = vcmp.eq.s32.totalorder %v5290_v30, %v5050_v15 }
  0x7a   :  { %4396 = vmatprep.subr.msk.bf16.mxu0 %vm4395_vm7, %v4933_v17  ;;  %vm1165_vm8 = vmor %vm333_vm2, %vm781_vm3  ;;  %vm780_vm2 = vcmp.eq.s32.totalorder %v5282_v29, %v5054_v16 }
  0x7b   :  { %vm1181_vm12 = vmor %vm349_vm5, %vm797_vm6  ;;  %vm796_vm5 = vcmp.eq.s32.totalorder %v5290_v30, %v5054_v16 }
  0x7c   :  { %vm4443_vm15 = vmpackc.low %vm1181_vm12, %vm1165_vm8  ;;  %vm363_vm8 = vcmp.eq.s32.totalorder %v5324_v31, %v5007_v8  ;;  %vm379_vm12 = vcmp.eq.s32.totalorder %v5332_v32, %v5007_v8 }
  0x7d   :  { %4444 = vmatprep.subr.msk.bf16.mxu1 %vm4443_vm15, %v4933_v17  ;;  %vm1162_vm0 = vmor %vm330_vm10, %vm778_vm11  ;;  %vm811_vm10 = vcmp.eq.s32.totalorder %v5324_v31, %v5011_v9 }
  0x7e   :  { %vm1178_vm3 = vmor %vm346_vm13, %vm794_vm14  ;;  %vm827_vm13 = vcmp.eq.s32.totalorder %v5332_v32, %v5011_v9 }
  0x7f   :  { %vm4397_vm6 = vmpackc.low %vm1178_vm3, %vm1162_vm0  ;;  %vm365_vm0 = vcmp.eq.s32.totalorder %v5324_v31, %v5015_v10  ;;  %vm381_vm3 = vcmp.eq.s32.totalorder %v5332_v32, %v5015_v10 }
  0x80   :  { %4398 = vmatpush1.bf16.msk.msra.mxu0 %vm4397_vm6, %v4933_v17  ;;  %vm1164_vm7 = vmor %vm332_vm1, %vm780_vm2  ;;  %vm813_vm1 = vcmp.eq.s32.totalorder %v5324_v31, %v5019_v11 }
  0x81   :  { %vm1180_vm11 = vmor %vm348_vm4, %vm796_vm5  ;;  %vm829_vm4 = vcmp.eq.s32.totalorder %v5332_v32, %v5019_v11 }
  0x82   :  { %vm4445_vm14 = vmpackc.low %vm1180_vm11, %vm1164_vm7  ;;  %vm362_vm7 = vcmp.eq.s32.totalorder %v5324_v31, %v5023_v12  ;;  %vm378_vm11 = vcmp.eq.s32.totalorder %v5332_v32, %v5023_v12 }
  0x83   :  { %4446 = vmatpush1.bf16.msk.msra.mxu1 %vm4445_vm14, %v4933_v17  ;;  %vm1195_vm15 = vmor %vm363_vm8, %vm811_vm10  ;;  %vm810_vm8 = vcmp.eq.s32.totalorder %v5324_v31, %v5027_v13 }
  0x84   :  { %vm1211_vm2 = vmor %vm379_vm12, %vm827_vm13  ;;  %vm826_vm12 = vcmp.eq.s32.totalorder %v5332_v32, %v5027_v13 }
  0x85   :  { %vm4399_vm5 = vmpackc.low %vm1211_vm2, %vm1195_vm15  ;;  %vm364_vm15 = vcmp.eq.s32.totalorder %v5324_v31, %v5050_v15  ;;  %vm380_vm2 = vcmp.eq.s32.totalorder %v5332_v32, %v5050_v15 }
  0x86   :  { %4400 = vmatprep.subr.msk.bf16.mxu0 %vm4399_vm5, %v4933_v17  ;;  %vm1197_vm6 = vmor %vm365_vm0, %vm813_vm1  ;;  %vm812_vm0 = vcmp.eq.s32.totalorder %v5324_v31, %v5054_v16 }
  0x87   :  { %vm1213_vm10 = vmor %vm381_vm3, %vm829_vm4  ;;  %vm828_vm3 = vcmp.eq.s32.totalorder %v5332_v32, %v5054_v16 }
  0x88   :  { %vm4447_vm13 = vmpackc.low %vm1213_vm10, %vm1197_vm6  ;;  %vm395_vm6 = vcmp.eq.s32.totalorder %v5366_v33, %v5007_v8  ;;  %vm411_vm10 = vcmp.eq.s32.totalorder %v5374_v34, %v5007_v8 }
  0x89   :  { %4448 = vmatprep.subr.msk.bf16.mxu1 %vm4447_vm13, %v4933_v17  ;;  %vm1194_vm14 = vmor %vm362_vm7, %vm810_vm8  ;;  %vm843_vm7 = vcmp.eq.s32.totalorder %v5366_v33, %v5011_v9 }
  0x8a   :  { %vm1210_vm1 = vmor %vm378_vm11, %vm826_vm12  ;;  %vm859_vm11 = vcmp.eq.s32.totalorder %v5374_v34, %v5011_v9 }
  0x8b   :  { %vm4401_vm4 = vmpackc.low %vm1210_vm1, %vm1194_vm14  ;;  %vm397_vm14 = vcmp.eq.s32.totalorder %v5366_v33, %v5015_v10  ;;  %vm413_vm1 = vcmp.eq.s32.totalorder %v5374_v34, %v5015_v10 }
  0x8c   :  { %4402 = vmatpush1.bf16.msk.msra.mxu0 %vm4401_vm4, %v4933_v17  ;;  %vm1196_vm5 = vmor %vm364_vm15, %vm812_vm0  ;;  %vm845_vm15 = vcmp.eq.s32.totalorder %v5366_v33, %v5019_v11 }
  0x8d   :  { %vm1212_vm8 = vmor %vm380_vm2, %vm828_vm3  ;;  %vm861_vm2 = vcmp.eq.s32.totalorder %v5374_v34, %v5019_v11 }
  0x8e   :  { %vm4449_vm12 = vmpackc.low %vm1212_vm8, %vm1196_vm5  ;;  %vm394_vm5 = vcmp.eq.s32.totalorder %v5366_v33, %v5023_v12  ;;  %vm410_vm8 = vcmp.eq.s32.totalorder %v5374_v34, %v5023_v12 }
  0x8f   :  { %4450 = vmatpush1.bf16.msk.msra.mxu1 %vm4449_vm12, %v4933_v17  ;;  %vm1227_vm13 = vmor %vm395_vm6, %vm843_vm7  ;;  %vm842_vm6 = vcmp.eq.s32.totalorder %v5366_v33, %v5027_v13 }
  0x90   :  { %vm1243_vm0 = vmor %vm411_vm10, %vm859_vm11  ;;  %vm858_vm10 = vcmp.eq.s32.totalorder %v5374_v34, %v5027_v13 }
  0x91   :  { %vm4403_vm3 = vmpackc.low %vm1243_vm0, %vm1227_vm13  ;;  %vm396_vm13 = vcmp.eq.s32.totalorder %v5366_v33, %v5050_v15  ;;  %vm412_vm0 = vcmp.eq.s32.totalorder %v5374_v34, %v5050_v15 }
  0x92   :  { %4404 = vmatprep.subr.msk.bf16.mxu0 %vm4403_vm3, %v4933_v17  ;;  %vm1229_vm4 = vmor %vm397_vm14, %vm845_vm15  ;;  %vm844_vm14 = vcmp.eq.s32.totalorder %v5366_v33, %v5054_v16 }
  0x93   :  { %vm1245_vm7 = vmor %vm413_vm1, %vm861_vm2  ;;  %vm860_vm1 = vcmp.eq.s32.totalorder %v5374_v34, %v5054_v16 }
  0x94   :  { %vm4451_vm11 = vmpackc.low %vm1245_vm7, %vm1229_vm4  ;;  %vm427_vm4 = vcmp.eq.s32.totalorder %v5408_v35, %v5007_v8  ;;  %vm443_vm7 = vcmp.eq.s32.totalorder %v5416_v36, %v5007_v8 }
  0x95   :  { %4452 = vmatprep.subr.msk.bf16.mxu1 %vm4451_vm11, %v4933_v17  ;;  %vm1226_vm12 = vmor %vm394_vm5, %vm842_vm6  ;;  %vm875_vm5 = vcmp.eq.s32.totalorder %v5408_v35, %v5011_v9 }
  0x96   :  { %vm1242_vm15 = vmor %vm410_vm8, %vm858_vm10  ;;  %vm891_vm8 = vcmp.eq.s32.totalorder %v5416_v36, %v5011_v9 }
  0x97   :  { %vm4405_vm2 = vmpackc.low %vm1242_vm15, %vm1226_vm12  ;;  %vm429_vm12 = vcmp.eq.s32.totalorder %v5408_v35, %v5015_v10  ;;  %vm445_vm15 = vcmp.eq.s32.totalorder %v5416_v36, %v5015_v10 }
  0x98   :  { %4406 = vmatpush1.bf16.msk.msra.mxu0 %vm4405_vm2, %v4933_v17  ;;  %vm1228_vm3 = vmor %vm396_vm13, %vm844_vm14  ;;  %vm877_vm13 = vcmp.eq.s32.totalorder %v5408_v35, %v5019_v11 }
  0x99   :  { %vm1244_vm6 = vmor %vm412_vm0, %vm860_vm1  ;;  %vm893_vm0 = vcmp.eq.s32.totalorder %v5416_v36, %v5019_v11 }
  0x9a   :  { %vm4453_vm10 = vmpackc.low %vm1244_vm6, %vm1228_vm3  ;;  %vm426_vm3 = vcmp.eq.s32.totalorder %v5408_v35, %v5023_v12  ;;  %vm442_vm6 = vcmp.eq.s32.totalorder %v5416_v36, %v5023_v12 }
  0x9b   :  { %4454 = vmatpush1.bf16.msk.msra.mxu1 %vm4453_vm10, %v4933_v17  ;;  %vm1259_vm11 = vmor %vm427_vm4, %vm875_vm5  ;;  %vm874_vm4 = vcmp.eq.s32.totalorder %v5408_v35, %v5027_v13 }
  0x9c   :  { %vm1275_vm14 = vmor %vm443_vm7, %vm891_vm8  ;;  %vm890_vm7 = vcmp.eq.s32.totalorder %v5416_v36, %v5027_v13 }
  0x9d   :  { %vm4407_vm1 = vmpackc.low %vm1275_vm14, %vm1259_vm11  ;;  %vm428_vm11 = vcmp.eq.s32.totalorder %v5408_v35, %v5050_v15  ;;  %vm444_vm14 = vcmp.eq.s32.totalorder %v5416_v36, %v5050_v15 }
  0x9e   :  { %4408 = vmatprep.subr.msk.bf16.mxu0 %vm4407_vm1, %v4933_v17  ;;  %vm1261_vm2 = vmor %vm429_vm12, %vm877_vm13  ;;  %vm876_vm12 = vcmp.eq.s32.totalorder %v5408_v35, %v5054_v16 }
  0x9f   :  { %vm1277_vm5 = vmor %vm445_vm15, %vm893_vm0  ;;  %vm892_vm15 = vcmp.eq.s32.totalorder %v5416_v36, %v5054_v16 }
  0xa0   :  { %vm4455_vm8 = vmpackc.low %vm1277_vm5, %vm1261_vm2  ;;  %vm459_vm2 = vcmp.eq.s32.totalorder %v5450_v37, %v5007_v8  ;;  %vm475_vm5 = vcmp.eq.s32.totalorder %v5458_v38, %v5007_v8 }
  0xa1   :  { %4456 = vmatprep.subr.msk.bf16.mxu1 %vm4455_vm8, %v4933_v17  ;;  %vm1258_vm10 = vmor %vm426_vm3, %vm874_vm4  ;;  %vm907_vm3 = vcmp.eq.s32.totalorder %v5450_v37, %v5011_v9 }
  0xa2   :  { %vm1274_vm13 = vmor %vm442_vm6, %vm890_vm7  ;;  %vm923_vm6 = vcmp.eq.s32.totalorder %v5458_v38, %v5011_v9 }
  0xa3   :  { %vm4409_vm0 = vmpackc.low %vm1274_vm13, %vm1258_vm10  ;;  %vm461_vm10 = vcmp.eq.s32.totalorder %v5450_v37, %v5015_v10  ;;  %vm477_vm13 = vcmp.eq.s32.totalorder %v5458_v38, %v5015_v10 }
  0xa4   :  { %4410 = vmatpush1.bf16.msk.msra.mxu0 %vm4409_vm0, %v4933_v17  ;;  %vm1260_vm1 = vmor %vm428_vm11, %vm876_vm12  ;;  %vm909_vm11 = vcmp.eq.s32.totalorder %v5450_v37, %v5019_v11 }
  0xa5   :  { %vm1276_vm4 = vmor %vm444_vm14, %vm892_vm15  ;;  %vm925_vm14 = vcmp.eq.s32.totalorder %v5458_v38, %v5019_v11 }
  0xa6   :  { %vm4457_vm7 = vmpackc.low %vm1276_vm4, %vm1260_vm1  ;;  %vm458_vm1 = vcmp.eq.s32.totalorder %v5450_v37, %v5023_v12  ;;  %vm474_vm4 = vcmp.eq.s32.totalorder %v5458_v38, %v5023_v12 }
  0xa7   :  { %4458 = vmatpush1.bf16.msk.msra.mxu1 %vm4457_vm7, %v4933_v17  ;;  %vm1291_vm8 = vmor %vm459_vm2, %vm907_vm3  ;;  %vm906_vm2 = vcmp.eq.s32.totalorder %v5450_v37, %v5027_v13 }
  0xa8   :  { %vm1307_vm12 = vmor %vm475_vm5, %vm923_vm6  ;;  %vm922_vm5 = vcmp.eq.s32.totalorder %v5458_v38, %v5027_v13 }
  0xa9   :  { %vm4411_vm15 = vmpackc.low %vm1307_vm12, %vm1291_vm8  ;;  %vm460_vm8 = vcmp.eq.s32.totalorder %v5450_v37, %v5050_v15  ;;  %vm476_vm12 = vcmp.eq.s32.totalorder %v5458_v38, %v5050_v15 }
  0xaa   :  { %4412 = vmatprep.subr.msk.bf16.mxu0 %vm4411_vm15, %v4933_v17  ;;  %vm1293_vm0 = vmor %vm461_vm10, %vm909_vm11  ;;  %vm908_vm10 = vcmp.eq.s32.totalorder %v5450_v37, %v5054_v16 }
  0xab   :  { %vm1309_vm3 = vmor %vm477_vm13, %vm925_vm14  ;;  %vm924_vm13 = vcmp.eq.s32.totalorder %v5458_v38, %v5054_v16 }
  0xac   :  { %vm4459_vm6 = vmpackc.low %vm1309_vm3, %vm1293_vm0  ;;  %vm491_vm0 = vcmp.eq.s32.totalorder %v5492_v39, %v5007_v8  ;;  %vm507_vm3 = vcmp.eq.s32.totalorder %v5500_v40, %v5007_v8  ;;  %v5747_v8 = vld [vmem:[#allocation6 + $0x70] sm:$0xff] }
  0xad   :  { %4460 = vmatprep.subr.msk.bf16.mxu1 %vm4459_vm6, %v4933_v17  ;;  %vm1290_vm7 = vmor %vm458_vm1, %vm906_vm2  ;;  %vm939_vm1 = vcmp.eq.s32.totalorder %v5492_v39, %v5011_v9 }
  0xae   :  { %vm1306_vm11 = vmor %vm474_vm4, %vm922_vm5  ;;  %vm955_vm4 = vcmp.eq.s32.totalorder %v5500_v40, %v5011_v9  ;;  %v6078_v9 = vld [vmem:[#allocation3 + $0x10] ss:$2 sm:$0xff] }
  0xaf   :  { %vm4413_vm14 = vmpackc.low %vm1306_vm11, %vm1290_vm7  ;;  %vm493_vm7 = vcmp.eq.s32.totalorder %v5492_v39, %v5015_v10  ;;  %vm509_vm11 = vcmp.eq.s32.totalorder %v5500_v40, %v5015_v10  ;;  %v6080_v10 = vld [vmem:[#allocation3 + $0x11] ss:$2 sm:$0xff] }
  0xb0   :  { %4414 = vmatpush1.bf16.msk.msra.mxu0 %vm4413_vm14, %v4933_v17  ;;  %vm1292_vm15 = vmor %vm460_vm8, %vm908_vm10  ;;  %vm941_vm8 = vcmp.eq.s32.totalorder %v5492_v39, %v5019_v11 }
  0xb1   :  { %vm1308_vm2 = vmor %vm476_vm12, %vm924_vm13  ;;  %vm957_vm12 = vcmp.eq.s32.totalorder %v5500_v40, %v5019_v11  ;;  %v6093_v11 = vrot.slane %v6078_v9, %v4990_v2 }
  0xb2   :  { %vm4461_vm5 = vmpackc.low %vm1308_vm2, %vm1292_vm15  ;;  %vm490_vm15 = vcmp.eq.s32.totalorder %v5492_v39, %v5023_v12  ;;  %vm506_vm2 = vcmp.eq.s32.totalorder %v5500_v40, %v5023_v12  ;;  %v6097_v12 = vrot.slane %v6080_v10, %v4990_v2  ;;  %v6110_v2 = vrot.slane %v6078_v9, %v4993_v3 }
  0xb3   :  { %4462 = vmatpush1.bf16.msk.msra.mxu1 %vm4461_vm5, %v4933_v17  ;;  %vm1323_vm6 = vmor %vm491_vm0, %vm939_vm1  ;;  %vm938_vm0 = vcmp.eq.s32.totalorder %v5492_v39, %v5027_v13 }
  0xb4   :  { %vm1339_vm10 = vmor %vm507_vm3, %vm955_vm4  ;;  %vm954_vm3 = vcmp.eq.s32.totalorder %v5500_v40, %v5027_v13  ;;  %v6114_v13 = vrot.slane %v6080_v10, %v4993_v3  ;;  %v6127_v3 = vrot.slane %v6078_v9, %v4996_v4 }
  0xb5   :  { %vm4415_vm13 = vmpackc.low %vm1339_vm10, %vm1323_vm6  ;;  %vm492_vm6 = vcmp.eq.s32.totalorder %v5492_v39, %v5050_v15  ;;  %vm508_vm10 = vcmp.eq.s32.totalorder %v5500_v40, %v5050_v15  ;;  %v6131_v15 = vrot.slane %v6080_v10, %v4996_v4  ;;  %v6147_v4 = vrot.slane %v6078_v9, %v5030_v14 }
  0xb6   :  { %4416 = vmatprep.subr.msk.bf16.mxu0 %vm4415_vm13, %v4933_v17  ;;  %vm1325_vm14 = vmor %vm493_vm7, %vm941_vm8  ;;  %vm940_vm7 = vcmp.eq.s32.totalorder %v5492_v39, %v5054_v16 }
  0xb7   :  { %vm1341_vm1 = vmor %vm509_vm11, %vm957_vm12  ;;  %vm956_vm11 = vcmp.eq.s32.totalorder %v5500_v40, %v5054_v16  ;;  %v6151_v16 = vrot.slane %v6080_v10, %v5030_v14  ;;  %v6284_v14 = vld [vmem:[#allocation6 + $0x8] sm:$0xff] }
  0xb8   :  { %vm4463_vm4 = vmpackc.low %vm1341_vm1, %vm1325_vm14  ;;  %vm143_vm14 = vcmp.eq.s32.totalorder %v4987_v1, %v5541_v43  ;;  %vm159_vm1 = vcmp.eq.s32.totalorder %v4999_v5, %v5541_v43 }
  0xb9   :  { %4464 = vmatprep.subr.msk.bf16.mxu1 %vm4463_vm4, %v4933_v17  ;;  %vm1322_vm5 = vmor %vm490_vm15, %vm938_vm0  ;;  %vm591_vm15 = vcmp.eq.s32.totalorder %v4987_v1, %v5545_v44 }
  0xba   :  { %vm1338_vm8 = vmor %vm506_vm2, %vm954_vm3  ;;  %vm607_vm2 = vcmp.eq.s32.totalorder %v4999_v5, %v5545_v44 }
  0xbb   :  { %vm4417_vm12 = vmpackc.low %vm1338_vm8, %vm1322_vm5  ;;  %vm145_vm5 = vcmp.eq.s32.totalorder %v4987_v1, %v5561_v46  ;;  %vm161_vm8 = vcmp.eq.s32.totalorder %v4999_v5, %v5561_v46 }
  0xbc   :  { %4418 = vmatpush1.bf16.msk.msra.mxu0 %vm4417_vm12, %v4933_v17  ;;  %vm1324_vm13 = vmor %vm492_vm6, %vm940_vm7  ;;  %vm593_vm6 = vcmp.eq.s32.totalorder %v4987_v1, %v5565_v47 }
  0xbd   :  { %vm1340_vm0 = vmor %vm508_vm10, %vm956_vm11  ;;  %vm609_vm10 = vcmp.eq.s32.totalorder %v4999_v5, %v5565_v47 }
  0xbe   :  { %vm4465_vm3 = vmpackc.low %vm1340_vm0, %vm1324_vm13  ;;  %vm142_vm13 = vcmp.eq.s32.totalorder %v4987_v1, %v5585_v51  ;;  %vm158_vm0 = vcmp.eq.s32.totalorder %v4999_v5, %v5585_v51 }
  0xbf   :  { %4466 = vmatpush1.bf16.msk.msra.mxu1 %vm4465_vm3, %v4933_v17  ;;  %2228 = vmatmul.mubr.f32.vlgmr.msra.gmra.mrb[0].mxu0 %v5568_v48  ;;  %vm975_vm4 = vmor %vm143_vm14, %vm591_vm15  ;;  %vm590_vm14 = vcmp.eq.s32.totalorder %v4987_v1, %v5589_v52 }
  0xc0   :  { %vm991_vm7 = vmor %vm159_vm1, %vm607_vm2  ;;  %3956 = vmatprep.mubr.msk.f32.mxu0 %vm2138_vm9, %v5581_v50  ;;  %vm606_vm1 = vcmp.eq.s32.totalorder %v4999_v5, %v5589_v52 }
  0xc1   :  { %vm4467_vm11 = vmpackc.low %vm991_vm7, %vm975_vm4  ;;  %vm144_vm4 = vcmp.eq.s32.totalorder %v4987_v1, %v5607_v54  ;;  %vm160_vm7 = vcmp.eq.s32.totalorder %v4999_v5, %v5607_v54 }
  0xc2   :  { %2341 = vmatmul.mubr.f32.vlgmr.msra.gmra.mrb[0].mxu1 %v5568_v48  ;;  %4468 = vmatprep.subr.msk.bf16.mxu0 %vm4467_vm11, %v4933_v17  ;;  %vm977_vm12 = vmor %vm145_vm5, %vm593_vm6  ;;  %vm592_vm5 = vcmp.eq.s32.totalorder %v4987_v1, %v5611_v55 }
  0xc3   :  { %vm993_vm15 = vmor %vm161_vm8, %vm609_vm10  ;;  %4012 = vmatprep.mubr.msk.f32.mxu1 %vm2138_vm9, %v5581_v50  ;;  %2234 = vmatmul.mubr.f32.gmra.mrb[2].mxu0 %v5603_v53  ;;  %vm608_vm8 = vcmp.eq.s32.totalorder %v4999_v5, %v5611_v55 }
  0xc4   :  { %vm4515_vm2 = vmpackc.low %vm993_vm15, %vm977_vm12  ;;  %3957 = vmatprep.mubr.msk.f32.mxu0 %vm2138_vm9, %v5613_v56  ;;  %vm175_vm12 = vcmp.eq.s32.totalorder %v5066_v18, %v5541_v43  ;;  %vm191_vm15 = vcmp.eq.s32.totalorder %v5074_v19, %v5541_v43 }
  0xc5   :  { %4516 = vmatprep.subr.msk.bf16.mxu1 %vm4515_vm2, %v4933_v17  ;;  %vm974_vm3 = vmor %vm142_vm13, %vm590_vm14  ;;  %vm623_vm13 = vcmp.eq.s32.totalorder %v5066_v18, %v5545_v44 }
  0xc6   :  { %vm990_vm6 = vmor %vm158_vm0, %vm606_vm1  ;;  %2347 = vmatmul.mubr.f32.gmra.mrb[2].mxu1 %v5603_v53  ;;  %vm639_vm0 = vcmp.eq.s32.totalorder %v5074_v19, %v5545_v44 }
  0xc7   :  { %vm4469_vm10 = vmpackc.low %vm990_vm6, %vm974_vm3  ;;  %4013 = vmatprep.mubr.msk.f32.mxu1 %vm2138_vm9, %v5613_v56  ;;  %2240 = vmatmul.mubr.f32.gmra.mrb[4].mxu0 %v5630_v57  ;;  %vm177_vm3 = vcmp.eq.s32.totalorder %v5066_v18, %v5561_v46  ;;  %vm193_vm6 = vcmp.eq.s32.totalorder %v5074_v19, %v5561_v46 }
  0xc8   :  { %4470 = vmatpush1.bf16.msk.msra.mxu0 %vm4469_vm10, %v4933_v17  ;;  %vm976_vm11 = vmor %vm144_vm4, %vm592_vm5  ;;  %3958 = vmatprep.mubr.msk.f32.mxu0 %vm2138_vm9, %v5637_v58  ;;  %vm625_vm4 = vcmp.eq.s32.totalorder %v5066_v18, %v5565_v47 }
  0xc9   :  { %vm992_vm14 = vmor %vm160_vm7, %vm608_vm8  ;;  %vm641_vm7 = vcmp.eq.s32.totalorder %v5074_v19, %v5565_v47 }
  0xca   :  { %vm4517_vm1 = vmpackc.low %vm992_vm14, %vm976_vm11  ;;  %2353 = vmatmul.mubr.f32.gmra.mrb[4].mxu1 %v5630_v57  ;;  %vm174_vm11 = vcmp.eq.s32.totalorder %v5066_v18, %v5585_v51  ;;  %vm190_vm14 = vcmp.eq.s32.totalorder %v5074_v19, %v5585_v51 }
  0xcb   :  { %4518 = vmatpush1.bf16.msk.msra.mxu1 %vm4517_vm1, %v4933_v17  ;;  %vm1007_vm2 = vmor %vm175_vm12, %vm623_vm13  ;;  %4014 = vmatprep.mubr.msk.f32.mxu1 %vm2138_vm9, %v5637_v58  ;;  %vm622_vm12 = vcmp.eq.s32.totalorder %v5066_v18, %v5589_v52 }
  0xcc   :  { %vm1023_vm5 = vmor %vm191_vm15, %vm639_vm0  ;;  %2246 = vmatmul.mubr.f32.gmra.mrb[6].mxu0 %v5658_v59  ;;  %vm638_vm15 = vcmp.eq.s32.totalorder %v5074_v19, %v5589_v52 }
  0xcd   :  { %vm4471_vm8 = vmpackc.low %vm1023_vm5, %vm1007_vm2  ;;  %3959 = vmatprep.mubr.msk.f32.mxu0 %vm2138_vm9, %v5661_v60  ;;  %vm176_vm2 = vcmp.eq.s32.totalorder %v5066_v18, %v5607_v54  ;;  %vm192_vm5 = vcmp.eq.s32.totalorder %v5074_v19, %v5607_v54 }
  0xce   :  { %4472 = vmatprep.subr.msk.bf16.mxu0 %vm4471_vm8, %v4933_v17  ;;  %vm1009_vm10 = vmor %vm177_vm3, %vm625_vm4  ;;  %2359 = vmatmul.mubr.f32.gmra.mrb[6].mxu1 %v5658_v59  ;;  %vm624_vm3 = vcmp.eq.s32.totalorder %v5066_v18, %v5611_v55 }
  0xcf   :  { %vm1025_vm13 = vmor %vm193_vm6, %vm641_vm7  ;;  %4015 = vmatprep.mubr.msk.f32.mxu1 %vm2138_vm9, %v5661_v60  ;;  %vm640_vm6 = vcmp.eq.s32.totalorder %v5074_v19, %v5611_v55 }
  0xd0   :  { %vm4519_vm0 = vmpackc.low %vm1025_vm13, %vm1009_vm10  ;;  %2252 = vmatmul.mubr.f32.gmra.mrb[8].mxu0 %v5677_v61  ;;  %vm207_vm10 = vcmp.eq.s32.totalorder %v5108_v20, %v5541_v43  ;;  %vm223_vm13 = vcmp.eq.s32.totalorder %v5116_v21, %v5541_v43 }
  0xd1   :  { %4520 = vmatprep.subr.msk.bf16.mxu1 %vm4519_vm0, %v4933_v17  ;;  %vm1006_vm1 = vmor %vm174_vm11, %vm622_vm12  ;;  %3960 = vmatprep.mubr.msk.f32.mxu0 %vm2138_vm9, %v5685_v62  ;;  %vm655_vm11 = vcmp.eq.s32.totalorder %v5108_v20, %v5545_v44 }
  0xd2   :  { %vm1022_vm4 = vmor %vm190_vm14, %vm638_vm15  ;;  %2365 = vmatmul.mubr.f32.gmra.mrb[8].mxu1 %v5677_v61  ;;  %vm671_vm14 = vcmp.eq.s32.totalorder %v5116_v21, %v5545_v44 }
  0xd3   :  { %vm4473_vm7 = vmpackc.low %vm1022_vm4, %vm1006_vm1  ;;  %4016 = vmatprep.mubr.msk.f32.mxu1 %vm2138_vm9, %v5685_v62  ;;  %vm209_vm1 = vcmp.eq.s32.totalorder %v5108_v20, %v5561_v46  ;;  %vm225_vm4 = vcmp.eq.s32.totalorder %v5116_v21, %v5561_v46 }
  0xd4   :  { %4474 = vmatpush1.bf16.msk.msra.mxu0 %vm4473_vm7, %v4933_v17  ;;  %vm1008_vm8 = vmor %vm176_vm2, %vm624_vm3  ;;  %vm657_vm2 = vcmp.eq.s32.totalorder %v5108_v20, %v5565_v47 }
  0xd5   :  { %vm1024_vm12 = vmor %vm192_vm5, %vm640_vm6  ;;  %2258 = vmatmul.mubr.f32.gmra.mrb[10].mxu0 %v5706_v63  ;;  %vm673_vm5 = vcmp.eq.s32.totalorder %v5116_v21, %v5565_v47 }
  0xd6   :  { %vm4521_vm15 = vmpackc.low %vm1024_vm12, %vm1008_vm8  ;;  %2371 = vmatmul.mubr.f32.gmra.mrb[10].mxu1 %v5706_v63  ;;  %3961 = vmatprep.mubr.msk.f32.mxu0 %vm2138_vm9, %v5710_v0  ;;  %vm206_vm8 = vcmp.eq.s32.totalorder %v5108_v20, %v5585_v51  ;;  %vm222_vm12 = vcmp.eq.s32.totalorder %v5116_v21, %v5585_v51 }
  0xd7   :  { %4522 = vmatpush1.bf16.msk.msra.mxu1 %vm4521_vm15, %v4933_v17  ;;  %vm1039_vm0 = vmor %vm207_vm10, %vm655_vm11  ;;  %4017 = vmatprep.mubr.msk.f32.mxu1 %vm2138_vm9, %v5710_v0  ;;  %vm654_vm10 = vcmp.eq.s32.totalorder %v5108_v20, %v5589_v52 }
  0xd8   :  { %vm1055_vm3 = vmor %vm223_vm13, %vm671_vm14  ;;  %vm670_vm13 = vcmp.eq.s32.totalorder %v5116_v21, %v5589_v52 }
  0xd9   :  { %vm4475_vm6 = vmpackc.low %vm1055_vm3, %vm1039_vm0  ;;  %2264 = vmatmul.mubr.f32.gmra.mrb[12].mxu0 %v5725_v6  ;;  %vm208_vm0 = vcmp.eq.s32.totalorder %v5108_v20, %v5607_v54  ;;  %vm224_vm3 = vcmp.eq.s32.totalorder %v5116_v21, %v5607_v54 }
  0xda   :  { %4476 = vmatprep.subr.msk.bf16.mxu0 %vm4475_vm6, %v4933_v17  ;;  %vm1041_vm7 = vmor %vm209_vm1, %vm657_vm2  ;;  %2377 = vmatmul.mubr.f32.gmra.mrb[12].mxu1 %v5725_v6  ;;  %vm656_vm1 = vcmp.eq.s32.totalorder %v5108_v20, %v5611_v55 }
  0xdb   :  { %vm1057_vm11 = vmor %vm225_vm4, %vm673_vm5  ;;  %3962 = vmatprep.mubr.msk.f32.mxu0 %vm2138_vm9, %v5738_v7  ;;  %4018 = vmatprep.mubr.msk.f32.mxu1 %vm2138_vm9, %v5738_v7  ;;  %vm672_vm4 = vcmp.eq.s32.totalorder %v5116_v21, %v5611_v55 }
  0xdc   :  { %vm4523_vm14 = vmpackc.low %vm1057_vm11, %vm1041_vm7  ;;  %vm239_vm7 = vcmp.eq.s32.totalorder %v5150_v22, %v5541_v43  ;;  %vm255_vm11 = vcmp.eq.s32.totalorder %v5158_v23, %v5541_v43 }
  0xdd   :  { %4524 = vmatprep.subr.msk.bf16.mxu1 %vm4523_vm14, %v4933_v17  ;;  %vm1038_vm15 = vmor %vm206_vm8, %vm654_vm10  ;;  %2270 = vmatmul.mubr.f32.gmra.mrb[14].mxu0 %v5747_v8  ;;  %vm687_vm8 = vcmp.eq.s32.totalorder %v5150_v22, %v5545_v44 }
  0xde   :  { %vm1054_vm2 = vmor %vm222_vm12, %vm670_vm13  ;;  %2383 = vmatmul.mubr.f32.gmra.mrb[14].mxu1 %v5747_v8  ;;  %4067 = vmatprep.mubr.msk.f32.mxu0 %vm2138_vm9, %v5191_v24  ;;  %vm703_vm12 = vcmp.eq.s32.totalorder %v5158_v23, %v5545_v44 }
  0xdf   :  { %vm4477_vm5 = vmpackc.low %vm1054_vm2, %vm1038_vm15  ;;  %4123 = vmatprep.mubr.msk.f32.mxu1 %vm2138_vm9, %v5191_v24  ;;  %vm241_vm15 = vcmp.eq.s32.totalorder %v5150_v22, %v5561_v46  ;;  %vm257_vm2 = vcmp.eq.s32.totalorder %v5158_v23, %v5561_v46  ;;  %v6607_v24 = vrot.slane %v6078_v9, %v5525_v41 }
  0xe0   :  { %4478 = vmatpush1.bf16.msk.msra.mxu0 %vm4477_vm5, %v4933_v17  ;;  %vm1040_vm6 = vmor %vm208_vm0, %vm656_vm1  ;;  %vm689_vm0 = vcmp.eq.s32.totalorder %v5150_v22, %v5565_v47 }
  0xe1   :  { %vm1056_vm10 = vmor %vm224_vm3, %vm672_vm4  ;;  %vm705_vm3 = vcmp.eq.s32.totalorder %v5158_v23, %v5565_v47 }
  0xe2   :  { %vm4525_vm13 = vmpackc.low %vm1056_vm10, %vm1040_vm6  ;;  %vm238_vm6 = vcmp.eq.s32.totalorder %v5150_v22, %v5585_v51  ;;  %vm254_vm10 = vcmp.eq.s32.totalorder %v5158_v23, %v5585_v51 }
  0xe3   :  { %4526 = vmatpush1.bf16.msk.msra.mxu1 %vm4525_vm13, %v4933_v17  ;;  %vm1071_vm14 = vmor %vm239_vm7, %vm687_vm8  ;;  %vm686_vm7 = vcmp.eq.s32.totalorder %v5150_v22, %v5589_v52 }
  0xe4   :  { %vm1087_vm1 = vmor %vm255_vm11, %vm703_vm12  ;;  %vm702_vm11 = vcmp.eq.s32.totalorder %v5158_v23, %v5589_v52 }
  0xe5   :  { %vm4479_vm4 = vmpackc.low %vm1087_vm1, %vm1071_vm14  ;;  %vm240_vm14 = vcmp.eq.s32.totalorder %v5150_v22, %v5607_v54  ;;  %vm256_vm1 = vcmp.eq.s32.totalorder %v5158_v23, %v5607_v54 }
  0xe6   :  { %4480 = vmatprep.subr.msk.bf16.mxu0 %vm4479_vm4, %v4933_v17  ;;  %vm1073_vm5 = vmor %vm241_vm15, %vm689_vm0  ;;  %vm688_vm15 = vcmp.eq.s32.totalorder %v5150_v22, %v5611_v55 }
  0xe7   :  { %vm1089_vm8 = vmor %vm257_vm2, %vm705_vm3  ;;  %vm704_vm2 = vcmp.eq.s32.totalorder %v5158_v23, %v5611_v55 }
  0xe8   :  { %vm4527_vm12 = vmpackc.low %vm1089_vm8, %vm1073_vm5  ;;  %vm271_vm5 = vcmp.eq.s32.totalorder %v5194_v25, %v5541_v43  ;;  %vm287_vm8 = vcmp.eq.s32.totalorder %v5202_v26, %v5541_v43 }
  0xe9   :  { %4528 = vmatprep.subr.msk.bf16.mxu1 %vm4527_vm12, %v4933_v17  ;;  %vm1070_vm13 = vmor %vm238_vm6, %vm686_vm7  ;;  %vm719_vm6 = vcmp.eq.s32.totalorder %v5194_v25, %v5545_v44 }
  0xea   :  { %vm1086_vm0 = vmor %vm254_vm10, %vm702_vm11  ;;  %vm735_vm10 = vcmp.eq.s32.totalorder %v5202_v26, %v5545_v44 }
  0xeb   :  { %vm4481_vm3 = vmpackc.low %vm1086_vm0, %vm1070_vm13  ;;  %vm273_vm13 = vcmp.eq.s32.totalorder %v5194_v25, %v5561_v46  ;;  %vm289_vm0 = vcmp.eq.s32.totalorder %v5202_v26, %v5561_v46 }
  0xec   :  { %4482 = vmatpush1.bf16.msk.msra.mxu0 %vm4481_vm3, %v4933_v17  ;;  %vm1072_vm4 = vmor %vm240_vm14, %vm688_vm15  ;;  %vm721_vm14 = vcmp.eq.s32.totalorder %v5194_v25, %v5565_v47 }
  0xed   :  { %vm1088_vm7 = vmor %vm256_vm1, %vm704_vm2  ;;  %vm737_vm1 = vcmp.eq.s32.totalorder %v5202_v26, %v5565_v47 }
  0xee   :  { %vm4529_vm11 = vmpackc.low %vm1088_vm7, %vm1072_vm4  ;;  %vm270_vm4 = vcmp.eq.s32.totalorder %v5194_v25, %v5585_v51  ;;  %vm286_vm7 = vcmp.eq.s32.totalorder %v5202_v26, %v5585_v51 }
  0xef   :  { %4530 = vmatpush1.bf16.msk.msra.mxu1 %vm4529_vm11, %v4933_v17  ;;  %vm1103_vm12 = vmor %vm271_vm5, %vm719_vm6  ;;  %vm718_vm5 = vcmp.eq.s32.totalorder %v5194_v25, %v5589_v52 }
  0xf0   :  { %vm1119_vm15 = vmor %vm287_vm8, %vm735_vm10  ;;  %vm734_vm8 = vcmp.eq.s32.totalorder %v5202_v26, %v5589_v52 }
  0xf1   :  { %vm4483_vm2 = vmpackc.low %vm1119_vm15, %vm1103_vm12  ;;  %vm272_vm12 = vcmp.eq.s32.totalorder %v5194_v25, %v5607_v54  ;;  %vm288_vm15 = vcmp.eq.s32.totalorder %v5202_v26, %v5607_v54 }
  0xf2   :  { %4484 = vmatprep.subr.msk.bf16.mxu0 %vm4483_vm2, %v4933_v17  ;;  %vm1105_vm3 = vmor %vm273_vm13, %vm721_vm14  ;;  %vm720_vm13 = vcmp.eq.s32.totalorder %v5194_v25, %v5611_v55 }
  0xf3   :  { %vm1121_vm6 = vmor %vm289_vm0, %vm737_vm1  ;;  %vm736_vm0 = vcmp.eq.s32.totalorder %v5202_v26, %v5611_v55 }
  0xf4   :  { %vm4531_vm10 = vmpackc.low %vm1121_vm6, %vm1105_vm3  ;;  %vm303_vm3 = vcmp.eq.s32.totalorder %v5240_v27, %v5541_v43  ;;  %vm319_vm6 = vcmp.eq.s32.totalorder %v5248_v28, %v5541_v43 }
  0xf5   :  { %4532 = vmatprep.subr.msk.bf16.mxu1 %vm4531_vm10, %v4933_v17  ;;  %vm1102_vm11 = vmor %vm270_vm4, %vm718_vm5  ;;  %vm751_vm4 = vcmp.eq.s32.totalorder %v5240_v27, %v5545_v44 }
  0xf6   :  { %vm1118_vm14 = vmor %vm286_vm7, %vm734_vm8  ;;  %vm767_vm7 = vcmp.eq.s32.totalorder %v5248_v28, %v5545_v44 }
  0xf7   :  { %vm4485_vm1 = vmpackc.low %vm1118_vm14, %vm1102_vm11  ;;  %vm305_vm11 = vcmp.eq.s32.totalorder %v5240_v27, %v5561_v46  ;;  %vm321_vm14 = vcmp.eq.s32.totalorder %v5248_v28, %v5561_v46 }
  0xf8   :  { %4486 = vmatpush1.bf16.msk.msra.mxu0 %vm4485_vm1, %v4933_v17  ;;  %vm1104_vm2 = vmor %vm272_vm12, %vm720_vm13  ;;  %vm753_vm12 = vcmp.eq.s32.totalorder %v5240_v27, %v5565_v47 }
  0xf9   :  { %vm1120_vm5 = vmor %vm288_vm15, %vm736_vm0  ;;  %vm769_vm15 = vcmp.eq.s32.totalorder %v5248_v28, %v5565_v47 }
  0xfa   :  { %vm4533_vm8 = vmpackc.low %vm1120_vm5, %vm1104_vm2  ;;  %vm302_vm2 = vcmp.eq.s32.totalorder %v5240_v27, %v5585_v51  ;;  %vm318_vm5 = vcmp.eq.s32.totalorder %v5248_v28, %v5585_v51 }
  0xfb   :  { %4534 = vmatpush1.bf16.msk.msra.mxu1 %vm4533_vm8, %v4933_v17  ;;  %vm1135_vm10 = vmor %vm303_vm3, %vm751_vm4  ;;  %vm750_vm3 = vcmp.eq.s32.totalorder %v5240_v27, %v5589_v52 }
  0xfc   :  { %vm1151_vm13 = vmor %vm319_vm6, %vm767_vm7  ;;  %vm766_vm6 = vcmp.eq.s32.totalorder %v5248_v28, %v5589_v52 }
  0xfd   :  { %vm4487_vm0 = vmpackc.low %vm1151_vm13, %vm1135_vm10  ;;  %vm304_vm10 = vcmp.eq.s32.totalorder %v5240_v27, %v5607_v54  ;;  %vm320_vm13 = vcmp.eq.s32.totalorder %v5248_v28, %v5607_v54 }
  0xfe   :  { %4488 = vmatprep.subr.msk.bf16.mxu0 %vm4487_vm0, %v4933_v17  ;;  %vm1137_vm1 = vmor %vm305_vm11, %vm753_vm12  ;;  %vm752_vm11 = vcmp.eq.s32.totalorder %v5240_v27, %v5611_v55 }
  0xff   :  { %vm1153_vm4 = vmor %vm321_vm14, %vm769_vm15  ;;  %vm768_vm14 = vcmp.eq.s32.totalorder %v5248_v28, %v5611_v55 }
 0x100   :  { %vm4535_vm7 = vmpackc.low %vm1153_vm4, %vm1137_vm1  ;;  %vm335_vm1 = vcmp.eq.s32.totalorder %v5282_v29, %v5541_v43  ;;  %vm351_vm4 = vcmp.eq.s32.totalorder %v5290_v30, %v5541_v43 }
 0x101   :  { %4536 = vmatprep.subr.msk.bf16.mxu1 %vm4535_vm7, %v4933_v17  ;;  %vm1134_vm8 = vmor %vm302_vm2, %vm750_vm3  ;;  %vm783_vm2 = vcmp.eq.s32.totalorder %v5282_v29, %v5545_v44 }
 0x102   :  { %vm1150_vm12 = vmor %vm318_vm5, %vm766_vm6  ;;  %vm799_vm5 = vcmp.eq.s32.totalorder %v5290_v30, %v5545_v44 }
 0x103   :  { %vm4489_vm15 = vmpackc.low %vm1150_vm12, %vm1134_vm8  ;;  %vm337_vm8 = vcmp.eq.s32.totalorder %v5282_v29, %v5561_v46  ;;  %vm353_vm12 = vcmp.eq.s32.totalorder %v5290_v30, %v5561_v46 }
 0x104   :  { %4490 = vmatpush1.bf16.msk.msra.mxu0 %vm4489_vm15, %v4933_v17  ;;  %vm1136_vm0 = vmor %vm304_vm10, %vm752_vm11  ;;  %vm785_vm10 = vcmp.eq.s32.totalorder %v5282_v29, %v5565_v47 }
 0x105   :  { %vm1152_vm3 = vmor %vm320_vm13, %vm768_vm14  ;;  %vm801_vm13 = vcmp.eq.s32.totalorder %v5290_v30, %v5565_v47 }
 0x106   :  { %vm4537_vm6 = vmpackc.low %vm1152_vm3, %vm1136_vm0  ;;  %vm334_vm0 = vcmp.eq.s32.totalorder %v5282_v29, %v5585_v51  ;;  %vm350_vm3 = vcmp.eq.s32.totalorder %v5290_v30, %v5585_v51 }
 0x107   :  { %4538 = vmatpush1.bf16.msk.msra.mxu1 %vm4537_vm6, %v4933_v17  ;;  %vm1167_vm7 = vmor %vm335_vm1, %vm783_vm2  ;;  %vm782_vm1 = vcmp.eq.s32.totalorder %v5282_v29, %v5589_v52 }
 0x108   :  { %vm1183_vm11 = vmor %vm351_vm4, %vm799_vm5  ;;  %vm798_vm4 = vcmp.eq.s32.totalorder %v5290_v30, %v5589_v52 }
 0x109   :  { %vm4491_vm14 = vmpackc.low %vm1183_vm11, %vm1167_vm7  ;;  %vm336_vm7 = vcmp.eq.s32.totalorder %v5282_v29, %v5607_v54  ;;  %vm352_vm11 = vcmp.eq.s32.totalorder %v5290_v30, %v5607_v54 }
 0x10a   :  { %4492 = vmatprep.subr.msk.bf16.mxu0 %vm4491_vm14, %v4933_v17  ;;  %vm1169_vm15 = vmor %vm337_vm8, %vm785_vm10  ;;  %vm784_vm8 = vcmp.eq.s32.totalorder %v5282_v29, %v5611_v55 }
 0x10b   :  { %vm1185_vm2 = vmor %vm353_vm12, %vm801_vm13  ;;  %vm800_vm12 = vcmp.eq.s32.totalorder %v5290_v30, %v5611_v55 }
 0x10c   :  { %vm4539_vm5 = vmpackc.low %vm1185_vm2, %vm1169_vm15  ;;  %vm367_vm15 = vcmp.eq.s32.totalorder %v5324_v31, %v5541_v43  ;;  %vm383_vm2 = vcmp.eq.s32.totalorder %v5332_v32, %v5541_v43 }
 0x10d   :  { %4540 = vmatprep.subr.msk.bf16.mxu1 %vm4539_vm5, %v4933_v17  ;;  %vm1166_vm6 = vmor %vm334_vm0, %vm782_vm1  ;;  %vm815_vm0 = vcmp.eq.s32.totalorder %v5324_v31, %v5545_v44 }
 0x10e   :  { %vm1182_vm10 = vmor %vm350_vm3, %vm798_vm4  ;;  %vm831_vm3 = vcmp.eq.s32.totalorder %v5332_v32, %v5545_v44 }
 0x10f   :  { %vm4493_vm13 = vmpackc.low %vm1182_vm10, %vm1166_vm6  ;;  %vm369_vm6 = vcmp.eq.s32.totalorder %v5324_v31, %v5561_v46  ;;  %vm385_vm10 = vcmp.eq.s32.totalorder %v5332_v32, %v5561_v46 }
 0x110   :  { %4494 = vmatpush1.bf16.msk.msra.mxu0 %vm4493_vm13, %v4933_v17  ;;  %vm1168_vm14 = vmor %vm336_vm7, %vm784_vm8  ;;  %vm817_vm7 = vcmp.eq.s32.totalorder %v5324_v31, %v5565_v47 }
 0x111   :  { %vm1184_vm1 = vmor %vm352_vm11, %vm800_vm12  ;;  %vm833_vm11 = vcmp.eq.s32.totalorder %v5332_v32, %v5565_v47 }
 0x112   :  { %vm4541_vm4 = vmpackc.low %vm1184_vm1, %vm1168_vm14  ;;  %vm366_vm14 = vcmp.eq.s32.totalorder %v5324_v31, %v5585_v51  ;;  %vm382_vm1 = vcmp.eq.s32.totalorder %v5332_v32, %v5585_v51 }
 0x113   :  { %4542 = vmatpush1.bf16.msk.msra.mxu1 %vm4541_vm4, %v4933_v17  ;;  %vm1199_vm5 = vmor %vm367_vm15, %vm815_vm0  ;;  %vm814_vm15 = vcmp.eq.s32.totalorder %v5324_v31, %v5589_v52 }
 0x114   :  { %vm1215_vm8 = vmor %vm383_vm2, %vm831_vm3  ;;  %vm830_vm2 = vcmp.eq.s32.totalorder %v5332_v32, %v5589_v52 }
 0x115   :  { %vm4495_vm12 = vmpackc.low %vm1215_vm8, %vm1199_vm5  ;;  %vm368_vm5 = vcmp.eq.s32.totalorder %v5324_v31, %v5607_v54  ;;  %vm384_vm8 = vcmp.eq.s32.totalorder %v5332_v32, %v5607_v54 }
 0x116   :  { %4496 = vmatprep.subr.msk.bf16.mxu0 %vm4495_vm12, %v4933_v17  ;;  %vm1201_vm13 = vmor %vm369_vm6, %vm817_vm7  ;;  %vm816_vm6 = vcmp.eq.s32.totalorder %v5324_v31, %v5611_v55 }
 0x117   :  { %vm1217_vm0 = vmor %vm385_vm10, %vm833_vm11  ;;  %vm832_vm10 = vcmp.eq.s32.totalorder %v5332_v32, %v5611_v55 }
 0x118   :  { %vm4543_vm3 = vmpackc.low %vm1217_vm0, %vm1201_vm13  ;;  %vm399_vm13 = vcmp.eq.s32.totalorder %v5366_v33, %v5541_v43  ;;  %vm415_vm0 = vcmp.eq.s32.totalorder %v5374_v34, %v5541_v43 }
 0x119   :  { %4544 = vmatprep.subr.msk.bf16.mxu1 %vm4543_vm3, %v4933_v17  ;;  %vm1198_vm4 = vmor %vm366_vm14, %vm814_vm15  ;;  %vm847_vm14 = vcmp.eq.s32.totalorder %v5366_v33, %v5545_v44 }
 0x11a   :  { %vm1214_vm7 = vmor %vm382_vm1, %vm830_vm2  ;;  %vm863_vm1 = vcmp.eq.s32.totalorder %v5374_v34, %v5545_v44 }
 0x11b   :  { %vm4497_vm11 = vmpackc.low %vm1214_vm7, %vm1198_vm4  ;;  %vm401_vm4 = vcmp.eq.s32.totalorder %v5366_v33, %v5561_v46  ;;  %vm417_vm7 = vcmp.eq.s32.totalorder %v5374_v34, %v5561_v46 }
 0x11c   :  { %4498 = vmatpush1.bf16.msk.msra.mxu0 %vm4497_vm11, %v4933_v17  ;;  %vm1200_vm12 = vmor %vm368_vm5, %vm816_vm6  ;;  %vm849_vm5 = vcmp.eq.s32.totalorder %v5366_v33, %v5565_v47 }
 0x11d   :  { %vm1216_vm15 = vmor %vm384_vm8, %vm832_vm10  ;;  %vm865_vm8 = vcmp.eq.s32.totalorder %v5374_v34, %v5565_v47 }
 0x11e   :  { %vm4545_vm2 = vmpackc.low %vm1216_vm15, %vm1200_vm12  ;;  %vm398_vm12 = vcmp.eq.s32.totalorder %v5366_v33, %v5585_v51  ;;  %vm414_vm15 = vcmp.eq.s32.totalorder %v5374_v34, %v5585_v51 }
 0x11f   :  { %4546 = vmatpush1.bf16.msk.msra.mxu1 %vm4545_vm2, %v4933_v17  ;;  %vm1231_vm3 = vmor %vm399_vm13, %vm847_vm14  ;;  %vm846_vm13 = vcmp.eq.s32.totalorder %v5366_v33, %v5589_v52 }
 0x120   :  { %vm1247_vm6 = vmor %vm415_vm0, %vm863_vm1  ;;  %vm862_vm0 = vcmp.eq.s32.totalorder %v5374_v34, %v5589_v52 }
 0x121   :  { %vm4499_vm10 = vmpackc.low %vm1247_vm6, %vm1231_vm3  ;;  %vm400_vm3 = vcmp.eq.s32.totalorder %v5366_v33, %v5607_v54  ;;  %vm416_vm6 = vcmp.eq.s32.totalorder %v5374_v34, %v5607_v54 }
 0x122   :  { %4500 = vmatprep.subr.msk.bf16.mxu0 %vm4499_vm10, %v4933_v17  ;;  %vm1233_vm11 = vmor %vm401_vm4, %vm849_vm5  ;;  %vm848_vm4 = vcmp.eq.s32.totalorder %v5366_v33, %v5611_v55 }
 0x123   :  { %vm1249_vm14 = vmor %vm417_vm7, %vm865_vm8  ;;  %vm864_vm7 = vcmp.eq.s32.totalorder %v5374_v34, %v5611_v55 }
 0x124   :  { %vm4547_vm1 = vmpackc.low %vm1249_vm14, %vm1233_vm11  ;;  %vm431_vm11 = vcmp.eq.s32.totalorder %v5408_v35, %v5541_v43  ;;  %vm447_vm14 = vcmp.eq.s32.totalorder %v5416_v36, %v5541_v43 }
 0x125   :  { %4548 = vmatprep.subr.msk.bf16.mxu1 %vm4547_vm1, %v4933_v17  ;;  %vm1230_vm2 = vmor %vm398_vm12, %vm846_vm13  ;;  %vm879_vm12 = vcmp.eq.s32.totalorder %v5408_v35, %v5545_v44 }
 0x126   :  { %vm1246_vm5 = vmor %vm414_vm15, %vm862_vm0  ;;  %vm895_vm15 = vcmp.eq.s32.totalorder %v5416_v36, %v5545_v44 }
 0x127   :  { %vm4501_vm8 = vmpackc.low %vm1246_vm5, %vm1230_vm2  ;;  %vm433_vm2 = vcmp.eq.s32.totalorder %v5408_v35, %v5561_v46  ;;  %vm449_vm5 = vcmp.eq.s32.totalorder %v5416_v36, %v5561_v46 }
 0x128   :  { %4502 = vmatpush1.bf16.msk.msra.mxu0 %vm4501_vm8, %v4933_v17  ;;  %vm1232_vm10 = vmor %vm400_vm3, %vm848_vm4  ;;  %vm881_vm3 = vcmp.eq.s32.totalorder %v5408_v35, %v5565_v47 }
 0x129   :  { %vm1248_vm13 = vmor %vm416_vm6, %vm864_vm7  ;;  %vm897_vm6 = vcmp.eq.s32.totalorder %v5416_v36, %v5565_v47 }
 0x12a   :  { %vm4549_vm0 = vmpackc.low %vm1248_vm13, %vm1232_vm10  ;;  %vm430_vm10 = vcmp.eq.s32.totalorder %v5408_v35, %v5585_v51  ;;  %vm446_vm13 = vcmp.eq.s32.totalorder %v5416_v36, %v5585_v51 }
 0x12b   :  { %4550 = vmatpush1.bf16.msk.msra.mxu1 %vm4549_vm0, %v4933_v17  ;;  %vm1263_vm1 = vmor %vm431_vm11, %vm879_vm12  ;;  %vm878_vm11 = vcmp.eq.s32.totalorder %v5408_v35, %v5589_v52 }
 0x12c   :  { %vm1279_vm4 = vmor %vm447_vm14, %vm895_vm15  ;;  %vm894_vm14 = vcmp.eq.s32.totalorder %v5416_v36, %v5589_v52 }
 0x12d   :  { %vm4503_vm7 = vmpackc.low %vm1279_vm4, %vm1263_vm1  ;;  %vm432_vm1 = vcmp.eq.s32.totalorder %v5408_v35, %v5607_v54  ;;  %vm448_vm4 = vcmp.eq.s32.totalorder %v5416_v36, %v5607_v54 }
 0x12e   :  { %4504 = vmatprep.subr.msk.bf16.mxu0 %vm4503_vm7, %v4933_v17  ;;  %vm1265_vm8 = vmor %vm433_vm2, %vm881_vm3  ;;  %vm880_vm2 = vcmp.eq.s32.totalorder %v5408_v35, %v5611_v55 }
 0x12f   :  { %vm1281_vm12 = vmor %vm449_vm5, %vm897_vm6  ;;  %vm896_vm5 = vcmp.eq.s32.totalorder %v5416_v36, %v5611_v55 }
 0x130   :  { %vm4551_vm15 = vmpackc.low %vm1281_vm12, %vm1265_vm8  ;;  %vm463_vm8 = vcmp.eq.s32.totalorder %v5450_v37, %v5541_v43  ;;  %vm479_vm12 = vcmp.eq.s32.totalorder %v5458_v38, %v5541_v43 }
 0x131   :  { %4552 = vmatprep.subr.msk.bf16.mxu1 %vm4551_vm15, %v4933_v17  ;;  %vm1262_vm0 = vmor %vm430_vm10, %vm878_vm11  ;;  %vm911_vm10 = vcmp.eq.s32.totalorder %v5450_v37, %v5545_v44 }
 0x132   :  { %vm1278_vm3 = vmor %vm446_vm13, %vm894_vm14  ;;  %vm927_vm13 = vcmp.eq.s32.totalorder %v5458_v38, %v5545_v44 }
 0x133   :  { %vm4505_vm6 = vmpackc.low %vm1278_vm3, %vm1262_vm0  ;;  %vm465_vm0 = vcmp.eq.s32.totalorder %v5450_v37, %v5561_v46  ;;  %vm481_vm3 = vcmp.eq.s32.totalorder %v5458_v38, %v5561_v46 }
 0x134   :  { %4506 = vmatpush1.bf16.msk.msra.mxu0 %vm4505_vm6, %v4933_v17  ;;  %vm1264_vm7 = vmor %vm432_vm1, %vm880_vm2  ;;  %vm913_vm1 = vcmp.eq.s32.totalorder %v5450_v37, %v5565_v47 }
 0x135   :  { %vm1280_vm11 = vmor %vm448_vm4, %vm896_vm5  ;;  %vm929_vm4 = vcmp.eq.s32.totalorder %v5458_v38, %v5565_v47 }
 0x136   :  { %vm4553_vm14 = vmpackc.low %vm1280_vm11, %vm1264_vm7  ;;  %vm462_vm7 = vcmp.eq.s32.totalorder %v5450_v37, %v5585_v51  ;;  %vm478_vm11 = vcmp.eq.s32.totalorder %v5458_v38, %v5585_v51 }
 0x137   :  { %4554 = vmatpush1.bf16.msk.msra.mxu1 %vm4553_vm14, %v4933_v17  ;;  %vm1295_vm15 = vmor %vm463_vm8, %vm911_vm10  ;;  %vm910_vm8 = vcmp.eq.s32.totalorder %v5450_v37, %v5589_v52 }
 0x138   :  { %vm1311_vm2 = vmor %vm479_vm12, %vm927_vm13  ;;  %vm926_vm12 = vcmp.eq.s32.totalorder %v5458_v38, %v5589_v52 }
 0x139   :  { %vm4507_vm5 = vmpackc.low %vm1311_vm2, %vm1295_vm15  ;;  %vm464_vm15 = vcmp.eq.s32.totalorder %v5450_v37, %v5607_v54  ;;  %vm480_vm2 = vcmp.eq.s32.totalorder %v5458_v38, %v5607_v54 }
 0x13a   :  { %4508 = vmatprep.subr.msk.bf16.mxu0 %vm4507_vm5, %v4933_v17  ;;  %vm1297_vm6 = vmor %vm465_vm0, %vm913_vm1  ;;  %vm912_vm0 = vcmp.eq.s32.totalorder %v5450_v37, %v5611_v55 }
 0x13b   :  { %vm1313_vm10 = vmor %vm481_vm3, %vm929_vm4  ;;  %vm928_vm3 = vcmp.eq.s32.totalorder %v5458_v38, %v5611_v55 }
 0x13c   :  { %vm4555_vm13 = vmpackc.low %vm1313_vm10, %vm1297_vm6  ;;  %vm495_vm6 = vcmp.eq.s32.totalorder %v5492_v39, %v5541_v43  ;;  %vm511_vm10 = vcmp.eq.s32.totalorder %v5500_v40, %v5541_v43  ;;  %v6611_v43 = vrot.slane %v6080_v10, %v5525_v41  ;;  %v6624_v41 = vrot.slane %v6078_v9, %v5537_v42 }
 0x13d   :  { %4556 = vmatprep.subr.msk.bf16.mxu1 %vm4555_vm13, %v4933_v17  ;;  %vm1294_vm14 = vmor %vm462_vm7, %vm910_vm8  ;;  %vm943_vm7 = vcmp.eq.s32.totalorder %v5492_v39, %v5545_v44 }
 0x13e   :  { %vm1310_vm1 = vmor %vm478_vm11, %vm926_vm12  ;;  %vm959_vm11 = vcmp.eq.s32.totalorder %v5500_v40, %v5545_v44  ;;  %v6628_v44 = vrot.slane %v6080_v10, %v5537_v42  ;;  %v6641_v42 = vrot.slane %v6078_v9, %v5557_v45 }
 0x13f   :  { %vm4509_vm4 = vmpackc.low %vm1310_vm1, %vm1294_vm14  ;;  %vm497_vm14 = vcmp.eq.s32.totalorder %v5492_v39, %v5561_v46  ;;  %vm513_vm1 = vcmp.eq.s32.totalorder %v5500_v40, %v5561_v46  ;;  %v6645_v46 = vrot.slane %v6080_v10, %v5557_v45  ;;  %v4828_v45 = vld [vmem:[#allocation6 + $0x18] sm:$0xff] }
 0x140   :  { %4510 = vmatpush1.bf16.msk.msra.mxu0 %vm4509_vm4, %v4933_v17  ;;  %vm1296_vm5 = vmor %vm464_vm15, %vm912_vm0  ;;  %vm945_vm15 = vcmp.eq.s32.totalorder %v5492_v39, %v5565_v47 }
 0x141   :  { %vm1312_vm8 = vmor %vm480_vm2, %vm928_vm3  ;;  %vm961_vm2 = vcmp.eq.s32.totalorder %v5500_v40, %v5565_v47  ;;  %v4827_v47 = vld [vmem:[#allocation6] sm:$0xff] }
 0x142   :  { %vm4557_vm12 = vmpackc.low %vm1312_vm8, %vm1296_vm5  ;;  %vm494_vm5 = vcmp.eq.s32.totalorder %v5492_v39, %v5585_v51  ;;  %vm510_vm8 = vcmp.eq.s32.totalorder %v5500_v40, %v5585_v51  ;;  %v4830_v51 = vld [vmem:[#allocation6 + $0x28] sm:$0xff] }
 0x143   :  { %4558 = vmatpush1.bf16.msk.msra.mxu1 %vm4557_vm12, %v4933_v17  ;;  %vm1327_vm13 = vmor %vm495_vm6, %vm943_vm7  ;;  %vm942_vm6 = vcmp.eq.s32.totalorder %v5492_v39, %v5589_v52 }
 0x144   :  { %vm1343_vm0 = vmor %vm511_vm10, %vm959_vm11  ;;  %vm958_vm10 = vcmp.eq.s32.totalorder %v5500_v40, %v5589_v52  ;;  %v4831_v52 = vld [vmem:[#allocation6 + $0x20] sm:$0xff] }
 0x145   :  { %vm4511_vm3 = vmpackc.low %vm1343_vm0, %vm1327_vm13  ;;  %vm496_vm13 = vcmp.eq.s32.totalorder %v5492_v39, %v5607_v54  ;;  %vm512_vm0 = vcmp.eq.s32.totalorder %v5500_v40, %v5607_v54  ;;  %v4834_v54 = vld [vmem:[#allocation6 + $0x48] sm:$0xff] }
 0x146   :  { %4512 = vmatprep.subr.msk.bf16.mxu0 %vm4511_vm3, %v4933_v17  ;;  %vm1329_vm4 = vmor %vm497_vm14, %vm945_vm15  ;;  %vm944_vm14 = vcmp.eq.s32.totalorder %v5492_v39, %v5611_v55 }
 0x147   :  { %vm1345_vm7 = vmor %vm513_vm1, %vm961_vm2  ;;  %vm960_vm1 = vcmp.eq.s32.totalorder %v5500_v40, %v5611_v55  ;;  %v4835_v55 = vld [vmem:[#allocation6 + $0x40] sm:$0xff] }
 0x148   :  { %vm4559_vm11 = vmpackc.low %vm1345_vm7, %vm1329_vm4  ;;  %vm147_vm4 = vcmp.eq.s32.totalorder %v4987_v1, %v6093_v11  ;;  %vm163_vm7 = vcmp.eq.s32.totalorder %v4999_v5, %v6093_v11 }
 0x149   :  { %4560 = vmatprep.subr.msk.bf16.mxu1 %vm4559_vm11, %v4933_v17  ;;  %vm1326_vm12 = vmor %vm494_vm5, %vm942_vm6  ;;  %vm595_vm5 = vcmp.eq.s32.totalorder %v4987_v1, %v6097_v12 }
 0x14a   :  { %vm1342_vm15 = vmor %vm510_vm8, %vm958_vm10  ;;  %vm611_vm8 = vcmp.eq.s32.totalorder %v4999_v5, %v6097_v12 }
 0x14b   :  { %vm4513_vm2 = vmpackc.low %vm1342_vm15, %vm1326_vm12  ;;  %vm149_vm12 = vcmp.eq.s32.totalorder %v4987_v1, %v6110_v2  ;;  %vm165_vm15 = vcmp.eq.s32.totalorder %v4999_v5, %v6110_v2 }
 0x14c   :  { %4514 = vmatpush1.bf16.msk.msra.mxu0 %vm4513_vm2, %v4933_v17  ;;  %vm1328_vm3 = vmor %vm496_vm13, %vm944_vm14  ;;  %vm597_vm13 = vcmp.eq.s32.totalorder %v4987_v1, %v6114_v13 }
 0x14d   :  { %vm1344_vm6 = vmor %vm512_vm0, %vm960_vm1  ;;  %vm613_vm0 = vcmp.eq.s32.totalorder %v4999_v5, %v6114_v13 }
 0x14e   :  { %vm4561_vm10 = vmpackc.low %vm1344_vm6, %vm1328_vm3  ;;  %vm146_vm3 = vcmp.eq.s32.totalorder %v4987_v1, %v6127_v3  ;;  %vm162_vm6 = vcmp.eq.s32.totalorder %v4999_v5, %v6127_v3 }
 0x14f   :  { %4562 = vmatpush1.bf16.msk.msra.mxu1 %vm4561_vm10, %v4933_v17  ;;  %2454 = vmatmul.mubr.f32.vlgmr.msra.gmra.mrb[16].mxu0 %v5568_v48  ;;  %vm979_vm11 = vmor %vm147_vm4, %vm595_vm5  ;;  %vm594_vm4 = vcmp.eq.s32.totalorder %v4987_v1, %v6131_v15 }
 0x150   :  { %vm995_vm14 = vmor %vm163_vm7, %vm611_vm8  ;;  %4068 = vmatprep.mubr.msk.f32.mxu0 %vm2138_vm9, %v5581_v50  ;;  %vm610_vm7 = vcmp.eq.s32.totalorder %v4999_v5, %v6131_v15 }
 0x151   :  { %vm4563_vm1 = vmpackc.low %vm995_vm14, %vm979_vm11  ;;  %vm148_vm11 = vcmp.eq.s32.totalorder %v4987_v1, %v6147_v4  ;;  %vm164_vm14 = vcmp.eq.s32.totalorder %v4999_v5, %v6147_v4 }
 0x152   :  { %2567 = vmatmul.mubr.f32.vlgmr.msra.gmra.mrb[16].mxu1 %v5568_v48  ;;  %4564 = vmatprep.subr.msk.bf16.mxu0 %vm4563_vm1, %v4933_v17  ;;  %vm981_vm2 = vmor %vm149_vm12, %vm597_vm13  ;;  %vm596_vm12 = vcmp.eq.s32.totalorder %v4987_v1, %v6151_v16  ;;  %v6659_v48 = vrot.slane %v6078_v9, %v5579_v49 }
 0x153   :  { %vm997_vm5 = vmor %vm165_vm15, %vm613_vm0  ;;  %4124 = vmatprep.mubr.msk.f32.mxu1 %vm2138_vm9, %v5581_v50  ;;  %2460 = vmatmul.mubr.f32.gmra.mrb[18].mxu0 %v5603_v53  ;;  %vm612_vm15 = vcmp.eq.s32.totalorder %v4999_v5, %v6151_v16  ;;  %v6663_v50 = vrot.slane %v6080_v10, %v5579_v49  ;;  %v4829_v49 = vld [vmem:[#allocation6 + $0x10] sm:$0xff] }
 0x154   :  { %vm4611_vm8 = vmpackc.low %vm997_vm5, %vm981_vm2  ;;  %4069 = vmatprep.mubr.msk.f32.mxu0 %vm2138_vm9, %v5613_v56  ;;  %vm179_vm2 = vcmp.eq.s32.totalorder %v5066_v18, %v6093_v11  ;;  %vm195_vm5 = vcmp.eq.s32.totalorder %v5074_v19, %v6093_v11 }
 0x155   :  { %4612 = vmatprep.subr.msk.bf16.mxu1 %vm4611_vm8, %v4933_v17  ;;  %vm978_vm10 = vmor %vm146_vm3, %vm594_vm4  ;;  %vm627_vm3 = vcmp.eq.s32.totalorder %v5066_v18, %v6097_v12 }
 0x156   :  { %vm994_vm13 = vmor %vm162_vm6, %vm610_vm7  ;;  %2573 = vmatmul.mubr.f32.gmra.mrb[18].mxu1 %v5603_v53  ;;  %vm643_vm6 = vcmp.eq.s32.totalorder %v5074_v19, %v6097_v12  ;;  %v4832_v53 = vld [vmem:[#allocation6 + $0x38] sm:$0xff] }
 0x157   :  { %vm4565_vm0 = vmpackc.low %vm994_vm13, %vm978_vm10  ;;  %4125 = vmatprep.mubr.msk.f32.mxu1 %vm2138_vm9, %v5613_v56  ;;  %2466 = vmatmul.mubr.f32.gmra.mrb[20].mxu0 %v5630_v57  ;;  %vm181_vm10 = vcmp.eq.s32.totalorder %v5066_v18, %v6110_v2  ;;  %vm197_vm13 = vcmp.eq.s32.totalorder %v5074_v19, %v6110_v2  ;;  %v4836_v56 = vld [vmem:[#allocation6 + $0x58] sm:$0xff] }
 0x158   :  { %4566 = vmatpush1.bf16.msk.msra.mxu0 %vm4565_vm0, %v4933_v17  ;;  %vm980_vm1 = vmor %vm148_vm11, %vm596_vm12  ;;  %4070 = vmatprep.mubr.msk.f32.mxu0 %vm2138_vm9, %v5637_v58  ;;  %vm629_vm11 = vcmp.eq.s32.totalorder %v5066_v18, %v6114_v13 }
 0x159   :  { %vm996_vm4 = vmor %vm164_vm14, %vm612_vm15  ;;  %vm645_vm14 = vcmp.eq.s32.totalorder %v5074_v19, %v6114_v13 }
 0x15a   :  { %vm4613_vm7 = vmpackc.low %vm996_vm4, %vm980_vm1  ;;  %2579 = vmatmul.mubr.f32.gmra.mrb[20].mxu1 %v5630_v57  ;;  %vm178_vm1 = vcmp.eq.s32.totalorder %v5066_v18, %v6127_v3  ;;  %vm194_vm4 = vcmp.eq.s32.totalorder %v5074_v19, %v6127_v3  ;;  %v4839_v57 = vld [vmem:[#allocation6 + $0x60] sm:$0xff] }
 0x15b   :  { %4614 = vmatpush1.bf16.msk.msra.mxu1 %vm4613_vm7, %v4933_v17  ;;  %vm1011_vm8 = vmor %vm179_vm2, %vm627_vm3  ;;  %4126 = vmatprep.mubr.msk.f32.mxu1 %vm2138_vm9, %v5637_v58  ;;  %vm626_vm2 = vcmp.eq.s32.totalorder %v5066_v18, %v6131_v15  ;;  %v4840_v58 = vld [vmem:[#allocation6 + $0x78] sm:$0xff] }
 0x15c   :  { %vm1027_vm12 = vmor %vm195_vm5, %vm643_vm6  ;;  %2472 = vmatmul.mubr.f32.gmra.mrb[22].mxu0 %v5658_v59  ;;  %vm642_vm5 = vcmp.eq.s32.totalorder %v5074_v19, %v6131_v15 }
 0x15d   :  { %vm4567_vm15 = vmpackc.low %vm1027_vm12, %vm1011_vm8  ;;  %4071 = vmatprep.mubr.msk.f32.mxu0 %vm2138_vm9, %v5661_v60  ;;  %vm180_vm8 = vcmp.eq.s32.totalorder %v5066_v18, %v6147_v4  ;;  %vm196_vm12 = vcmp.eq.s32.totalorder %v5074_v19, %v6147_v4 }
 0x15e   :  { %4568 = vmatprep.subr.msk.bf16.mxu0 %vm4567_vm15, %v4933_v17  ;;  %vm1013_vm0 = vmor %vm181_vm10, %vm629_vm11  ;;  %2585 = vmatmul.mubr.f32.gmra.mrb[22].mxu1 %v5658_v59  ;;  %vm628_vm10 = vcmp.eq.s32.totalorder %v5066_v18, %v6151_v16  ;;  %v4841_v59 = vld [vmem:[#allocation6 + $0x70] sm:$0xff] }
 0x15f   :  { %vm1029_vm3 = vmor %vm197_vm13, %vm645_vm14  ;;  %4127 = vmatprep.mubr.msk.f32.mxu1 %vm2138_vm9, %v5661_v60  ;;  %vm644_vm13 = vcmp.eq.s32.totalorder %v5074_v19, %v6151_v16 }
 0x160   :  { %vm4615_vm6 = vmpackc.low %vm1029_vm3, %vm1013_vm0  ;;  %2478 = vmatmul.mubr.f32.gmra.mrb[24].mxu0 %v5677_v61  ;;  %vm211_vm0 = vcmp.eq.s32.totalorder %v5108_v20, %v6093_v11  ;;  %vm227_vm3 = vcmp.eq.s32.totalorder %v5116_v21, %v6093_v11 }
 0x161   :  { %4616 = vmatprep.subr.msk.bf16.mxu1 %vm4615_vm6, %v4933_v17  ;;  %vm1010_vm7 = vmor %vm178_vm1, %vm626_vm2  ;;  %4072 = vmatprep.mubr.msk.f32.mxu0 %vm2138_vm9, %v5685_v62  ;;  %vm659_vm1 = vcmp.eq.s32.totalorder %v5108_v20, %v6097_v12 }
 0x162   :  { %vm1026_vm11 = vmor %vm194_vm4, %vm642_vm5  ;;  %2591 = vmatmul.mubr.f32.gmra.mrb[24].mxu1 %v5677_v61  ;;  %vm675_vm4 = vcmp.eq.s32.totalorder %v5116_v21, %v6097_v12 }
 0x163   :  { %vm4569_vm14 = vmpackc.low %vm1026_vm11, %vm1010_vm7  ;;  %4128 = vmatprep.mubr.msk.f32.mxu1 %vm2138_vm9, %v5685_v62  ;;  %vm213_vm7 = vcmp.eq.s32.totalorder %v5108_v20, %v6110_v2  ;;  %vm229_vm11 = vcmp.eq.s32.totalorder %v5116_v21, %v6110_v2 }
 0x164   :  { %4570 = vmatpush1.bf16.msk.msra.mxu0 %vm4569_vm14, %v4933_v17  ;;  %vm1012_vm15 = vmor %vm180_vm8, %vm628_vm10  ;;  %vm661_vm8 = vcmp.eq.s32.totalorder %v5108_v20, %v6114_v13 }
 0x165   :  { %vm1028_vm2 = vmor %vm196_vm12, %vm644_vm13  ;;  %2484 = vmatmul.mubr.f32.gmra.mrb[26].mxu0 %v5706_v63  ;;  %vm677_vm12 = vcmp.eq.s32.totalorder %v5116_v21, %v6114_v13 }
 0x166   :  { %vm4617_vm5 = vmpackc.low %vm1028_vm2, %vm1012_vm15  ;;  %2597 = vmatmul.mubr.f32.gmra.mrb[26].mxu1 %v5706_v63  ;;  %4073 = vmatprep.mubr.msk.f32.mxu0 %vm2138_vm9, %v5710_v0  ;;  %vm210_vm15 = vcmp.eq.s32.totalorder %v5108_v20, %v6127_v3  ;;  %vm226_vm2 = vcmp.eq.s32.totalorder %v5116_v21, %v6127_v3 }
 0x167   :  { %4618 = vmatpush1.bf16.msk.msra.mxu1 %vm4617_vm5, %v4933_v17  ;;  %vm1043_vm6 = vmor %vm211_vm0, %vm659_vm1  ;;  %4129 = vmatprep.mubr.msk.f32.mxu1 %vm2138_vm9, %v5710_v0  ;;  %vm658_vm0 = vcmp.eq.s32.totalorder %v5108_v20, %v6131_v15 }
 0x168   :  { %vm1059_vm10 = vmor %vm227_vm3, %vm675_vm4  ;;  %vm674_vm3 = vcmp.eq.s32.totalorder %v5116_v21, %v6131_v15 }
 0x169   :  { %vm4571_vm13 = vmpackc.low %vm1059_vm10, %vm1043_vm6  ;;  %2490 = vmatmul.mubr.f32.gmra.mrb[28].mxu0 %v5725_v6  ;;  %vm212_vm6 = vcmp.eq.s32.totalorder %v5108_v20, %v6147_v4  ;;  %vm228_vm10 = vcmp.eq.s32.totalorder %v5116_v21, %v6147_v4 }
 0x16a   :  { %4572 = vmatprep.subr.msk.bf16.mxu0 %vm4571_vm13, %v4933_v17  ;;  %vm1045_vm14 = vmor %vm213_vm7, %vm661_vm8  ;;  %2603 = vmatmul.mubr.f32.gmra.mrb[28].mxu1 %v5725_v6  ;;  %vm660_vm7 = vcmp.eq.s32.totalorder %v5108_v20, %v6151_v16 }
 0x16b   :  { %vm1061_vm1 = vmor %vm229_vm11, %vm677_vm12  ;;  %4074 = vmatprep.mubr.msk.f32.mxu0 %vm2138_vm9, %v5738_v7  ;;  %4130 = vmatprep.mubr.msk.f32.mxu1 %vm2138_vm9, %v5738_v7  ;;  %vm676_vm11 = vcmp.eq.s32.totalorder %v5116_v21, %v6151_v16 }
 0x16c   :  { %vm4619_vm4 = vmpackc.low %vm1061_vm1, %vm1045_vm14  ;;  %vm243_vm14 = vcmp.eq.s32.totalorder %v5150_v22, %v6093_v11  ;;  %vm259_vm1 = vcmp.eq.s32.totalorder %v5158_v23, %v6093_v11 }
 0x16d   :  { %4620 = vmatprep.subr.msk.bf16.mxu1 %vm4619_vm4, %v4933_v17  ;;  %vm1042_vm5 = vmor %vm210_vm15, %vm658_vm0  ;;  %2496 = vmatmul.mubr.f32.gmra.mrb[30].mxu0 %v5747_v8  ;;  %vm691_vm15 = vcmp.eq.s32.totalorder %v5150_v22, %v6097_v12 }
 0x16e   :  { %vm1058_vm8 = vmor %vm226_vm2, %vm674_vm3  ;;  %2609 = vmatmul.mubr.f32.gmra.mrb[30].mxu1 %v5747_v8  ;;  %4179 = vmatprep.mubr.msk.f32.mxu0 %vm2138_vm9, %v6284_v14  ;;  %vm707_vm2 = vcmp.eq.s32.totalorder %v5158_v23, %v6097_v12 }
 0x16f   :  { %vm4573_vm12 = vmpackc.low %vm1058_vm8, %vm1042_vm5  ;;  %4235 = vmatprep.mubr.msk.f32.mxu1 %vm2138_vm9, %v6284_v14  ;;  %vm245_vm5 = vcmp.eq.s32.totalorder %v5150_v22, %v6110_v2  ;;  %vm261_vm8 = vcmp.eq.s32.totalorder %v5158_v23, %v6110_v2 }
 0x170   :  { %4574 = vmatpush1.bf16.msk.msra.mxu0 %vm4573_vm12, %v4933_v17  ;;  %vm1044_vm13 = vmor %vm212_vm6, %vm660_vm7  ;;  %vm693_vm6 = vcmp.eq.s32.totalorder %v5150_v22, %v6114_v13 }
 0x171   :  { %vm1060_vm0 = vmor %vm228_vm10, %vm676_vm11  ;;  %vm709_vm10 = vcmp.eq.s32.totalorder %v5158_v23, %v6114_v13 }
 0x172   :  { %vm4621_vm3 = vmpackc.low %vm1060_vm0, %vm1044_vm13  ;;  %vm242_vm13 = vcmp.eq.s32.totalorder %v5150_v22, %v6127_v3  ;;  %vm258_vm0 = vcmp.eq.s32.totalorder %v5158_v23, %v6127_v3 }
 0x173   :  { %4622 = vmatpush1.bf16.msk.msra.mxu1 %vm4621_vm3, %v4933_v17  ;;  %vm1075_vm4 = vmor %vm243_vm14, %vm691_vm15  ;;  %vm690_vm14 = vcmp.eq.s32.totalorder %v5150_v22, %v6131_v15 }
 0x174   :  { %vm1091_vm7 = vmor %vm259_vm1, %vm707_vm2  ;;  %vm706_vm1 = vcmp.eq.s32.totalorder %v5158_v23, %v6131_v15 }
 0x175   :  { %vm4575_vm11 = vmpackc.low %vm1091_vm7, %vm1075_vm4  ;;  %vm244_vm4 = vcmp.eq.s32.totalorder %v5150_v22, %v6147_v4  ;;  %vm260_vm7 = vcmp.eq.s32.totalorder %v5158_v23, %v6147_v4 }
 0x176   :  { %4576 = vmatprep.subr.msk.bf16.mxu0 %vm4575_vm11, %v4933_v17  ;;  %vm1077_vm12 = vmor %vm245_vm5, %vm693_vm6  ;;  %vm692_vm5 = vcmp.eq.s32.totalorder %v5150_v22, %v6151_v16 }
 0x177   :  { %vm1093_vm15 = vmor %vm261_vm8, %vm709_vm10  ;;  %vm708_vm8 = vcmp.eq.s32.totalorder %v5158_v23, %v6151_v16 }
 0x178   :  { %vm4623_vm2 = vmpackc.low %vm1093_vm15, %vm1077_vm12  ;;  %vm275_vm12 = vcmp.eq.s32.totalorder %v5194_v25, %v6093_v11  ;;  %vm291_vm15 = vcmp.eq.s32.totalorder %v5202_v26, %v6093_v11 }
 0x179   :  { %4624 = vmatprep.subr.msk.bf16.mxu1 %vm4623_vm2, %v4933_v17  ;;  %vm1074_vm3 = vmor %vm242_vm13, %vm690_vm14  ;;  %vm723_vm13 = vcmp.eq.s32.totalorder %v5194_v25, %v6097_v12 }
 0x17a   :  { %vm1090_vm6 = vmor %vm258_vm0, %vm706_vm1  ;;  %vm739_vm0 = vcmp.eq.s32.totalorder %v5202_v26, %v6097_v12 }
 0x17b   :  { %vm4577_vm10 = vmpackc.low %vm1090_vm6, %vm1074_vm3  ;;  %vm277_vm3 = vcmp.eq.s32.totalorder %v5194_v25, %v6110_v2  ;;  %vm293_vm6 = vcmp.eq.s32.totalorder %v5202_v26, %v6110_v2 }
 0x17c   :  { %4578 = vmatpush1.bf16.msk.msra.mxu0 %vm4577_vm10, %v4933_v17  ;;  %vm1076_vm11 = vmor %vm244_vm4, %vm692_vm5  ;;  %vm725_vm4 = vcmp.eq.s32.totalorder %v5194_v25, %v6114_v13 }
 0x17d   :  { %vm1092_vm14 = vmor %vm260_vm7, %vm708_vm8  ;;  %vm741_vm7 = vcmp.eq.s32.totalorder %v5202_v26, %v6114_v13 }
 0x17e   :  { %vm4625_vm1 = vmpackc.low %vm1092_vm14, %vm1076_vm11  ;;  %vm274_vm11 = vcmp.eq.s32.totalorder %v5194_v25, %v6127_v3  ;;  %vm290_vm14 = vcmp.eq.s32.totalorder %v5202_v26, %v6127_v3 }
 0x17f   :  { %4626 = vmatpush1.bf16.msk.msra.mxu1 %vm4625_vm1, %v4933_v17  ;;  %vm1107_vm2 = vmor %vm275_vm12, %vm723_vm13  ;;  %vm722_vm12 = vcmp.eq.s32.totalorder %v5194_v25, %v6131_v15 }
 0x180   :  { %vm1123_vm5 = vmor %vm291_vm15, %vm739_vm0  ;;  %vm738_vm15 = vcmp.eq.s32.totalorder %v5202_v26, %v6131_v15 }
 0x181   :  { %vm4579_vm8 = vmpackc.low %vm1123_vm5, %vm1107_vm2  ;;  %vm276_vm2 = vcmp.eq.s32.totalorder %v5194_v25, %v6147_v4  ;;  %vm292_vm5 = vcmp.eq.s32.totalorder %v5202_v26, %v6147_v4 }
 0x182   :  { %4580 = vmatprep.subr.msk.bf16.mxu0 %vm4579_vm8, %v4933_v17  ;;  %vm1109_vm10 = vmor %vm277_vm3, %vm725_vm4  ;;  %vm724_vm3 = vcmp.eq.s32.totalorder %v5194_v25, %v6151_v16 }
 0x183   :  { %vm1125_vm13 = vmor %vm293_vm6, %vm741_vm7  ;;  %vm740_vm6 = vcmp.eq.s32.totalorder %v5202_v26, %v6151_v16 }
 0x184   :  { %vm4627_vm0 = vmpackc.low %vm1125_vm13, %vm1109_vm10  ;;  %vm307_vm10 = vcmp.eq.s32.totalorder %v5240_v27, %v6093_v11  ;;  %vm323_vm13 = vcmp.eq.s32.totalorder %v5248_v28, %v6093_v11 }
 0x185   :  { %4628 = vmatprep.subr.msk.bf16.mxu1 %vm4627_vm0, %v4933_v17  ;;  %vm1106_vm1 = vmor %vm274_vm11, %vm722_vm12  ;;  %vm755_vm11 = vcmp.eq.s32.totalorder %v5240_v27, %v6097_v12 }
 0x186   :  { %vm1122_vm4 = vmor %vm290_vm14, %vm738_vm15  ;;  %vm771_vm14 = vcmp.eq.s32.totalorder %v5248_v28, %v6097_v12 }
 0x187   :  { %vm4581_vm7 = vmpackc.low %vm1122_vm4, %vm1106_vm1  ;;  %vm309_vm1 = vcmp.eq.s32.totalorder %v5240_v27, %v6110_v2  ;;  %vm325_vm4 = vcmp.eq.s32.totalorder %v5248_v28, %v6110_v2 }
 0x188   :  { %4582 = vmatpush1.bf16.msk.msra.mxu0 %vm4581_vm7, %v4933_v17  ;;  %vm1108_vm8 = vmor %vm276_vm2, %vm724_vm3  ;;  %vm757_vm2 = vcmp.eq.s32.totalorder %v5240_v27, %v6114_v13 }
 0x189   :  { %vm1124_vm12 = vmor %vm292_vm5, %vm740_vm6  ;;  %vm773_vm5 = vcmp.eq.s32.totalorder %v5248_v28, %v6114_v13 }
 0x18a   :  { %vm4629_vm15 = vmpackc.low %vm1124_vm12, %vm1108_vm8  ;;  %vm306_vm8 = vcmp.eq.s32.totalorder %v5240_v27, %v6127_v3  ;;  %vm322_vm12 = vcmp.eq.s32.totalorder %v5248_v28, %v6127_v3 }
 0x18b   :  { %4630 = vmatpush1.bf16.msk.msra.mxu1 %vm4629_vm15, %v4933_v17  ;;  %vm1139_vm0 = vmor %vm307_vm10, %vm755_vm11  ;;  %vm754_vm10 = vcmp.eq.s32.totalorder %v5240_v27, %v6131_v15 }
 0x18c   :  { %vm1155_vm3 = vmor %vm323_vm13, %vm771_vm14  ;;  %vm770_vm13 = vcmp.eq.s32.totalorder %v5248_v28, %v6131_v15 }
 0x18d   :  { %vm4583_vm6 = vmpackc.low %vm1155_vm3, %vm1139_vm0  ;;  %vm308_vm0 = vcmp.eq.s32.totalorder %v5240_v27, %v6147_v4  ;;  %vm324_vm3 = vcmp.eq.s32.totalorder %v5248_v28, %v6147_v4 }
 0x18e   :  { %4584 = vmatprep.subr.msk.bf16.mxu0 %vm4583_vm6, %v4933_v17  ;;  %vm1141_vm7 = vmor %vm309_vm1, %vm757_vm2  ;;  %vm756_vm1 = vcmp.eq.s32.totalorder %v5240_v27, %v6151_v16 }
 0x18f   :  { %vm1157_vm11 = vmor %vm325_vm4, %vm773_vm5  ;;  %vm772_vm4 = vcmp.eq.s32.totalorder %v5248_v28, %v6151_v16 }
 0x190   :  { %vm4631_vm14 = vmpackc.low %vm1157_vm11, %vm1141_vm7  ;;  %vm339_vm7 = vcmp.eq.s32.totalorder %v5282_v29, %v6093_v11  ;;  %vm355_vm11 = vcmp.eq.s32.totalorder %v5290_v30, %v6093_v11 }
 0x191   :  { %4632 = vmatprep.subr.msk.bf16.mxu1 %vm4631_vm14, %v4933_v17  ;;  %vm1138_vm15 = vmor %vm306_vm8, %vm754_vm10  ;;  %vm787_vm8 = vcmp.eq.s32.totalorder %v5282_v29, %v6097_v12 }
 0x192   :  { %vm1154_vm2 = vmor %vm322_vm12, %vm770_vm13  ;;  %vm803_vm12 = vcmp.eq.s32.totalorder %v5290_v30, %v6097_v12 }
 0x193   :  { %vm4585_vm5 = vmpackc.low %vm1154_vm2, %vm1138_vm15  ;;  %vm341_vm15 = vcmp.eq.s32.totalorder %v5282_v29, %v6110_v2  ;;  %vm357_vm2 = vcmp.eq.s32.totalorder %v5290_v30, %v6110_v2 }
 0x194   :  { %4586 = vmatpush1.bf16.msk.msra.mxu0 %vm4585_vm5, %v4933_v17  ;;  %vm1140_vm6 = vmor %vm308_vm0, %vm756_vm1  ;;  %vm789_vm0 = vcmp.eq.s32.totalorder %v5282_v29, %v6114_v13 }
 0x195   :  { %vm1156_vm10 = vmor %vm324_vm3, %vm772_vm4  ;;  %vm805_vm3 = vcmp.eq.s32.totalorder %v5290_v30, %v6114_v13 }
 0x196   :  { %vm4633_vm13 = vmpackc.low %vm1156_vm10, %vm1140_vm6  ;;  %vm338_vm6 = vcmp.eq.s32.totalorder %v5282_v29, %v6127_v3  ;;  %vm354_vm10 = vcmp.eq.s32.totalorder %v5290_v30, %v6127_v3 }
 0x197   :  { %4634 = vmatpush1.bf16.msk.msra.mxu1 %vm4633_vm13, %v4933_v17  ;;  %vm1171_vm14 = vmor %vm339_vm7, %vm787_vm8  ;;  %vm786_vm7 = vcmp.eq.s32.totalorder %v5282_v29, %v6131_v15 }
 0x198   :  { %vm1187_vm1 = vmor %vm355_vm11, %vm803_vm12  ;;  %vm802_vm11 = vcmp.eq.s32.totalorder %v5290_v30, %v6131_v15 }
 0x199   :  { %vm4587_vm4 = vmpackc.low %vm1187_vm1, %vm1171_vm14  ;;  %vm340_vm14 = vcmp.eq.s32.totalorder %v5282_v29, %v6147_v4  ;;  %vm356_vm1 = vcmp.eq.s32.totalorder %v5290_v30, %v6147_v4 }
 0x19a   :  { %4588 = vmatprep.subr.msk.bf16.mxu0 %vm4587_vm4, %v4933_v17  ;;  %vm1173_vm5 = vmor %vm341_vm15, %vm789_vm0  ;;  %vm788_vm15 = vcmp.eq.s32.totalorder %v5282_v29, %v6151_v16 }
 0x19b   :  { %vm1189_vm8 = vmor %vm357_vm2, %vm805_vm3  ;;  %vm804_vm2 = vcmp.eq.s32.totalorder %v5290_v30, %v6151_v16 }
 0x19c   :  { %vm4635_vm12 = vmpackc.low %vm1189_vm8, %vm1173_vm5  ;;  %vm371_vm5 = vcmp.eq.s32.totalorder %v5324_v31, %v6093_v11  ;;  %vm387_vm8 = vcmp.eq.s32.totalorder %v5332_v32, %v6093_v11 }
 0x19d   :  { %4636 = vmatprep.subr.msk.bf16.mxu1 %vm4635_vm12, %v4933_v17  ;;  %vm1170_vm13 = vmor %vm338_vm6, %vm786_vm7  ;;  %vm819_vm6 = vcmp.eq.s32.totalorder %v5324_v31, %v6097_v12 }
 0x19e   :  { %vm1186_vm0 = vmor %vm354_vm10, %vm802_vm11  ;;  %vm835_vm10 = vcmp.eq.s32.totalorder %v5332_v32, %v6097_v12 }
 0x19f   :  { %vm4589_vm3 = vmpackc.low %vm1186_vm0, %vm1170_vm13  ;;  %vm373_vm13 = vcmp.eq.s32.totalorder %v5324_v31, %v6110_v2  ;;  %vm389_vm0 = vcmp.eq.s32.totalorder %v5332_v32, %v6110_v2 }
 0x1a0   :  { %4590 = vmatpush1.bf16.msk.msra.mxu0 %vm4589_vm3, %v4933_v17  ;;  %vm1172_vm4 = vmor %vm340_vm14, %vm788_vm15  ;;  %vm821_vm14 = vcmp.eq.s32.totalorder %v5324_v31, %v6114_v13 }
 0x1a1   :  { %vm1188_vm7 = vmor %vm356_vm1, %vm804_vm2  ;;  %vm837_vm1 = vcmp.eq.s32.totalorder %v5332_v32, %v6114_v13 }
 0x1a2   :  { %vm4637_vm11 = vmpackc.low %vm1188_vm7, %vm1172_vm4  ;;  %vm370_vm4 = vcmp.eq.s32.totalorder %v5324_v31, %v6127_v3  ;;  %vm386_vm7 = vcmp.eq.s32.totalorder %v5332_v32, %v6127_v3 }
 0x1a3   :  { %4638 = vmatpush1.bf16.msk.msra.mxu1 %vm4637_vm11, %v4933_v17  ;;  %vm1203_vm12 = vmor %vm371_vm5, %vm819_vm6  ;;  %vm818_vm5 = vcmp.eq.s32.totalorder %v5324_v31, %v6131_v15 }
 0x1a4   :  { %vm1219_vm15 = vmor %vm387_vm8, %vm835_vm10  ;;  %vm834_vm8 = vcmp.eq.s32.totalorder %v5332_v32, %v6131_v15 }
 0x1a5   :  { %vm4591_vm2 = vmpackc.low %vm1219_vm15, %vm1203_vm12  ;;  %vm372_vm12 = vcmp.eq.s32.totalorder %v5324_v31, %v6147_v4  ;;  %vm388_vm15 = vcmp.eq.s32.totalorder %v5332_v32, %v6147_v4 }
 0x1a6   :  { %4592 = vmatprep.subr.msk.bf16.mxu0 %vm4591_vm2, %v4933_v17  ;;  %vm1205_vm3 = vmor %vm373_vm13, %vm821_vm14  ;;  %vm820_vm13 = vcmp.eq.s32.totalorder %v5324_v31, %v6151_v16 }
 0x1a7   :  { %vm1221_vm6 = vmor %vm389_vm0, %vm837_vm1  ;;  %vm836_vm0 = vcmp.eq.s32.totalorder %v5332_v32, %v6151_v16 }
 0x1a8   :  { %vm4639_vm10 = vmpackc.low %vm1221_vm6, %vm1205_vm3  ;;  %vm403_vm3 = vcmp.eq.s32.totalorder %v5366_v33, %v6093_v11  ;;  %vm419_vm6 = vcmp.eq.s32.totalorder %v5374_v34, %v6093_v11 }
 0x1a9   :  { %4640 = vmatprep.subr.msk.bf16.mxu1 %vm4639_vm10, %v4933_v17  ;;  %vm1202_vm11 = vmor %vm370_vm4, %vm818_vm5  ;;  %vm851_vm4 = vcmp.eq.s32.totalorder %v5366_v33, %v6097_v12 }
 0x1aa   :  { %vm1218_vm14 = vmor %vm386_vm7, %vm834_vm8  ;;  %vm867_vm7 = vcmp.eq.s32.totalorder %v5374_v34, %v6097_v12 }
 0x1ab   :  { %vm4593_vm1 = vmpackc.low %vm1218_vm14, %vm1202_vm11  ;;  %vm405_vm11 = vcmp.eq.s32.totalorder %v5366_v33, %v6110_v2  ;;  %vm421_vm14 = vcmp.eq.s32.totalorder %v5374_v34, %v6110_v2 }
 0x1ac   :  { %4594 = vmatpush1.bf16.msk.msra.mxu0 %vm4593_vm1, %v4933_v17  ;;  %vm1204_vm2 = vmor %vm372_vm12, %vm820_vm13  ;;  %vm853_vm12 = vcmp.eq.s32.totalorder %v5366_v33, %v6114_v13 }
 0x1ad   :  { %vm1220_vm5 = vmor %vm388_vm15, %vm836_vm0  ;;  %vm869_vm15 = vcmp.eq.s32.totalorder %v5374_v34, %v6114_v13 }
 0x1ae   :  { %vm4641_vm8 = vmpackc.low %vm1220_vm5, %vm1204_vm2  ;;  %vm402_vm2 = vcmp.eq.s32.totalorder %v5366_v33, %v6127_v3  ;;  %vm418_vm5 = vcmp.eq.s32.totalorder %v5374_v34, %v6127_v3 }
 0x1af   :  { %4642 = vmatpush1.bf16.msk.msra.mxu1 %vm4641_vm8, %v4933_v17  ;;  %vm1235_vm10 = vmor %vm403_vm3, %vm851_vm4  ;;  %vm850_vm3 = vcmp.eq.s32.totalorder %v5366_v33, %v6131_v15 }
 0x1b0   :  { %vm1251_vm13 = vmor %vm419_vm6, %vm867_vm7  ;;  %vm866_vm6 = vcmp.eq.s32.totalorder %v5374_v34, %v6131_v15 }
 0x1b1   :  { %vm4595_vm0 = vmpackc.low %vm1251_vm13, %vm1235_vm10  ;;  %vm404_vm10 = vcmp.eq.s32.totalorder %v5366_v33, %v6147_v4  ;;  %vm420_vm13 = vcmp.eq.s32.totalorder %v5374_v34, %v6147_v4 }
 0x1b2   :  { %4596 = vmatprep.subr.msk.bf16.mxu0 %vm4595_vm0, %v4933_v17  ;;  %vm1237_vm1 = vmor %vm405_vm11, %vm853_vm12  ;;  %vm852_vm11 = vcmp.eq.s32.totalorder %v5366_v33, %v6151_v16 }
 0x1b3   :  { %vm1253_vm4 = vmor %vm421_vm14, %vm869_vm15  ;;  %vm868_vm14 = vcmp.eq.s32.totalorder %v5374_v34, %v6151_v16 }
 0x1b4   :  { %vm4643_vm7 = vmpackc.low %vm1253_vm4, %vm1237_vm1  ;;  %vm435_vm1 = vcmp.eq.s32.totalorder %v5408_v35, %v6093_v11  ;;  %vm451_vm4 = vcmp.eq.s32.totalorder %v5416_v36, %v6093_v11 }
 0x1b5   :  { %4644 = vmatprep.subr.msk.bf16.mxu1 %vm4643_vm7, %v4933_v17  ;;  %vm1234_vm8 = vmor %vm402_vm2, %vm850_vm3  ;;  %vm883_vm2 = vcmp.eq.s32.totalorder %v5408_v35, %v6097_v12 }
 0x1b6   :  { %vm1250_vm12 = vmor %vm418_vm5, %vm866_vm6  ;;  %vm899_vm5 = vcmp.eq.s32.totalorder %v5416_v36, %v6097_v12 }
 0x1b7   :  { %vm4597_vm15 = vmpackc.low %vm1250_vm12, %vm1234_vm8  ;;  %vm437_vm8 = vcmp.eq.s32.totalorder %v5408_v35, %v6110_v2  ;;  %vm453_vm12 = vcmp.eq.s32.totalorder %v5416_v36, %v6110_v2 }
 0x1b8   :  { %4598 = vmatpush1.bf16.msk.msra.mxu0 %vm4597_vm15, %v4933_v17  ;;  %vm1236_vm0 = vmor %vm404_vm10, %vm852_vm11  ;;  %vm885_vm10 = vcmp.eq.s32.totalorder %v5408_v35, %v6114_v13 }
 0x1b9   :  { %vm1252_vm3 = vmor %vm420_vm13, %vm868_vm14  ;;  %vm901_vm13 = vcmp.eq.s32.totalorder %v5416_v36, %v6114_v13 }
 0x1ba   :  { %vm4645_vm6 = vmpackc.low %vm1252_vm3, %vm1236_vm0  ;;  %vm434_vm0 = vcmp.eq.s32.totalorder %v5408_v35, %v6127_v3  ;;  %vm450_vm3 = vcmp.eq.s32.totalorder %v5416_v36, %v6127_v3 }
 0x1bb   :  { %4646 = vmatpush1.bf16.msk.msra.mxu1 %vm4645_vm6, %v4933_v17  ;;  %vm1267_vm7 = vmor %vm435_vm1, %vm883_vm2  ;;  %vm882_vm1 = vcmp.eq.s32.totalorder %v5408_v35, %v6131_v15 }
 0x1bc   :  { %vm1283_vm11 = vmor %vm451_vm4, %vm899_vm5  ;;  %vm898_vm4 = vcmp.eq.s32.totalorder %v5416_v36, %v6131_v15 }
 0x1bd   :  { %vm4599_vm14 = vmpackc.low %vm1283_vm11, %vm1267_vm7  ;;  %vm436_vm7 = vcmp.eq.s32.totalorder %v5408_v35, %v6147_v4  ;;  %vm452_vm11 = vcmp.eq.s32.totalorder %v5416_v36, %v6147_v4 }
 0x1be   :  { %4600 = vmatprep.subr.msk.bf16.mxu0 %vm4599_vm14, %v4933_v17  ;;  %vm1269_vm15 = vmor %vm437_vm8, %vm885_vm10  ;;  %vm884_vm8 = vcmp.eq.s32.totalorder %v5408_v35, %v6151_v16 }
 0x1bf   :  { %vm1285_vm2 = vmor %vm453_vm12, %vm901_vm13  ;;  %vm900_vm12 = vcmp.eq.s32.totalorder %v5416_v36, %v6151_v16 }
 0x1c0   :  { %vm4647_vm5 = vmpackc.low %vm1285_vm2, %vm1269_vm15  ;;  %vm467_vm15 = vcmp.eq.s32.totalorder %v5450_v37, %v6093_v11  ;;  %vm483_vm2 = vcmp.eq.s32.totalorder %v5458_v38, %v6093_v11 }
 0x1c1   :  { %4648 = vmatprep.subr.msk.bf16.mxu1 %vm4647_vm5, %v4933_v17  ;;  %vm1266_vm6 = vmor %vm434_vm0, %vm882_vm1  ;;  %vm915_vm0 = vcmp.eq.s32.totalorder %v5450_v37, %v6097_v12 }
 0x1c2   :  { %vm1282_vm10 = vmor %vm450_vm3, %vm898_vm4  ;;  %vm931_vm3 = vcmp.eq.s32.totalorder %v5458_v38, %v6097_v12 }
 0x1c3   :  { %vm4601_vm13 = vmpackc.low %vm1282_vm10, %vm1266_vm6  ;;  %vm469_vm6 = vcmp.eq.s32.totalorder %v5450_v37, %v6110_v2  ;;  %vm485_vm10 = vcmp.eq.s32.totalorder %v5458_v38, %v6110_v2 }
 0x1c4   :  { %4602 = vmatpush1.bf16.msk.msra.mxu0 %vm4601_vm13, %v4933_v17  ;;  %vm1268_vm14 = vmor %vm436_vm7, %vm884_vm8  ;;  %vm917_vm7 = vcmp.eq.s32.totalorder %v5450_v37, %v6114_v13 }
 0x1c5   :  { %vm1284_vm1 = vmor %vm452_vm11, %vm900_vm12  ;;  %vm933_vm11 = vcmp.eq.s32.totalorder %v5458_v38, %v6114_v13 }
 0x1c6   :  { %vm4649_vm4 = vmpackc.low %vm1284_vm1, %vm1268_vm14  ;;  %vm466_vm14 = vcmp.eq.s32.totalorder %v5450_v37, %v6127_v3  ;;  %vm482_vm1 = vcmp.eq.s32.totalorder %v5458_v38, %v6127_v3 }
 0x1c7   :  { %4650 = vmatpush1.bf16.msk.msra.mxu1 %vm4649_vm4, %v4933_v17  ;;  %vm1299_vm5 = vmor %vm467_vm15, %vm915_vm0  ;;  %vm914_vm15 = vcmp.eq.s32.totalorder %v5450_v37, %v6131_v15 }
 0x1c8   :  { %vm1315_vm8 = vmor %vm483_vm2, %vm931_vm3  ;;  %vm930_vm2 = vcmp.eq.s32.totalorder %v5458_v38, %v6131_v15 }
 0x1c9   :  { %vm4603_vm12 = vmpackc.low %vm1315_vm8, %vm1299_vm5  ;;  %vm468_vm5 = vcmp.eq.s32.totalorder %v5450_v37, %v6147_v4  ;;  %vm484_vm8 = vcmp.eq.s32.totalorder %v5458_v38, %v6147_v4 }
 0x1ca   :  { %4604 = vmatprep.subr.msk.bf16.mxu0 %vm4603_vm12, %v4933_v17  ;;  %vm1301_vm13 = vmor %vm469_vm6, %vm917_vm7  ;;  %vm916_vm6 = vcmp.eq.s32.totalorder %v5450_v37, %v6151_v16 }
 0x1cb   :  { %vm1317_vm0 = vmor %vm485_vm10, %vm933_vm11  ;;  %vm932_vm10 = vcmp.eq.s32.totalorder %v5458_v38, %v6151_v16 }
 0x1cc   :  { %vm4651_vm3 = vmpackc.low %vm1317_vm0, %vm1301_vm13  ;;  %vm499_vm13 = vcmp.eq.s32.totalorder %v5492_v39, %v6093_v11  ;;  %vm515_vm0 = vcmp.eq.s32.totalorder %v5500_v40, %v6093_v11 }
 0x1cd   :  { %4652 = vmatprep.subr.msk.bf16.mxu1 %vm4651_vm3, %v4933_v17  ;;  %vm1298_vm4 = vmor %vm466_vm14, %vm914_vm15  ;;  %vm947_vm14 = vcmp.eq.s32.totalorder %v5492_v39, %v6097_v12 }
 0x1ce   :  { %vm1314_vm7 = vmor %vm482_vm1, %vm930_vm2  ;;  %vm963_vm1 = vcmp.eq.s32.totalorder %v5500_v40, %v6097_v12 }
 0x1cf   :  { %vm4605_vm11 = vmpackc.low %vm1314_vm7, %vm1298_vm4  ;;  %vm501_vm4 = vcmp.eq.s32.totalorder %v5492_v39, %v6110_v2  ;;  %vm517_vm7 = vcmp.eq.s32.totalorder %v5500_v40, %v6110_v2 }
 0x1d0   :  { %4606 = vmatpush1.bf16.msk.msra.mxu0 %vm4605_vm11, %v4933_v17  ;;  %vm1300_vm12 = vmor %vm468_vm5, %vm916_vm6  ;;  %vm949_vm5 = vcmp.eq.s32.totalorder %v5492_v39, %v6114_v13 }
 0x1d1   :  { %vm1316_vm15 = vmor %vm484_vm8, %vm932_vm10  ;;  %vm965_vm8 = vcmp.eq.s32.totalorder %v5500_v40, %v6114_v13 }
 0x1d2   :  { %vm4653_vm2 = vmpackc.low %vm1316_vm15, %vm1300_vm12  ;;  %vm498_vm12 = vcmp.eq.s32.totalorder %v5492_v39, %v6127_v3  ;;  %vm514_vm15 = vcmp.eq.s32.totalorder %v5500_v40, %v6127_v3 }
 0x1d3   :  { %4654 = vmatpush1.bf16.msk.msra.mxu1 %vm4653_vm2, %v4933_v17  ;;  %vm1331_vm3 = vmor %vm499_vm13, %vm947_vm14  ;;  %vm946_vm13 = vcmp.eq.s32.totalorder %v5492_v39, %v6131_v15 }
 0x1d4   :  { %vm1347_vm6 = vmor %vm515_vm0, %vm963_vm1  ;;  %vm962_vm0 = vcmp.eq.s32.totalorder %v5500_v40, %v6131_v15 }
 0x1d5   :  { %vm4607_vm10 = vmpackc.low %vm1347_vm6, %vm1331_vm3  ;;  %vm500_vm3 = vcmp.eq.s32.totalorder %v5492_v39, %v6147_v4  ;;  %vm516_vm6 = vcmp.eq.s32.totalorder %v5500_v40, %v6147_v4 }
 0x1d6   :  { %4608 = vmatprep.subr.msk.bf16.mxu0 %vm4607_vm10, %v4933_v17  ;;  %vm1333_vm11 = vmor %vm501_vm4, %vm949_vm5  ;;  %vm948_vm4 = vcmp.eq.s32.totalorder %v5492_v39, %v6151_v16 }
 0x1d7   :  { %vm1349_vm14 = vmor %vm517_vm7, %vm965_vm8  ;;  %vm964_vm7 = vcmp.eq.s32.totalorder %v5500_v40, %v6151_v16 }
 0x1d8   :  { %vm4655_vm1 = vmpackc.low %vm1349_vm14, %vm1333_vm11  ;;  %vm151_vm11 = vcmp.eq.s32.totalorder %v4987_v1, %v6607_v24  ;;  %vm167_vm14 = vcmp.eq.s32.totalorder %v4999_v5, %v6607_v24 }
 0x1d9   :  { %4656 = vmatprep.subr.msk.bf16.mxu1 %vm4655_vm1, %v4933_v17  ;;  %vm1330_vm2 = vmor %vm498_vm12, %vm946_vm13  ;;  %vm599_vm12 = vcmp.eq.s32.totalorder %v4987_v1, %v6611_v43 }
 0x1da   :  { %vm1346_vm5 = vmor %vm514_vm15, %vm962_vm0  ;;  %vm615_vm15 = vcmp.eq.s32.totalorder %v4999_v5, %v6611_v43 }
 0x1db   :  { %vm4609_vm8 = vmpackc.low %vm1346_vm5, %vm1330_vm2  ;;  %vm153_vm2 = vcmp.eq.s32.totalorder %v4987_v1, %v6624_v41  ;;  %vm169_vm5 = vcmp.eq.s32.totalorder %v4999_v5, %v6624_v41 }
 0x1dc   :  { %4610 = vmatpush1.bf16.msk.msra.mxu0 %vm4609_vm8, %v4933_v17  ;;  %vm1332_vm10 = vmor %vm500_vm3, %vm948_vm4  ;;  %vm601_vm3 = vcmp.eq.s32.totalorder %v4987_v1, %v6628_v44 }
 0x1dd   :  { %vm1348_vm13 = vmor %vm516_vm6, %vm964_vm7  ;;  %vm617_vm6 = vcmp.eq.s32.totalorder %v4999_v5, %v6628_v44 }
 0x1de   :  { %vm4657_vm0 = vmpackc.low %vm1348_vm13, %vm1332_vm10  ;;  %vm150_vm10 = vcmp.eq.s32.totalorder %v4987_v1, %v6641_v42  ;;  %vm166_vm13 = vcmp.eq.s32.totalorder %v4999_v5, %v6641_v42 }
 0x1df   :  { %4658 = vmatpush1.bf16.msk.msra.mxu1 %vm4657_vm0, %v4933_v17  ;;  %2680 = vmatmul.mubr.f32.vlgmr.msra.gmra.mrb[32].mxu0 %v4827_v47  ;;  %vm983_vm1 = vmor %vm151_vm11, %vm599_vm12  ;;  %vm598_vm11 = vcmp.eq.s32.totalorder %v4987_v1, %v6645_v46 }
 0x1e0   :  { %vm999_vm4 = vmor %vm167_vm14, %vm615_vm15  ;;  %4180 = vmatprep.mubr.msk.f32.mxu0 %vm2138_vm9, %v4828_v45  ;;  %vm614_vm14 = vcmp.eq.s32.totalorder %v4999_v5, %v6645_v46 }
 0x1e1   :  { %vm4659_vm7 = vmpackc.low %vm999_vm4, %vm983_vm1  ;;  %vm152_vm1 = vcmp.eq.s32.totalorder %v4987_v1, %v6659_v48  ;;  %vm168_vm4 = vcmp.eq.s32.totalorder %v4999_v5, %v6659_v48 }
 0x1e2   :  { %2793 = vmatmul.mubr.f32.vlgmr.msra.gmra.mrb[32].mxu1 %v4827_v47  ;;  %4660 = vmatprep.subr.msk.bf16.mxu0 %vm4659_vm7, %v4933_v17  ;;  %vm985_vm8 = vmor %vm153_vm2, %vm601_vm3  ;;  %vm600_vm2 = vcmp.eq.s32.totalorder %v4987_v1, %v6663_v50 }
 0x1e3   :  { %vm1001_vm12 = vmor %vm169_vm5, %vm617_vm6  ;;  %4236 = vmatprep.mubr.msk.f32.mxu1 %vm2138_vm9, %v4828_v45  ;;  %2686 = vmatmul.mubr.f32.gmra.mrb[34].mxu0 %v4829_v49  ;;  %vm616_vm5 = vcmp.eq.s32.totalorder %v4999_v5, %v6663_v50  ;;  %v4833_v5 = vld [vmem:[#allocation6 + $0x30] sm:$0xff] }
 0x1e4   :  { %vm4707_vm15 = vmpackc.low %vm1001_vm12, %vm985_vm8  ;;  %4181 = vmatprep.mubr.msk.f32.mxu0 %vm2138_vm9, %v4830_v51  ;;  %vm183_vm8 = vcmp.eq.s32.totalorder %v5066_v18, %v6607_v24  ;;  %vm199_vm12 = vcmp.eq.s32.totalorder %v5074_v19, %v6607_v24 }
 0x1e5   :  { %4708 = vmatprep.subr.msk.bf16.mxu1 %vm4707_vm15, %v4933_v17  ;;  %vm982_vm0 = vmor %vm150_vm10, %vm598_vm11  ;;  %vm631_vm10 = vcmp.eq.s32.totalorder %v5066_v18, %v6611_v43 }
 0x1e6   :  { %vm998_vm3 = vmor %vm166_vm13, %vm614_vm14  ;;  %2799 = vmatmul.mubr.f32.gmra.mrb[34].mxu1 %v4829_v49  ;;  %vm647_vm13 = vcmp.eq.s32.totalorder %v5074_v19, %v6611_v43 }
 0x1e7   :  { %vm4661_vm6 = vmpackc.low %vm998_vm3, %vm982_vm0  ;;  %4237 = vmatprep.mubr.msk.f32.mxu1 %vm2138_vm9, %v4830_v51  ;;  %2692 = vmatmul.mubr.f32.gmra.mrb[36].mxu0 %v4831_v52  ;;  %vm185_vm0 = vcmp.eq.s32.totalorder %v5066_v18, %v6624_v41  ;;  %vm201_vm3 = vcmp.eq.s32.totalorder %v5074_v19, %v6624_v41 }
 0x1e8   :  { %4662 = vmatpush1.bf16.msk.msra.mxu0 %vm4661_vm6, %v4933_v17  ;;  %vm984_vm7 = vmor %vm152_vm1, %vm600_vm2  ;;  %4182 = vmatprep.mubr.msk.f32.mxu0 %vm2138_vm9, %v4832_v53  ;;  %vm633_vm1 = vcmp.eq.s32.totalorder %v5066_v18, %v6628_v44 }
 0x1e9   :  { %vm1000_vm11 = vmor %vm168_vm4, %vm616_vm5  ;;  %vm649_vm4 = vcmp.eq.s32.totalorder %v5074_v19, %v6628_v44 }
 0x1ea   :  { %vm4709_vm14 = vmpackc.low %vm1000_vm11, %vm984_vm7  ;;  %2805 = vmatmul.mubr.f32.gmra.mrb[36].mxu1 %v4831_v52  ;;  %vm182_vm7 = vcmp.eq.s32.totalorder %v5066_v18, %v6641_v42  ;;  %vm198_vm11 = vcmp.eq.s32.totalorder %v5074_v19, %v6641_v42 }
 0x1eb   :  { %4710 = vmatpush1.bf16.msk.msra.mxu1 %vm4709_vm14, %v4933_v17  ;;  %vm1015_vm15 = vmor %vm183_vm8, %vm631_vm10  ;;  %4238 = vmatprep.mubr.msk.f32.mxu1 %vm2138_vm9, %v4832_v53  ;;  %vm630_vm8 = vcmp.eq.s32.totalorder %v5066_v18, %v6645_v46 }
 0x1ec   :  { %vm1031_vm2 = vmor %vm199_vm12, %vm647_vm13  ;;  %2698 = vmatmul.mubr.f32.gmra.mrb[38].mxu0 %v4833_v5  ;;  %vm646_vm12 = vcmp.eq.s32.totalorder %v5074_v19, %v6645_v46 }
 0x1ed   :  { %vm4663_vm5 = vmpackc.low %vm1031_vm2, %vm1015_vm15  ;;  %4183 = vmatprep.mubr.msk.f32.mxu0 %vm2138_vm9, %v4834_v54  ;;  %vm184_vm15 = vcmp.eq.s32.totalorder %v5066_v18, %v6659_v48  ;;  %vm200_vm2 = vcmp.eq.s32.totalorder %v5074_v19, %v6659_v48 }
 0x1ee   :  { %4664 = vmatprep.subr.msk.bf16.mxu0 %vm4663_vm5, %v4933_v17  ;;  %vm1017_vm6 = vmor %vm185_vm0, %vm633_vm1  ;;  %2811 = vmatmul.mubr.f32.gmra.mrb[38].mxu1 %v4833_v5  ;;  %vm632_vm0 = vcmp.eq.s32.totalorder %v5066_v18, %v6663_v50  ;;  %v4837_v18 = vld [vmem:[#allocation6 + $0x50] sm:$0xff] }
 0x1ef   :  { %vm1033_vm10 = vmor %vm201_vm3, %vm649_vm4  ;;  %4239 = vmatprep.mubr.msk.f32.mxu1 %vm2138_vm9, %v4834_v54  ;;  %vm648_vm3 = vcmp.eq.s32.totalorder %v5074_v19, %v6663_v50  ;;  %v4838_v19 = vld [vmem:[#allocation6 + $0x68] sm:$0xff] }
 0x1f0   :  { %vm4711_vm13 = vmpackc.low %vm1033_vm10, %vm1017_vm6  ;;  %2704 = vmatmul.mubr.f32.gmra.mrb[40].mxu0 %v4835_v55  ;;  %vm215_vm6 = vcmp.eq.s32.totalorder %v5108_v20, %v6607_v24  ;;  %vm231_vm10 = vcmp.eq.s32.totalorder %v5116_v21, %v6607_v24 }
 0x1f1   :  { %4712 = vmatprep.subr.msk.bf16.mxu1 %vm4711_vm13, %v4933_v17  ;;  %vm1014_vm14 = vmor %vm182_vm7, %vm630_vm8  ;;  %4184 = vmatprep.mubr.msk.f32.mxu0 %vm2138_vm9, %v4836_v56  ;;  %vm663_vm7 = vcmp.eq.s32.totalorder %v5108_v20, %v6611_v43 }
 0x1f2   :  { %vm1030_vm1 = vmor %vm198_vm11, %vm646_vm12  ;;  %2817 = vmatmul.mubr.f32.gmra.mrb[40].mxu1 %v4835_v55  ;;  %vm679_vm11 = vcmp.eq.s32.totalorder %v5116_v21, %v6611_v43 }
 0x1f3   :  { %vm4665_vm4 = vmpackc.low %vm1030_vm1, %vm1014_vm14  ;;  %4240 = vmatprep.mubr.msk.f32.mxu1 %vm2138_vm9, %v4836_v56  ;;  %vm217_vm14 = vcmp.eq.s32.totalorder %v5108_v20, %v6624_v41  ;;  %vm233_vm1 = vcmp.eq.s32.totalorder %v5116_v21, %v6624_v41 }
 0x1f4   :  { %4666 = vmatpush1.bf16.msk.msra.mxu0 %vm4665_vm4, %v4933_v17  ;;  %vm1016_vm5 = vmor %vm184_vm15, %vm632_vm0  ;;  %vm665_vm15 = vcmp.eq.s32.totalorder %v5108_v20, %v6628_v44 }
 0x1f5   :  { %vm1032_vm8 = vmor %vm200_vm2, %vm648_vm3  ;;  %2710 = vmatmul.mubr.f32.gmra.mrb[42].mxu0 %v4837_v18  ;;  %vm681_vm2 = vcmp.eq.s32.totalorder %v5116_v21, %v6628_v44 }
 0x1f6   :  { %vm4713_vm12 = vmpackc.low %vm1032_vm8, %vm1016_vm5  ;;  %2823 = vmatmul.mubr.f32.gmra.mrb[42].mxu1 %v4837_v18  ;;  %4185 = vmatprep.mubr.msk.f32.mxu0 %vm2138_vm9, %v4838_v19  ;;  %vm214_vm5 = vcmp.eq.s32.totalorder %v5108_v20, %v6641_v42  ;;  %vm230_vm8 = vcmp.eq.s32.totalorder %v5116_v21, %v6641_v42 }
 0x1f7   :  { %4714 = vmatpush1.bf16.msk.msra.mxu1 %vm4713_vm12, %v4933_v17  ;;  %vm1047_vm13 = vmor %vm215_vm6, %vm663_vm7  ;;  %4241 = vmatprep.mubr.msk.f32.mxu1 %vm2138_vm9, %v4838_v19  ;;  %vm662_vm6 = vcmp.eq.s32.totalorder %v5108_v20, %v6645_v46 }
 0x1f8   :  { %vm1063_vm0 = vmor %vm231_vm10, %vm679_vm11  ;;  %vm678_vm10 = vcmp.eq.s32.totalorder %v5116_v21, %v6645_v46 }
 0x1f9   :  { %vm4667_vm3 = vmpackc.low %vm1063_vm0, %vm1047_vm13  ;;  %2716 = vmatmul.mubr.f32.gmra.mrb[44].mxu0 %v4839_v57  ;;  %vm216_vm13 = vcmp.eq.s32.totalorder %v5108_v20, %v6659_v48  ;;  %vm232_vm0 = vcmp.eq.s32.totalorder %v5116_v21, %v6659_v48 }
 0x1fa   :  { %4668 = vmatprep.subr.msk.bf16.mxu0 %vm4667_vm3, %v4933_v17  ;;  %vm1049_vm4 = vmor %vm217_vm14, %vm665_vm15  ;;  %2829 = vmatmul.mubr.f32.gmra.mrb[44].mxu1 %v4839_v57  ;;  %vm664_vm14 = vcmp.eq.s32.totalorder %v5108_v20, %v6663_v50  ;;  %v2229_v20 = vpop.f32.mrb[0].mxu0 }
 0x1fb   :  { %vm1065_vm7 = vmor %vm233_vm1, %vm681_vm2  ;;  %4186 = vmatprep.mubr.msk.f32.mxu0 %vm2138_vm9, %v4840_v58  ;;  %4242 = vmatprep.mubr.msk.f32.mxu1 %vm2138_vm9, %v4840_v58  ;;  %vm680_vm1 = vcmp.eq.s32.totalorder %v5116_v21, %v6663_v50  ;;  %v2342_v21 = vpop.f32.mrb[0].mxu1 }
 0x1fc   :  { %vm4715_vm11 = vmpackc.low %vm1065_vm7, %vm1049_vm4  ;;  %vm247_vm4 = vcmp.eq.s32.totalorder %v5150_v22, %v6607_v24  ;;  %vm263_vm7 = vcmp.eq.s32.totalorder %v5158_v23, %v6607_v24 }
 0x1fd   :  { %4716 = vmatprep.subr.msk.bf16.mxu1 %vm4715_vm11, %v4933_v17  ;;  %vm1046_vm12 = vmor %vm214_vm5, %vm662_vm6  ;;  %2722 = vmatmul.mubr.f32.gmra.mrb[46].mxu0 %v4841_v59  ;;  %vm695_vm5 = vcmp.eq.s32.totalorder %v5150_v22, %v6611_v43 }
 0x1fe   :  { %vm1062_vm15 = vmor %vm230_vm8, %vm678_vm10  ;;  %2835 = vmatmul.mubr.f32.gmra.mrb[46].mxu1 %v4841_v59  ;;  %4291 = vmatprep.mubr.msk.f32.mxu0 %vm2138_vm9, %v6284_v14  ;;  %vm711_vm8 = vcmp.eq.s32.totalorder %v5158_v23, %v6611_v43 }
 0x1ff   :  { %vm4669_vm2 = vmpackc.low %vm1062_vm15, %vm1046_vm12  ;;  %4347 = vmatprep.mubr.msk.f32.mxu1 %vm2138_vm9, %v6284_v14  ;;  %vm249_vm12 = vcmp.eq.s32.totalorder %v5150_v22, %v6624_v41  ;;  %vm265_vm15 = vcmp.eq.s32.totalorder %v5158_v23, %v6624_v41 }
 0x200   :  { %4670 = vmatpush1.bf16.msk.msra.mxu0 %vm4669_vm2, %v4933_v17  ;;  %vm1048_vm3 = vmor %vm216_vm13, %vm664_vm14  ;;  %vm697_vm13 = vcmp.eq.s32.totalorder %v5150_v22, %v6628_v44 }
 0x201   :  { %vm1064_vm6 = vmor %vm232_vm0, %vm680_vm1  ;;  %vm713_vm0 = vcmp.eq.s32.totalorder %v5158_v23, %v6628_v44 }
 0x202   :  { %vm4717_vm10 = vmpackc.low %vm1064_vm6, %vm1048_vm3  ;;  %vm246_vm3 = vcmp.eq.s32.totalorder %v5150_v22, %v6641_v42  ;;  %vm262_vm6 = vcmp.eq.s32.totalorder %v5158_v23, %v6641_v42 }
 0x203   :  { %4718 = vmatpush1.bf16.msk.msra.mxu1 %vm4717_vm10, %v4933_v17  ;;  %vm1079_vm11 = vmor %vm247_vm4, %vm695_vm5  ;;  %vm694_vm4 = vcmp.eq.s32.totalorder %v5150_v22, %v6645_v46 }
 0x204   :  { %vm1095_vm14 = vmor %vm263_vm7, %vm711_vm8  ;;  %vm710_vm7 = vcmp.eq.s32.totalorder %v5158_v23, %v6645_v46 }
 0x205   :  { %vm4671_vm1 = vmpackc.low %vm1095_vm14, %vm1079_vm11  ;;  %vm248_vm11 = vcmp.eq.s32.totalorder %v5150_v22, %v6659_v48  ;;  %vm264_vm14 = vcmp.eq.s32.totalorder %v5158_v23, %v6659_v48 }
 0x206   :  { %4672 = vmatprep.subr.msk.bf16.mxu0 %vm4671_vm1, %v4933_v17  ;;  %vm1081_vm2 = vmor %vm249_vm12, %vm697_vm13  ;;  %vm696_vm12 = vcmp.eq.s32.totalorder %v5150_v22, %v6663_v50  ;;  %v2231_v22 = vpop.f32.mrb[1].mxu0 }
 0x207   :  { %vm1097_vm5 = vmor %vm265_vm15, %vm713_vm0  ;;  %vm712_vm15 = vcmp.eq.s32.totalorder %v5158_v23, %v6663_v50  ;;  %v2344_v23 = vpop.f32.mrb[1].mxu1  ;;  %v2235_v60 = vpop.f32.mrb[2].mxu0 }
 0x208   :  { %vm4719_vm8 = vmpackc.low %vm1097_vm5, %vm1081_vm2  ;;  %vm279_vm2 = vcmp.eq.s32.totalorder %v5194_v25, %v6607_v24  ;;  %vm295_vm5 = vcmp.eq.s32.totalorder %v5202_v26, %v6607_v24  ;;  %v2348_v61 = vpop.f32.mrb[2].mxu1  ;;  %v2237_v62 = vpop.f32.mrb[3].mxu0 }
 0x209   :  { %4720 = vmatprep.subr.msk.bf16.mxu1 %vm4719_vm8, %v4933_v17  ;;  %vm1078_vm10 = vmor %vm246_vm3, %vm694_vm4  ;;  %vm727_vm3 = vcmp.eq.s32.totalorder %v5194_v25, %v6611_v43  ;;  %v2350_v63 = vpop.f32.mrb[3].mxu1  ;;  %v2241_v0 = vpop.f32.mrb[4].mxu0 }
 0x20a   :  { %vm1094_vm13 = vmor %vm262_vm6, %vm710_vm7  ;;  %vm743_vm6 = vcmp.eq.s32.totalorder %v5202_v26, %v6611_v43  ;;  %v2354_v6 = vpop.f32.mrb[4].mxu1  ;;  %v2243_v7 = vpop.f32.mrb[5].mxu0 }
 0x20b   :  { %vm4673_vm0 = vmpackc.low %vm1094_vm13, %vm1078_vm10  ;;  %vm281_vm10 = vcmp.eq.s32.totalorder %v5194_v25, %v6624_v41  ;;  %vm297_vm13 = vcmp.eq.s32.totalorder %v5202_v26, %v6624_v41  ;;  %v2356_v8 = vpop.f32.mrb[5].mxu1  ;;  %v2247_v9 = vpop.f32.mrb[6].mxu0 }
 0x20c   :  { %4674 = vmatpush1.bf16.msk.msra.mxu0 %vm4673_vm0, %v4933_v17  ;;  %vm1080_vm1 = vmor %vm248_vm11, %vm696_vm12  ;;  %vm729_vm11 = vcmp.eq.s32.totalorder %v5194_v25, %v6628_v44  ;;  %v2360_v10 = vpop.f32.mrb[6].mxu1  ;;  %v6844_v12 = vpop.f32.mrb[7].mxu0 }
 0x20d   :  { %vm1096_vm4 = vmor %vm264_vm14, %vm712_vm15  ;;  %vm745_vm14 = vcmp.eq.s32.totalorder %v5202_v26, %v6628_v44  ;;  %v6846_v2 = vpop.f32.mrb[7].mxu1  ;;  %v2253_v13 = vpop.f32.mrb[8].mxu0 }
 0x20e   :  { %vm4721_vm7 = vmpackc.low %vm1096_vm4, %vm1080_vm1  ;;  %vm278_vm1 = vcmp.eq.s32.totalorder %v5194_v25, %v6641_v42  ;;  %vm294_vm4 = vcmp.eq.s32.totalorder %v5202_v26, %v6641_v42  ;;  %v2366_v3 = vpop.f32.mrb[8].mxu1  ;;  %v3067_v15 = vmul.f32 %v2253_v13, %v2229_v20  ;;  %v2255_v16 = vpop.f32.mrb[9].mxu0 }
 0x20f   :  { %4722 = vmatpush1.bf16.msk.msra.mxu1 %vm4721_vm7, %v4933_v17  ;;  %vm1111_vm8 = vmor %vm279_vm2, %vm727_vm3  ;;  %vm726_vm2 = vcmp.eq.s32.totalorder %v5194_v25, %v6645_v46  ;;  %v3069_v4 = vmul.f32 %v2366_v3, %v2342_v21  ;;  %v2368_v14 = vpop.f32.mrb[9].mxu1  ;;  %v3068_v45 = vmul.f32 %v2255_v16, %v2231_v22  ;;  %v2259_v51 = vpop.f32.mrb[10].mxu0 }
 0x210   :  { %vm1127_vm12 = vmor %vm295_vm5, %vm743_vm6  ;;  %vm742_vm5 = vcmp.eq.s32.totalorder %v5202_v26, %v6645_v46  ;;  %v3070_v49 = vmul.f32 %v2368_v14, %v2344_v23  ;;  %v2372_v52 = vpop.f32.mrb[10].mxu1  ;;  %v2261_v5 = vpop.f32.mrb[11].mxu0 }
 0x211   :  { %vm4675_vm15 = vmpackc.low %vm1127_vm12, %vm1111_vm8  ;;  %vm280_vm8 = vcmp.eq.s32.totalorder %v5194_v25, %v6659_v48  ;;  %vm296_vm12 = vcmp.eq.s32.totalorder %v5202_v26, %v6659_v48  ;;  %v3085_v53 = vmul.f32 %v2372_v52, %v2348_v61  ;;  %v2374_v54 = vpop.f32.mrb[11].mxu1  ;;  %v2265_v56 = vpop.f32.mrb[12].mxu0 }
 0x212   :  { %4676 = vmatprep.subr.msk.bf16.mxu0 %vm4675_vm15, %v4933_v17  ;;  %vm1113_vm0 = vmor %vm281_vm10, %vm729_vm11  ;;  %vm728_vm10 = vcmp.eq.s32.totalorder %v5194_v25, %v6663_v50  ;;  %vm327_vm15 = vcmp.eq.s32.totalorder %v5248_v28, %v6607_v24  ;;  %v3083_v25 = vmul.f32 %v2259_v51, %v2235_v60  ;;  %v3086_v55 = vmul.f32 %v2374_v54, %v2350_v63  ;;  %v2378_v18 = vpop.f32.mrb[12].mxu1  ;;  %v2267_v21 = vpop.f32.mrb[13].mxu0 }
 0x213   :  { %vm1129_vm3 = vmor %vm297_vm13, %vm745_vm14  ;;  %vm744_vm13 = vcmp.eq.s32.totalorder %v5202_v26, %v6663_v50  ;;  %vm311_vm14 = vcmp.eq.s32.totalorder %v5240_v27, %v6607_v24  ;;  %v3084_v26 = vmul.f32 %v2261_v5, %v2237_v62  ;;  %v3149_v58 = vadd.f32 %v3085_v53, %v3069_v4  ;;  %v2380_v22 = vpop.f32.mrb[13].mxu1  ;;  %v2271_v63 = vpop.f32.mrb[14].mxu0 }
 0x214   :  { %vm4723_vm6 = vmpackc.low %vm1129_vm3, %vm1113_vm0  ;;  %v3131_v57 = vadd.f32 %v3083_v25, %v3067_v15  ;;  %v3099_v59 = vmul.f32 %v2265_v56, %v2241_v0  ;;  %v3101_v20 = vmul.f32 %v2378_v18, %v2354_v6  ;;  %v3158_v60 = vadd.f32 %v3086_v55, %v3070_v49  ;;  %v2384_v11 = vpop.f32.mrb[14].mxu1  ;;  %v2273_v15 = vpop.f32.mrb[15].mxu0 }
 0x215   :  { %4724 = vmatprep.subr.msk.bf16.mxu1 %vm4723_vm6, %v4933_v17  ;;  %vm6836_vm7 = vmor %vm278_vm1, %vm726_vm2  ;;  %vm759_vm1 = vcmp.eq.s32.totalorder %v5240_v27, %v6611_v43  ;;  %vm775_vm2 = vcmp.eq.s32.totalorder %v5248_v28, %v6611_v43  ;;  %v3140_v23 = vadd.f32 %v3084_v26, %v3068_v45  ;;  %v3100_v61 = vmul.f32 %v2267_v21, %v2243_v7  ;;  %v2386_v4 = vpop.f32.mrb[15].mxu1 }
 0x216   :  { %vm1126_vm11 = vmor %vm294_vm4, %vm742_vm5  ;;  %vm313_vm4 = vcmp.eq.s32.totalorder %v5240_v27, %v6624_v41  ;;  %vm329_vm5 = vcmp.eq.s32.totalorder %v5248_v28, %v6624_v41  ;;  %v3102_v62 = vmul.f32 %v2380_v22, %v2356_v8  ;;  %v3132_v0 = vadd.f32 %v3131_v57, %v3099_v59 }
 0x217   :  { %vm4677_vm0 = vmpackc.low %vm1126_vm11, %vm6836_vm7  ;;  %vm761_vm7 = vcmp.eq.s32.totalorder %v5240_v27, %v6628_v44  ;;  %vm310_vm11 = vcmp.eq.s32.totalorder %v5240_v27, %v6641_v42  ;;  %v3150_v6 = vadd.f32 %v3149_v58, %v3101_v20  ;;  %v3115_v13 = vmul.f32 %v2271_v63, %v2247_v9 }
 0x218   :  { %4678 = vmatpush1.bf16.msk.msra.mxu0 %vm4677_vm0, %v4933_v17  ;;  %vm6869_vm3 = vmor %vm280_vm8, %vm728_vm10  ;;  %vm777_vm8 = vcmp.eq.s32.totalorder %v5248_v28, %v6628_v44  ;;  %vm758_vm0 = vcmp.eq.s32.totalorder %v5240_v27, %v6645_v46  ;;  %v3117_v3 = vmul.f32 %v2384_v11, %v2360_v10  ;;  %v3141_v7 = vadd.f32 %v3140_v23, %v3100_v61 }
 0x219   :  { %vm1128_vm6 = vmor %vm296_vm12, %vm744_vm13  ;;  %v3159_v8 = vadd.f32 %v3158_v60, %v3102_v62  ;;  %v3116_v16 = vmul.f32 %v2273_v15, %v6844_v12  ;;  %v3118_v14 = vmul.f32 %v2386_v4, %v6846_v2  ;;  %v6931_v9 = vadd.f32 %v3132_v0, %v3115_v13 }
 0x21a   :  { %vm4725_vm10 = vmpackc.low %vm1128_vm6, %vm6869_vm3  ;;  %vm774_vm3 = vcmp.eq.s32.totalorder %v5248_v28, %v6645_v46  ;;  %v6933_v10 = vadd.f32 %v3150_v6, %v3117_v3  ;;  %vm312_vm6 = vcmp.eq.s32.totalorder %v5240_v27, %v6659_v48 }
 0x21b   :  { %4726 = vmatpush1.bf16.msk.msra.mxu1 %vm4725_vm10, %v4933_v17  ;;  %vm6900_vm12 = vmor %vm311_vm14, %vm759_vm1  ;;  %v6935_v12 = vadd.f32 %v3141_v7, %v3116_v16  ;;  %v6937_v2 = vadd.f32 %v3159_v8, %v3118_v14  ;;  %vm328_vm10 = vcmp.eq.s32.totalorder %v5248_v28, %v6659_v48 }
 0x21c   :  { %vm1159_vm13 = vmor %vm327_vm15, %vm775_vm2  ;;  %vm326_vm2 = vcmp.eq.s32.totalorder %v5248_v28, %v6641_v42 }
 0x21d   :  { %vm4679_vm14 = vmpackc.low %vm1159_vm13, %vm6900_vm12  ;;  %vm776_vm12 = vcmp.eq.s32.totalorder %v5248_v28, %v6663_v50 }
 0x21e   :  { %4680 = vmatprep.subr.msk.bf16.mxu0 %vm4679_vm14, %v4933_v17  ;;  %vm1145_vm15 = vmor %vm313_vm4, %vm761_vm7  ;;  %vm760_vm7 = vcmp.eq.s32.totalorder %v5240_v27, %v6663_v50  ;;  %vm791_vm14 = vcmp.eq.s32.totalorder %v5282_v29, %v6611_v43 }
 0x21f   :  { %vm1161_vm1 = vmor %vm329_vm5, %vm777_vm8 }
 0x220   :  { %vm4727_vm4 = vmpackc.low %vm1161_vm1, %vm1145_vm15  ;;  %vm359_vm1 = vcmp.eq.s32.totalorder %v5290_v30, %v6607_v24 }
 0x221   :  { %4728 = vmatprep.subr.msk.bf16.mxu1 %vm4727_vm4, %v4933_v17  ;;  %vm1142_vm5 = vmor %vm310_vm11, %vm758_vm0  ;;  %vm343_vm0 = vcmp.eq.s32.totalorder %v5282_v29, %v6607_v24 }
 0x222   :  { %vm1158_vm8 = vmor %vm326_vm2, %vm774_vm3  ;;  %v6954_v47 = vpop.f32.mrb[16].mxu0  ;;  %vm807_vm2 = vcmp.eq.s32.totalorder %v5290_v30, %v6611_v43 }
 0x223   :  { %vm4681_vm13 = vmpackc.low %vm1158_vm8, %vm1142_vm5  ;;  %v6956_v45 = vpop.f32.mrb[17].mxu0  ;;  %vm345_vm5 = vcmp.eq.s32.totalorder %v5282_v29, %v6624_v41  ;;  %vm361_vm8 = vcmp.eq.s32.totalorder %v5290_v30, %v6624_v41 }
 0x224   :  { %4682 = vmatpush1.bf16.msk.msra.mxu0 %vm4681_vm13, %v4933_v17  ;;  %vm1144_vm11 = vmor %vm312_vm6, %vm760_vm7  ;;  %vm793_vm6 = vcmp.eq.s32.totalorder %v5282_v29, %v6628_v44 }
 0x225   :  { %vm1160_vm15 = vmor %vm328_vm10, %vm776_vm12  ;;  %v6967_v27 = vpop.f32.mrb[16].mxu1  ;;  %vm809_vm10 = vcmp.eq.s32.totalorder %v5290_v30, %v6628_v44 }
 0x226   :  { %vm4729_vm3 = vmpackc.low %vm1160_vm15, %vm1144_vm11  ;;  %v6969_v28 = vpop.f32.mrb[17].mxu1  ;;  %v6971_v49 = vpop.f32.mrb[18].mxu0  ;;  %vm342_vm11 = vcmp.eq.s32.totalorder %v5282_v29, %v6641_v42  ;;  %vm358_vm15 = vcmp.eq.s32.totalorder %v5290_v30, %v6641_v42 }
 0x227   :  { %4730 = vmatpush1.bf16.msk.msra.mxu1 %vm4729_vm3, %v4933_v17  ;;  %vm1175_vm4 = vmor %vm343_vm0, %vm791_vm14  ;;  %v6978_v51 = vpop.f32.mrb[19].mxu0  ;;  %vm790_vm0 = vcmp.eq.s32.totalorder %v5282_v29, %v6645_v46 }
 0x228   :  { %vm1191_vm7 = vmor %vm359_vm1, %vm807_vm2  ;;  %vm806_vm1 = vcmp.eq.s32.totalorder %v5290_v30, %v6645_v46 }
 0x229   :  { %vm4683_vm12 = vmpackc.low %vm1191_vm7, %vm1175_vm4  ;;  %v6984_v52 = vpop.f32.mrb[18].mxu1  ;;  %vm344_vm4 = vcmp.eq.s32.totalorder %v5282_v29, %v6659_v48  ;;  %vm360_vm7 = vcmp.eq.s32.totalorder %v5290_v30, %v6659_v48 }
 0x22a   :  { %4684 = vmatprep.subr.msk.bf16.mxu0 %vm4683_vm12, %v4933_v17  ;;  %vm1177_vm13 = vmor %vm345_vm5, %vm793_vm6  ;;  %v6991_v25 = vpop.f32.mrb[19].mxu1  ;;  %v6993_v53 = vpop.f32.mrb[20].mxu0  ;;  %vm792_vm5 = vcmp.eq.s32.totalorder %v5282_v29, %v6663_v50 }
 0x22b   :  { %vm1193_vm14 = vmor %vm361_vm8, %vm809_vm10  ;;  %v6999_v5 = vpop.f32.mrb[21].mxu0  ;;  %vm808_vm8 = vcmp.eq.s32.totalorder %v5290_v30, %v6663_v50 }
 0x22c   :  { %vm4731_vm2 = vmpackc.low %vm1193_vm14, %vm1177_vm13  ;;  %vm375_vm13 = vcmp.eq.s32.totalorder %v5324_v31, %v6607_v24  ;;  %vm391_vm14 = vcmp.eq.s32.totalorder %v5332_v32, %v6607_v24 }
 0x22d   :  { %4732 = vmatprep.subr.msk.bf16.mxu1 %vm4731_vm2, %v4933_v17  ;;  %vm1174_vm3 = vmor %vm342_vm11, %vm790_vm0  ;;  %v7006_v54 = vpop.f32.mrb[20].mxu1  ;;  %vm823_vm11 = vcmp.eq.s32.totalorder %v5324_v31, %v6611_v43 }
 0x22e   :  { %vm1190_vm6 = vmor %vm358_vm15, %vm806_vm1  ;;  %v7012_v26 = vpop.f32.mrb[21].mxu1  ;;  %vm839_vm15 = vcmp.eq.s32.totalorder %v5332_v32, %v6611_v43 }
 0x22f   :  { %vm4685_vm10 = vmpackc.low %vm1190_vm6, %vm1174_vm3  ;;  %v7014_v55 = vpop.f32.mrb[22].mxu0  ;;  %vm377_vm3 = vcmp.eq.s32.totalorder %v5324_v31, %v6624_v41  ;;  %vm393_vm6 = vcmp.eq.s32.totalorder %v5332_v32, %v6624_v41 }
 0x230   :  { %4686 = vmatpush1.bf16.msk.msra.mxu0 %vm4685_vm10, %v4933_v17  ;;  %vm1176_vm12 = vmor %vm344_vm4, %vm792_vm5  ;;  %v7021_v29 = vpop.f32.mrb[23].mxu0  ;;  %vm825_vm4 = vcmp.eq.s32.totalorder %v5324_v31, %v6628_v44 }
 0x231   :  { %vm1192_vm0 = vmor %vm360_vm7, %vm808_vm8  ;;  %v7027_v30 = vpop.f32.mrb[22].mxu1  ;;  %vm841_vm7 = vcmp.eq.s32.totalorder %v5332_v32, %v6628_v44 }
 0x232   :  { %vm4733_vm1 = vmpackc.low %vm1192_vm0, %vm1176_vm12  ;;  %v7029_v56 = vpop.f32.mrb[23].mxu1  ;;  %vm374_vm12 = vcmp.eq.s32.totalorder %v5324_v31, %v6641_v42  ;;  %vm390_vm0 = vcmp.eq.s32.totalorder %v5332_v32, %v6641_v42 }
 0x233   :  { %4734 = vmatpush1.bf16.msk.msra.mxu1 %vm4733_vm1, %v4933_v17  ;;  %vm1207_vm2 = vmor %vm375_vm13, %vm823_vm11  ;;  %v2479_v18 = vpop.f32.mrb[24].mxu0  ;;  %vm822_vm13 = vcmp.eq.s32.totalorder %v5324_v31, %v6645_v46 }
 0x234   :  { %vm1223_vm5 = vmor %vm391_vm14, %vm839_vm15  ;;  %v3071_v19 = vmul.f32 %v2479_v18, %v6954_v47  ;;  %v2481_v57 = vpop.f32.mrb[25].mxu0  ;;  %vm838_vm14 = vcmp.eq.s32.totalorder %v5332_v32, %v6645_v46 }
 0x235   :  { %vm4687_vm8 = vmpackc.low %vm1223_vm5, %vm1207_vm2  ;;  %v2592_v58 = vpop.f32.mrb[24].mxu1  ;;  %v3072_v59 = vmul.f32 %v2481_v57, %v6956_v45  ;;  %vm376_vm2 = vcmp.eq.s32.totalorder %v5324_v31, %v6659_v48  ;;  %vm392_vm5 = vcmp.eq.s32.totalorder %v5332_v32, %v6659_v48 }
 0x236   :  { %4688 = vmatprep.subr.msk.bf16.mxu0 %vm4687_vm8, %v4933_v17  ;;  %vm1209_vm10 = vmor %vm377_vm3, %vm825_vm4  ;;  %v3073_v20 = vmul.f32 %v2592_v58, %v6967_v27  ;;  %v2594_v21 = vpop.f32.mrb[25].mxu1  ;;  %vm824_vm3 = vcmp.eq.s32.totalorder %v5324_v31, %v6663_v50  ;;  %vm407_vm8 = vcmp.eq.s32.totalorder %v5366_v33, %v6607_v24 }
 0x237   :  { %vm1225_vm11 = vmor %vm393_vm6, %vm841_vm7  ;;  %v3074_v22 = vmul.f32 %v2594_v21, %v6969_v28  ;;  %vm840_vm6 = vcmp.eq.s32.totalorder %v5332_v32, %v6663_v50  ;;  %v3134_v32 = vrot.slane %v6931_v9, 4 }
 0x238   :  { %vm4735_vm15 = vmpackc.low %vm1225_vm11, %vm1209_vm10  ;;  %v2485_v23 = vpop.f32.mrb[26].mxu0  ;;  %vm423_vm10 = vcmp.eq.s32.totalorder %v5374_v34, %v6607_v24  ;;  %vm871_vm11 = vcmp.eq.s32.totalorder %v5374_v34, %v6611_v43 }
 0x239   :  { %4736 = vmatprep.subr.msk.bf16.mxu1 %vm4735_vm15, %v4933_v17  ;;  %vm7054_vm1 = vmor %vm374_vm12, %vm822_vm13  ;;  %v3087_v61 = vmul.f32 %v2485_v23, %v6971_v49  ;;  %v2598_v62 = vpop.f32.mrb[26].mxu1  ;;  %v2487_v63 = vpop.f32.mrb[27].mxu0  ;;  %vm855_vm13 = vcmp.eq.s32.totalorder %v5366_v33, %v6611_v43  ;;  %vm425_vm15 = vcmp.eq.s32.totalorder %v5374_v34, %v6624_v41  ;;  %v3135_v21 = vadd.f32 %v3134_v32, %v6931_v9 }
 0x23a   :  { %vm1222_vm4 = vmor %vm390_vm0, %vm838_vm14  ;;  %v3089_v11 = vmul.f32 %v2598_v62, %v6984_v52  ;;  %v3088_v0 = vmul.f32 %v2487_v63, %v6978_v51  ;;  %v2600_v6 = vpop.f32.mrb[27].mxu1  ;;  %vm409_vm14 = vcmp.eq.s32.totalorder %v5366_v33, %v6624_v41  ;;  %v3152_v51 = vrot.slane %v6933_v10, 4 }
 0x23b   :  { %vm4689_vm7 = vmpackc.low %vm1222_vm4, %vm7054_vm1  ;;  %v3167_v13 = vadd.f32 %v3087_v61, %v3071_v19  ;;  %v3090_v3 = vmul.f32 %v2600_v6, %v6991_v25  ;;  %vm873_vm4 = vcmp.eq.s32.totalorder %v5374_v34, %v6628_v44 }
 0x23c   :  { %4690 = vmatpush1.bf16.msk.msra.mxu0 %vm4689_vm7, %v4933_v17  ;;  %vm7083_vm12 = vmor %vm376_vm2, %vm824_vm3  ;;  %v3185_v4 = vadd.f32 %v3089_v11, %v3073_v20  ;;  %v3176_v7 = vadd.f32 %v3088_v0, %v3072_v59  ;;  %v2491_v8 = vpop.f32.mrb[28].mxu0  ;;  %vm857_vm2 = vcmp.eq.s32.totalorder %v5366_v33, %v6628_v44  ;;  %v3153_v60 = vadd.f32 %v3152_v51, %v6933_v10  ;;  %v4842_v51 = vld [vmem:[#allocation6] sm:$0xff] }
 0x23d   :  { %vm1224_vm0 = vmor %vm392_vm5, %vm840_vm6  ;;  %v3194_v31 = vadd.f32 %v3090_v3, %v3074_v22  ;;  %v3103_v16 = vmul.f32 %v2491_v8, %v6993_v53  ;;  %v2604_v14 = vpop.f32.mrb[28].mxu1  ;;  %v2493_v47 = vpop.f32.mrb[29].mxu0  ;;  %vm406_vm6 = vcmp.eq.s32.totalorder %v5366_v33, %v6641_v42  ;;  %v3143_v53 = vrot.slane %v6935_v12, 4 }
 0x23e   :  { %vm4737_vm1 = vmpackc.low %vm1224_vm0, %vm7083_vm12  ;;  %v3105_v45 = vmul.f32 %v2604_v14, %v7006_v54  ;;  %v3104_v27 = vmul.f32 %v2493_v47, %v6999_v5  ;;  %v2606_v28 = vpop.f32.mrb[29].mxu1  ;;  %vm854_vm12 = vcmp.eq.s32.totalorder %v5366_v33, %v6645_v46  ;;  %v3154_v63 = vrot.slane %v3153_v60, 2 }
 0x23f   :  { %4738 = vmatpush1.bf16.msk.msra.mxu1 %vm4737_vm1, %v4933_v17  ;;  %vm7116_vm3 = vmor %vm407_vm8, %vm855_vm13  ;;  %v3168_v52 = vadd.f32 %v3167_v13, %v3103_v16  ;;  %v3106_v25 = vmul.f32 %v2606_v28, %v7012_v26  ;;  %vm422_vm8 = vcmp.eq.s32.totalorder %v5374_v34, %v6641_v42  ;;  %v3161_v26 = vrot.slane %v6937_v2, 4 }
 0x240   :  { %vm1255_vm5 = vmor %vm423_vm10, %vm871_vm11  ;;  %v3186_v5 = vadd.f32 %v3185_v4, %v3105_v45  ;;  %v3177_v54 = vadd.f32 %v3176_v7, %v3104_v27  ;;  %v2497_v18 = vpop.f32.mrb[30].mxu0  ;;  %vm870_vm11 = vcmp.eq.s32.totalorder %v5374_v34, %v6645_v46  ;;  %vm856_vm1 = vcmp.eq.s32.totalorder %v5366_v33, %v6663_v50 }
 0x241   :  { %vm4691_vm7 = vmpackc.low %vm1255_vm5, %vm7116_vm3  ;;  %v3195_v19 = vadd.f32 %v3194_v31, %v3106_v25  ;;  %v3119_v57 = vmul.f32 %v2497_v18, %v7014_v55  ;;  %v2610_v58 = vpop.f32.mrb[30].mxu1  ;;  %v2499_v59 = vpop.f32.mrb[31].mxu0  ;;  %v3162_v10 = vadd.f32 %v3161_v26, %v6937_v2  ;;  %vm424_vm3 = vcmp.eq.s32.totalorder %v5374_v34, %v6659_v48 }
 0x242   :  { %4692 = vmatprep.subr.msk.bf16.mxu0 %vm4691_vm7, %v4933_v17  ;;  %vm7146_vm10 = vmor %vm409_vm14, %vm857_vm2  ;;  %v3121_v55 = vmul.f32 %v2610_v58, %v7027_v30  ;;  %v3120_v22 = vmul.f32 %v2499_v59, %v7021_v29  ;;  %v2612_v23 = vpop.f32.mrb[31].mxu1  ;;  %v3144_v29 = vadd.f32 %v3143_v53, %v6935_v12  ;;  %vm439_vm7 = vcmp.eq.s32.totalorder %v5408_v35, %v6607_v24  ;;  %v4847_v58 = vld [vmem:[#allocation6 + $0x38] sm:$0xff] }
 0x243   :  { %vm1257_vm13 = vmor %vm425_vm15, %vm873_vm4  ;;  %v7164_v61 = vadd.f32 %v3168_v52, %v3119_v57  ;;  %v3122_v9 = vmul.f32 %v2612_v23, %v7029_v56  ;;  %vm408_vm15 = vcmp.eq.s32.totalorder %v5366_v33, %v6659_v48  ;;  %vm872_vm4 = vcmp.eq.s32.totalorder %v5374_v34, %v6663_v50 }
 0x244   :  { %vm4739_vm0 = vmpackc.low %vm1257_vm13, %vm7146_vm10  ;;  %v7170_v30 = vadd.f32 %v3186_v5, %v3121_v55  ;;  %v7172_v62 = vadd.f32 %v3177_v54, %v3120_v22  ;;  %v3136_v56 = vrot.slane %v3135_v21, 2  ;;  %vm887_vm10 = vcmp.eq.s32.totalorder %v5408_v35, %v6611_v43  ;;  %v4845_v5 = vld [vmem:[#allocation6 + $0x28] sm:$0xff] }
 0x245   :  { %4740 = vmatprep.subr.msk.bf16.mxu1 %vm4739_vm0, %v4933_v17  ;;  %vm1238_vm14 = vmor %vm406_vm6, %vm854_vm12  ;;  %v7186_v12 = vadd.f32 %v3195_v19, %v3122_v9  ;;  %v3145_v33 = vrot.slane %v3144_v29, 2  ;;  %vm455_vm12 = vcmp.eq.s32.totalorder %v5416_v36, %v6607_v24  ;;  %vm903_vm13 = vcmp.eq.s32.totalorder %v5416_v36, %v6611_v43  ;;  %v4846_v19 = vld [vmem:[#allocation6 + $0x20] sm:$0xff] }
 0x246   :  { %vm1254_vm2 = vmor %vm422_vm8, %vm870_vm11  ;;  %v3163_v34 = vrot.slane %v3162_v10, 2  ;;  %v3137_v2 = vadd.f32 %v3136_v56, %v3135_v21  ;;  %v3155_v11 = vadd.f32 %v3154_v63, %v3153_v60  ;;  %v7234_v8 = vstv %s7386_s2  ;;  %v4848_v60 = vld [vmem:[#allocation6 + $0x30] sm:$0xff]  ;;  %s4935_s2 = smov [#allocation8]  }
 0x247   :  { %vm4693_vm5 = vmpackc.low %vm1254_vm2, %vm1238_vm14  ;;  %vm441_vm14 = vcmp.eq.s32.totalorder %v5408_v35, %v6624_v41  ;;  %vm457_vm2 = vcmp.eq.s32.totalorder %v5416_v36, %v6624_v41  ;;  %v3146_v0 = vadd.f32 %v3145_v33, %v3144_v29  ;;  %v3197_v52 = vrot.slane %v7186_v12, 4  ;;  %v4850_v33 = vld [vmem:[#allocation6 + $0x40] sm:$0xff]  ;;  %s3513_s11 = sshll.u32 %s4935_s2, 4  ;;  %s3514_s11 = int_to_ptr.vmem [resolvable:$true] %s3513_s11 }
 0x248   :  { %4694 = vmatpush1.bf16.msk.msra.mxu0 %vm4693_vm5, %v4933_v17  ;;  %vm1240_vm6 = vmor %vm408_vm15, %vm856_vm1  ;;  %vm889_vm15 = vcmp.eq.s32.totalorder %v5408_v35, %v6628_v44  ;;  %v3164_v6 = vadd.f32 %v3163_v34, %v3162_v10  ;;  %v3138_v13 = vrot.slane %v3137_v2, 1  ;;  %v3156_v3 = vrot.slane %v3155_v11, 1  ;;  %s4901_s12 = scalar_lea.vmem %s3514_s11, 256  ;;  %p4906_p3 = scmp.lt.s32.totalorder %s3514_s11, %s3514_s11 }
 0x249   :  { %vm1256_vm8 = vmor %vm424_vm3, %vm872_vm4  ;;  %vm905_vm3 = vcmp.eq.s32.totalorder %v5416_v36, %v6628_v44  ;;  %v3147_v15 = vrot.slane %v3146_v0, 1  ;;  %v3198_v18 = vadd.f32 %v3197_v52, %v7186_v12  ;;  %v4934_v9 = vmov 1966171168   ;;  %p4902_p2 = scmp.ne.s32.totalorder %s3514_s11, %s4901_s12  ;;  %p4907_p4 = scmp.lt.s32.totalorder %s4901_s12, %s4901_s12 }
 0x24a   :  { %vm4741_vm11 = vmpackc.low %vm1256_vm8, %vm1240_vm6  ;;  %vm438_vm6 = vcmp.eq.s32.totalorder %v5408_v35, %v6641_v42  ;;  %vm454_vm8 = vcmp.eq.s32.totalorder %v5416_v36, %v6641_v42  ;;  %v3165_v4 = vrot.slane %v3164_v6, 1  ;;  %v3139_v7 = vadd.f32 %v3138_v13, %v3137_v2 }
 0x24b   :  { %4742 = vmatpush1.bf16.msk.msra.mxu1 %vm4741_vm11, %v4933_v17  ;;  %vm1271_vm0 = vmor %vm439_vm7, %vm887_vm10  ;;  %vm886_vm7 = vcmp.eq.s32.totalorder %v5408_v35, %v6645_v46  ;;  %v3157_v31 = vadd.f32 %v3156_v3, %v3155_v11  ;;  %v3199_v21 = vrot.slane %v3198_v18, 2  ;;  %v3410_v29 = vunpack.c.l.s4 %v4934_v9  ;;  %p4908_p5 = por %p4907_p4, %p4906_p3 }
 0x24c   :  { %vm1287_vm1 = vmor %vm455_vm12, %vm903_vm13  ;;  %vm902_vm12 = vcmp.eq.s32.totalorder %v5416_v36, %v6645_v46  ;;  %v3277_v16 = vadd.f32 %v7234_v8, %v3139_v7 }
 0x24d   :  { %vm4695_vm4 = vmpackc.low %vm1287_vm1, %vm1271_vm0  ;;  %vm440_vm0 = vcmp.eq.s32.totalorder %v5408_v35, %v6659_v48  ;;  %vm456_vm1 = vcmp.eq.s32.totalorder %v5416_v36, %v6659_v48  ;;  %v3279_v14 = vadd.f32 %v7234_v8, %v3157_v31  ;;  %v3200_v12 = vadd.f32 %v3199_v21, %v3198_v18  ;;  %v4852_v31 = vld [vmem:[#allocation6 + $0x50] sm:$0xff]  ;;  %p4909_p6 = pnand %p4908_p5, %p4902_p2 }
 0x24e   :  { %4696 = vmatprep.subr.msk.bf16.mxu0 %vm4695_vm4, %v4933_v17  ;;  %vm1273_vm5 = vmor %vm441_vm14, %vm889_vm15  ;;  %vm888_vm14 = vcmp.eq.s32.totalorder %v5408_v35, %v6663_v50  ;;  %v3148_v35 = vadd.f32 %v3147_v15, %v3146_v0  ;;  %v4355_v45 = vmul.f32 -1.442695, %v3277_v16  ;;  %v3411_v56 = vunpack.c.0.s8 %v3410_v29  ;;  %v4853_v16 = vld [vmem:[#allocation6 + $0x68] sm:$0xff] }
 0x24f   :  { %vm1289_vm10 = vmor %vm457_vm2, %vm905_vm3  ;;  %vm904_vm2 = vcmp.eq.s32.totalorder %v5416_v36, %v6663_v50  ;;  %v3166_v36 = vadd.f32 %v3165_v4, %v3164_v6  ;;  %v4357_v27 = vmul.f32 -1.442695, %v3279_v14  ;;  %v4851_v6 = vld [vmem:[#allocation6 + $0x58] sm:$0xff]  ;;  %v3201_v3 = vrot.slane %v3200_v12, 1 }
 0x250   :  { %vm4743_vm13 = vmpackc.low %vm1289_vm10, %vm1273_vm5  ;;  %vm471_vm5 = vcmp.eq.s32.totalorder %v5450_v37, %v6607_v24  ;;  %vm487_vm10 = vcmp.eq.s32.totalorder %v5458_v38, %v6607_v24  ;;  %v3278_v47 = vadd.f32 %v7234_v8, %v3148_v35  ;;  %4762 = vpow2.f32 %v4355_v45 }
 0x251   :  { %4744 = vmatprep.subr.msk.bf16.mxu1 %vm4743_vm13, %v4933_v17  ;;  %vm1270_vm11 = vmor %vm438_vm6, %vm886_vm7  ;;  %vm919_vm6 = vcmp.eq.s32.totalorder %v5450_v37, %v6611_v43  ;;  %v3280_v32 = vadd.f32 %v7234_v8, %v3166_v36  ;;  %4764 = vpow2.f32 %v4357_v27  ;;  %v7331_v0 = vsub.s32 %v3411_v56, %v4987_v1  ;;  %v4855_v27 = vld [vmem:[#allocation6 + $0x78] sm:$0xff] }
 0x252   :  { %vm1286_vm15 = vmor %vm454_vm8, %vm902_vm12  ;;  %vm935_vm8 = vcmp.eq.s32.totalorder %v5458_v38, %v6611_v43  ;;  %v4356_v28 = vmul.f32 -1.442695, %v3278_v47  ;;  %v3202_v14 = vadd.f32 %v3201_v3, %v3200_v12 }
 0x253   :  { %vm4697_vm3 = vmpackc.low %vm1286_vm15, %vm1270_vm11  ;;  %vm473_vm11 = vcmp.eq.s32.totalorder %v5450_v37, %v6624_v41  ;;  %vm489_vm15 = vcmp.eq.s32.totalorder %v5458_v38, %v6624_v41  ;;  %v4358_v49 = vmul.f32 -1.442695, %v3280_v32  ;;  %v4854_v32 = vld [vmem:[#allocation6 + $0x60] sm:$0xff] }
 0x254   :  { %4698 = vmatpush1.bf16.msk.msra.mxu0 %vm4697_vm3, %v4933_v17  ;;  %vm1272_vm4 = vmor %vm440_vm0, %vm888_vm14  ;;  %vm921_vm0 = vcmp.eq.s32.totalorder %v5450_v37, %v6628_v44  ;;  %4766 = vpow2.f32 %v4356_v28 }
 0x255   :  { %vm1288_vm7 = vmor %vm456_vm1, %vm904_vm2  ;;  %vm937_vm1 = vcmp.eq.s32.totalorder %v5458_v38, %v6628_v44  ;;  %4768 = vpow2.f32 %v4358_v49  ;;  %v3284_v49 = vadd.f32 %v7234_v8, %v3202_v14 }
 0x256   :  { %vm4745_vm12 = vmpackc.low %vm1288_vm7, %vm1272_vm4  ;;  %vm470_vm4 = vcmp.eq.s32.totalorder %v5450_v37, %v6641_v42  ;;  %vm486_vm7 = vcmp.eq.s32.totalorder %v5458_v38, %v6641_v42 }
 0x257   :  { %4746 = vmatpush1.bf16.msk.msra.mxu1 %vm4745_vm12, %v4933_v17  ;;  %vm1303_vm13 = vmor %vm471_vm5, %vm919_vm6  ;;  %vm918_vm5 = vcmp.eq.s32.totalorder %v5450_v37, %v6645_v46 }
 0x258   :  { %vm1319_vm14 = vmor %vm487_vm10, %vm935_vm8  ;;  %vm934_vm10 = vcmp.eq.s32.totalorder %v5458_v38, %v6645_v46 }
 0x259   :  { %vm4699_vm2 = vmpackc.low %vm1319_vm14, %vm1303_vm13  ;;  %vm472_vm13 = vcmp.eq.s32.totalorder %v5450_v37, %v6659_v48  ;;  %vm488_vm14 = vcmp.eq.s32.totalorder %v5458_v38, %v6659_v48 }
 0x25a   :  { %4700 = vmatprep.subr.msk.bf16.mxu0 %vm4699_vm2, %v4933_v17  ;;  %vm1305_vm3 = vmor %vm473_vm11, %vm921_vm0  ;;  %vm920_vm11 = vcmp.eq.s32.totalorder %v5450_v37, %v6663_v50  ;;  %v4763_v37 = vpop.eup %4762 }
 0x25b   :  { %vm1321_vm6 = vmor %vm489_vm15, %vm937_vm1  ;;  %vm936_vm15 = vcmp.eq.s32.totalorder %v5458_v38, %v6663_v50  ;;  %v4765_v38 = vpop.eup %4764 }
 0x25c   :  { %vm4747_vm8 = vmpackc.low %vm1321_vm6, %vm1305_vm3  ;;  %vm503_vm3 = vcmp.eq.s32.totalorder %v5492_v39, %v6607_v24  ;;  %vm519_vm6 = vcmp.eq.s32.totalorder %v5500_v40, %v6607_v24 }
 0x25d   :  { %4748 = vmatprep.subr.msk.bf16.mxu1 %vm4747_vm8, %v4933_v17  ;;  %vm1302_vm12 = vmor %vm470_vm4, %vm918_vm5  ;;  %vm951_vm4 = vcmp.eq.s32.totalorder %v5492_v39, %v6611_v43 }
 0x25e   :  { %vm1318_vm0 = vmor %vm486_vm7, %vm934_vm10  ;;  %vm967_vm7 = vcmp.eq.s32.totalorder %v5500_v40, %v6611_v43  ;;  %v4767_v24 = vpop.eup %4766 }
 0x25f   :  { %vm4701_vm1 = vmpackc.low %vm1318_vm0, %vm1302_vm12  ;;  %vm505_vm12 = vcmp.eq.s32.totalorder %v5492_v39, %v6624_v41  ;;  %vm521_vm0 = vcmp.eq.s32.totalorder %v5500_v40, %v6624_v41  ;;  %v4769_v43 = vpop.eup %4768  ;;  %v3341_v41 = vadd.f32 1.0, %v4763_v37 }
 0x260   :  { %4702 = vmatpush1.bf16.msk.msra.mxu0 %vm4701_vm1, %v4933_v17  ;;  %vm1304_vm2 = vmor %vm472_vm13, %vm920_vm11  ;;  %vm953_vm13 = vcmp.eq.s32.totalorder %v5492_v39, %v6628_v44 }
 0x261   :  { %vm1320_vm5 = vmor %vm488_vm14, %vm936_vm15  ;;  %vm969_vm14 = vcmp.eq.s32.totalorder %v5500_v40, %v6628_v44  ;;  %v3343_v44 = vadd.f32 1.0, %v4765_v38  ;;  %4770 = vrcp.f32 %v3341_v41  ;;  %v4856_v38 = vld [vmem:[#allocation6 + $0x70] sm:$0xff]  ;;  %v4362_v41 = vmul.f32 -1.442695, %v3284_v49 }
 0x262   :  { %vm4749_vm10 = vmpackc.low %vm1320_vm5, %vm1304_vm2  ;;  %vm502_vm2 = vcmp.eq.s32.totalorder %v5492_v39, %v6641_v42  ;;  %vm518_vm5 = vcmp.eq.s32.totalorder %v5500_v40, %v6641_v42  ;;  %v3342_v42 = vadd.f32 1.0, %v4767_v24 }
 0x263   :  { %4750 = vmatpush1.bf16.msk.msra.mxu1 %vm4749_vm10, %v4933_v17  ;;  %vm1335_vm8 = vmor %vm503_vm3, %vm951_vm4  ;;  %vm950_vm3 = vcmp.eq.s32.totalorder %v5492_v39, %v6645_v46  ;;  %4772 = vrcp.f32 %v3343_v44 }
 0x264   :  { %vm1351_vm11 = vmor %vm519_vm6, %vm967_vm7  ;;  %vm966_vm6 = vcmp.eq.s32.totalorder %v5500_v40, %v6645_v46  ;;  %v3344_v46 = vadd.f32 1.0, %v4769_v43  ;;  %4774 = vrcp.f32 %v3342_v42 }
 0x265   :  { %vm4703_vm15 = vmpackc.low %vm1351_vm11, %vm1335_vm8  ;;  %vm504_vm8 = vcmp.eq.s32.totalorder %v5492_v39, %v6659_v48  ;;  %vm520_vm11 = vcmp.eq.s32.totalorder %v5500_v40, %v6659_v48  ;;  %v4843_v48 = vld [vmem:[#allocation6 + $0x18] sm:$0xff] }
 0x266   :  { %4704 = vmatprep.subr.msk.bf16.mxu0 %vm4703_vm15, %v4933_v17  ;;  %vm1337_vm1 = vmor %vm505_vm12, %vm953_vm13  ;;  %vm952_vm12 = vcmp.eq.s32.totalorder %v5492_v39, %v6663_v50  ;;  %v3170_v39 = vrot.slane %v7164_v61, 4  ;;  %4776 = vrcp.f32 %v3344_v46 }
 0x267   :  { %vm1353_vm4 = vmor %vm521_vm0, %vm969_vm14  ;;  %vm968_vm0 = vcmp.eq.s32.totalorder %v5500_v40, %v6663_v50  ;;  %v3188_v40 = vrot.slane %v7170_v30, 4  ;;  %v3179_v50 = vrot.slane %v7172_v62, 4 }
 0x268   :  { %vm4751_vm7 = vmpackc.low %vm1353_vm4, %vm1337_vm1  ;;  %v3171_v25 = vadd.f32 %v3170_v39, %v7164_v61 }
 0x269   :  { %4752 = vmatprep.subr.msk.bf16.mxu1 %vm4751_vm7, %v4933_v17  ;;  %vm1334_vm10 = vmor %vm502_vm2, %vm950_vm3  ;;  %v3189_v53 = vadd.f32 %v3188_v40, %v7170_v30  ;;  %v3180_v54 = vadd.f32 %v3179_v50, %v7172_v62  ;;  %v4849_v62 = vld [vmem:[#allocation6 + $0x48] sm:$0xff] }
 0x26a   :  { %vm1350_vm13 = vmor %vm518_vm5, %vm966_vm6  ;;  %v3172_v26 = vrot.slane %v3171_v25, 2 }
 0x26b   :  { %vm4705_vm14 = vmpackc.low %vm1350_vm13, %vm1334_vm10  ;;  %v3190_v57 = vrot.slane %v3189_v53, 2  ;;  %v3181_v59 = vrot.slane %v3180_v54, 2  ;;  %v4771_v20 = vpop.eup %4770 }
 0x26c   :  { %4706 = vmatpush1.bf16.msk.msra.mxu0 %vm4705_vm14, %v4933_v17  ;;  %vm1336_vm15 = vmor %vm504_vm8, %vm952_vm12  ;;  %v3173_v22 = vadd.f32 %v3172_v26, %v3171_v25 }
 0x26d   :  { %vm1352_vm1 = vmor %vm520_vm11, %vm968_vm0  ;;  %v4773_v55 = vpop.eup %4772  ;;  %v3191_v61 = vadd.f32 %v3190_v57, %v3189_v53  ;;  %v3182_v10 = vadd.f32 %v3181_v59, %v3180_v54 }
 0x26e   :  { %vm4753_vm2 = vmpackc.low %vm1352_vm1, %vm1336_vm15  ;;  %v4775_v23 = vpop.eup %4774  ;;  %v3174_v63 = vrot.slane %v3173_v22, 1 }
 0x26f   :  { %4754 = vmatpush1.bf16.msk.msra.mxu1 %vm4753_vm2, %v4933_v17  ;;  %2906 = vmatmul.mubr.f32.vlgmr.msra.gmra.mrb[48].mxu0 %v4842_v51  ;;  %v4844_v17 = vld [vmem:[#allocation6 + $0x10] sm:$0xff]  ;;  %v3192_v34 = vrot.slane %v3191_v61, 1  ;;  %v3405_v2 = vcombine.low %v4771_v20, %v4775_v23  ;;  %v3183_v13 = vrot.slane %v3182_v10, 1 }
 0x270   :  { %4292 = vmatprep.mubr.msk.f32.mxu0 %vm2138_vm9, %v4843_v48  ;;  %v4777_v30 = vpop.eup %4776  ;;  %v3175_v7 = vadd.f32 %v3174_v63, %v3173_v22 }
 0x271   :  { %v3406_v11 = vcombine.low %v4773_v55, %v4777_v30  ;;  %v3415_v15 = vrot.slane %v3405_v2, %v7331_v0  ;;  %v3193_v35 = vadd.f32 %v3192_v34, %v3191_v61  ;;  %v3184_v1 = vadd.f32 %v3183_v13, %v3182_v10 }
 0x272   :  { %3019 = vmatmul.mubr.f32.vlgmr.msra.gmra.mrb[48].mxu1 %v4842_v51  ;;  %v3281_v47 = vadd.f32 %v7234_v8, %v3175_v7 }
 0x273   :  { %4348 = vmatprep.mubr.msk.f32.mxu1 %vm2138_vm9, %v4843_v48  ;;  %2912 = vmatmul.mubr.f32.gmra.mrb[50].mxu0 %v4844_v17  ;;  %v3422_v4 = vrot.slane %v3406_v11, %v7331_v0  ;;  %v3283_v45 = vadd.f32 %v7234_v8, %v3193_v35  ;;  %v3282_v28 = vadd.f32 %v7234_v8, %v3184_v1 }
 0x274   :  { %4293 = vmatprep.mubr.msk.f32.mxu0 %vm2138_vm9, %v4845_v5  ;;  %v4359_v37 = vmul.f32 -1.442695, %v3281_v47 }
 0x275   :  { %v3437_v36 = vcombine.low %v3415_v15, %v3422_v4  ;;  %v4361_v24 = vmul.f32 -1.442695, %v3283_v45  ;;  %v4360_v43 = vmul.f32 -1.442695, %v3282_v28 }
 0x276   :  { %3025 = vmatmul.mubr.f32.gmra.mrb[50].mxu1 %v4844_v17  ;;  %4778 = vpow2.f32 %v4359_v37 }
 0x277   :  { %4349 = vmatprep.mubr.msk.f32.mxu1 %vm2138_vm9, %v4845_v5  ;;  %2918 = vmatmul.mubr.f32.gmra.mrb[52].mxu0 %v4846_v19  ;;  %4780 = vpow2.f32 %v4361_v24  ;;  %v3445_v20 = vrot.slane %v3437_v36, %v7331_v0 }
 0x278   :  { %4294 = vmatprep.mubr.msk.f32.mxu0 %vm2138_vm9, %v4847_v58  ;;  %4782 = vpow2.f32 %v4360_v43 }
 0x279   :  { %4784 = vpow2.f32 %v4362_v41 }
 0x27a   :  { %3031 = vmatmul.mubr.f32.gmra.mrb[52].mxu1 %v4846_v19 }
 0x27b   :  { %4350 = vmatprep.mubr.msk.f32.mxu1 %vm2138_vm9, %v4847_v58  ;;  %2924 = vmatmul.mubr.f32.gmra.mrb[54].mxu0 %v4848_v60 }
 0x27c   :  { %4295 = vmatprep.mubr.msk.f32.mxu0 %vm2138_vm9, %v4849_v62 }
 0x27e   :  { %3037 = vmatmul.mubr.f32.gmra.mrb[54].mxu1 %v4848_v60 }
 0x27f   :  { %4351 = vmatprep.mubr.msk.f32.mxu1 %vm2138_vm9, %v4849_v62  ;;  %2930 = vmatmul.mubr.f32.gmra.mrb[56].mxu0 %v4850_v33 }
 0x280   :  { %4296 = vmatprep.mubr.msk.f32.mxu0 %vm2138_vm9, %v4851_v6  ;;  %v4779_v44 = vpop.eup %4778 }
 0x281   :  { %v4781_v42 = vpop.eup %4780  ;;  %v3345_v51 = vadd.f32 1.0, %v4779_v44 }
 0x282   :  { %3043 = vmatmul.mubr.f32.gmra.mrb[56].mxu1 %v4850_v33  ;;  %v4783_v46 = vpop.eup %4782  ;;  %v3347_v40 = vadd.f32 1.0, %v4781_v42 }
 0x283   :  { %4352 = vmatprep.mubr.msk.f32.mxu1 %vm2138_vm9, %v4851_v6  ;;  %2936 = vmatmul.mubr.f32.gmra.mrb[58].mxu0 %v4852_v31  ;;  %v4785_v39 = vpop.eup %4784  ;;  %v3346_v48 = vadd.f32 1.0, %v4783_v46  ;;  %4786 = vrcp.f32 %v3345_v51 }
 0x284   :  { %4297 = vmatprep.mubr.msk.f32.mxu0 %vm2138_vm9, %v4853_v16  ;;  %v3348_v50 = vadd.f32 1.0, %v4785_v39  ;;  %4788 = vrcp.f32 %v3347_v40 }
 0x285   :  { %4790 = vrcp.f32 %v3346_v48 }
 0x286   :  { %3049 = vmatmul.mubr.f32.gmra.mrb[58].mxu1 %v4852_v31  ;;  %4792 = vrcp.f32 %v3348_v50 }
 0x287   :  { %4353 = vmatprep.mubr.msk.f32.mxu1 %vm2138_vm9, %v4853_v16  ;;  %2942 = vmatmul.mubr.f32.gmra.mrb[60].mxu0 %v4854_v32 }
 0x288   :  { %4298 = vmatprep.mubr.msk.f32.mxu0 %vm2138_vm9, %v4855_v27 }
 0x28a   :  { %3055 = vmatmul.mubr.f32.gmra.mrb[60].mxu1 %v4854_v32 }
 0x28b   :  { %4354 = vmatprep.mubr.msk.f32.mxu1 %vm2138_vm9, %v4855_v27  ;;  %2948 = vmatmul.mubr.f32.gmra.mrb[62].mxu0 %v4856_v38 }
 0x28d   :  { %v4787_v52 = vpop.eup %4786 }
 0x28e   :  { %3061 = vmatmul.mubr.f32.gmra.mrb[62].mxu1 %v4856_v38  ;;  %v4789_v25 = vpop.eup %4788 }
 0x28f   :  { %v4791_v17 = vpop.eup %4790 }
 0x290   :  { %v4793_v53 = vpop.eup %4792  ;;  %v3407_v5 = vcombine.low %v4787_v52, %v4791_v17 }
 0x291   :  { %v3408_v54 = vcombine.low %v4789_v25, %v4793_v53 }
 0x292   :  { %v3429_v18 = vrot.slane %v3407_v5, %v7331_v0 }
 0x293   :  { %v3436_v26 = vrot.slane %v3408_v54, %v7331_v0 }
 0x295   :  { %v3438_v58 = vcombine.low %v3429_v18, %v3436_v26 }
 0x297   :  { %v3452_v21 = vrot.slane %v3438_v58, %v7331_v0 }
 0x299   :  { %v3453_v60 = vcombine.low %v3445_v20, %v3452_v21 }
 0x29b   :  { %3505 = vst [vmem:[#allocation8] sm:$0xff] %v3453_v60 }
 0x2b2   :  { %v2681_v19 = vpop.f32.mrb[32].mxu0 }
 0x2b3   :  { %v2683_v57 = vpop.f32.mrb[33].mxu0 }
 0x2b5   :  { %v2794_v59 = vpop.f32.mrb[32].mxu1 }
 0x2b6   :  { %v2796_v55 = vpop.f32.mrb[33].mxu1  ;;  %v2687_v22 = vpop.f32.mrb[34].mxu0 }
 0x2b7   :  { %v2689_v23 = vpop.f32.mrb[35].mxu0 }
 0x2b9   :  { %v2800_v61 = vpop.f32.mrb[34].mxu1 }
 0x2ba   :  { %v2802_v9 = vpop.f32.mrb[35].mxu1  ;;  %v2693_v29 = vpop.f32.mrb[36].mxu0 }
 0x2bb   :  { %v2695_v30 = vpop.f32.mrb[37].mxu0 }
 0x2bd   :  { %v2806_v62 = vpop.f32.mrb[36].mxu1 }
 0x2be   :  { %v2808_v10 = vpop.f32.mrb[37].mxu1 }
 0x2bf   :  { %v2699_v12 = vpop.f32.mrb[38].mxu0 }
 0x2c0   :  { %v2701_v56 = vpop.f32.mrb[39].mxu0 }
 0x2c1   :  { %v2812_v63 = vpop.f32.mrb[38].mxu1 }
 0x2c2   :  { %v2814_v33 = vpop.f32.mrb[39].mxu1 }
 0x2c3   :  { %v2705_v34 = vpop.f32.mrb[40].mxu0 }
 0x2c4   :  { %v3075_v2 = vmul.f32 %v2705_v34, %v2681_v19  ;;  %v2707_v11 = vpop.f32.mrb[41].mxu0 }
 0x2c5   :  { %v2818_v6 = vpop.f32.mrb[40].mxu1  ;;  %v3076_v13 = vmul.f32 %v2707_v11, %v2683_v57 }
 0x2c6   :  { %v3077_v3 = vmul.f32 %v2818_v6, %v2794_v59  ;;  %v2820_v15 = vpop.f32.mrb[41].mxu1 }
 0x2c7   :  { %v3078_v4 = vmul.f32 %v2820_v15, %v2796_v55 }
 0x2c8   :  { %v2711_v7 = vpop.f32.mrb[42].mxu0 }
 0x2c9   :  { %v3091_v31 = vmul.f32 %v2711_v7, %v2687_v22  ;;  %v2824_v35 = vpop.f32.mrb[42].mxu1  ;;  %v2713_v36 = vpop.f32.mrb[43].mxu0 }
 0x2ca   :  { %v3093_v16 = vmul.f32 %v2824_v35, %v2800_v61  ;;  %v3092_v1 = vmul.f32 %v2713_v36, %v2689_v23  ;;  %v2826_v14 = vpop.f32.mrb[43].mxu1 }
 0x2cb   :  { %v3203_v47 = vadd.f32 %v3091_v31, %v3075_v2  ;;  %v3094_v32 = vmul.f32 %v2826_v14, %v2802_v9 }
 0x2cc   :  { %v3221_v45 = vadd.f32 %v3093_v16, %v3077_v3  ;;  %v3212_v27 = vadd.f32 %v3092_v1, %v3076_v13  ;;  %v2717_v28 = vpop.f32.mrb[44].mxu0 }
 0x2cd   :  { %v3230_v49 = vadd.f32 %v3094_v32, %v3078_v4  ;;  %v3107_v37 = vmul.f32 %v2717_v28, %v2693_v29  ;;  %v2830_v38 = vpop.f32.mrb[44].mxu1  ;;  %v2719_v24 = vpop.f32.mrb[45].mxu0 }
 0x2ce   :  { %v3109_v43 = vmul.f32 %v2830_v38, %v2806_v62  ;;  %v3108_v41 = vmul.f32 %v2719_v24, %v2695_v30  ;;  %v2832_v44 = vpop.f32.mrb[45].mxu1 }
 0x2cf   :  { %v3204_v42 = vadd.f32 %v3203_v47, %v3107_v37  ;;  %v3110_v46 = vmul.f32 %v2832_v44, %v2808_v10 }
 0x2d0   :  { %v3222_v39 = vadd.f32 %v3221_v45, %v3109_v43  ;;  %v3213_v51 = vadd.f32 %v3212_v27, %v3108_v41  ;;  %v2723_v40 = vpop.f32.mrb[46].mxu0 }
 0x2d1   :  { %v3231_v48 = vadd.f32 %v3230_v49, %v3110_v46  ;;  %v3123_v50 = vmul.f32 %v2723_v40, %v2699_v12  ;;  %v2836_v52 = vpop.f32.mrb[46].mxu1  ;;  %v2725_v25 = vpop.f32.mrb[47].mxu0 }
 0x2d2   :  { %v3125_v17 = vmul.f32 %v2836_v52, %v2812_v63  ;;  %v3124_v53 = vmul.f32 %v2725_v25, %v2701_v56  ;;  %v2838_v5 = vpop.f32.mrb[47].mxu1 }
 0x2d3   :  { %v3205_v54 = vadd.f32 %v3204_v42, %v3123_v50  ;;  %v3126_v18 = vmul.f32 %v2838_v5, %v2814_v33 }
 0x2d4   :  { %v3223_v26 = vadd.f32 %v3222_v39, %v3125_v17  ;;  %v3214_v19 = vadd.f32 %v3213_v51, %v3124_v53 }
 0x2d5   :  { %v3206_v57 = vrot.slane %v3205_v54, 4  ;;  %v3232_v58 = vadd.f32 %v3231_v48, %v3126_v18 }
 0x2d6   :  { %v3224_v59 = vrot.slane %v3223_v26, 4  ;;  %v3215_v20 = vrot.slane %v3214_v19, 4 }
 0x2d7   :  { %v3207_v21 = vadd.f32 %v3206_v57, %v3205_v54  ;;  %v3233_v55 = vrot.slane %v3232_v58, 4 }
 0x2d8   :  { %v3225_v22 = vadd.f32 %v3224_v59, %v3223_v26  ;;  %v3216_v23 = vadd.f32 %v3215_v20, %v3214_v19 }
 0x2d9   :  { %v3208_v60 = vrot.slane %v3207_v21, 2  ;;  %v3234_v61 = vadd.f32 %v3233_v55, %v3232_v58 }
 0x2da   :  { %v3226_v9 = vrot.slane %v3225_v22, 2  ;;  %v3217_v29 = vrot.slane %v3216_v23, 2 }
 0x2db   :  { %v3209_v30 = vadd.f32 %v3208_v60, %v3207_v21  ;;  %v3235_v62 = vrot.slane %v3234_v61, 2 }
 0x2dc   :  { %v3227_v10 = vadd.f32 %v3226_v9, %v3225_v22  ;;  %v3218_v12 = vadd.f32 %v3217_v29, %v3216_v23 }
 0x2dd   :  { %v3210_v56 = vrot.slane %v3209_v30, 1  ;;  %v3236_v63 = vadd.f32 %v3235_v62, %v3234_v61 }
 0x2de   :  { %v3228_v33 = vrot.slane %v3227_v10, 1  ;;  %v3219_v34 = vrot.slane %v3218_v12, 1 }
 0x2df   :  { %v3211_v2 = vadd.f32 %v3210_v56, %v3209_v30  ;;  %v3237_v11 = vrot.slane %v3236_v63, 1 }
 0x2e0   :  { %v3229_v6 = vadd.f32 %v3228_v33, %v3227_v10  ;;  %v3220_v13 = vadd.f32 %v3219_v34, %v3218_v12 }
 0x2e1   :  { %v3285_v3 = vadd.f32 %v7234_v8, %v3211_v2  ;;  %v3238_v15 = vadd.f32 %v3237_v11, %v3236_v63 }
 0x2e2   :  { %v3287_v4 = vadd.f32 %v7234_v8, %v3229_v6  ;;  %v3286_v7 = vadd.f32 %v7234_v8, %v3220_v13 }
 0x2e3   :  { %v4363_v31 = vmul.f32 -1.442695, %v3285_v3  ;;  %v3288_v35 = vadd.f32 %v7234_v8, %v3238_v15 }
 0x2e4   :  { %v4365_v36 = vmul.f32 -1.442695, %v3287_v4  ;;  %v4364_v16 = vmul.f32 -1.442695, %v3286_v7 }
 0x2e5   :  { %4794 = vpow2.f32 %v4363_v31  ;;  %v4366_v1 = vmul.f32 -1.442695, %v3288_v35 }
 0x2e6   :  { %4796 = vpow2.f32 %v4365_v36 }
 0x2e7   :  { %4798 = vpow2.f32 %v4364_v16 }
 0x2e8   :  { %4800 = vpow2.f32 %v4366_v1 }
 0x2ef   :  { %v4795_v14 = vpop.eup %4794 }
 0x2f0   :  { %v4797_v47 = vpop.eup %4796  ;;  %v3349_v32 = vadd.f32 1.0, %v4795_v14 }
 0x2f1   :  { %v4799_v45 = vpop.eup %4798  ;;  %v3351_v27 = vadd.f32 1.0, %v4797_v47 }
 0x2f2   :  { %v4801_v28 = vpop.eup %4800  ;;  %4802 = vrcp.f32 %v3349_v32  ;;  %v3350_v49 = vadd.f32 1.0, %v4799_v45 }
 0x2f3   :  { %4804 = vrcp.f32 %v3351_v27  ;;  %v3352_v37 = vadd.f32 1.0, %v4801_v28 }
 0x2f4   :  { %4806 = vrcp.f32 %v3350_v49 }
 0x2f5   :  { %4808 = vrcp.f32 %v3352_v37 }
 0x2fc   :  { %v4803_v38 = vpop.eup %4802 }
 0x2fd   :  { %v4805_v24 = vpop.eup %4804 }
 0x2fe   :  { %v4807_v43 = vpop.eup %4806 }
 0x2ff   :  { %v4809_v41 = vpop.eup %4808  ;;  %v3454_v44 = vcombine.low %v4803_v38, %v4807_v43 }
 0x300   :  { %v3455_v42 = vcombine.low %v4805_v24, %v4809_v41 }
 0x301   :  { %v7354_v46 = vrot.slane %v3454_v44, %v7331_v0 }
 0x302   :  { %v7357_v39 = vrot.slane %v3455_v42, %v7331_v0 }
 0x304   :  { %v3486_v51 = vcombine.low %v7354_v46, %v7357_v39 }
 0x342   :  { %v2907_v40 = vpop.f32.mrb[48].mxu0 }
 0x343   :  { %v2909_v48 = vpop.f32.mrb[49].mxu0 }
 0x345   :  { %v3020_v50 = vpop.f32.mrb[48].mxu1 }
 0x346   :  { %v3022_v52 = vpop.f32.mrb[49].mxu1  ;;  %v2913_v25 = vpop.f32.mrb[50].mxu0 }
 0x347   :  { %v2915_v17 = vpop.f32.mrb[51].mxu0 }
 0x349   :  { %v3026_v53 = vpop.f32.mrb[50].mxu1 }
 0x34a   :  { %v3028_v5 = vpop.f32.mrb[51].mxu1  ;;  %v2919_v54 = vpop.f32.mrb[52].mxu0 }
 0x34b   :  { %v2921_v18 = vpop.f32.mrb[53].mxu0 }
 0x34d   :  { %v3032_v26 = vpop.f32.mrb[52].mxu1 }
 0x34e   :  { %v3034_v19 = vpop.f32.mrb[53].mxu1  ;;  %v2925_v57 = vpop.f32.mrb[54].mxu0 }
 0x34f   :  { %v2927_v58 = vpop.f32.mrb[55].mxu0 }
 0x351   :  { %v3038_v59 = vpop.f32.mrb[54].mxu1 }
 0x352   :  { %v3040_v20 = vpop.f32.mrb[55].mxu1  ;;  %v2931_v21 = vpop.f32.mrb[56].mxu0 }
 0x353   :  { %v3079_v55 = vmul.f32 %v2931_v21, %v2907_v40  ;;  %v2933_v22 = vpop.f32.mrb[57].mxu0 }
 0x354   :  { %v3080_v23 = vmul.f32 %v2933_v22, %v2909_v48 }
 0x355   :  { %v3044_v60 = vpop.f32.mrb[56].mxu1 }
 0x356   :  { %v3081_v61 = vmul.f32 %v3044_v60, %v3020_v50  ;;  %v3046_v9 = vpop.f32.mrb[57].mxu1  ;;  %v2937_v29 = vpop.f32.mrb[58].mxu0 }
 0x357   :  { %v3082_v30 = vmul.f32 %v3046_v9, %v3022_v52  ;;  %v3095_v62 = vmul.f32 %v2937_v29, %v2913_v25  ;;  %v2939_v10 = vpop.f32.mrb[59].mxu0 }
 0x358   :  { %v3096_v12 = vmul.f32 %v2939_v10, %v2915_v17 }
 0x359   :  { %v3239_v56 = vadd.f32 %v3095_v62, %v3079_v55  ;;  %v3050_v63 = vpop.f32.mrb[58].mxu1 }
 0x35a   :  { %v3097_v33 = vmul.f32 %v3050_v63, %v3026_v53  ;;  %v3248_v34 = vadd.f32 %v3096_v12, %v3080_v23  ;;  %v3052_v2 = vpop.f32.mrb[59].mxu1  ;;  %v2943_v11 = vpop.f32.mrb[60].mxu0 }
 0x35b   :  { %v3098_v6 = vmul.f32 %v3052_v2, %v3028_v5  ;;  %v3111_v13 = vmul.f32 %v2943_v11, %v2919_v54  ;;  %v2945_v3 = vpop.f32.mrb[61].mxu0 }
 0x35c   :  { %v3257_v15 = vadd.f32 %v3097_v33, %v3081_v61  ;;  %v3112_v4 = vmul.f32 %v2945_v3, %v2921_v18 }
 0x35d   :  { %v3266_v7 = vadd.f32 %v3098_v6, %v3082_v30  ;;  %v3240_v31 = vadd.f32 %v3239_v56, %v3111_v13  ;;  %v3056_v35 = vpop.f32.mrb[60].mxu1 }
 0x35e   :  { %v3113_v36 = vmul.f32 %v3056_v35, %v3032_v26  ;;  %v3249_v16 = vadd.f32 %v3248_v34, %v3112_v4  ;;  %v3058_v1 = vpop.f32.mrb[61].mxu1  ;;  %v2949_v14 = vpop.f32.mrb[62].mxu0 }
 0x35f   :  { %v3114_v47 = vmul.f32 %v3058_v1, %v3034_v19  ;;  %v3127_v32 = vmul.f32 %v2949_v14, %v2925_v57  ;;  %v2951_v45 = vpop.f32.mrb[63].mxu0 }
 0x360   :  { %v3258_v27 = vadd.f32 %v3257_v15, %v3113_v36  ;;  %v3128_v28 = vmul.f32 %v2951_v45, %v2927_v58 }
 0x361   :  { %v3267_v49 = vadd.f32 %v3266_v7, %v3114_v47  ;;  %v3241_v37 = vadd.f32 %v3240_v31, %v3127_v32  ;;  %v3062_v38 = vpop.f32.mrb[62].mxu1 }
 0x362   :  { %v3129_v24 = vmul.f32 %v3062_v38, %v3038_v59  ;;  %v3250_v43 = vadd.f32 %v3249_v16, %v3128_v28  ;;  %v3064_v41 = vpop.f32.mrb[63].mxu1 }
 0x363   :  { %v3242_v44 = vrot.slane %v3241_v37, 4  ;;  %v3130_v42 = vmul.f32 %v3064_v41, %v3040_v20 }
 0x364   :  { %v3259_v40 = vadd.f32 %v3258_v27, %v3129_v24  ;;  %v3251_v48 = vrot.slane %v3250_v43, 4  ;;  %v3494_v27 = vrot.slane %v3486_v51, %v7331_v0 }
 0x365   :  { %v3243_v50 = vadd.f32 %v3242_v44, %v3241_v37  ;;  %v3268_v52 = vadd.f32 %v3267_v49, %v3130_v42 }
 0x366   :  { %v3260_v25 = vrot.slane %v3259_v40, 4  ;;  %v3252_v17 = vadd.f32 %v3251_v48, %v3250_v43 }
 0x367   :  { %v3244_v53 = vrot.slane %v3243_v50, 2  ;;  %v3269_v5 = vrot.slane %v3268_v52, 4 }
 0x368   :  { %v3261_v54 = vadd.f32 %v3260_v25, %v3259_v40  ;;  %v3253_v18 = vrot.slane %v3252_v17, 2 }
 0x369   :  { %v3245_v26 = vadd.f32 %v3244_v53, %v3243_v50  ;;  %v3270_v19 = vadd.f32 %v3269_v5, %v3268_v52 }
 0x36a   :  { %v3262_v57 = vrot.slane %v3261_v54, 2  ;;  %v3254_v58 = vadd.f32 %v3253_v18, %v3252_v17 }
 0x36b   :  { %v3246_v21 = vrot.slane %v3245_v26, 1  ;;  %v3271_v59 = vrot.slane %v3270_v19, 2 }
 0x36c   :  { %v3263_v55 = vadd.f32 %v3262_v57, %v3261_v54  ;;  %v3255_v22 = vrot.slane %v3254_v58, 1 }
 0x36d   :  { %v3247_v23 = vadd.f32 %v3246_v21, %v3245_v26  ;;  %v3272_v20 = vadd.f32 %v3271_v59, %v3270_v19 }
 0x36e   :  { %v3264_v60 = vrot.slane %v3263_v55, 1  ;;  %v3256_v61 = vadd.f32 %v3255_v22, %v3254_v58 }
 0x36f   :  { %v3289_v9 = vadd.f32 %v7234_v8, %v3247_v23  ;;  %v3273_v29 = vrot.slane %v3272_v20, 1 }
 0x370   :  { %v3265_v30 = vadd.f32 %v3264_v60, %v3263_v55  ;;  %v3290_v62 = vadd.f32 %v7234_v8, %v3256_v61 }
 0x371   :  { %v4367_v10 = vmul.f32 -1.442695, %v3289_v9  ;;  %v3274_v12 = vadd.f32 %v3273_v29, %v3272_v20 }
 0x372   :  { %v3291_v56 = vadd.f32 %v7234_v8, %v3265_v30  ;;  %v4368_v63 = vmul.f32 -1.442695, %v3290_v62 }
 0x373   :  { %4810 = vpow2.f32 %v4367_v10  ;;  %v3292_v33 = vadd.f32 %v7234_v8, %v3274_v12 }
 0x374   :  { %v4369_v34 = vmul.f32 -1.442695, %v3291_v56  ;;  %4812 = vpow2.f32 %v4368_v63 }
 0x375   :  { %v4370_v2 = vmul.f32 -1.442695, %v3292_v33 }
 0x376   :  { %4814 = vpow2.f32 %v4369_v34 }
 0x377   :  { %4816 = vpow2.f32 %v4370_v2 }
 0x37d   :  { %v4811_v11 = vpop.eup %4810 }
 0x37e   :  { %v4813_v6 = vpop.eup %4812  ;;  %v3353_v13 = vadd.f32 1.0, %v4811_v11 }
 0x37f   :  { %v3354_v3 = vadd.f32 1.0, %v4813_v6 }
 0x380   :  { %v4815_v15 = vpop.eup %4814  ;;  %4818 = vrcp.f32 %v3353_v13 }
 0x381   :  { %v4817_v4 = vpop.eup %4816  ;;  %v3355_v7 = vadd.f32 1.0, %v4815_v15  ;;  %4820 = vrcp.f32 %v3354_v3 }
 0x382   :  { %v3356_v31 = vadd.f32 1.0, %v4817_v4 }
 0x383   :  { %4822 = vrcp.f32 %v3355_v7 }
 0x384   :  { %4824 = vrcp.f32 %v3356_v31 }
 0x38a   :  { %v4819_v35 = vpop.eup %4818 }
 0x38b   :  { %v4821_v36 = vpop.eup %4820 }
 0x38c   :  { %v3456_v8 = vcombine.low %v4819_v35, %v4821_v36 }
 0x38d   :  { %v4823_v16 = vpop.eup %4822 }
 0x38e   :  { %v4825_v1 = vpop.eup %4824  ;;  %v3478_v47 = vrot.slane %v3456_v8, %v7331_v0 }
 0x38f   :  { %v3457_v14 = vcombine.low %v4823_v16, %v4825_v1 }
 0x391   :  { %v3485_v32 = vrot.slane %v3457_v14, %v7331_v0 }
 0x393   :  { %v3487_v45 = vcombine.low %v3478_v47, %v3485_v32 }
 0x395   :  { %v3501_v28 = vrot.slane %v3487_v45, %v7331_v0 }
 0x397   :  { %v3502_v49 = vcombine.low %v3494_v27, %v3501_v28 }
 0x399   :  { %3506 = vst [vmem:[#allocation8 + $0x8] sm:$0xff] %v3502_v49 }
 0x39a   :  { %4912 = shalt.err (!%p4909_p6)
}
 0x39b   :  { %s4913_s15 = scalar_lea.hbm %s7387_s3, 256 }
 0x39c   :  { %p4914_p7 = scmp.ne.s32.totalorder %s7387_s3, %s4913_s15  ;;  %p4917_p8 = scmp.lt.u32.totalorder %s4913_s15, %s7387_s3 }
 0x39e   :  { %p4919_p9 = pnand %p4917_p8, %p4914_p7 }
 0x3a0   :  { %4922 = shalt.err (!%p4919_p9)
}
 0x3a1   :  { %3516 = dma.vmem_to_hbm [thread:$0]  %s3514_s11, 256, %s7387_s3, [#allocation5]  }
 0x3a2   :  { %4927 = dma.done.wait [#allocation5], 256  }
 0x3a3   :  { %4928 = vsyncadd [#allocation5], 4294967040 }
 0x3a4   :  { %3520 = vsyncpa [#allocation4], 1 }
 0x3a5   :  { %3521 = vsyncpa [#allocation7], 1 }
 0x3a6   :  { %3522 = vsyncpa [#allocation5], 1 }

// kernel: tpu_custom_call.1
= control target key start
LH: loop header
LB: loop body
LE: loop exit
PB: predicated region body
PF: predicated region fallthrough
CT: control target
= control target key end

     0   :  { %9 = vsyncpa [#allocation4], 0  ;;  %s7384_s0 = inlined_call_operand.hbm [shape: s32[2,2048], index: 0, kind: input, shape index: {}]   ;;  %s7385_s1 = inlined_call_operand.hbm [shape: f32[64,192], index: 1, kind: input, shape index: {}]   ;;  %s7386_s2 = inlined_call_operand.<no memory space> [shape: f32[1,1], index: 2, kind: input, shape index: {}]   ;;  %s7387_s3 = inlined_call_operand.hbm [shape: f32[1,2048], index: 3, kind: output, shape index: {}]  }
   0x1   :  { %10 = vsyncpa [#allocation7], 0 }
   0x2   :  { %11 = vsyncpa [#allocation5], 0  ;;  %s4929_s12 = smov [#allocation3]   ;;  %s4930_s14 = smov [#allocation6]  }
   0x3   :  { %s18_s13 = sshll.u32 %s4929_s12, 4  ;;  %s27_s15 = sshll.u32 %s4930_s14, 4  ;;  %s19_s13 = int_to_ptr.vmem [resolvable:$true] %s18_s13  ;;  %s4956_s15 = int_to_ptr.vmem [resolvable:$true] %s27_s15 }
   0x4   :  { %s4857_s18 = scalar_lea.hbm %s7384_s0, 512 }
   0x5   :  { %p4858_p0 = scmp.ne.s32.totalorder %s7384_s0, %s4857_s18  ;;  %p4861_p1 = scmp.lt.u32.totalorder %s4857_s18, %s7384_s0 }
   0x7   :  { %p4863_p2 = pnand %p4861_p1, %p4858_p0 }
   0x9   :  { %4866 = shalt.err (!%p4863_p2)
}
   0xa   :  { %s4867_s23 = scalar_lea.vmem %s19_s13, 512  ;;  %p4872_p4 = scmp.lt.s32.totalorder %s19_s13, %s19_s13 }
   0xb   :  { %p4868_p3 = scmp.ne.s32.totalorder %s19_s13, %s4867_s23  ;;  %p4873_p5 = scmp.lt.s32.totalorder %s4867_s23, %s4867_s23 }
   0xd   :  { %p4874_p6 = por %p4873_p5, %p4872_p4 }
   0xf   :  { %p4875_p7 = pnand %p4874_p6, %p4868_p3 }
  0x11   :  { %4878 = shalt.err (!%p4875_p7)
}
  0x12   :  { %21 = dma.hbm_to_vmem [thread:$0]  %s7384_s0, 512, %s19_s13, [#allocation4]  }
  0x13   :  { %s4879_s28 = scalar_lea.hbm %s7385_s1, 2048 }
  0x14   :  { %p4880_p8 = scmp.ne.s32.totalorder %s7385_s1, %s4879_s28  ;;  %p4883_p9 = scmp.lt.u32.totalorder %s4879_s28, %s7385_s1 }
  0x16   :  { %p4885_p10 = pnand %p4883_p9, %p4880_p8 }
  0x18   :  { %4888 = shalt.err (!%p4885_p10)
}
  0x19   :  { %s4889_s6 = scalar_lea.vmem %s4956_s15, 2048  ;;  %p4894_p12 = scmp.lt.s32.totalorder %s4956_s15, %s4956_s15 }
  0x1a   :  { %p4890_p11 = scmp.ne.s32.totalorder %s4956_s15, %s4889_s6  ;;  %p4895_p13 = scmp.lt.s32.totalorder %s4889_s6, %s4889_s6 }
  0x1c   :  { %p4896_p0 = por %p4895_p13, %p4894_p12 }
  0x1e   :  { %p4897_p1 = pnand %p4896_p0, %p4890_p11 }
  0x20   :  { %4900 = shalt.err (!%p4897_p1)
}
  0x21   :  { %s4931_s0 = smov 256   ;;  %s4932_s7 = smov 16  }
  0x22   :  { %33 = dma.hbm_to_vmem [thread:$0]  %s7385_s1, 2048, %s4956_s15, [#allocation7], %s4931_s0, %s4931_s0, %s4932_s7  }
  0x23   :  { %4923 = dma.done.wait [#allocation4], 512  }
  0x24   :  { %4924 = vsyncadd [#allocation4], 4294966784 }
  0x25   :  { %4925 = dma.done.wait [#allocation7], 2048  }
  0x26   :  { %4926 = vsyncadd [#allocation7], 4294965248  ;;  %v49_v0 = vlaneseq  ;;  %v5001_v6 = vld [vmem:[#allocation3] ss:$2 sm:$0xff]  ;;  %v5003_v7 = vld [vmem:[#allocation3 + $0x1] ss:$2 sm:$0xff] }
  0x27   :  { %v4933_v17 = vmov 1.0|1.0   ;;  %v5191_v24 = vld [vmem:[#allocation6 + $0x8] sm:$0xff]  ;;  %v5568_v48 = vld [vmem:[#allocation6] sm:$0xff]  ;;  %v5581_v50 = vld [vmem:[#allocation6 + $0x18] sm:$0xff] }
  0x28   :  { %v4987_v1 = vshrl.u32 %v49_v0, 7  ;;  %v5603_v53 = vld [vmem:[#allocation6 + $0x10] sm:$0xff]  ;;  %v5613_v56 = vld [vmem:[#allocation6 + $0x28] sm:$0xff]  ;;  %v5630_v57 = vld [vmem:[#allocation6 + $0x20] sm:$0xff] }
  0x29   :  { %v5637_v58 = vld [vmem:[#allocation6 + $0x38] sm:$0xff]  ;;  %v5658_v59 = vld [vmem:[#allocation6 + $0x30] sm:$0xff]  ;;  %v5661_v60 = vld [vmem:[#allocation6 + $0x48] sm:$0xff] }
  0x2a   :  { %v4990_v2 = vsub.s32 1, %v4987_v1  ;;  %v4993_v3 = vsub.s32 3, %v4987_v1  ;;  %v4996_v4 = vsub.s32 0, %v4987_v1  ;;  %v4999_v5 = vadd.s32 8, %v4987_v1  ;;  %v5677_v61 = vld [vmem:[#allocation6 + $0x40] sm:$0xff]  ;;  %v5685_v62 = vld [vmem:[#allocation6 + $0x58] sm:$0xff] }
  0x2b   :  { %v5030_v14 = vsub.s32 2, %v4987_v1  ;;  %v5066_v18 = vadd.s32 16, %v4987_v1  ;;  %v5074_v19 = vadd.s32 24, %v4987_v1  ;;  %v5108_v20 = vadd.s32 32, %v4987_v1  ;;  %v5706_v63 = vld [vmem:[#allocation6 + $0x50] sm:$0xff]  ;;  %v5710_v0 = vld [vmem:[#allocation6 + $0x68] sm:$0xff] }
  0x2c   :  { %v5007_v8 = vrot.slane %v5001_v6, %v4990_v2  ;;  %v5011_v9 = vrot.slane %v5003_v7, %v4990_v2  ;;  %v5015_v10 = vrot.slane %v5001_v6, %v4993_v3  ;;  %v5019_v11 = vrot.slane %v5003_v7, %v4993_v3 }
  0x2d   :  { %v5023_v12 = vrot.slane %v5001_v6, %v4996_v4  ;;  %v5027_v13 = vrot.slane %v5003_v7, %v4996_v4  ;;  %v5050_v15 = vrot.slane %v5001_v6, %v5030_v14  ;;  %v5054_v16 = vrot.slane %v5003_v7, %v5030_v14 }
  0x2e   :  { %vm139_vm0 = vcmp.eq.s32.totalorder %v4987_v1, %v5007_v8  ;;  %vm155_vm1 = vcmp.eq.s32.totalorder %v4999_v5, %v5007_v8  ;;  %vm587_vm2 = vcmp.eq.s32.totalorder %v4987_v1, %v5011_v9  ;;  %vm603_vm3 = vcmp.eq.s32.totalorder %v4999_v5, %v5011_v9 }
  0x2f   :  { %vm971_vm4 = vmor %vm139_vm0, %vm587_vm2  ;;  %vm141_vm5 = vcmp.eq.s32.totalorder %v4987_v1, %v5015_v10  ;;  %vm589_vm6 = vcmp.eq.s32.totalorder %v4987_v1, %v5019_v11  ;;  %vm157_vm8 = vcmp.eq.s32.totalorder %v4999_v5, %v5015_v10  ;;  %vm605_vm9 = vcmp.eq.s32.totalorder %v4999_v5, %v5019_v11 }
  0x30   :  { %vm987_vm7 = vmor %vm155_vm1, %vm603_vm3  ;;  %vm138_vm12 = vcmp.eq.s32.totalorder %v4987_v1, %v5023_v12  ;;  %vm586_vm13 = vcmp.eq.s32.totalorder %v4987_v1, %v5027_v13  ;;  %vm154_vm15 = vcmp.eq.s32.totalorder %v4999_v5, %v5023_v12  ;;  %vm602_vm0 = vcmp.eq.s32.totalorder %v4999_v5, %v5027_v13 }
  0x31   :  { %vm4371_vm10 = vmpackc.low %vm987_vm7, %vm971_vm4  ;;  %vm140_vm3 = vcmp.eq.s32.totalorder %v4987_v1, %v5050_v15  ;;  %vm588_vm4 = vcmp.eq.s32.totalorder %v4987_v1, %v5054_v16  ;;  %vm604_vm7 = vcmp.eq.s32.totalorder %v4999_v5, %v5054_v16  ;;  %v5116_v21 = vadd.s32 40, %v4987_v1 }
  0x32   :  { %4372 = vmatprep.subr.msk.bf16.mxu0 %vm4371_vm10, %v4933_v17  ;;  %vm973_vm11 = vmor %vm141_vm5, %vm589_vm6  ;;  %vm156_vm6 = vcmp.eq.s32.totalorder %v4999_v5, %v5050_v15  ;;  %vm171_vm10 = vcmp.eq.s32.totalorder %v5066_v18, %v5007_v8  ;;  %v5150_v22 = vadd.s32 48, %v4987_v1  ;;  %v5158_v23 = vadd.s32 56, %v4987_v1 }
  0x33   :  { %vm989_vm14 = vmor %vm157_vm8, %vm605_vm9  ;;  %v5194_v25 = vadd.s32 64, %v4987_v1  ;;  %v5202_v26 = vadd.s32 72, %v4987_v1  ;;  %v5240_v27 = vadd.s32 80, %v4987_v1  ;;  %v5248_v28 = vadd.s32 88, %v4987_v1 }
  0x34   :  { %vm4419_vm1 = vmpackc.low %vm989_vm14, %vm973_vm11  ;;  %vm619_vm11 = vcmp.eq.s32.totalorder %v5066_v18, %v5011_v9  ;;  %vm635_vm14 = vcmp.eq.s32.totalorder %v5074_v19, %v5011_v9  ;;  %v5282_v29 = vadd.s32 96, %v4987_v1  ;;  %v5290_v30 = vadd.s32 104, %v4987_v1 }
  0x35   :  { %4420 = vmatprep.subr.msk.bf16.mxu1 %vm4419_vm1, %v4933_v17  ;;  %vm970_vm2 = vmor %vm138_vm12, %vm586_vm13  ;;  %vm187_vm13 = vcmp.eq.s32.totalorder %v5074_v19, %v5007_v8  ;;  %vm173_vm1 = vcmp.eq.s32.totalorder %v5066_v18, %v5015_v10  ;;  %v5324_v31 = vadd.s32 112, %v4987_v1  ;;  %v5332_v32 = vadd.s32 120, %v4987_v1 }
  0x36   :  { %vm986_vm5 = vmor %vm154_vm15, %vm602_vm0  ;;  %v5366_v33 = vadd.s32 128, %v4987_v1  ;;  %v5374_v34 = vadd.s32 136, %v4987_v1  ;;  %v5408_v35 = vadd.s32 144, %v4987_v1  ;;  %v5416_v36 = vadd.s32 152, %v4987_v1 }
  0x37   :  { %vm4373_vm8 = vmpackc.low %vm986_vm5, %vm970_vm2  ;;  %vm621_vm2 = vcmp.eq.s32.totalorder %v5066_v18, %v5019_v11  ;;  %vm637_vm5 = vcmp.eq.s32.totalorder %v5074_v19, %v5019_v11  ;;  %v5450_v37 = vadd.s32 160, %v4987_v1  ;;  %v5458_v38 = vadd.s32 168, %v4987_v1 }
  0x38   :  { %4374 = vmatpush1.bf16.msk.msra.mxu0 %vm4373_vm8, %v4933_v17  ;;  %vm972_vm9 = vmor %vm140_vm3, %vm588_vm4  ;;  %vm189_vm4 = vcmp.eq.s32.totalorder %v5074_v19, %v5015_v10  ;;  %vm170_vm8 = vcmp.eq.s32.totalorder %v5066_v18, %v5023_v12  ;;  %v5492_v39 = vadd.s32 176, %v4987_v1  ;;  %v5500_v40 = vadd.s32 184, %v4987_v1 }
  0x39   :  { %vm988_vm12 = vmor %vm156_vm6, %vm604_vm7  ;;  %v5525_v41 = vsub.s32 5, %v4987_v1  ;;  %v5537_v42 = vsub.s32 7, %v4987_v1  ;;  %v5557_v45 = vsub.s32 4, %v4987_v1  ;;  %v5579_v49 = vsub.s32 6, %v4987_v1 }
  0x3a   :  { %vm4421_vm15 = vmpackc.low %vm988_vm12, %vm972_vm9  ;;  %vm618_vm9 = vcmp.eq.s32.totalorder %v5066_v18, %v5027_v13  ;;  %vm634_vm12 = vcmp.eq.s32.totalorder %v5074_v19, %v5027_v13 }
  0x3b   :  { %4422 = vmatpush1.bf16.msk.msra.mxu1 %vm4421_vm15, %v4933_v17  ;;  %vm1003_vm0 = vmor %vm171_vm10, %vm619_vm11  ;;  %vm186_vm11 = vcmp.eq.s32.totalorder %v5074_v19, %v5023_v12  ;;  %vm172_vm15 = vcmp.eq.s32.totalorder %v5066_v18, %v5050_v15  ;;  %v5541_v43 = vrot.slane %v5001_v6, %v5525_v41  ;;  %v5545_v44 = vrot.slane %v5003_v7, %v5525_v41 }
  0x3c   :  { %vm1019_vm3 = vmor %vm187_vm13, %vm635_vm14  ;;  %v5561_v46 = vrot.slane %v5001_v6, %v5537_v42  ;;  %v5565_v47 = vrot.slane %v5003_v7, %v5537_v42  ;;  %v5585_v51 = vrot.slane %v5001_v6, %v5557_v45  ;;  %v5589_v52 = vrot.slane %v5003_v7, %v5557_v45 }
  0x3d   :  { %vm4375_vm6 = vmpackc.low %vm1019_vm3, %vm1003_vm0  ;;  %vm620_vm0 = vcmp.eq.s32.totalorder %v5066_v18, %v5054_v16  ;;  %vm636_vm3 = vcmp.eq.s32.totalorder %v5074_v19, %v5054_v16  ;;  %v5607_v54 = vrot.slane %v5001_v6, %v5579_v49  ;;  %v5611_v55 = vrot.slane %v5003_v7, %v5579_v49  ;;  %v5725_v6 = vld [vmem:[#allocation6 + $0x60] sm:$0xff]  ;;  %v5738_v7 = vld [vmem:[#allocation6 + $0x78] sm:$0xff] }
  0x3e   :  { %4376 = vmatprep.subr.msk.bf16.mxu0 %vm4375_vm6, %v4933_v17  ;;  %vm1005_vm7 = vmor %vm173_vm1, %vm621_vm2  ;;  %vm188_vm2 = vcmp.eq.s32.totalorder %v5074_v19, %v5050_v15  ;;  %vm203_vm6 = vcmp.eq.s32.totalorder %v5108_v20, %v5007_v8 }
  0x3f   :  { %vm1021_vm10 = vmor %vm189_vm4, %vm637_vm5 }
  0x40   :  { %vm4423_vm13 = vmpackc.low %vm1021_vm10, %vm1005_vm7  ;;  %vm651_vm7 = vcmp.eq.s32.totalorder %v5108_v20, %v5011_v9  ;;  %vm667_vm10 = vcmp.eq.s32.totalorder %v5116_v21, %v5011_v9 }
  0x41   :  { %4424 = vmatprep.subr.msk.bf16.mxu1 %vm4423_vm13, %v4933_v17  ;;  %vm1002_vm14 = vmor %vm170_vm8, %vm618_vm9  ;;  %vm219_vm9 = vcmp.eq.s32.totalorder %v5116_v21, %v5007_v8  ;;  %vm205_vm13 = vcmp.eq.s32.totalorder %v5108_v20, %v5015_v10 }
  0x42   :  { %vm1018_vm1 = vmor %vm186_vm11, %vm634_vm12 }
  0x43   :  { %vm4377_vm4 = vmpackc.low %vm1018_vm1, %vm1002_vm14  ;;  %vm653_vm14 = vcmp.eq.s32.totalorder %v5108_v20, %v5019_v11  ;;  %vm669_vm1 = vcmp.eq.s32.totalorder %v5116_v21, %v5019_v11 }
  0x44   :  { %4378 = vmatpush1.bf16.msk.msra.mxu0 %vm4377_vm4, %v4933_v17  ;;  %vm1004_vm5 = vmor %vm172_vm15, %vm620_vm0  ;;  %vm221_vm0 = vcmp.eq.s32.totalorder %v5116_v21, %v5015_v10  ;;  %vm202_vm4 = vcmp.eq.s32.totalorder %v5108_v20, %v5023_v12 }
  0x45   :  { %vm1020_vm8 = vmor %vm188_vm2, %vm636_vm3 }
  0x46   :  { %vm4425_vm11 = vmpackc.low %vm1020_vm8, %vm1004_vm5  ;;  %vm650_vm5 = vcmp.eq.s32.totalorder %v5108_v20, %v5027_v13  ;;  %vm666_vm8 = vcmp.eq.s32.totalorder %v5116_v21, %v5027_v13 }
  0x47   :  { %4426 = vmatpush1.bf16.msk.msra.mxu1 %vm4425_vm11, %v4933_v17  ;;  %vm1035_vm12 = vmor %vm203_vm6, %vm651_vm7  ;;  %vm218_vm7 = vcmp.eq.s32.totalorder %v5116_v21, %v5023_v12  ;;  %vm204_vm11 = vcmp.eq.s32.totalorder %v5108_v20, %v5050_v15 }
  0x48   :  { %vm1051_vm15 = vmor %vm219_vm9, %vm667_vm10 }
  0x49   :  { %vm4379_vm2 = vmpackc.low %vm1051_vm15, %vm1035_vm12  ;;  %vm652_vm12 = vcmp.eq.s32.totalorder %v5108_v20, %v5054_v16  ;;  %vm668_vm15 = vcmp.eq.s32.totalorder %v5116_v21, %v5054_v16 }
  0x4a   :  { %4380 = vmatprep.subr.msk.bf16.mxu0 %vm4379_vm2, %v4933_v17  ;;  %vm1037_vm3 = vmor %vm205_vm13, %vm653_vm14  ;;  %vm220_vm14 = vcmp.eq.s32.totalorder %v5116_v21, %v5050_v15  ;;  %vm235_vm2 = vcmp.eq.s32.totalorder %v5150_v22, %v5007_v8 }
  0x4b   :  { %vm1053_vm6 = vmor %vm221_vm0, %vm669_vm1 }
  0x4c   :  { %vm4427_vm9 = vmpackc.low %vm1053_vm6, %vm1037_vm3  ;;  %vm683_vm3 = vcmp.eq.s32.totalorder %v5150_v22, %v5011_v9  ;;  %vm699_vm6 = vcmp.eq.s32.totalorder %v5158_v23, %v5011_v9 }
  0x4d   :  { %4428 = vmatprep.subr.msk.bf16.mxu1 %vm4427_vm9, %v4933_v17  ;;  %vm1034_vm10 = vmor %vm202_vm4, %vm650_vm5  ;;  %vm251_vm5 = vcmp.eq.s32.totalorder %v5158_v23, %v5007_v8  ;;  %vm237_vm9 = vcmp.eq.s32.totalorder %v5150_v22, %v5015_v10 }
  0x4e   :  { %vm1050_vm13 = vmor %vm218_vm7, %vm666_vm8 }
  0x4f   :  { %vm4381_vm0 = vmpackc.low %vm1050_vm13, %vm1034_vm10  ;;  %vm685_vm10 = vcmp.eq.s32.totalorder %v5150_v22, %v5019_v11  ;;  %vm701_vm13 = vcmp.eq.s32.totalorder %v5158_v23, %v5019_v11 }
  0x50   :  { %4382 = vmatpush1.bf16.msk.msra.mxu0 %vm4381_vm0, %v4933_v17  ;;  %vm1036_vm1 = vmor %vm204_vm11, %vm652_vm12  ;;  %vm253_vm12 = vcmp.eq.s32.totalorder %v5158_v23, %v5015_v10  ;;  %vm234_vm0 = vcmp.eq.s32.totalorder %v5150_v22, %v5023_v12 }
  0x51   :  { %vm1052_vm4 = vmor %vm220_vm14, %vm668_vm15 }
  0x52   :  { %vm4429_vm7 = vmpackc.low %vm1052_vm4, %vm1036_vm1  ;;  %vm682_vm1 = vcmp.eq.s32.totalorder %v5150_v22, %v5027_v13  ;;  %vm698_vm4 = vcmp.eq.s32.totalorder %v5158_v23, %v5027_v13 }
  0x53   :  { %4430 = vmatpush1.bf16.msk.msra.mxu1 %vm4429_vm7, %v4933_v17  ;;  %vm1067_vm8 = vmor %vm235_vm2, %vm683_vm3  ;;  %vm250_vm3 = vcmp.eq.s32.totalorder %v5158_v23, %v5023_v12  ;;  %vm236_vm7 = vcmp.eq.s32.totalorder %v5150_v22, %v5050_v15 }
  0x54   :  { %vm1083_vm11 = vmor %vm251_vm5, %vm699_vm6 }
  0x55   :  { %vm4383_vm14 = vmpackc.low %vm1083_vm11, %vm1067_vm8  ;;  %vm684_vm8 = vcmp.eq.s32.totalorder %v5150_v22, %v5054_v16  ;;  %vm252_vm11 = vcmp.eq.s32.totalorder %v5158_v23, %v5050_v15 }
  0x56   :  { %4384 = vmatprep.subr.msk.bf16.mxu0 %vm4383_vm14, %v4933_v17  ;;  %vm1069_vm15 = vmor %vm237_vm9, %vm685_vm10  ;;  %vm2138_vm9 = vcmask 523264  }
  0x57   :  { %vm1085_vm2 = vmor %vm253_vm12, %vm701_vm13  ;;  %vm700_vm12 = vcmp.eq.s32.totalorder %v5158_v23, %v5054_v16  ;;  %3955 = vmatprep.mubr.msk.f32.mxu0 %vm2138_vm9, %v5191_v24  ;;  %4011 = vmatprep.mubr.msk.f32.mxu1 %vm2138_vm9, %v5191_v24 }
  0x58   :  { %vm4431_vm5 = vmpackc.low %vm1085_vm2, %vm1069_vm15  ;;  %vm267_vm15 = vcmp.eq.s32.totalorder %v5194_v25, %v5007_v8  ;;  %vm283_vm2 = vcmp.eq.s32.totalorder %v5202_v26, %v5007_v8 }
  0x59   :  { %4432 = vmatprep.subr.msk.bf16.mxu1 %vm4431_vm5, %v4933_v17  ;;  %vm1066_vm6 = vmor %vm234_vm0, %vm682_vm1  ;;  %vm715_vm0 = vcmp.eq.s32.totalorder %v5194_v25, %v5011_v9 }
  0x5a   :  { %vm1082_vm10 = vmor %vm250_vm3, %vm698_vm4  ;;  %vm731_vm3 = vcmp.eq.s32.totalorder %v5202_v26, %v5011_v9 }
  0x5b   :  { %vm4385_vm13 = vmpackc.low %vm1082_vm10, %vm1066_vm6  ;;  %vm269_vm6 = vcmp.eq.s32.totalorder %v5194_v25, %v5015_v10  ;;  %vm285_vm10 = vcmp.eq.s32.totalorder %v5202_v26, %v5015_v10 }
  0x5c   :  { %4386 = vmatpush1.bf16.msk.msra.mxu0 %vm4385_vm13, %v4933_v17  ;;  %vm1068_vm14 = vmor %vm236_vm7, %vm684_vm8  ;;  %vm717_vm7 = vcmp.eq.s32.totalorder %v5194_v25, %v5019_v11 }
  0x5d   :  { %vm1084_vm1 = vmor %vm252_vm11, %vm700_vm12  ;;  %vm733_vm11 = vcmp.eq.s32.totalorder %v5202_v26, %v5019_v11 }
  0x5e   :  { %vm4433_vm4 = vmpackc.low %vm1084_vm1, %vm1068_vm14  ;;  %vm266_vm14 = vcmp.eq.s32.totalorder %v5194_v25, %v5023_v12  ;;  %vm282_vm1 = vcmp.eq.s32.totalorder %v5202_v26, %v5023_v12 }
  0x5f   :  { %4434 = vmatpush1.bf16.msk.msra.mxu1 %vm4433_vm4, %v4933_v17  ;;  %vm1099_vm5 = vmor %vm267_vm15, %vm715_vm0  ;;  %vm714_vm15 = vcmp.eq.s32.totalorder %v5194_v25, %v5027_v13 }
  0x60   :  { %vm1115_vm8 = vmor %vm283_vm2, %vm731_vm3  ;;  %vm730_vm2 = vcmp.eq.s32.totalorder %v5202_v26, %v5027_v13 }
  0x61   :  { %vm4387_vm12 = vmpackc.low %vm1115_vm8, %vm1099_vm5  ;;  %vm268_vm5 = vcmp.eq.s32.totalorder %v5194_v25, %v5050_v15  ;;  %vm284_vm8 = vcmp.eq.s32.totalorder %v5202_v26, %v5050_v15 }
  0x62   :  { %4388 = vmatprep.subr.msk.bf16.mxu0 %vm4387_vm12, %v4933_v17  ;;  %vm1101_vm13 = vmor %vm269_vm6, %vm717_vm7  ;;  %vm716_vm6 = vcmp.eq.s32.totalorder %v5194_v25, %v5054_v16 }
  0x63   :  { %vm1117_vm0 = vmor %vm285_vm10, %vm733_vm11  ;;  %vm732_vm10 = vcmp.eq.s32.totalorder %v5202_v26, %v5054_v16 }
  0x64   :  { %vm4435_vm3 = vmpackc.low %vm1117_vm0, %vm1101_vm13  ;;  %vm299_vm13 = vcmp.eq.s32.totalorder %v5240_v27, %v5007_v8  ;;  %vm315_vm0 = vcmp.eq.s32.totalorder %v5248_v28, %v5007_v8 }
  0x65   :  { %4436 = vmatprep.subr.msk.bf16.mxu1 %vm4435_vm3, %v4933_v17  ;;  %vm1098_vm4 = vmor %vm266_vm14, %vm714_vm15  ;;  %vm747_vm14 = vcmp.eq.s32.totalorder %v5240_v27, %v5011_v9 }
  0x66   :  { %vm1114_vm7 = vmor %vm282_vm1, %vm730_vm2  ;;  %vm763_vm1 = vcmp.eq.s32.totalorder %v5248_v28, %v5011_v9 }
  0x67   :  { %vm4389_vm11 = vmpackc.low %vm1114_vm7, %vm1098_vm4  ;;  %vm301_vm4 = vcmp.eq.s32.totalorder %v5240_v27, %v5015_v10  ;;  %vm317_vm7 = vcmp.eq.s32.totalorder %v5248_v28, %v5015_v10 }
  0x68   :  { %4390 = vmatpush1.bf16.msk.msra.mxu0 %vm4389_vm11, %v4933_v17  ;;  %vm1100_vm12 = vmor %vm268_vm5, %vm716_vm6  ;;  %vm749_vm5 = vcmp.eq.s32.totalorder %v5240_v27, %v5019_v11 }
  0x69   :  { %vm1116_vm15 = vmor %vm284_vm8, %vm732_vm10  ;;  %vm765_vm8 = vcmp.eq.s32.totalorder %v5248_v28, %v5019_v11 }
  0x6a   :  { %vm4437_vm2 = vmpackc.low %vm1116_vm15, %vm1100_vm12  ;;  %vm298_vm12 = vcmp.eq.s32.totalorder %v5240_v27, %v5023_v12  ;;  %vm314_vm15 = vcmp.eq.s32.totalorder %v5248_v28, %v5023_v12 }
  0x6b   :  { %4438 = vmatpush1.bf16.msk.msra.mxu1 %vm4437_vm2, %v4933_v17  ;;  %vm1131_vm3 = vmor %vm299_vm13, %vm747_vm14  ;;  %vm746_vm13 = vcmp.eq.s32.totalorder %v5240_v27, %v5027_v13 }
  0x6c   :  { %vm1147_vm6 = vmor %vm315_vm0, %vm763_vm1  ;;  %vm762_vm0 = vcmp.eq.s32.totalorder %v5248_v28, %v5027_v13 }
  0x6d   :  { %vm4391_vm10 = vmpackc.low %vm1147_vm6, %vm1131_vm3  ;;  %vm300_vm3 = vcmp.eq.s32.totalorder %v5240_v27, %v5050_v15  ;;  %vm316_vm6 = vcmp.eq.s32.totalorder %v5248_v28, %v5050_v15 }
  0x6e   :  { %4392 = vmatprep.subr.msk.bf16.mxu0 %vm4391_vm10, %v4933_v17  ;;  %vm1133_vm11 = vmor %vm301_vm4, %vm749_vm5  ;;  %vm748_vm4 = vcmp.eq.s32.totalorder %v5240_v27, %v5054_v16 }
  0x6f   :  { %vm1149_vm14 = vmor %vm317_vm7, %vm765_vm8  ;;  %vm764_vm7 = vcmp.eq.s32.totalorder %v5248_v28, %v5054_v16 }
  0x70   :  { %vm4439_vm1 = vmpackc.low %vm1149_vm14, %vm1133_vm11  ;;  %vm331_vm11 = vcmp.eq.s32.totalorder %v5282_v29, %v5007_v8  ;;  %vm347_vm14 = vcmp.eq.s32.totalorder %v5290_v30, %v5007_v8 }
  0x71   :  { %4440 = vmatprep.subr.msk.bf16.mxu1 %vm4439_vm1, %v4933_v17  ;;  %vm1130_vm2 = vmor %vm298_vm12, %vm746_vm13  ;;  %vm779_vm12 = vcmp.eq.s32.totalorder %v5282_v29, %v5011_v9 }
  0x72   :  { %vm1146_vm5 = vmor %vm314_vm15, %vm762_vm0  ;;  %vm795_vm15 = vcmp.eq.s32.totalorder %v5290_v30, %v5011_v9 }
  0x73   :  { %vm4393_vm8 = vmpackc.low %vm1146_vm5, %vm1130_vm2  ;;  %vm333_vm2 = vcmp.eq.s32.totalorder %v5282_v29, %v5015_v10  ;;  %vm349_vm5 = vcmp.eq.s32.totalorder %v5290_v30, %v5015_v10 }
  0x74   :  { %4394 = vmatpush1.bf16.msk.msra.mxu0 %vm4393_vm8, %v4933_v17  ;;  %vm1132_vm10 = vmor %vm300_vm3, %vm748_vm4  ;;  %vm781_vm3 = vcmp.eq.s32.totalorder %v5282_v29, %v5019_v11 }
  0x75   :  { %vm1148_vm13 = vmor %vm316_vm6, %vm764_vm7  ;;  %vm797_vm6 = vcmp.eq.s32.totalorder %v5290_v30, %v5019_v11 }
  0x76   :  { %vm4441_vm0 = vmpackc.low %vm1148_vm13, %vm1132_vm10  ;;  %vm330_vm10 = vcmp.eq.s32.totalorder %v5282_v29, %v5023_v12  ;;  %vm346_vm13 = vcmp.eq.s32.totalorder %v5290_v30, %v5023_v12 }
  0x77   :  { %4442 = vmatpush1.bf16.msk.msra.mxu1 %vm4441_vm0, %v4933_v17  ;;  %vm1163_vm1 = vmor %vm331_vm11, %vm779_vm12  ;;  %vm778_vm11 = vcmp.eq.s32.totalorder %v5282_v29, %v5027_v13 }
  0x78   :  { %vm1179_vm4 = vmor %vm347_vm14, %vm795_vm15  ;;  %vm794_vm14 = vcmp.eq.s32.totalorder %v5290_v30, %v5027_v13 }
  0x79   :  { %vm4395_vm7 = vmpackc.low %vm1179_vm4, %vm1163_vm1  ;;  %vm332_vm1 = vcmp.eq.s32.totalorder %v5282_v29, %v5050_v15  ;;  %vm348_vm4 = vcmp.eq.s32.totalorder %v5290_v30, %v5050_v15 }
  0x7a   :  { %4396 = vmatprep.subr.msk.bf16.mxu0 %vm4395_vm7, %v4933_v17  ;;  %vm1165_vm8 = vmor %vm333_vm2, %vm781_vm3  ;;  %vm780_vm2 = vcmp.eq.s32.totalorder %v5282_v29, %v5054_v16 }
  0x7b   :  { %vm1181_vm12 = vmor %vm349_vm5, %vm797_vm6  ;;  %vm796_vm5 = vcmp.eq.s32.totalorder %v5290_v30, %v5054_v16 }
  0x7c   :  { %vm4443_vm15 = vmpackc.low %vm1181_vm12, %vm1165_vm8  ;;  %vm363_vm8 = vcmp.eq.s32.totalorder %v5324_v31, %v5007_v8  ;;  %vm379_vm12 = vcmp.eq.s32.totalorder %v5332_v32, %v5007_v8 }
  0x7d   :  { %4444 = vmatprep.subr.msk.bf16.mxu1 %vm4443_vm15, %v4933_v17  ;;  %vm1162_vm0 = vmor %vm330_vm10, %vm778_vm11  ;;  %vm811_vm10 = vcmp.eq.s32.totalorder %v5324_v31, %v5011_v9 }
  0x7e   :  { %vm1178_vm3 = vmor %vm346_vm13, %vm794_vm14  ;;  %vm827_vm13 = vcmp.eq.s32.totalorder %v5332_v32, %v5011_v9 }
  0x7f   :  { %vm4397_vm6 = vmpackc.low %vm1178_vm3, %vm1162_vm0  ;;  %vm365_vm0 = vcmp.eq.s32.totalorder %v5324_v31, %v5015_v10  ;;  %vm381_vm3 = vcmp.eq.s32.totalorder %v5332_v32, %v5015_v10 }
  0x80   :  { %4398 = vmatpush1.bf16.msk.msra.mxu0 %vm4397_vm6, %v4933_v17  ;;  %vm1164_vm7 = vmor %vm332_vm1, %vm780_vm2  ;;  %vm813_vm1 = vcmp.eq.s32.totalorder %v5324_v31, %v5019_v11 }
  0x81   :  { %vm1180_vm11 = vmor %vm348_vm4, %vm796_vm5  ;;  %vm829_vm4 = vcmp.eq.s32.totalorder %v5332_v32, %v5019_v11 }
  0x82   :  { %vm4445_vm14 = vmpackc.low %vm1180_vm11, %vm1164_vm7  ;;  %vm362_vm7 = vcmp.eq.s32.totalorder %v5324_v31, %v5023_v12  ;;  %vm378_vm11 = vcmp.eq.s32.totalorder %v5332_v32, %v5023_v12 }
  0x83   :  { %4446 = vmatpush1.bf16.msk.msra.mxu1 %vm4445_vm14, %v4933_v17  ;;  %vm1195_vm15 = vmor %vm363_vm8, %vm811_vm10  ;;  %vm810_vm8 = vcmp.eq.s32.totalorder %v5324_v31, %v5027_v13 }
  0x84   :  { %vm1211_vm2 = vmor %vm379_vm12, %vm827_vm13  ;;  %vm826_vm12 = vcmp.eq.s32.totalorder %v5332_v32, %v5027_v13 }
  0x85   :  { %vm4399_vm5 = vmpackc.low %vm1211_vm2, %vm1195_vm15  ;;  %vm364_vm15 = vcmp.eq.s32.totalorder %v5324_v31, %v5050_v15  ;;  %vm380_vm2 = vcmp.eq.s32.totalorder %v5332_v32, %v5050_v15 }
  0x86   :  { %4400 = vmatprep.subr.msk.bf16.mxu0 %vm4399_vm5, %v4933_v17  ;;  %vm1197_vm6 = vmor %vm365_vm0, %vm813_vm1  ;;  %vm812_vm0 = vcmp.eq.s32.totalorder %v5324_v31, %v5054_v16 }
  0x87   :  { %vm1213_vm10 = vmor %vm381_vm3, %vm829_vm4  ;;  %vm828_vm3 = vcmp.eq.s32.totalorder %v5332_v32, %v5054_v16 }
  0x88   :  { %vm4447_vm13 = vmpackc.low %vm1213_vm10, %vm1197_vm6  ;;  %vm395_vm6 = vcmp.eq.s32.totalorder %v5366_v33, %v5007_v8  ;;  %vm411_vm10 = vcmp.eq.s32.totalorder %v5374_v34, %v5007_v8 }
  0x89   :  { %4448 = vmatprep.subr.msk.bf16.mxu1 %vm4447_vm13, %v4933_v17  ;;  %vm1194_vm14 = vmor %vm362_vm7, %vm810_vm8  ;;  %vm843_vm7 = vcmp.eq.s32.totalorder %v5366_v33, %v5011_v9 }
  0x8a   :  { %vm1210_vm1 = vmor %vm378_vm11, %vm826_vm12  ;;  %vm859_vm11 = vcmp.eq.s32.totalorder %v5374_v34, %v5011_v9 }
  0x8b   :  { %vm4401_vm4 = vmpackc.low %vm1210_vm1, %vm1194_vm14  ;;  %vm397_vm14 = vcmp.eq.s32.totalorder %v5366_v33, %v5015_v10  ;;  %vm413_vm1 = vcmp.eq.s32.totalorder %v5374_v34, %v5015_v10 }
  0x8c   :  { %4402 = vmatpush1.bf16.msk.msra.mxu0 %vm4401_vm4, %v4933_v17  ;;  %vm1196_vm5 = vmor %vm364_vm15, %vm812_vm0  ;;  %vm845_vm15 = vcmp.eq.s32.totalorder %v5366_v33, %v5019_v11 }
  0x8d   :  { %vm1212_vm8 = vmor %vm380_vm2, %vm828_vm3  ;;  %vm861_vm2 = vcmp.eq.s32.totalorder %v5374_v34, %v5019_v11 }
  0x8e   :  { %vm4449_vm12 = vmpackc.low %vm1212_vm8, %vm1196_vm5  ;;  %vm394_vm5 = vcmp.eq.s32.totalorder %v5366_v33, %v5023_v12  ;;  %vm410_vm8 = vcmp.eq.s32.totalorder %v5374_v34, %v5023_v12 }
  0x8f   :  { %4450 = vmatpush1.bf16.msk.msra.mxu1 %vm4449_vm12, %v4933_v17  ;;  %vm1227_vm13 = vmor %vm395_vm6, %vm843_vm7  ;;  %vm842_vm6 = vcmp.eq.s32.totalorder %v5366_v33, %v5027_v13 }
  0x90   :  { %vm1243_vm0 = vmor %vm411_vm10, %vm859_vm11  ;;  %vm858_vm10 = vcmp.eq.s32.totalorder %v5374_v34, %v5027_v13 }
  0x91   :  { %vm4403_vm3 = vmpackc.low %vm1243_vm0, %vm1227_vm13  ;;  %vm396_vm13 = vcmp.eq.s32.totalorder %v5366_v33, %v5050_v15  ;;  %vm412_vm0 = vcmp.eq.s32.totalorder %v5374_v34, %v5050_v15 }
  0x92   :  { %4404 = vmatprep.subr.msk.bf16.mxu0 %vm4403_vm3, %v4933_v17  ;;  %vm1229_vm4 = vmor %vm397_vm14, %vm845_vm15  ;;  %vm844_vm14 = vcmp.eq.s32.totalorder %v5366_v33, %v5054_v16 }
  0x93   :  { %vm1245_vm7 = vmor %vm413_vm1, %vm861_vm2  ;;  %vm860_vm1 = vcmp.eq.s32.totalorder %v5374_v34, %v5054_v16 }
  0x94   :  { %vm4451_vm11 = vmpackc.low %vm1245_vm7, %vm1229_vm4  ;;  %vm427_vm4 = vcmp.eq.s32.totalorder %v5408_v35, %v5007_v8  ;;  %vm443_vm7 = vcmp.eq.s32.totalorder %v5416_v36, %v5007_v8 }
  0x95   :  { %4452 = vmatprep.subr.msk.bf16.mxu1 %vm4451_vm11, %v4933_v17  ;;  %vm1226_vm12 = vmor %vm394_vm5, %vm842_vm6  ;;  %vm875_vm5 = vcmp.eq.s32.totalorder %v5408_v35, %v5011_v9 }
  0x96   :  { %vm1242_vm15 = vmor %vm410_vm8, %vm858_vm10  ;;  %vm891_vm8 = vcmp.eq.s32.totalorder %v5416_v36, %v5011_v9 }
  0x97   :  { %vm4405_vm2 = vmpackc.low %vm1242_vm15, %vm1226_vm12  ;;  %vm429_vm12 = vcmp.eq.s32.totalorder %v5408_v35, %v5015_v10  ;;  %vm445_vm15 = vcmp.eq.s32.totalorder %v5416_v36, %v5015_v10 }
  0x98   :  { %4406 = vmatpush1.bf16.msk.msra.mxu0 %vm4405_vm2, %v4933_v17  ;;  %vm1228_vm3 = vmor %vm396_vm13, %vm844_vm14  ;;  %vm877_vm13 = vcmp.eq.s32.totalorder %v5408_v35, %v5019_v11 }
  0x99   :  { %vm1244_vm6 = vmor %vm412_vm0, %vm860_vm1  ;;  %vm893_vm0 = vcmp.eq.s32.totalorder %v5416_v36, %v5019_v11 }
  0x9a   :  { %vm4453_vm10 = vmpackc.low %vm1244_vm6, %vm1228_vm3  ;;  %vm426_vm3 = vcmp.eq.s32.totalorder %v5408_v35, %v5023_v12  ;;  %vm442_vm6 = vcmp.eq.s32.totalorder %v5416_v36, %v5023_v12 }
  0x9b   :  { %4454 = vmatpush1.bf16.msk.msra.mxu1 %vm4453_vm10, %v4933_v17  ;;  %vm1259_vm11 = vmor %vm427_vm4, %vm875_vm5  ;;  %vm874_vm4 = vcmp.eq.s32.totalorder %v5408_v35, %v5027_v13 }
  0x9c   :  { %vm1275_vm14 = vmor %vm443_vm7, %vm891_vm8  ;;  %vm890_vm7 = vcmp.eq.s32.totalorder %v5416_v36, %v5027_v13 }
  0x9d   :  { %vm4407_vm1 = vmpackc.low %vm1275_vm14, %vm1259_vm11  ;;  %vm428_vm11 = vcmp.eq.s32.totalorder %v5408_v35, %v5050_v15  ;;  %vm444_vm14 = vcmp.eq.s32.totalorder %v5416_v36, %v5050_v15 }
  0x9e   :  { %4408 = vmatprep.subr.msk.bf16.mxu0 %vm4407_vm1, %v4933_v17  ;;  %vm1261_vm2 = vmor %vm429_vm12, %vm877_vm13  ;;  %vm876_vm12 = vcmp.eq.s32.totalorder %v5408_v35, %v5054_v16 }
  0x9f   :  { %vm1277_vm5 = vmor %vm445_vm15, %vm893_vm0  ;;  %vm892_vm15 = vcmp.eq.s32.totalorder %v5416_v36, %v5054_v16 }
  0xa0   :  { %vm4455_vm8 = vmpackc.low %vm1277_vm5, %vm1261_vm2  ;;  %vm459_vm2 = vcmp.eq.s32.totalorder %v5450_v37, %v5007_v8  ;;  %vm475_vm5 = vcmp.eq.s32.totalorder %v5458_v38, %v5007_v8 }
  0xa1   :  { %4456 = vmatprep.subr.msk.bf16.mxu1 %vm4455_vm8, %v4933_v17  ;;  %vm1258_vm10 = vmor %vm426_vm3, %vm874_vm4  ;;  %vm907_vm3 = vcmp.eq.s32.totalorder %v5450_v37, %v5011_v9 }
  0xa2   :  { %vm1274_vm13 = vmor %vm442_vm6, %vm890_vm7  ;;  %vm923_vm6 = vcmp.eq.s32.totalorder %v5458_v38, %v5011_v9 }
  0xa3   :  { %vm4409_vm0 = vmpackc.low %vm1274_vm13, %vm1258_vm10  ;;  %vm461_vm10 = vcmp.eq.s32.totalorder %v5450_v37, %v5015_v10  ;;  %vm477_vm13 = vcmp.eq.s32.totalorder %v5458_v38, %v5015_v10 }
  0xa4   :  { %4410 = vmatpush1.bf16.msk.msra.mxu0 %vm4409_vm0, %v4933_v17  ;;  %vm1260_vm1 = vmor %vm428_vm11, %vm876_vm12  ;;  %vm909_vm11 = vcmp.eq.s32.totalorder %v5450_v37, %v5019_v11 }
  0xa5   :  { %vm1276_vm4 = vmor %vm444_vm14, %vm892_vm15  ;;  %vm925_vm14 = vcmp.eq.s32.totalorder %v5458_v38, %v5019_v11 }
  0xa6   :  { %vm4457_vm7 = vmpackc.low %vm1276_vm4, %vm1260_vm1  ;;  %vm458_vm1 = vcmp.eq.s32.totalorder %v5450_v37, %v5023_v12  ;;  %vm474_vm4 = vcmp.eq.s32.totalorder %v5458_v38, %v5023_v12 }
  0xa7   :  { %4458 = vmatpush1.bf16.msk.msra.mxu1 %vm4457_vm7, %v4933_v17  ;;  %vm1291_vm8 = vmor %vm459_vm2, %vm907_vm3  ;;  %vm906_vm2 = vcmp.eq.s32.totalorder %v5450_v37, %v5027_v13 }
  0xa8   :  { %vm1307_vm12 = vmor %vm475_vm5, %vm923_vm6  ;;  %vm922_vm5 = vcmp.eq.s32.totalorder %v5458_v38, %v5027_v13 }
  0xa9   :  { %vm4411_vm15 = vmpackc.low %vm1307_vm12, %vm1291_vm8  ;;  %vm460_vm8 = vcmp.eq.s32.totalorder %v5450_v37, %v5050_v15  ;;  %vm476_vm12 = vcmp.eq.s32.totalorder %v5458_v38, %v5050_v15 }
  0xaa   :  { %4412 = vmatprep.subr.msk.bf16.mxu0 %vm4411_vm15, %v4933_v17  ;;  %vm1293_vm0 = vmor %vm461_vm10, %vm909_vm11  ;;  %vm908_vm10 = vcmp.eq.s32.totalorder %v5450_v37, %v5054_v16 }
  0xab   :  { %vm1309_vm3 = vmor %vm477_vm13, %vm925_vm14  ;;  %vm924_vm13 = vcmp.eq.s32.totalorder %v5458_v38, %v5054_v16 }
  0xac   :  { %vm4459_vm6 = vmpackc.low %vm1309_vm3, %vm1293_vm0  ;;  %vm491_vm0 = vcmp.eq.s32.totalorder %v5492_v39, %v5007_v8  ;;  %vm507_vm3 = vcmp.eq.s32.totalorder %v5500_v40, %v5007_v8  ;;  %v5747_v8 = vld [vmem:[#allocation6 + $0x70] sm:$0xff] }
  0xad   :  { %4460 = vmatprep.subr.msk.bf16.mxu1 %vm4459_vm6, %v4933_v17  ;;  %vm1290_vm7 = vmor %vm458_vm1, %vm906_vm2  ;;  %vm939_vm1 = vcmp.eq.s32.totalorder %v5492_v39, %v5011_v9 }
  0xae   :  { %vm1306_vm11 = vmor %vm474_vm4, %vm922_vm5  ;;  %vm955_vm4 = vcmp.eq.s32.totalorder %v5500_v40, %v5011_v9  ;;  %v6078_v9 = vld [vmem:[#allocation3 + $0x10] ss:$2 sm:$0xff] }
  0xaf   :  { %vm4413_vm14 = vmpackc.low %vm1306_vm11, %vm1290_vm7  ;;  %vm493_vm7 = vcmp.eq.s32.totalorder %v5492_v39, %v5015_v10  ;;  %vm509_vm11 = vcmp.eq.s32.totalorder %v5500_v40, %v5015_v10  ;;  %v6080_v10 = vld [vmem:[#allocation3 + $0x11] ss:$2 sm:$0xff] }
  0xb0   :  { %4414 = vmatpush1.bf16.msk.msra.mxu0 %vm4413_vm14, %v4933_v17  ;;  %vm1292_vm15 = vmor %vm460_vm8, %vm908_vm10  ;;  %vm941_vm8 = vcmp.eq.s32.totalorder %v5492_v39, %v5019_v11 }
  0xb1   :  { %vm1308_vm2 = vmor %vm476_vm12, %vm924_vm13  ;;  %vm957_vm12 = vcmp.eq.s32.totalorder %v5500_v40, %v5019_v11  ;;  %v6093_v11 = vrot.slane %v6078_v9, %v4990_v2 }
  0xb2   :  { %vm4461_vm5 = vmpackc.low %vm1308_vm2, %vm1292_vm15  ;;  %vm490_vm15 = vcmp.eq.s32.totalorder %v5492_v39, %v5023_v12  ;;  %vm506_vm2 = vcmp.eq.s32.totalorder %v5500_v40, %v5023_v12  ;;  %v6097_v12 = vrot.slane %v6080_v10, %v4990_v2  ;;  %v6110_v2 = vrot.slane %v6078_v9, %v4993_v3 }
  0xb3   :  { %4462 = vmatpush1.bf16.msk.msra.mxu1 %vm4461_vm5, %v4933_v17  ;;  %vm1323_vm6 = vmor %vm491_vm0, %vm939_vm1  ;;  %vm938_vm0 = vcmp.eq.s32.totalorder %v5492_v39, %v5027_v13 }
  0xb4   :  { %vm1339_vm10 = vmor %vm507_vm3, %vm955_vm4  ;;  %vm954_vm3 = vcmp.eq.s32.totalorder %v5500_v40, %v5027_v13  ;;  %v6114_v13 = vrot.slane %v6080_v10, %v4993_v3  ;;  %v6127_v3 = vrot.slane %v6078_v9, %v4996_v4 }
  0xb5   :  { %vm4415_vm13 = vmpackc.low %vm1339_vm10, %vm1323_vm6  ;;  %vm492_vm6 = vcmp.eq.s32.totalorder %v5492_v39, %v5050_v15  ;;  %vm508_vm10 = vcmp.eq.s32.totalorder %v5500_v40, %v5050_v15  ;;  %v6131_v15 = vrot.slane %v6080_v10, %v4996_v4  ;;  %v6147_v4 = vrot.slane %v6078_v9, %v5030_v14 }
  0xb6   :  { %4416 = vmatprep.subr.msk.bf16.mxu0 %vm4415_vm13, %v4933_v17  ;;  %vm1325_vm14 = vmor %vm493_vm7, %vm941_vm8  ;;  %vm940_vm7 = vcmp.eq.s32.totalorder %v5492_v39, %v5054_v16 }
  0xb7   :  { %vm1341_vm1 = vmor %vm509_vm11, %vm957_vm12  ;;  %vm956_vm11 = vcmp.eq.s32.totalorder %v5500_v40, %v5054_v16  ;;  %v6151_v16 = vrot.slane %v6080_v10, %v5030_v14  ;;  %v6284_v14 = vld [vmem:[#allocation6 + $0x8] sm:$0xff] }
  0xb8   :  { %vm4463_vm4 = vmpackc.low %vm1341_vm1, %vm1325_vm14  ;;  %vm143_vm14 = vcmp.eq.s32.totalorder %v4987_v1, %v5541_v43  ;;  %vm159_vm1 = vcmp.eq.s32.totalorder %v4999_v5, %v5541_v43 }
  0xb9   :  { %4464 = vmatprep.subr.msk.bf16.mxu1 %vm4463_vm4, %v4933_v17  ;;  %vm1322_vm5 = vmor %vm490_vm15, %vm938_vm0  ;;  %vm591_vm15 = vcmp.eq.s32.totalorder %v4987_v1, %v5545_v44 }
  0xba   :  { %vm1338_vm8 = vmor %vm506_vm2, %vm954_vm3  ;;  %vm607_vm2 = vcmp.eq.s32.totalorder %v4999_v5, %v5545_v44 }
  0xbb   :  { %vm4417_vm12 = vmpackc.low %vm1338_vm8, %vm1322_vm5  ;;  %vm145_vm5 = vcmp.eq.s32.totalorder %v4987_v1, %v5561_v46  ;;  %vm161_vm8 = vcmp.eq.s32.totalorder %v4999_v5, %v5561_v46 }
  0xbc   :  { %4418 = vmatpush1.bf16.msk.msra.mxu0 %vm4417_vm12, %v4933_v17  ;;  %vm1324_vm13 = vmor %vm492_vm6, %vm940_vm7  ;;  %vm593_vm6 = vcmp.eq.s32.totalorder %v4987_v1, %v5565_v47 }
  0xbd   :  { %vm1340_vm0 = vmor %vm508_vm10, %vm956_vm11  ;;  %vm609_vm10 = vcmp.eq.s32.totalorder %v4999_v5, %v5565_v47 }
  0xbe   :  { %vm4465_vm3 = vmpackc.low %vm1340_vm0, %vm1324_vm13  ;;  %vm142_vm13 = vcmp.eq.s32.totalorder %v4987_v1, %v5585_v51  ;;  %vm158_vm0 = vcmp.eq.s32.totalorder %v4999_v5, %v5585_v51 }
  0xbf   :  { %4466 = vmatpush1.bf16.msk.msra.mxu1 %vm4465_vm3, %v4933_v17  ;;  %2228 = vmatmul.mubr.f32.vlgmr.msra.gmra.mrb[0].mxu0 %v5568_v48  ;;  %vm975_vm4 = vmor %vm143_vm14, %vm591_vm15  ;;  %vm590_vm14 = vcmp.eq.s32.totalorder %v4987_v1, %v5589_v52 }
  0xc0   :  { %vm991_vm7 = vmor %vm159_vm1, %vm607_vm2  ;;  %3956 = vmatprep.mubr.msk.f32.mxu0 %vm2138_vm9, %v5581_v50  ;;  %vm606_vm1 = vcmp.eq.s32.totalorder %v4999_v5, %v5589_v52 }
  0xc1   :  { %vm4467_vm11 = vmpackc.low %vm991_vm7, %vm975_vm4  ;;  %vm144_vm4 = vcmp.eq.s32.totalorder %v4987_v1, %v5607_v54  ;;  %vm160_vm7 = vcmp.eq.s32.totalorder %v4999_v5, %v5607_v54 }
  0xc2   :  { %2341 = vmatmul.mubr.f32.vlgmr.msra.gmra.mrb[0].mxu1 %v5568_v48  ;;  %4468 = vmatprep.subr.msk.bf16.mxu0 %vm4467_vm11, %v4933_v17  ;;  %vm977_vm12 = vmor %vm145_vm5, %vm593_vm6  ;;  %vm592_vm5 = vcmp.eq.s32.totalorder %v4987_v1, %v5611_v55 }
  0xc3   :  { %vm993_vm15 = vmor %vm161_vm8, %vm609_vm10  ;;  %4012 = vmatprep.mubr.msk.f32.mxu1 %vm2138_vm9, %v5581_v50  ;;  %2234 = vmatmul.mubr.f32.gmra.mrb[2].mxu0 %v5603_v53  ;;  %vm608_vm8 = vcmp.eq.s32.totalorder %v4999_v5, %v5611_v55 }
  0xc4   :  { %vm4515_vm2 = vmpackc.low %vm993_vm15, %vm977_vm12  ;;  %3957 = vmatprep.mubr.msk.f32.mxu0 %vm2138_vm9, %v5613_v56  ;;  %vm175_vm12 = vcmp.eq.s32.totalorder %v5066_v18, %v5541_v43  ;;  %vm191_vm15 = vcmp.eq.s32.totalorder %v5074_v19, %v5541_v43 }
  0xc5   :  { %4516 = vmatprep.subr.msk.bf16.mxu1 %vm4515_vm2, %v4933_v17  ;;  %vm974_vm3 = vmor %vm142_vm13, %vm590_vm14  ;;  %vm623_vm13 = vcmp.eq.s32.totalorder %v5066_v18, %v5545_v44 }
  0xc6   :  { %vm990_vm6 = vmor %vm158_vm0, %vm606_vm1  ;;  %2347 = vmatmul.mubr.f32.gmra.mrb[2].mxu1 %v5603_v53  ;;  %vm639_vm0 = vcmp.eq.s32.totalorder %v5074_v19, %v5545_v44 }
  0xc7   :  { %vm4469_vm10 = vmpackc.low %vm990_vm6, %vm974_vm3  ;;  %4013 = vmatprep.mubr.msk.f32.mxu1 %vm2138_vm9, %v5613_v56  ;;  %2240 = vmatmul.mubr.f32.gmra.mrb[4].mxu0 %v5630_v57  ;;  %vm177_vm3 = vcmp.eq.s32.totalorder %v5066_v18, %v5561_v46  ;;  %vm193_vm6 = vcmp.eq.s32.totalorder %v5074_v19, %v5561_v46 }
  0xc8   :  { %4470 = vmatpush1.bf16.msk.msra.mxu0 %vm4469_vm10, %v4933_v17  ;;  %vm976_vm11 = vmor %vm144_vm4, %vm592_vm5  ;;  %3958 = vmatprep.mubr.msk.f32.mxu0 %vm2138_vm9, %v5637_v58  ;;  %vm625_vm4 = vcmp.eq.s32.totalorder %v5066_v18, %v5565_v47 }
  0xc9   :  { %vm992_vm14 = vmor %vm160_vm7, %vm608_vm8  ;;  %vm641_vm7 = vcmp.eq.s32.totalorder %v5074_v19, %v5565_v47 }
  0xca   :  { %vm4517_vm1 = vmpackc.low %vm992_vm14, %vm976_vm11  ;;  %2353 = vmatmul.mubr.f32.gmra.mrb[4].mxu1 %v5630_v57  ;;  %vm174_vm11 = vcmp.eq.s32.totalorder %v5066_v18, %v5585_v51  ;;  %vm190_vm14 = vcmp.eq.s32.totalorder %v5074_v19, %v5585_v51 }
  0xcb   :  { %4518 = vmatpush1.bf16.msk.msra.mxu1 %vm4517_vm1, %v4933_v17  ;;  %vm1007_vm2 = vmor %vm175_vm12, %vm623_vm13  ;;  %4014 = vmatprep.mubr.msk.f32.mxu1 %vm2138_vm9, %v5637_v58  ;;  %vm622_vm12 = vcmp.eq.s32.totalorder %v5066_v18, %v5589_v52 }
  0xcc   :  { %vm1023_vm5 = vmor %vm191_vm15, %vm639_vm0  ;;  %2246 = vmatmul.mubr.f32.gmra.mrb[6].mxu0 %v5658_v59  ;;  %vm638_vm15 = vcmp.eq.s32.totalorder %v5074_v19, %v5589_v52 }
  0xcd   :  { %vm4471_vm8 = vmpackc.low %vm1023_vm5, %vm1007_vm2  ;;  %3959 = vmatprep.mubr.msk.f32.mxu0 %vm2138_vm9, %v5661_v60  ;;  %vm176_vm2 = vcmp.eq.s32.totalorder %v5066_v18, %v5607_v54  ;;  %vm192_vm5 = vcmp.eq.s32.totalorder %v5074_v19, %v5607_v54 }
  0xce   :  { %4472 = vmatprep.subr.msk.bf16.mxu0 %vm4471_vm8, %v4933_v17  ;;  %vm1009_vm10 = vmor %vm177_vm3, %vm625_vm4  ;;  %2359 = vmatmul.mubr.f32.gmra.mrb[6].mxu1 %v5658_v59  ;;  %vm624_vm3 = vcmp.eq.s32.totalorder %v5066_v18, %v5611_v55 }
  0xcf   :  { %vm1025_vm13 = vmor %vm193_vm6, %vm641_vm7  ;;  %4015 = vmatprep.mubr.msk.f32.mxu1 %vm2138_vm9, %v5661_v60  ;;  %vm640_vm6 = vcmp.eq.s32.totalorder %v5074_v19, %v5611_v55 }
  0xd0   :  { %vm4519_vm0 = vmpackc.low %vm1025_vm13, %vm1009_vm10  ;;  %2252 = vmatmul.mubr.f32.gmra.mrb[8].mxu0 %v5677_v61  ;;  %vm207_vm10 = vcmp.eq.s32.totalorder %v5108_v20, %v5541_v43  ;;  %vm223_vm13 = vcmp.eq.s32.totalorder %v5116_v21, %v5541_v43 }
  0xd1   :  { %4520 = vmatprep.subr.msk.bf16.mxu1 %vm4519_vm0, %v4933_v17  ;;  %vm1006_vm1 = vmor %vm174_vm11, %vm622_vm12  ;;  %3960 = vmatprep.mubr.msk.f32.mxu0 %vm2138_vm9, %v5685_v62  ;;  %vm655_vm11 = vcmp.eq.s32.totalorder %v5108_v20, %v5545_v44 }
  0xd2   :  { %vm1022_vm4 = vmor %vm190_vm14, %vm638_vm15  ;;  %2365 = vmatmul.mubr.f32.gmra.mrb[8].mxu1 %v5677_v61  ;;  %vm671_vm14 = vcmp.eq.s32.totalorder %v5116_v21, %v5545_v44 }
  0xd3   :  { %vm4473_vm7 = vmpackc.low %vm1022_vm4, %vm1006_vm1  ;;  %4016 = vmatprep.mubr.msk.f32.mxu1 %vm2138_vm9, %v5685_v62  ;;  %vm209_vm1 = vcmp.eq.s32.totalorder %v5108_v20, %v5561_v46  ;;  %vm225_vm4 = vcmp.eq.s32.totalorder %v5116_v21, %v5561_v46 }
  0xd4   :  { %4474 = vmatpush1.bf16.msk.msra.mxu0 %vm4473_vm7, %v4933_v17  ;;  %vm1008_vm8 = vmor %vm176_vm2, %vm624_vm3  ;;  %vm657_vm2 = vcmp.eq.s32.totalorder %v5108_v20, %v5565_v47 }
  0xd5   :  { %vm1024_vm12 = vmor %vm192_vm5, %vm640_vm6  ;;  %2258 = vmatmul.mubr.f32.gmra.mrb[10].mxu0 %v5706_v63  ;;  %vm673_vm5 = vcmp.eq.s32.totalorder %v5116_v21, %v5565_v47 }
  0xd6   :  { %vm4521_vm15 = vmpackc.low %vm1024_vm12, %vm1008_vm8  ;;  %2371 = vmatmul.mubr.f32.gmra.mrb[10].mxu1 %v5706_v63  ;;  %3961 = vmatprep.mubr.msk.f32.mxu0 %vm2138_vm9, %v5710_v0  ;;  %vm206_vm8 = vcmp.eq.s32.totalorder %v5108_v20, %v5585_v51  ;;  %vm222_vm12 = vcmp.eq.s32.totalorder %v5116_v21, %v5585_v51 }
  0xd7   :  { %4522 = vmatpush1.bf16.msk.msra.mxu1 %vm4521_vm15, %v4933_v17  ;;  %vm1039_vm0 = vmor %vm207_vm10, %vm655_vm11  ;;  %4017 = vmatprep.mubr.msk.f32.mxu1 %vm2138_vm9, %v5710_v0  ;;  %vm654_vm10 = vcmp.eq.s32.totalorder %v5108_v20, %v5589_v52 }
  0xd8   :  { %vm1055_vm3 = vmor %vm223_vm13, %vm671_vm14  ;;  %vm670_vm13 = vcmp.eq.s32.totalorder %v5116_v21, %v5589_v52 }
  0xd9   :  { %vm4475_vm6 = vmpackc.low %vm1055_vm3, %vm1039_vm0  ;;  %2264 = vmatmul.mubr.f32.gmra.mrb[12].mxu0 %v5725_v6  ;;  %vm208_vm0 = vcmp.eq.s32.totalorder %v5108_v20, %v5607_v54  ;;  %vm224_vm3 = vcmp.eq.s32.totalorder %v5116_v21, %v5607_v54 }
  0xda   :  { %4476 = vmatprep.subr.msk.bf16.mxu0 %vm4475_vm6, %v4933_v17  ;;  %vm1041_vm7 = vmor %vm209_vm1, %vm657_vm2  ;;  %2377 = vmatmul.mubr.f32.gmra.mrb[12].mxu1 %v5725_v6  ;;  %vm656_vm1 = vcmp.eq.s32.totalorder %v5108_v20, %v5611_v55 }
  0xdb   :  { %vm1057_vm11 = vmor %vm225_vm4, %vm673_vm5  ;;  %3962 = vmatprep.mubr.msk.f32.mxu0 %vm2138_vm9, %v5738_v7  ;;  %4018 = vmatprep.mubr.msk.f32.mxu1 %vm2138_vm9, %v5738_v7  ;;  %vm672_vm4 = vcmp.eq.s32.totalorder %v5116_v21, %v5611_v55 }
  0xdc   :  { %vm4523_vm14 = vmpackc.low %vm1057_vm11, %vm1041_vm7  ;;  %vm239_vm7 = vcmp.eq.s32.totalorder %v5150_v22, %v5541_v43  ;;  %vm255_vm11 = vcmp.eq.s32.totalorder %v5158_v23, %v5541_v43 }
  0xdd   :  { %4524 = vmatprep.subr.msk.bf16.mxu1 %vm4523_vm14, %v4933_v17  ;;  %vm1038_vm15 = vmor %vm206_vm8, %vm654_vm10  ;;  %2270 = vmatmul.mubr.f32.gmra.mrb[14].mxu0 %v5747_v8  ;;  %vm687_vm8 = vcmp.eq.s32.totalorder %v5150_v22, %v5545_v44 }
  0xde   :  { %vm1054_vm2 = vmor %vm222_vm12, %vm670_vm13  ;;  %2383 = vmatmul.mubr.f32.gmra.mrb[14].mxu1 %v5747_v8  ;;  %4067 = vmatprep.mubr.msk.f32.mxu0 %vm2138_vm9, %v5191_v24  ;;  %vm703_vm12 = vcmp.eq.s32.totalorder %v5158_v23, %v5545_v44 }
  0xdf   :  { %vm4477_vm5 = vmpackc.low %vm1054_vm2, %vm1038_vm15  ;;  %4123 = vmatprep.mubr.msk.f32.mxu1 %vm2138_vm9, %v5191_v24  ;;  %vm241_vm15 = vcmp.eq.s32.totalorder %v5150_v22, %v5561_v46  ;;  %vm257_vm2 = vcmp.eq.s32.totalorder %v5158_v23, %v5561_v46  ;;  %v6607_v24 = vrot.slane %v6078_v9, %v5525_v41 }
  0xe0   :  { %4478 = vmatpush1.bf16.msk.msra.mxu0 %vm4477_vm5, %v4933_v17  ;;  %vm1040_vm6 = vmor %vm208_vm0, %vm656_vm1  ;;  %vm689_vm0 = vcmp.eq.s32.totalorder %v5150_v22, %v5565_v47 }
  0xe1   :  { %vm1056_vm10 = vmor %vm224_vm3, %vm672_vm4  ;;  %vm705_vm3 = vcmp.eq.s32.totalorder %v5158_v23, %v5565_v47 }
  0xe2   :  { %vm4525_vm13 = vmpackc.low %vm1056_vm10, %vm1040_vm6  ;;  %vm238_vm6 = vcmp.eq.s32.totalorder %v5150_v22, %v5585_v51  ;;  %vm254_vm10 = vcmp.eq.s32.totalorder %v5158_v23, %v5585_v51 }
  0xe3   :  { %4526 = vmatpush1.bf16.msk.msra.mxu1 %vm4525_vm13, %v4933_v17  ;;  %vm1071_vm14 = vmor %vm239_vm7, %vm687_vm8  ;;  %vm686_vm7 = vcmp.eq.s32.totalorder %v5150_v22, %v5589_v52 }
  0xe4   :  { %vm1087_vm1 = vmor %vm255_vm11, %vm703_vm12  ;;  %vm702_vm11 = vcmp.eq.s32.totalorder %v5158_v23, %v5589_v52 }
  0xe5   :  { %vm4479_vm4 = vmpackc.low %vm1087_vm1, %vm1071_vm14  ;;  %vm240_vm14 = vcmp.eq.s32.totalorder %v5150_v22, %v5607_v54  ;;  %vm256_vm1 = vcmp.eq.s32.totalorder %v5158_v23, %v5607_v54 }
  0xe6   :  { %4480 = vmatprep.subr.msk.bf16.mxu0 %vm4479_vm4, %v4933_v17  ;;  %vm1073_vm5 = vmor %vm241_vm15, %vm689_vm0  ;;  %vm688_vm15 = vcmp.eq.s32.totalorder %v5150_v22, %v5611_v55 }
  0xe7   :  { %vm1089_vm8 = vmor %vm257_vm2, %vm705_vm3  ;;  %vm704_vm2 = vcmp.eq.s32.totalorder %v5158_v23, %v5611_v55 }
  0xe8   :  { %vm4527_vm12 = vmpackc.low %vm1089_vm8, %vm1073_vm5  ;;  %vm271_vm5 = vcmp.eq.s32.totalorder %v5194_v25, %v5541_v43  ;;  %vm287_vm8 = vcmp.eq.s32.totalorder %v5202_v26, %v5541_v43 }
  0xe9   :  { %4528 = vmatprep.subr.msk.bf16.mxu1 %vm4527_vm12, %v4933_v17  ;;  %vm1070_vm13 = vmor %vm238_vm6, %vm686_vm7  ;;  %vm719_vm6 = vcmp.eq.s32.totalorder %v5194_v25, %v5545_v44 }
  0xea   :  { %vm1086_vm0 = vmor %vm254_vm10, %vm702_vm11  ;;  %vm735_vm10 = vcmp.eq.s32.totalorder %v5202_v26, %v5545_v44 }
  0xeb   :  { %vm4481_vm3 = vmpackc.low %vm1086_vm0, %vm1070_vm13  ;;  %vm273_vm13 = vcmp.eq.s32.totalorder %v5194_v25, %v5561_v46  ;;  %vm289_vm0 = vcmp.eq.s32.totalorder %v5202_v26, %v5561_v46 }
  0xec   :  { %4482 = vmatpush1.bf16.msk.msra.mxu0 %vm4481_vm3, %v4933_v17  ;;  %vm1072_vm4 = vmor %vm240_vm14, %vm688_vm15  ;;  %vm721_vm14 = vcmp.eq.s32.totalorder %v5194_v25, %v5565_v47 }
  0xed   :  { %vm1088_vm7 = vmor %vm256_vm1, %vm704_vm2  ;;  %vm737_vm1 = vcmp.eq.s32.totalorder %v5202_v26, %v5565_v47 }
  0xee   :  { %vm4529_vm11 = vmpackc.low %vm1088_vm7, %vm1072_vm4  ;;  %vm270_vm4 = vcmp.eq.s32.totalorder %v5194_v25, %v5585_v51  ;;  %vm286_vm7 = vcmp.eq.s32.totalorder %v5202_v26, %v5585_v51 }
  0xef   :  { %4530 = vmatpush1.bf16.msk.msra.mxu1 %vm4529_vm11, %v4933_v17  ;;  %vm1103_vm12 = vmor %vm271_vm5, %vm719_vm6  ;;  %vm718_vm5 = vcmp.eq.s32.totalorder %v5194_v25, %v5589_v52 }
  0xf0   :  { %vm1119_vm15 = vmor %vm287_vm8, %vm735_vm10  ;;  %vm734_vm8 = vcmp.eq.s32.totalorder %v5202_v26, %v5589_v52 }
  0xf1   :  { %vm4483_vm2 = vmpackc.low %vm1119_vm15, %vm1103_vm12  ;;  %vm272_vm12 = vcmp.eq.s32.totalorder %v5194_v25, %v5607_v54  ;;  %vm288_vm15 = vcmp.eq.s32.totalorder %v5202_v26, %v5607_v54 }
  0xf2   :  { %4484 = vmatprep.subr.msk.bf16.mxu0 %vm4483_vm2, %v4933_v17  ;;  %vm1105_vm3 = vmor %vm273_vm13, %vm721_vm14  ;;  %vm720_vm13 = vcmp.eq.s32.totalorder %v5194_v25, %v5611_v55 }
  0xf3   :  { %vm1121_vm6 = vmor %vm289_vm0, %vm737_vm1  ;;  %vm736_vm0 = vcmp.eq.s32.totalorder %v5202_v26, %v5611_v55 }
  0xf4   :  { %vm4531_vm10 = vmpackc.low %vm1121_vm6, %vm1105_vm3  ;;  %vm303_vm3 = vcmp.eq.s32.totalorder %v5240_v27, %v5541_v43  ;;  %vm319_vm6 = vcmp.eq.s32.totalorder %v5248_v28, %v5541_v43 }
  0xf5   :  { %4532 = vmatprep.subr.msk.bf16.mxu1 %vm4531_vm10, %v4933_v17  ;;  %vm1102_vm11 = vmor %vm270_vm4, %vm718_vm5  ;;  %vm751_vm4 = vcmp.eq.s32.totalorder %v5240_v27, %v5545_v44 }
  0xf6   :  { %vm1118_vm14 = vmor %vm286_vm7, %vm734_vm8  ;;  %vm767_vm7 = vcmp.eq.s32.totalorder %v5248_v28, %v5545_v44 }
  0xf7   :  { %vm4485_vm1 = vmpackc.low %vm1118_vm14, %vm1102_vm11  ;;  %vm305_vm11 = vcmp.eq.s32.totalorder %v5240_v27, %v5561_v46  ;;  %vm321_vm14 = vcmp.eq.s32.totalorder %v5248_v28, %v5561_v46 }
  0xf8   :  { %4486 = vmatpush1.bf16.msk.msra.mxu0 %vm4485_vm1, %v4933_v17  ;;  %vm1104_vm2 = vmor %vm272_vm12, %vm720_vm13  ;;  %vm753_vm12 = vcmp.eq.s32.totalorder %v5240_v27, %v5565_v47 }
  0xf9   :  { %vm1120_vm5 = vmor %vm288_vm15, %vm736_vm0  ;;  %vm769_vm15 = vcmp.eq.s32.totalorder %v5248_v28, %v5565_v47 }
  0xfa   :  { %vm4533_vm8 = vmpackc.low %vm1120_vm5, %vm1104_vm2  ;;  %vm302_vm2 = vcmp.eq.s32.totalorder %v5240_v27, %v5585_v51  ;;  %vm318_vm5 = vcmp.eq.s32.totalorder %v5248_v28, %v5585_v51 }
  0xfb   :  { %4534 = vmatpush1.bf16.msk.msra.mxu1 %vm4533_vm8, %v4933_v17  ;;  %vm1135_vm10 = vmor %vm303_vm3, %vm751_vm4  ;;  %vm750_vm3 = vcmp.eq.s32.totalorder %v5240_v27, %v5589_v52 }
  0xfc   :  { %vm1151_vm13 = vmor %vm319_vm6, %vm767_vm7  ;;  %vm766_vm6 = vcmp.eq.s32.totalorder %v5248_v28, %v5589_v52 }
  0xfd   :  { %vm4487_vm0 = vmpackc.low %vm1151_vm13, %vm1135_vm10  ;;  %vm304_vm10 = vcmp.eq.s32.totalorder %v5240_v27, %v5607_v54  ;;  %vm320_vm13 = vcmp.eq.s32.totalorder %v5248_v28, %v5607_v54 }
  0xfe   :  { %4488 = vmatprep.subr.msk.bf16.mxu0 %vm4487_vm0, %v4933_v17  ;;  %vm1137_vm1 = vmor %vm305_vm11, %vm753_vm12  ;;  %vm752_vm11 = vcmp.eq.s32.totalorder %v5240_v27, %v5611_v55 }
  0xff   :  { %vm1153_vm4 = vmor %vm321_vm14, %vm769_vm15  ;;  %vm768_vm14 = vcmp.eq.s32.totalorder %v5248_v28, %v5611_v55 }
 0x100   :  { %vm4535_vm7 = vmpackc.low %vm1153_vm4, %vm1137_vm1  ;;  %vm335_vm1 = vcmp.eq.s32.totalorder %v5282_v29, %v5541_v43  ;;  %vm351_vm4 = vcmp.eq.s32.totalorder %v5290_v30, %v5541_v43 }
 0x101   :  { %4536 = vmatprep.subr.msk.bf16.mxu1 %vm4535_vm7, %v4933_v17  ;;  %vm1134_vm8 = vmor %vm302_vm2, %vm750_vm3  ;;  %vm783_vm2 = vcmp.eq.s32.totalorder %v5282_v29, %v5545_v44 }
 0x102   :  { %vm1150_vm12 = vmor %vm318_vm5, %vm766_vm6  ;;  %vm799_vm5 = vcmp.eq.s32.totalorder %v5290_v30, %v5545_v44 }
 0x103   :  { %vm4489_vm15 = vmpackc.low %vm1150_vm12, %vm1134_vm8  ;;  %vm337_vm8 = vcmp.eq.s32.totalorder %v5282_v29, %v5561_v46  ;;  %vm353_vm12 = vcmp.eq.s32.totalorder %v5290_v30, %v5561_v46 }
 0x104   :  { %4490 = vmatpush1.bf16.msk.msra.mxu0 %vm4489_vm15, %v4933_v17  ;;  %vm1136_vm0 = vmor %vm304_vm10, %vm752_vm11  ;;  %vm785_vm10 = vcmp.eq.s32.totalorder %v5282_v29, %v5565_v47 }
 0x105   :  { %vm1152_vm3 = vmor %vm320_vm13, %vm768_vm14  ;;  %vm801_vm13 = vcmp.eq.s32.totalorder %v5290_v30, %v5565_v47 }
 0x106   :  { %vm4537_vm6 = vmpackc.low %vm1152_vm3, %vm1136_vm0  ;;  %vm334_vm0 = vcmp.eq.s32.totalorder %v5282_v29, %v5585_v51  ;;  %vm350_vm3 = vcmp.eq.s32.totalorder %v5290_v30, %v5585_v51 }
 0x107   :  { %4538 = vmatpush1.bf16.msk.msra.mxu1 %vm4537_vm6, %v4933_v17  ;;  %vm1167_vm7 = vmor %vm335_vm1, %vm783_vm2  ;;  %vm782_vm1 = vcmp.eq.s32.totalorder %v5282_v29, %v5589_v52 }
 0x108   :  { %vm1183_vm11 = vmor %vm351_vm4, %vm799_vm5  ;;  %vm798_vm4 = vcmp.eq.s32.totalorder %v5290_v30, %v5589_v52 }
 0x109   :  { %vm4491_vm14 = vmpackc.low %vm1183_vm11, %vm1167_vm7  ;;  %vm336_vm7 = vcmp.eq.s32.totalorder %v5282_v29, %v5607_v54  ;;  %vm352_vm11 = vcmp.eq.s32.totalorder %v5290_v30, %v5607_v54 }
 0x10a   :  { %4492 = vmatprep.subr.msk.bf16.mxu0 %vm4491_vm14, %v4933_v17  ;;  %vm1169_vm15 = vmor %vm337_vm8, %vm785_vm10  ;;  %vm784_vm8 = vcmp.eq.s32.totalorder %v5282_v29, %v5611_v55 }
 0x10b   :  { %vm1185_vm2 = vmor %vm353_vm12, %vm801_vm13  ;;  %vm800_vm12 = vcmp.eq.s32.totalorder %v5290_v30, %v5611_v55 }
 0x10c   :  { %vm4539_vm5 = vmpackc.low %vm1185_vm2, %vm1169_vm15  ;;  %vm367_vm15 = vcmp.eq.s32.totalorder %v5324_v31, %v5541_v43  ;;  %vm383_vm2 = vcmp.eq.s32.totalorder %v5332_v32, %v5541_v43 }
 0x10d   :  { %4540 = vmatprep.subr.msk.bf16.mxu1 %vm4539_vm5, %v4933_v17  ;;  %vm1166_vm6 = vmor %vm334_vm0, %vm782_vm1  ;;  %vm815_vm0 = vcmp.eq.s32.totalorder %v5324_v31, %v5545_v44 }
 0x10e   :  { %vm1182_vm10 = vmor %vm350_vm3, %vm798_vm4  ;;  %vm831_vm3 = vcmp.eq.s32.totalorder %v5332_v32, %v5545_v44 }
 0x10f   :  { %vm4493_vm13 = vmpackc.low %vm1182_vm10, %vm1166_vm6  ;;  %vm369_vm6 = vcmp.eq.s32.totalorder %v5324_v31, %v5561_v46  ;;  %vm385_vm10 = vcmp.eq.s32.totalorder %v5332_v32, %v5561_v46 }
 0x110   :  { %4494 = vmatpush1.bf16.msk.msra.mxu0 %vm4493_vm13, %v4933_v17  ;;  %vm1168_vm14 = vmor %vm336_vm7, %vm784_vm8  ;;  %vm817_vm7 = vcmp.eq.s32.totalorder %v5324_v31, %v5565_v47 }
 0x111   :  { %vm1184_vm1 = vmor %vm352_vm11, %vm800_vm12  ;;  %vm833_vm11 = vcmp.eq.s32.totalorder %v5332_v32, %v5565_v47 }
 0x112   :  { %vm4541_vm4 = vmpackc.low %vm1184_vm1, %vm1168_vm14  ;;  %vm366_vm14 = vcmp.eq.s32.totalorder %v5324_v31, %v5585_v51  ;;  %vm382_vm1 = vcmp.eq.s32.totalorder %v5332_v32, %v5585_v51 }
 0x113   :  { %4542 = vmatpush1.bf16.msk.msra.mxu1 %vm4541_vm4, %v4933_v17  ;;  %vm1199_vm5 = vmor %vm367_vm15, %vm815_vm0  ;;  %vm814_vm15 = vcmp.eq.s32.totalorder %v5324_v31, %v5589_v52 }
 0x114   :  { %vm1215_vm8 = vmor %vm383_vm2, %vm831_vm3  ;;  %vm830_vm2 = vcmp.eq.s32.totalorder %v5332_v32, %v5589_v52 }
 0x115   :  { %vm4495_vm12 = vmpackc.low %vm1215_vm8, %vm1199_vm5  ;;  %vm368_vm5 = vcmp.eq.s32.totalorder %v5324_v31, %v5607_v54  ;;  %vm384_vm8 = vcmp.eq.s32.totalorder %v5332_v32, %v5607_v54 }
 0x116   :  { %4496 = vmatprep.subr.msk.bf16.mxu0 %vm4495_vm12, %v4933_v17  ;;  %vm1201_vm13 = vmor %vm369_vm6, %vm817_vm7  ;;  %vm816_vm6 = vcmp.eq.s32.totalorder %v5324_v31, %v5611_v55 }
 0x117   :  { %vm1217_vm0 = vmor %vm385_vm10, %vm833_vm11  ;;  %vm832_vm10 = vcmp.eq.s32.totalorder %v5332_v32, %v5611_v55 }
 0x118   :  { %vm4543_vm3 = vmpackc.low %vm1217_vm0, %vm1201_vm13  ;;  %vm399_vm13 = vcmp.eq.s32.totalorder %v5366_v33, %v5541_v43  ;;  %vm415_vm0 = vcmp.eq.s32.totalorder %v5374_v34, %v5541_v43 }
 0x119   :  { %4544 = vmatprep.subr.msk.bf16.mxu1 %vm4543_vm3, %v4933_v17  ;;  %vm1198_vm4 = vmor %vm366_vm14, %vm814_vm15  ;;  %vm847_vm14 = vcmp.eq.s32.totalorder %v5366_v33, %v5545_v44 }
 0x11a   :  { %vm1214_vm7 = vmor %vm382_vm1, %vm830_vm2  ;;  %vm863_vm1 = vcmp.eq.s32.totalorder %v5374_v34, %v5545_v44 }
 0x11b   :  { %vm4497_vm11 = vmpackc.low %vm1214_vm7, %vm1198_vm4  ;;  %vm401_vm4 = vcmp.eq.s32.totalorder %v5366_v33, %v5561_v46  ;;  %vm417_vm7 = vcmp.eq.s32.totalorder %v5374_v34, %v5561_v46 }
 0x11c   :  { %4498 = vmatpush1.bf16.msk.msra.mxu0 %vm4497_vm11, %v4933_v17  ;;  %vm1200_vm12 = vmor %vm368_vm5, %vm816_vm6  ;;  %vm849_vm5 = vcmp.eq.s32.totalorder %v5366_v33, %v5565_v47 }
 0x11d   :  { %vm1216_vm15 = vmor %vm384_vm8, %vm832_vm10  ;;  %vm865_vm8 = vcmp.eq.s32.totalorder %v5374_v34, %v5565_v47 }
 0x11e   :  { %vm4545_vm2 = vmpackc.low %vm1216_vm15, %vm1200_vm12  ;;  %vm398_vm12 = vcmp.eq.s32.totalorder %v5366_v33, %v5585_v51  ;;  %vm414_vm15 = vcmp.eq.s32.totalorder %v5374_v34, %v5585_v51 }
 0x11f   :  { %4546 = vmatpush1.bf16.msk.msra.mxu1 %vm4545_vm2, %v4933_v17  ;;  %vm1231_vm3 = vmor %vm399_vm13, %vm847_vm14  ;;  %vm846_vm13 = vcmp.eq.s32.totalorder %v5366_v33, %v5589_v52 }
 0x120   :  { %vm1247_vm6 = vmor %vm415_vm0, %vm863_vm1  ;;  %vm862_vm0 = vcmp.eq.s32.totalorder %v5374_v34, %v5589_v52 }
 0x121   :  { %vm4499_vm10 = vmpackc.low %vm1247_vm6, %vm1231_vm3  ;;  %vm400_vm3 = vcmp.eq.s32.totalorder %v5366_v33, %v5607_v54  ;;  %vm416_vm6 = vcmp.eq.s32.totalorder %v5374_v34, %v5607_v54 }
 0x122   :  { %4500 = vmatprep.subr.msk.bf16.mxu0 %vm4499_vm10, %v4933_v17  ;;  %vm1233_vm11 = vmor %vm401_vm4, %vm849_vm5  ;;  %vm848_vm4 = vcmp.eq.s32.totalorder %v5366_v33, %v5611_v55 }
 0x123   :  { %vm1249_vm14 = vmor %vm417_vm7, %vm865_vm8  ;;  %vm864_vm7 = vcmp.eq.s32.totalorder %v5374_v34, %v5611_v55 }
 0x124   :  { %vm4547_vm1 = vmpackc.low %vm1249_vm14, %vm1233_vm11  ;;  %vm431_vm11 = vcmp.eq.s32.totalorder %v5408_v35, %v5541_v43  ;;  %vm447_vm14 = vcmp.eq.s32.totalorder %v5416_v36, %v5541_v43 }
 0x125   :  { %4548 = vmatprep.subr.msk.bf16.mxu1 %vm4547_vm1, %v4933_v17  ;;  %vm1230_vm2 = vmor %vm398_vm12, %vm846_vm13  ;;  %vm879_vm12 = vcmp.eq.s32.totalorder %v5408_v35, %v5545_v44 }
 0x126   :  { %vm1246_vm5 = vmor %vm414_vm15, %vm862_vm0  ;;  %vm895_vm15 = vcmp.eq.s32.totalorder %v5416_v36, %v5545_v44 }
 0x127   :  { %vm4501_vm8 = vmpackc.low %vm1246_vm5, %vm1230_vm2  ;;  %vm433_vm2 = vcmp.eq.s32.totalorder %v5408_v35, %v5561_v46  ;;  %vm449_vm5 = vcmp.eq.s32.totalorder %v5416_v36, %v5561_v46 }
 0x128   :  { %4502 = vmatpush1.bf16.msk.msra.mxu0 %vm4501_vm8, %v4933_v17  ;;  %vm1232_vm10 = vmor %vm400_vm3, %vm848_vm4  ;;  %vm881_vm3 = vcmp.eq.s32.totalorder %v5408_v35, %v5565_v47 }
 0x129   :  { %vm1248_vm13 = vmor %vm416_vm6, %vm864_vm7  ;;  %vm897_vm6 = vcmp.eq.s32.totalorder %v5416_v36, %v5565_v47 }
 0x12a   :  { %vm4549_vm0 = vmpackc.low %vm1248_vm13, %vm1232_vm10  ;;  %vm430_vm10 = vcmp.eq.s32.totalorder %v5408_v35, %v5585_v51  ;;  %vm446_vm13 = vcmp.eq.s32.totalorder %v5416_v36, %v5585_v51 }
 0x12b   :  { %4550 = vmatpush1.bf16.msk.msra.mxu1 %vm4549_vm0, %v4933_v17  ;;  %vm1263_vm1 = vmor %vm431_vm11, %vm879_vm12  ;;  %vm878_vm11 = vcmp.eq.s32.totalorder %v5408_v35, %v5589_v52 }
 0x12c   :  { %vm1279_vm4 = vmor %vm447_vm14, %vm895_vm15  ;;  %vm894_vm14 = vcmp.eq.s32.totalorder %v5416_v36, %v5589_v52 }
 0x12d   :  { %vm4503_vm7 = vmpackc.low %vm1279_vm4, %vm1263_vm1  ;;  %vm432_vm1 = vcmp.eq.s32.totalorder %v5408_v35, %v5607_v54  ;;  %vm448_vm4 = vcmp.eq.s32.totalorder %v5416_v36, %v5607_v54 }
 0x12e   :  { %4504 = vmatprep.subr.msk.bf16.mxu0 %vm4503_vm7, %v4933_v17  ;;  %vm1265_vm8 = vmor %vm433_vm2, %vm881_vm3  ;;  %vm880_vm2 = vcmp.eq.s32.totalorder %v5408_v35, %v5611_v55 }
 0x12f   :  { %vm1281_vm12 = vmor %vm449_vm5, %vm897_vm6  ;;  %vm896_vm5 = vcmp.eq.s32.totalorder %v5416_v36, %v5611_v55 }
 0x130   :  { %vm4551_vm15 = vmpackc.low %vm1281_vm12, %vm1265_vm8  ;;  %vm463_vm8 = vcmp.eq.s32.totalorder %v5450_v37, %v5541_v43  ;;  %vm479_vm12 = vcmp.eq.s32.totalorder %v5458_v38, %v5541_v43 }
 0x131   :  { %4552 = vmatprep.subr.msk.bf16.mxu1 %vm4551_vm15, %v4933_v17  ;;  %vm1262_vm0 = vmor %vm430_vm10, %vm878_vm11  ;;  %vm911_vm10 = vcmp.eq.s32.totalorder %v5450_v37, %v5545_v44 }
 0x132   :  { %vm1278_vm3 = vmor %vm446_vm13, %vm894_vm14  ;;  %vm927_vm13 = vcmp.eq.s32.totalorder %v5458_v38, %v5545_v44 }
 0x133   :  { %vm4505_vm6 = vmpackc.low %vm1278_vm3, %vm1262_vm0  ;;  %vm465_vm0 = vcmp.eq.s32.totalorder %v5450_v37, %v5561_v46  ;;  %vm481_vm3 = vcmp.eq.s32.totalorder %v5458_v38, %v5561_v46 }
 0x134   :  { %4506 = vmatpush1.bf16.msk.msra.mxu0 %vm4505_vm6, %v4933_v17  ;;  %vm1264_vm7 = vmor %vm432_vm1, %vm880_vm2  ;;  %vm913_vm1 = vcmp.eq.s32.totalorder %v5450_v37, %v5565_v47 }
 0x135   :  { %vm1280_vm11 = vmor %vm448_vm4, %vm896_vm5  ;;  %vm929_vm4 = vcmp.eq.s32.totalorder %v5458_v38, %v5565_v47 }
 0x136   :  { %vm4553_vm14 = vmpackc.low %vm1280_vm11, %vm1264_vm7  ;;  %vm462_vm7 = vcmp.eq.s32.totalorder %v5450_v37, %v5585_v51  ;;  %vm478_vm11 = vcmp.eq.s32.totalorder %v5458_v38, %v5585_v51 }
 0x137   :  { %4554 = vmatpush1.bf16.msk.msra.mxu1 %vm4553_vm14, %v4933_v17  ;;  %vm1295_vm15 = vmor %vm463_vm8, %vm911_vm10  ;;  %vm910_vm8 = vcmp.eq.s32.totalorder %v5450_v37, %v5589_v52 }
 0x138   :  { %vm1311_vm2 = vmor %vm479_vm12, %vm927_vm13  ;;  %vm926_vm12 = vcmp.eq.s32.totalorder %v5458_v38, %v5589_v52 }
 0x139   :  { %vm4507_vm5 = vmpackc.low %vm1311_vm2, %vm1295_vm15  ;;  %vm464_vm15 = vcmp.eq.s32.totalorder %v5450_v37, %v5607_v54  ;;  %vm480_vm2 = vcmp.eq.s32.totalorder %v5458_v38, %v5607_v54 }
 0x13a   :  { %4508 = vmatprep.subr.msk.bf16.mxu0 %vm4507_vm5, %v4933_v17  ;;  %vm1297_vm6 = vmor %vm465_vm0, %vm913_vm1  ;;  %vm912_vm0 = vcmp.eq.s32.totalorder %v5450_v37, %v5611_v55 }
 0x13b   :  { %vm1313_vm10 = vmor %vm481_vm3, %vm929_vm4  ;;  %vm928_vm3 = vcmp.eq.s32.totalorder %v5458_v38, %v5611_v55 }
 0x13c   :  { %vm4555_vm13 = vmpackc.low %vm1313_vm10, %vm1297_vm6  ;;  %vm495_vm6 = vcmp.eq.s32.totalorder %v5492_v39, %v5541_v43  ;;  %vm511_vm10 = vcmp.eq.s32.totalorder %v5500_v40, %v5541_v43  ;;  %v6611_v43 = vrot.slane %v6080_v10, %v5525_v41  ;;  %v6624_v41 = vrot.slane %v6078_v9, %v5537_v42 }
 0x13d   :  { %4556 = vmatprep.subr.msk.bf16.mxu1 %vm4555_vm13, %v4933_v17  ;;  %vm1294_vm14 = vmor %vm462_vm7, %vm910_vm8  ;;  %vm943_vm7 = vcmp.eq.s32.totalorder %v5492_v39, %v5545_v44 }
 0x13e   :  { %vm1310_vm1 = vmor %vm478_vm11, %vm926_vm12  ;;  %vm959_vm11 = vcmp.eq.s32.totalorder %v5500_v40, %v5545_v44  ;;  %v6628_v44 = vrot.slane %v6080_v10, %v5537_v42  ;;  %v6641_v42 = vrot.slane %v6078_v9, %v5557_v45 }
 0x13f   :  { %vm4509_vm4 = vmpackc.low %vm1310_vm1, %vm1294_vm14  ;;  %vm497_vm14 = vcmp.eq.s32.totalorder %v5492_v39, %v5561_v46  ;;  %vm513_vm1 = vcmp.eq.s32.totalorder %v5500_v40, %v5561_v46  ;;  %v6645_v46 = vrot.slane %v6080_v10, %v5557_v45  ;;  %v4828_v45 = vld [vmem:[#allocation6 + $0x18] sm:$0xff] }
 0x140   :  { %4510 = vmatpush1.bf16.msk.msra.mxu0 %vm4509_vm4, %v4933_v17  ;;  %vm1296_vm5 = vmor %vm464_vm15, %vm912_vm0  ;;  %vm945_vm15 = vcmp.eq.s32.totalorder %v5492_v39, %v5565_v47 }
 0x141   :  { %vm1312_vm8 = vmor %vm480_vm2, %vm928_vm3  ;;  %vm961_vm2 = vcmp.eq.s32.totalorder %v5500_v40, %v5565_v47  ;;  %v4827_v47 = vld [vmem:[#allocation6] sm:$0xff] }
 0x142   :  { %vm4557_vm12 = vmpackc.low %vm1312_vm8, %vm1296_vm5  ;;  %vm494_vm5 = vcmp.eq.s32.totalorder %v5492_v39, %v5585_v51  ;;  %vm510_vm8 = vcmp.eq.s32.totalorder %v5500_v40, %v5585_v51  ;;  %v4830_v51 = vld [vmem:[#allocation6 + $0x28] sm:$0xff] }
 0x143   :  { %4558 = vmatpush1.bf16.msk.msra.mxu1 %vm4557_vm12, %v4933_v17  ;;  %vm1327_vm13 = vmor %vm495_vm6, %vm943_vm7  ;;  %vm942_vm6 = vcmp.eq.s32.totalorder %v5492_v39, %v5589_v52 }
 0x144   :  { %vm1343_vm0 = vmor %vm511_vm10, %vm959_vm11  ;;  %vm958_vm10 = vcmp.eq.s32.totalorder %v5500_v40, %v5589_v52  ;;  %v4831_v52 = vld [vmem:[#allocation6 + $0x20] sm:$0xff] }
 0x145   :  { %vm4511_vm3 = vmpackc.low %vm1343_vm0, %vm1327_vm13  ;;  %vm496_vm13 = vcmp.eq.s32.totalorder %v5492_v39, %v5607_v54  ;;  %vm512_vm0 = vcmp.eq.s32.totalorder %v5500_v40, %v5607_v54  ;;  %v4834_v54 = vld [vmem:[#allocation6 + $0x48] sm:$0xff] }
 0x146   :  { %4512 = vmatprep.subr.msk.bf16.mxu0 %vm4511_vm3, %v4933_v17  ;;  %vm1329_vm4 = vmor %vm497_vm14, %vm945_vm15  ;;  %vm944_vm14 = vcmp.eq.s32.totalorder %v5492_v39, %v5611_v55 }
 0x147   :  { %vm1345_vm7 = vmor %vm513_vm1, %vm961_vm2  ;;  %vm960_vm1 = vcmp.eq.s32.totalorder %v5500_v40, %v5611_v55  ;;  %v4835_v55 = vld [vmem:[#allocation6 + $0x40] sm:$0xff] }
 0x148   :  { %vm4559_vm11 = vmpackc.low %vm1345_vm7, %vm1329_vm4  ;;  %vm147_vm4 = vcmp.eq.s32.totalorder %v4987_v1, %v6093_v11  ;;  %vm163_vm7 = vcmp.eq.s32.totalorder %v4999_v5, %v6093_v11 }
 0x149   :  { %4560 = vmatprep.subr.msk.bf16.mxu1 %vm4559_vm11, %v4933_v17  ;;  %vm1326_vm12 = vmor %vm494_vm5, %vm942_vm6  ;;  %vm595_vm5 = vcmp.eq.s32.totalorder %v4987_v1, %v6097_v12 }
 0x14a   :  { %vm1342_vm15 = vmor %vm510_vm8, %vm958_vm10  ;;  %vm611_vm8 = vcmp.eq.s32.totalorder %v4999_v5, %v6097_v12 }
 0x14b   :  { %vm4513_vm2 = vmpackc.low %vm1342_vm15, %vm1326_vm12  ;;  %vm149_vm12 = vcmp.eq.s32.totalorder %v4987_v1, %v6110_v2  ;;  %vm165_vm15 = vcmp.eq.s32.totalorder %v4999_v5, %v6110_v2 }
 0x14c   :  { %4514 = vmatpush1.bf16.msk.msra.mxu0 %vm4513_vm2, %v4933_v17  ;;  %vm1328_vm3 = vmor %vm496_vm13, %vm944_vm14  ;;  %vm597_vm13 = vcmp.eq.s32.totalorder %v4987_v1, %v6114_v13 }
 0x14d   :  { %vm1344_vm6 = vmor %vm512_vm0, %vm960_vm1  ;;  %vm613_vm0 = vcmp.eq.s32.totalorder %v4999_v5, %v6114_v13 }
 0x14e   :  { %vm4561_vm10 = vmpackc.low %vm1344_vm6, %vm1328_vm3  ;;  %vm146_vm3 = vcmp.eq.s32.totalorder %v4987_v1, %v6127_v3  ;;  %vm162_vm6 = vcmp.eq.s32.totalorder %v4999_v5, %v6127_v3 }
 0x14f   :  { %4562 = vmatpush1.bf16.msk.msra.mxu1 %vm4561_vm10, %v4933_v17  ;;  %2454 = vmatmul.mubr.f32.vlgmr.msra.gmra.mrb[16].mxu0 %v5568_v48  ;;  %vm979_vm11 = vmor %vm147_vm4, %vm595_vm5  ;;  %vm594_vm4 = vcmp.eq.s32.totalorder %v4987_v1, %v6131_v15 }
 0x150   :  { %vm995_vm14 = vmor %vm163_vm7, %vm611_vm8  ;;  %4068 = vmatprep.mubr.msk.f32.mxu0 %vm2138_vm9, %v5581_v50  ;;  %vm610_vm7 = vcmp.eq.s32.totalorder %v4999_v5, %v6131_v15 }
 0x151   :  { %vm4563_vm1 = vmpackc.low %vm995_vm14, %vm979_vm11  ;;  %vm148_vm11 = vcmp.eq.s32.totalorder %v4987_v1, %v6147_v4  ;;  %vm164_vm14 = vcmp.eq.s32.totalorder %v4999_v5, %v6147_v4 }
 0x152   :  { %2567 = vmatmul.mubr.f32.vlgmr.msra.gmra.mrb[16].mxu1 %v5568_v48  ;;  %4564 = vmatprep.subr.msk.bf16.mxu0 %vm4563_vm1, %v4933_v17  ;;  %vm981_vm2 = vmor %vm149_vm12, %vm597_vm13  ;;  %vm596_vm12 = vcmp.eq.s32.totalorder %v4987_v1, %v6151_v16  ;;  %v6659_v48 = vrot.slane %v6078_v9, %v5579_v49 }
 0x153   :  { %vm997_vm5 = vmor %vm165_vm15, %vm613_vm0  ;;  %4124 = vmatprep.mubr.msk.f32.mxu1 %vm2138_vm9, %v5581_v50  ;;  %2460 = vmatmul.mubr.f32.gmra.mrb[18].mxu0 %v5603_v53  ;;  %vm612_vm15 = vcmp.eq.s32.totalorder %v4999_v5, %v6151_v16  ;;  %v6663_v50 = vrot.slane %v6080_v10, %v5579_v49  ;;  %v4829_v49 = vld [vmem:[#allocation6 + $0x10] sm:$0xff] }
 0x154   :  { %vm4611_vm8 = vmpackc.low %vm997_vm5, %vm981_vm2  ;;  %4069 = vmatprep.mubr.msk.f32.mxu0 %vm2138_vm9, %v5613_v56  ;;  %vm179_vm2 = vcmp.eq.s32.totalorder %v5066_v18, %v6093_v11  ;;  %vm195_vm5 = vcmp.eq.s32.totalorder %v5074_v19, %v6093_v11 }
 0x155   :  { %4612 = vmatprep.subr.msk.bf16.mxu1 %vm4611_vm8, %v4933_v17  ;;  %vm978_vm10 = vmor %vm146_vm3, %vm594_vm4  ;;  %vm627_vm3 = vcmp.eq.s32.totalorder %v5066_v18, %v6097_v12 }
 0x156   :  { %vm994_vm13 = vmor %vm162_vm6, %vm610_vm7  ;;  %2573 = vmatmul.mubr.f32.gmra.mrb[18].mxu1 %v5603_v53  ;;  %vm643_vm6 = vcmp.eq.s32.totalorder %v5074_v19, %v6097_v12  ;;  %v4832_v53 = vld [vmem:[#allocation6 + $0x38] sm:$0xff] }
 0x157   :  { %vm4565_vm0 = vmpackc.low %vm994_vm13, %vm978_vm10  ;;  %4125 = vmatprep.mubr.msk.f32.mxu1 %vm2138_vm9, %v5613_v56  ;;  %2466 = vmatmul.mubr.f32.gmra.mrb[20].mxu0 %v5630_v57  ;;  %vm181_vm10 = vcmp.eq.s32.totalorder %v5066_v18, %v6110_v2  ;;  %vm197_vm13 = vcmp.eq.s32.totalorder %v5074_v19, %v6110_v2  ;;  %v4836_v56 = vld [vmem:[#allocation6 + $0x58] sm:$0xff] }
 0x158   :  { %4566 = vmatpush1.bf16.msk.msra.mxu0 %vm4565_vm0, %v4933_v17  ;;  %vm980_vm1 = vmor %vm148_vm11, %vm596_vm12  ;;  %4070 = vmatprep.mubr.msk.f32.mxu0 %vm2138_vm9, %v5637_v58  ;;  %vm629_vm11 = vcmp.eq.s32.totalorder %v5066_v18, %v6114_v13 }
 0x159   :  { %vm996_vm4 = vmor %vm164_vm14, %vm612_vm15  ;;  %vm645_vm14 = vcmp.eq.s32.totalorder %v5074_v19, %v6114_v13 }
 0x15a   :  { %vm4613_vm7 = vmpackc.low %vm996_vm4, %vm980_vm1  ;;  %2579 = vmatmul.mubr.f32.gmra.mrb[20].mxu1 %v5630_v57  ;;  %vm178_vm1 = vcmp.eq.s32.totalorder %v5066_v18, %v6127_v3  ;;  %vm194_vm4 = vcmp.eq.s32.totalorder %v5074_v19, %v6127_v3  ;;  %v4839_v57 = vld [vmem:[#allocation6 + $0x60] sm:$0xff] }
 0x15b   :  { %4614 = vmatpush1.bf16.msk.msra.mxu1 %vm4613_vm7, %v4933_v17  ;;  %vm1011_vm8 = vmor %vm179_vm2, %vm627_vm3  ;;  %4126 = vmatprep.mubr.msk.f32.mxu1 %vm2138_vm9, %v5637_v58  ;;  %vm626_vm2 = vcmp.eq.s32.totalorder %v5066_v18, %v6131_v15  ;;  %v4840_v58 = vld [vmem:[#allocation6 + $0x78] sm:$0xff] }
 0x15c   :  { %vm1027_vm12 = vmor %vm195_vm5, %vm643_vm6  ;;  %2472 = vmatmul.mubr.f32.gmra.mrb[22].mxu0 %v5658_v59  ;;  %vm642_vm5 = vcmp.eq.s32.totalorder %v5074_v19, %v6131_v15 }
 0x15d   :  { %vm4567_vm15 = vmpackc.low %vm1027_vm12, %vm1011_vm8  ;;  %4071 = vmatprep.mubr.msk.f32.mxu0 %vm2138_vm9, %v5661_v60  ;;  %vm180_vm8 = vcmp.eq.s32.totalorder %v5066_v18, %v6147_v4  ;;  %vm196_vm12 = vcmp.eq.s32.totalorder %v5074_v19, %v6147_v4 }
 0x15e   :  { %4568 = vmatprep.subr.msk.bf16.mxu0 %vm4567_vm15, %v4933_v17  ;;  %vm1013_vm0 = vmor %vm181_vm10, %vm629_vm11  ;;  %2585 = vmatmul.mubr.f32.gmra.mrb[22].mxu1 %v5658_v59  ;;  %vm628_vm10 = vcmp.eq.s32.totalorder %v5066_v18, %v6151_v16  ;;  %v4841_v59 = vld [vmem:[#allocation6 + $0x70] sm:$0xff] }
 0x15f   :  { %vm1029_vm3 = vmor %vm197_vm13, %vm645_vm14  ;;  %4127 = vmatprep.mubr.msk.f32.mxu1 %vm2138_vm9, %v5661_v60  ;;  %vm644_vm13 = vcmp.eq.s32.totalorder %v5074_v19, %v6151_v16 }
 0x160   :  { %vm4615_vm6 = vmpackc.low %vm1029_vm3, %vm1013_vm0  ;;  %2478 = vmatmul.mubr.f32.gmra.mrb[24].mxu0 %v5677_v61  ;;  %vm211_vm0 = vcmp.eq.s32.totalorder %v5108_v20, %v6093_v11  ;;  %vm227_vm3 = vcmp.eq.s32.totalorder %v5116_v21, %v6093_v11 }
 0x161   :  { %4616 = vmatprep.subr.msk.bf16.mxu1 %vm4615_vm6, %v4933_v17  ;;  %vm1010_vm7 = vmor %vm178_vm1, %vm626_vm2  ;;  %4072 = vmatprep.mubr.msk.f32.mxu0 %vm2138_vm9, %v5685_v62  ;;  %vm659_vm1 = vcmp.eq.s32.totalorder %v5108_v20, %v6097_v12 }
 0x162   :  { %vm1026_vm11 = vmor %vm194_vm4, %vm642_vm5  ;;  %2591 = vmatmul.mubr.f32.gmra.mrb[24].mxu1 %v5677_v61  ;;  %vm675_vm4 = vcmp.eq.s32.totalorder %v5116_v21, %v6097_v12 }
 0x163   :  { %vm4569_vm14 = vmpackc.low %vm1026_vm11, %vm1010_vm7  ;;  %4128 = vmatprep.mubr.msk.f32.mxu1 %vm2138_vm9, %v5685_v62  ;;  %vm213_vm7 = vcmp.eq.s32.totalorder %v5108_v20, %v6110_v2  ;;  %vm229_vm11 = vcmp.eq.s32.totalorder %v5116_v21, %v6110_v2 }
 0x164   :  { %4570 = vmatpush1.bf16.msk.msra.mxu0 %vm4569_vm14, %v4933_v17  ;;  %vm1012_vm15 = vmor %vm180_vm8, %vm628_vm10  ;;  %vm661_vm8 = vcmp.eq.s32.totalorder %v5108_v20, %v6114_v13 }
 0x165   :  { %vm1028_vm2 = vmor %vm196_vm12, %vm644_vm13  ;;  %2484 = vmatmul.mubr.f32.gmra.mrb[26].mxu0 %v5706_v63  ;;  %vm677_vm12 = vcmp.eq.s32.totalorder %v5116_v21, %v6114_v13 }
 0x166   :  { %vm4617_vm5 = vmpackc.low %vm1028_vm2, %vm1012_vm15  ;;  %2597 = vmatmul.mubr.f32.gmra.mrb[26].mxu1 %v5706_v63  ;;  %4073 = vmatprep.mubr.msk.f32.mxu0 %vm2138_vm9, %v5710_v0  ;;  %vm210_vm15 = vcmp.eq.s32.totalorder %v5108_v20, %v6127_v3  ;;  %vm226_vm2 = vcmp.eq.s32.totalorder %v5116_v21, %v6127_v3 }
 0x167   :  { %4618 = vmatpush1.bf16.msk.msra.mxu1 %vm4617_vm5, %v4933_v17  ;;  %vm1043_vm6 = vmor %vm211_vm0, %vm659_vm1  ;;  %4129 = vmatprep.mubr.msk.f32.mxu1 %vm2138_vm9, %v5710_v0  ;;  %vm658_vm0 = vcmp.eq.s32.totalorder %v5108_v20, %v6131_v15 }
 0x168   :  { %vm1059_vm10 = vmor %vm227_vm3, %vm675_vm4  ;;  %vm674_vm3 = vcmp.eq.s32.totalorder %v5116_v21, %v6131_v15 }
 0x169   :  { %vm4571_vm13 = vmpackc.low %vm1059_vm10, %vm1043_vm6  ;;  %2490 = vmatmul.mubr.f32.gmra.mrb[28].mxu0 %v5725_v6  ;;  %vm212_vm6 = vcmp.eq.s32.totalorder %v5108_v20, %v6147_v4  ;;  %vm228_vm10 = vcmp.eq.s32.totalorder %v5116_v21, %v6147_v4 }
 0x16a   :  { %4572 = vmatprep.subr.msk.bf16.mxu0 %vm4571_vm13, %v4933_v17  ;;  %vm1045_vm14 = vmor %vm213_vm7, %vm661_vm8  ;;  %2603 = vmatmul.mubr.f32.gmra.mrb[28].mxu1 %v5725_v6  ;;  %vm660_vm7 = vcmp.eq.s32.totalorder %v5108_v20, %v6151_v16 }
 0x16b   :  { %vm1061_vm1 = vmor %vm229_vm11, %vm677_vm12  ;;  %4074 = vmatprep.mubr.msk.f32.mxu0 %vm2138_vm9, %v5738_v7  ;;  %4130 = vmatprep.mubr.msk.f32.mxu1 %vm2138_vm9, %v5738_v7  ;;  %vm676_vm11 = vcmp.eq.s32.totalorder %v5116_v21, %v6151_v16 }
 0x16c   :  { %vm4619_vm4 = vmpackc.low %vm1061_vm1, %vm1045_vm14  ;;  %vm243_vm14 = vcmp.eq.s32.totalorder %v5150_v22, %v6093_v11  ;;  %vm259_vm1 = vcmp.eq.s32.totalorder %v5158_v23, %v6093_v11 }
 0x16d   :  { %4620 = vmatprep.subr.msk.bf16.mxu1 %vm4619_vm4, %v4933_v17  ;;  %vm1042_vm5 = vmor %vm210_vm15, %vm658_vm0  ;;  %2496 = vmatmul.mubr.f32.gmra.mrb[30].mxu0 %v5747_v8  ;;  %vm691_vm15 = vcmp.eq.s32.totalorder %v5150_v22, %v6097_v12 }
 0x16e   :  { %vm1058_vm8 = vmor %vm226_vm2, %vm674_vm3  ;;  %2609 = vmatmul.mubr.f32.gmra.mrb[30].mxu1 %v5747_v8  ;;  %4179 = vmatprep.mubr.msk.f32.mxu0 %vm2138_vm9, %v6284_v14  ;;  %vm707_vm2 = vcmp.eq.s32.totalorder %v5158_v23, %v6097_v12 }
 0x16f   :  { %vm4573_vm12 = vmpackc.low %vm1058_vm8, %vm1042_vm5  ;;  %4235 = vmatprep.mubr.msk.f32.mxu1 %vm2138_vm9, %v6284_v14  ;;  %vm245_vm5 = vcmp.eq.s32.totalorder %v5150_v22, %v6110_v2  ;;  %vm261_vm8 = vcmp.eq.s32.totalorder %v5158_v23, %v6110_v2 }
 0x170   :  { %4574 = vmatpush1.bf16.msk.msra.mxu0 %vm4573_vm12, %v4933_v17  ;;  %vm1044_vm13 = vmor %vm212_vm6, %vm660_vm7  ;;  %vm693_vm6 = vcmp.eq.s32.totalorder %v5150_v22, %v6114_v13 }
 0x171   :  { %vm1060_vm0 = vmor %vm228_vm10, %vm676_vm11  ;;  %vm709_vm10 = vcmp.eq.s32.totalorder %v5158_v23, %v6114_v13 }
 0x172   :  { %vm4621_vm3 = vmpackc.low %vm1060_vm0, %vm1044_vm13  ;;  %vm242_vm13 = vcmp.eq.s32.totalorder %v5150_v22, %v6127_v3  ;;  %vm258_vm0 = vcmp.eq.s32.totalorder %v5158_v23, %v6127_v3 }
 0x173   :  { %4622 = vmatpush1.bf16.msk.msra.mxu1 %vm4621_vm3, %v4933_v17  ;;  %vm1075_vm4 = vmor %vm243_vm14, %vm691_vm15  ;;  %vm690_vm14 = vcmp.eq.s32.totalorder %v5150_v22, %v6131_v15 }
 0x174   :  { %vm1091_vm7 = vmor %vm259_vm1, %vm707_vm2  ;;  %vm706_vm1 = vcmp.eq.s32.totalorder %v5158_v23, %v6131_v15 }
 0x175   :  { %vm4575_vm11 = vmpackc.low %vm1091_vm7, %vm1075_vm4  ;;  %vm244_vm4 = vcmp.eq.s32.totalorder %v5150_v22, %v6147_v4  ;;  %vm260_vm7 = vcmp.eq.s32.totalorder %v5158_v23, %v6147_v4 }
 0x176   :  { %4576 = vmatprep.subr.msk.bf16.mxu0 %vm4575_vm11, %v4933_v17  ;;  %vm1077_vm12 = vmor %vm245_vm5, %vm693_vm6  ;;  %vm692_vm5 = vcmp.eq.s32.totalorder %v5150_v22, %v6151_v16 }
 0x177   :  { %vm1093_vm15 = vmor %vm261_vm8, %vm709_vm10  ;;  %vm708_vm8 = vcmp.eq.s32.totalorder %v5158_v23, %v6151_v16 }
 0x178   :  { %vm4623_vm2 = vmpackc.low %vm1093_vm15, %vm1077_vm12  ;;  %vm275_vm12 = vcmp.eq.s32.totalorder %v5194_v25, %v6093_v11  ;;  %vm291_vm15 = vcmp.eq.s32.totalorder %v5202_v26, %v6093_v11 }
 0x179   :  { %4624 = vmatprep.subr.msk.bf16.mxu1 %vm4623_vm2, %v4933_v17  ;;  %vm1074_vm3 = vmor %vm242_vm13, %vm690_vm14  ;;  %vm723_vm13 = vcmp.eq.s32.totalorder %v5194_v25, %v6097_v12 }
 0x17a   :  { %vm1090_vm6 = vmor %vm258_vm0, %vm706_vm1  ;;  %vm739_vm0 = vcmp.eq.s32.totalorder %v5202_v26, %v6097_v12 }
 0x17b   :  { %vm4577_vm10 = vmpackc.low %vm1090_vm6, %vm1074_vm3  ;;  %vm277_vm3 = vcmp.eq.s32.totalorder %v5194_v25, %v6110_v2  ;;  %vm293_vm6 = vcmp.eq.s32.totalorder %v5202_v26, %v6110_v2 }
 0x17c   :  { %4578 = vmatpush1.bf16.msk.msra.mxu0 %vm4577_vm10, %v4933_v17  ;;  %vm1076_vm11 = vmor %vm244_vm4, %vm692_vm5  ;;  %vm725_vm4 = vcmp.eq.s32.totalorder %v5194_v25, %v6114_v13 }
 0x17d   :  { %vm1092_vm14 = vmor %vm260_vm7, %vm708_vm8  ;;  %vm741_vm7 = vcmp.eq.s32.totalorder %v5202_v26, %v6114_v13 }
 0x17e   :  { %vm4625_vm1 = vmpackc.low %vm1092_vm14, %vm1076_vm11  ;;  %vm274_vm11 = vcmp.eq.s32.totalorder %v5194_v25, %v6127_v3  ;;  %vm290_vm14 = vcmp.eq.s32.totalorder %v5202_v26, %v6127_v3 }
 0x17f   :  { %4626 = vmatpush1.bf16.msk.msra.mxu1 %vm4625_vm1, %v4933_v17  ;;  %vm1107_vm2 = vmor %vm275_vm12, %vm723_vm13  ;;  %vm722_vm12 = vcmp.eq.s32.totalorder %v5194_v25, %v6131_v15 }
 0x180   :  { %vm1123_vm5 = vmor %vm291_vm15, %vm739_vm0  ;;  %vm738_vm15 = vcmp.eq.s32.totalorder %v5202_v26, %v6131_v15 }
 0x181   :  { %vm4579_vm8 = vmpackc.low %vm1123_vm5, %vm1107_vm2  ;;  %vm276_vm2 = vcmp.eq.s32.totalorder %v5194_v25, %v6147_v4  ;;  %vm292_vm5 = vcmp.eq.s32.totalorder %v5202_v26, %v6147_v4 }
 0x182   :  { %4580 = vmatprep.subr.msk.bf16.mxu0 %vm4579_vm8, %v4933_v17  ;;  %vm1109_vm10 = vmor %vm277_vm3, %vm725_vm4  ;;  %vm724_vm3 = vcmp.eq.s32.totalorder %v5194_v25, %v6151_v16 }
 0x183   :  { %vm1125_vm13 = vmor %vm293_vm6, %vm741_vm7  ;;  %vm740_vm6 = vcmp.eq.s32.totalorder %v5202_v26, %v6151_v16 }
 0x184   :  { %vm4627_vm0 = vmpackc.low %vm1125_vm13, %vm1109_vm10  ;;  %vm307_vm10 = vcmp.eq.s32.totalorder %v5240_v27, %v6093_v11  ;;  %vm323_vm13 = vcmp.eq.s32.totalorder %v5248_v28, %v6093_v11 }
 0x185   :  { %4628 = vmatprep.subr.msk.bf16.mxu1 %vm4627_vm0, %v4933_v17  ;;  %vm1106_vm1 = vmor %vm274_vm11, %vm722_vm12  ;;  %vm755_vm11 = vcmp.eq.s32.totalorder %v5240_v27, %v6097_v12 }
 0x186   :  { %vm1122_vm4 = vmor %vm290_vm14, %vm738_vm15  ;;  %vm771_vm14 = vcmp.eq.s32.totalorder %v5248_v28, %v6097_v12 }
 0x187   :  { %vm4581_vm7 = vmpackc.low %vm1122_vm4, %vm1106_vm1  ;;  %vm309_vm1 = vcmp.eq.s32.totalorder %v5240_v27, %v6110_v2  ;;  %vm325_vm4 = vcmp.eq.s32.totalorder %v5248_v28, %v6110_v2 }
 0x188   :  { %4582 = vmatpush1.bf16.msk.msra.mxu0 %vm4581_vm7, %v4933_v17  ;;  %vm1108_vm8 = vmor %vm276_vm2, %vm724_vm3  ;;  %vm757_vm2 = vcmp.eq.s32.totalorder %v5240_v27, %v6114_v13 }
 0x189   :  { %vm1124_vm12 = vmor %vm292_vm5, %vm740_vm6  ;;  %vm773_vm5 = vcmp.eq.s32.totalorder %v5248_v28, %v6114_v13 }
 0x18a   :  { %vm4629_vm15 = vmpackc.low %vm1124_vm12, %vm1108_vm8  ;;  %vm306_vm8 = vcmp.eq.s32.totalorder %v5240_v27, %v6127_v3  ;;  %vm322_vm12 = vcmp.eq.s32.totalorder %v5248_v28, %v6127_v3 }
 0x18b   :  { %4630 = vmatpush1.bf16.msk.msra.mxu1 %vm4629_vm15, %v4933_v17  ;;  %vm1139_vm0 = vmor %vm307_vm10, %vm755_vm11  ;;  %vm754_vm10 = vcmp.eq.s32.totalorder %v5240_v27, %v6131_v15 }
 0x18c   :  { %vm1155_vm3 = vmor %vm323_vm13, %vm771_vm14  ;;  %vm770_vm13 = vcmp.eq.s32.totalorder %v5248_v28, %v6131_v15 }
 0x18d   :  { %vm4583_vm6 = vmpackc.low %vm1155_vm3, %vm1139_vm0  ;;  %vm308_vm0 = vcmp.eq.s32.totalorder %v5240_v27, %v6147_v4  ;;  %vm324_vm3 = vcmp.eq.s32.totalorder %v5248_v28, %v6147_v4 }
 0x18e   :  { %4584 = vmatprep.subr.msk.bf16.mxu0 %vm4583_vm6, %v4933_v17  ;;  %vm1141_vm7 = vmor %vm309_vm1, %vm757_vm2  ;;  %vm756_vm1 = vcmp.eq.s32.totalorder %v5240_v27, %v6151_v16 }
 0x18f   :  { %vm1157_vm11 = vmor %vm325_vm4, %vm773_vm5  ;;  %vm772_vm4 = vcmp.eq.s32.totalorder %v5248_v28, %v6151_v16 }
 0x190   :  { %vm4631_vm14 = vmpackc.low %vm1157_vm11, %vm1141_vm7  ;;  %vm339_vm7 = vcmp.eq.s32.totalorder %v5282_v29, %v6093_v11  ;;  %vm355_vm11 = vcmp.eq.s32.totalorder %v5290_v30, %v6093_v11 }
 0x191   :  { %4632 = vmatprep.subr.msk.bf16.mxu1 %vm4631_vm14, %v4933_v17  ;;  %vm1138_vm15 = vmor %vm306_vm8, %vm754_vm10  ;;  %vm787_vm8 = vcmp.eq.s32.totalorder %v5282_v29, %v6097_v12 }
 0x192   :  { %vm1154_vm2 = vmor %vm322_vm12, %vm770_vm13  ;;  %vm803_vm12 = vcmp.eq.s32.totalorder %v5290_v30, %v6097_v12 }
 0x193   :  { %vm4585_vm5 = vmpackc.low %vm1154_vm2, %vm1138_vm15  ;;  %vm341_vm15 = vcmp.eq.s32.totalorder %v5282_v29, %v6110_v2  ;;  %vm357_vm2 = vcmp.eq.s32.totalorder %v5290_v30, %v6110_v2 }
 0x194   :  { %4586 = vmatpush1.bf16.msk.msra.mxu0 %vm4585_vm5, %v4933_v17  ;;  %vm1140_vm6 = vmor %vm308_vm0, %vm756_vm1  ;;  %vm789_vm0 = vcmp.eq.s32.totalorder %v5282_v29, %v6114_v13 }
 0x195   :  { %vm1156_vm10 = vmor %vm324_vm3, %vm772_vm4  ;;  %vm805_vm3 = vcmp.eq.s32.totalorder %v5290_v30, %v6114_v13 }
 0x196   :  { %vm4633_vm13 = vmpackc.low %vm1156_vm10, %vm1140_vm6  ;;  %vm338_vm6 = vcmp.eq.s32.totalorder %v5282_v29, %v6127_v3  ;;  %vm354_vm10 = vcmp.eq.s32.totalorder %v5290_v30, %v6127_v3 }
 0x197   :  { %4634 = vmatpush1.bf16.msk.msra.mxu1 %vm4633_vm13, %v4933_v17  ;;  %vm1171_vm14 = vmor %vm339_vm7, %vm787_vm8  ;;  %vm786_vm7 = vcmp.eq.s32.totalorder %v5282_v29, %v6131_v15 }
 0x198   :  { %vm1187_vm1 = vmor %vm355_vm11, %vm803_vm12  ;;  %vm802_vm11 = vcmp.eq.s32.totalorder %v5290_v30, %v6131_v15 }
 0x199   :  { %vm4587_vm4 = vmpackc.low %vm1187_vm1, %vm1171_vm14  ;;  %vm340_vm14 = vcmp.eq.s32.totalorder %v5282_v29, %v6147_v4  ;;  %vm356_vm1 = vcmp.eq.s32.totalorder %v5290_v30, %v6147_v4 }
 0x19a   :  { %4588 = vmatprep.subr.msk.bf16.mxu0 %vm4587_vm4, %v4933_v17  ;;  %vm1173_vm5 = vmor %vm341_vm15, %vm789_vm0  ;;  %vm788_vm15 = vcmp.eq.s32.totalorder %v5282_v29, %v6151_v16 }
 0x19b   :  { %vm1189_vm8 = vmor %vm357_vm2, %vm805_vm3  ;;  %vm804_vm2 = vcmp.eq.s32.totalorder %v5290_v30, %v6151_v16 }
 0x19c   :  { %vm4635_vm12 = vmpackc.low %vm1189_vm8, %vm1173_vm5  ;;  %vm371_vm5 = vcmp.eq.s32.totalorder %v5324_v31, %v6093_v11  ;;  %vm387_vm8 = vcmp.eq.s32.totalorder %v5332_v32, %v6093_v11 }
 0x19d   :  { %4636 = vmatprep.subr.msk.bf16.mxu1 %vm4635_vm12, %v4933_v17  ;;  %vm1170_vm13 = vmor %vm338_vm6, %vm786_vm7  ;;  %vm819_vm6 = vcmp.eq.s32.totalorder %v5324_v31, %v6097_v12 }
 0x19e   :  { %vm1186_vm0 = vmor %vm354_vm10, %vm802_vm11  ;;  %vm835_vm10 = vcmp.eq.s32.totalorder %v5332_v32, %v6097_v12 }
 0x19f   :  { %vm4589_vm3 = vmpackc.low %vm1186_vm0, %vm1170_vm13  ;;  %vm373_vm13 = vcmp.eq.s32.totalorder %v5324_v31, %v6110_v2  ;;  %vm389_vm0 = vcmp.eq.s32.totalorder %v5332_v32, %v6110_v2 }
 0x1a0   :  { %4590 = vmatpush1.bf16.msk.msra.mxu0 %vm4589_vm3, %v4933_v17  ;;  %vm1172_vm4 = vmor %vm340_vm14, %vm788_vm15  ;;  %vm821_vm14 = vcmp.eq.s32.totalorder %v5324_v31, %v6114_v13 }
 0x1a1   :  { %vm1188_vm7 = vmor %vm356_vm1, %vm804_vm2  ;;  %vm837_vm1 = vcmp.eq.s32.totalorder %v5332_v32, %v6114_v13 }
 0x1a2   :  { %vm4637_vm11 = vmpackc.low %vm1188_vm7, %vm1172_vm4  ;;  %vm370_vm4 = vcmp.eq.s32.totalorder %v5324_v31, %v6127_v3  ;;  %vm386_vm7 = vcmp.eq.s32.totalorder %v5332_v32, %v6127_v3 }
 0x1a3   :  { %4638 = vmatpush1.bf16.msk.msra.mxu1 %vm4637_vm11, %v4933_v17  ;;  %vm1203_vm12 = vmor %vm371_vm5, %vm819_vm6  ;;  %vm818_vm5 = vcmp.eq.s32.totalorder %v5324_v31, %v6131_v15 }
 0x1a4   :  { %vm1219_vm15 = vmor %vm387_vm8, %vm835_vm10  ;;  %vm834_vm8 = vcmp.eq.s32.totalorder %v5332_v32, %v6131_v15 }
 0x1a5   :  { %vm4591_vm2 = vmpackc.low %vm1219_vm15, %vm1203_vm12  ;;  %vm372_vm12 = vcmp.eq.s32.totalorder %v5324_v31, %v6147_v4  ;;  %vm388_vm15 = vcmp.eq.s32.totalorder %v5332_v32, %v6147_v4 }
 0x1a6   :  { %4592 = vmatprep.subr.msk.bf16.mxu0 %vm4591_vm2, %v4933_v17  ;;  %vm1205_vm3 = vmor %vm373_vm13, %vm821_vm14  ;;  %vm820_vm13 = vcmp.eq.s32.totalorder %v5324_v31, %v6151_v16 }
 0x1a7   :  { %vm1221_vm6 = vmor %vm389_vm0, %vm837_vm1  ;;  %vm836_vm0 = vcmp.eq.s32.totalorder %v5332_v32, %v6151_v16 }
 0x1a8   :  { %vm4639_vm10 = vmpackc.low %vm1221_vm6, %vm1205_vm3  ;;  %vm403_vm3 = vcmp.eq.s32.totalorder %v5366_v33, %v6093_v11  ;;  %vm419_vm6 = vcmp.eq.s32.totalorder %v5374_v34, %v6093_v11 }
 0x1a9   :  { %4640 = vmatprep.subr.msk.bf16.mxu1 %vm4639_vm10, %v4933_v17  ;;  %vm1202_vm11 = vmor %vm370_vm4, %vm818_vm5  ;;  %vm851_vm4 = vcmp.eq.s32.totalorder %v5366_v33, %v6097_v12 }
 0x1aa   :  { %vm1218_vm14 = vmor %vm386_vm7, %vm834_vm8  ;;  %vm867_vm7 = vcmp.eq.s32.totalorder %v5374_v34, %v6097_v12 }
 0x1ab   :  { %vm4593_vm1 = vmpackc.low %vm1218_vm14, %vm1202_vm11  ;;  %vm405_vm11 = vcmp.eq.s32.totalorder %v5366_v33, %v6110_v2  ;;  %vm421_vm14 = vcmp.eq.s32.totalorder %v5374_v34, %v6110_v2 }
 0x1ac   :  { %4594 = vmatpush1.bf16.msk.msra.mxu0 %vm4593_vm1, %v4933_v17  ;;  %vm1204_vm2 = vmor %vm372_vm12, %vm820_vm13  ;;  %vm853_vm12 = vcmp.eq.s32.totalorder %v5366_v33, %v6114_v13 }
 0x1ad   :  { %vm1220_vm5 = vmor %vm388_vm15, %vm836_vm0  ;;  %vm869_vm15 = vcmp.eq.s32.totalorder %v5374_v34, %v6114_v13 }
 0x1ae   :  { %vm4641_vm8 = vmpackc.low %vm1220_vm5, %vm1204_vm2  ;;  %vm402_vm2 = vcmp.eq.s32.totalorder %v5366_v33, %v6127_v3  ;;  %vm418_vm5 = vcmp.eq.s32.totalorder %v5374_v34, %v6127_v3 }
 0x1af   :  { %4642 = vmatpush1.bf16.msk.msra.mxu1 %vm4641_vm8, %v4933_v17  ;;  %vm1235_vm10 = vmor %vm403_vm3, %vm851_vm4  ;;  %vm850_vm3 = vcmp.eq.s32.totalorder %v5366_v33, %v6131_v15 }
 0x1b0   :  { %vm1251_vm13 = vmor %vm419_vm6, %vm867_vm7  ;;  %vm866_vm6 = vcmp.eq.s32.totalorder %v5374_v34, %v6131_v15 }
 0x1b1   :  { %vm4595_vm0 = vmpackc.low %vm1251_vm13, %vm1235_vm10  ;;  %vm404_vm10 = vcmp.eq.s32.totalorder %v5366_v33, %v6147_v4  ;;  %vm420_vm13 = vcmp.eq.s32.totalorder %v5374_v34, %v6147_v4 }
 0x1b2   :  { %4596 = vmatprep.subr.msk.bf16.mxu0 %vm4595_vm0, %v4933_v17  ;;  %vm1237_vm1 = vmor %vm405_vm11, %vm853_vm12  ;;  %vm852_vm11 = vcmp.eq.s32.totalorder %v5366_v33, %v6151_v16 }
 0x1b3   :  { %vm1253_vm4 = vmor %vm421_vm14, %vm869_vm15  ;;  %vm868_vm14 = vcmp.eq.s32.totalorder %v5374_v34, %v6151_v16 }
 0x1b4   :  { %vm4643_vm7 = vmpackc.low %vm1253_vm4, %vm1237_vm1  ;;  %vm435_vm1 = vcmp.eq.s32.totalorder %v5408_v35, %v6093_v11  ;;  %vm451_vm4 = vcmp.eq.s32.totalorder %v5416_v36, %v6093_v11 }
 0x1b5   :  { %4644 = vmatprep.subr.msk.bf16.mxu1 %vm4643_vm7, %v4933_v17  ;;  %vm1234_vm8 = vmor %vm402_vm2, %vm850_vm3  ;;  %vm883_vm2 = vcmp.eq.s32.totalorder %v5408_v35, %v6097_v12 }
 0x1b6   :  { %vm1250_vm12 = vmor %vm418_vm5, %vm866_vm6  ;;  %vm899_vm5 = vcmp.eq.s32.totalorder %v5416_v36, %v6097_v12 }
 0x1b7   :  { %vm4597_vm15 = vmpackc.low %vm1250_vm12, %vm1234_vm8  ;;  %vm437_vm8 = vcmp.eq.s32.totalorder %v5408_v35, %v6110_v2  ;;  %vm453_vm12 = vcmp.eq.s32.totalorder %v5416_v36, %v6110_v2 }
 0x1b8   :  { %4598 = vmatpush1.bf16.msk.msra.mxu0 %vm4597_vm15, %v4933_v17  ;;  %vm1236_vm0 = vmor %vm404_vm10, %vm852_vm11  ;;  %vm885_vm10 = vcmp.eq.s32.totalorder %v5408_v35, %v6114_v13 }
 0x1b9   :  { %vm1252_vm3 = vmor %vm420_vm13, %vm868_vm14  ;;  %vm901_vm13 = vcmp.eq.s32.totalorder %v5416_v36, %v6114_v13 }
 0x1ba   :  { %vm4645_vm6 = vmpackc.low %vm1252_vm3, %vm1236_vm0  ;;  %vm434_vm0 = vcmp.eq.s32.totalorder %v5408_v35, %v6127_v3  ;;  %vm450_vm3 = vcmp.eq.s32.totalorder %v5416_v36, %v6127_v3 }
 0x1bb   :  { %4646 = vmatpush1.bf16.msk.msra.mxu1 %vm4645_vm6, %v4933_v17  ;;  %vm1267_vm7 = vmor %vm435_vm1, %vm883_vm2  ;;  %vm882_vm1 = vcmp.eq.s32.totalorder %v5408_v35, %v6131_v15 }
 0x1bc   :  { %vm1283_vm11 = vmor %vm451_vm4, %vm899_vm5  ;;  %vm898_vm4 = vcmp.eq.s32.totalorder %v5416_v36, %v6131_v15 }
 0x1bd   :  { %vm4599_vm14 = vmpackc.low %vm1283_vm11, %vm1267_vm7  ;;  %vm436_vm7 = vcmp.eq.s32.totalorder %v5408_v35, %v6147_v4  ;;  %vm452_vm11 = vcmp.eq.s32.totalorder %v5416_v36, %v6147_v4 }
 0x1be   :  { %4600 = vmatprep.subr.msk.bf16.mxu0 %vm4599_vm14, %v4933_v17  ;;  %vm1269_vm15 = vmor %vm437_vm8, %vm885_vm10  ;;  %vm884_vm8 = vcmp.eq.s32.totalorder %v5408_v35, %v6151_v16 }
 0x1bf   :  { %vm1285_vm2 = vmor %vm453_vm12, %vm901_vm13  ;;  %vm900_vm12 = vcmp.eq.s32.totalorder %v5416_v36, %v6151_v16 }
 0x1c0   :  { %vm4647_vm5 = vmpackc.low %vm1285_vm2, %vm1269_vm15  ;;  %vm467_vm15 = vcmp.eq.s32.totalorder %v5450_v37, %v6093_v11  ;;  %vm483_vm2 = vcmp.eq.s32.totalorder %v5458_v38, %v6093_v11 }
 0x1c1   :  { %4648 = vmatprep.subr.msk.bf16.mxu1 %vm4647_vm5, %v4933_v17  ;;  %vm1266_vm6 = vmor %vm434_vm0, %vm882_vm1  ;;  %vm915_vm0 = vcmp.eq.s32.totalorder %v5450_v37, %v6097_v12 }
 0x1c2   :  { %vm1282_vm10 = vmor %vm450_vm3, %vm898_vm4  ;;  %vm931_vm3 = vcmp.eq.s32.totalorder %v5458_v38, %v6097_v12 }
 0x1c3   :  { %vm4601_vm13 = vmpackc.low %vm1282_vm10, %vm1266_vm6  ;;  %vm469_vm6 = vcmp.eq.s32.totalorder %v5450_v37, %v6110_v2  ;;  %vm485_vm10 = vcmp.eq.s32.totalorder %v5458_v38, %v6110_v2 }
 0x1c4   :  { %4602 = vmatpush1.bf16.msk.msra.mxu0 %vm4601_vm13, %v4933_v17  ;;  %vm1268_vm14 = vmor %vm436_vm7, %vm884_vm8  ;;  %vm917_vm7 = vcmp.eq.s32.totalorder %v5450_v37, %v6114_v13 }
 0x1c5   :  { %vm1284_vm1 = vmor %vm452_vm11, %vm900_vm12  ;;  %vm933_vm11 = vcmp.eq.s32.totalorder %v5458_v38, %v6114_v13 }
 0x1c6   :  { %vm4649_vm4 = vmpackc.low %vm1284_vm1, %vm1268_vm14  ;;  %vm466_vm14 = vcmp.eq.s32.totalorder %v5450_v37, %v6127_v3  ;;  %vm482_vm1 = vcmp.eq.s32.totalorder %v5458_v38, %v6127_v3 }
 0x1c7   :  { %4650 = vmatpush1.bf16.msk.msra.mxu1 %vm4649_vm4, %v4933_v17  ;;  %vm1299_vm5 = vmor %vm467_vm15, %vm915_vm0  ;;  %vm914_vm15 = vcmp.eq.s32.totalorder %v5450_v37, %v6131_v15 }
 0x1c8   :  { %vm1315_vm8 = vmor %vm483_vm2, %vm931_vm3  ;;  %vm930_vm2 = vcmp.eq.s32.totalorder %v5458_v38, %v6131_v15 }
 0x1c9   :  { %vm4603_vm12 = vmpackc.low %vm1315_vm8, %vm1299_vm5  ;;  %vm468_vm5 = vcmp.eq.s32.totalorder %v5450_v37, %v6147_v4  ;;  %vm484_vm8 = vcmp.eq.s32.totalorder %v5458_v38, %v6147_v4 }
 0x1ca   :  { %4604 = vmatprep.subr.msk.bf16.mxu0 %vm4603_vm12, %v4933_v17  ;;  %vm1301_vm13 = vmor %vm469_vm6, %vm917_vm7  ;;  %vm916_vm6 = vcmp.eq.s32.totalorder %v5450_v37, %v6151_v16 }
 0x1cb   :  { %vm1317_vm0 = vmor %vm485_vm10, %vm933_vm11  ;;  %vm932_vm10 = vcmp.eq.s32.totalorder %v5458_v38, %v6151_v16 }
 0x1cc   :  { %vm4651_vm3 = vmpackc.low %vm1317_vm0, %vm1301_vm13  ;;  %vm499_vm13 = vcmp.eq.s32.totalorder %v5492_v39, %v6093_v11  ;;  %vm515_vm0 = vcmp.eq.s32.totalorder %v5500_v40, %v6093_v11 }
 0x1cd   :  { %4652 = vmatprep.subr.msk.bf16.mxu1 %vm4651_vm3, %v4933_v17  ;;  %vm1298_vm4 = vmor %vm466_vm14, %vm914_vm15  ;;  %vm947_vm14 = vcmp.eq.s32.totalorder %v5492_v39, %v6097_v12 }
 0x1ce   :  { %vm1314_vm7 = vmor %vm482_vm1, %vm930_vm2  ;;  %vm963_vm1 = vcmp.eq.s32.totalorder %v5500_v40, %v6097_v12 }
 0x1cf   :  { %vm4605_vm11 = vmpackc.low %vm1314_vm7, %vm1298_vm4  ;;  %vm501_vm4 = vcmp.eq.s32.totalorder %v5492_v39, %v6110_v2  ;;  %vm517_vm7 = vcmp.eq.s32.totalorder %v5500_v40, %v6110_v2 }
 0x1d0   :  { %4606 = vmatpush1.bf16.msk.msra.mxu0 %vm4605_vm11, %v4933_v17  ;;  %vm1300_vm12 = vmor %vm468_vm5, %vm916_vm6  ;;  %vm949_vm5 = vcmp.eq.s32.totalorder %v5492_v39, %v6114_v13 }
 0x1d1   :  { %vm1316_vm15 = vmor %vm484_vm8, %vm932_vm10  ;;  %vm965_vm8 = vcmp.eq.s32.totalorder %v5500_v40, %v6114_v13 }
 0x1d2   :  { %vm4653_vm2 = vmpackc.low %vm1316_vm15, %vm1300_vm12  ;;  %vm498_vm12 = vcmp.eq.s32.totalorder %v5492_v39, %v6127_v3  ;;  %vm514_vm15 = vcmp.eq.s32.totalorder %v5500_v40, %v6127_v3 }
 0x1d3   :  { %4654 = vmatpush1.bf16.msk.msra.mxu1 %vm4653_vm2, %v4933_v17  ;;  %vm1331_vm3 = vmor %vm499_vm13, %vm947_vm14  ;;  %vm946_vm13 = vcmp.eq.s32.totalorder %v5492_v39, %v6131_v15 }
 0x1d4   :  { %vm1347_vm6 = vmor %vm515_vm0, %vm963_vm1  ;;  %vm962_vm0 = vcmp.eq.s32.totalorder %v5500_v40, %v6131_v15 }
 0x1d5   :  { %vm4607_vm10 = vmpackc.low %vm1347_vm6, %vm1331_vm3  ;;  %vm500_vm3 = vcmp.eq.s32.totalorder %v5492_v39, %v6147_v4  ;;  %vm516_vm6 = vcmp.eq.s32.totalorder %v5500_v40, %v6147_v4 }
 0x1d6   :  { %4608 = vmatprep.subr.msk.bf16.mxu0 %vm4607_vm10, %v4933_v17  ;;  %vm1333_vm11 = vmor %vm501_vm4, %vm949_vm5  ;;  %vm948_vm4 = vcmp.eq.s32.totalorder %v5492_v39, %v6151_v16 }
 0x1d7   :  { %vm1349_vm14 = vmor %vm517_vm7, %vm965_vm8  ;;  %vm964_vm7 = vcmp.eq.s32.totalorder %v5500_v40, %v6151_v16 }
 0x1d8   :  { %vm4655_vm1 = vmpackc.low %vm1349_vm14, %vm1333_vm11  ;;  %vm151_vm11 = vcmp.eq.s32.totalorder %v4987_v1, %v6607_v24  ;;  %vm167_vm14 = vcmp.eq.s32.totalorder %v4999_v5, %v6607_v24 }
 0x1d9   :  { %4656 = vmatprep.subr.msk.bf16.mxu1 %vm4655_vm1, %v4933_v17  ;;  %vm1330_vm2 = vmor %vm498_vm12, %vm946_vm13  ;;  %vm599_vm12 = vcmp.eq.s32.totalorder %v4987_v1, %v6611_v43 }
 0x1da   :  { %vm1346_vm5 = vmor %vm514_vm15, %vm962_vm0  ;;  %vm615_vm15 = vcmp.eq.s32.totalorder %v4999_v5, %v6611_v43 }
 0x1db   :  { %vm4609_vm8 = vmpackc.low %vm1346_vm5, %vm1330_vm2  ;;  %vm153_vm2 = vcmp.eq.s32.totalorder %v4987_v1, %v6624_v41  ;;  %vm169_vm5 = vcmp.eq.s32.totalorder %v4999_v5, %v6624_v41 }
 0x1dc   :  { %4610 = vmatpush1.bf16.msk.msra.mxu0 %vm4609_vm8, %v4933_v17  ;;  %vm1332_vm10 = vmor %vm500_vm3, %vm948_vm4  ;;  %vm601_vm3 = vcmp.eq.s32.totalorder %v4987_v1, %v6628_v44 }
 0x1dd   :  { %vm1348_vm13 = vmor %vm516_vm6, %vm964_vm7  ;;  %vm617_vm6 = vcmp.eq.s32.totalorder %v4999_v5, %v6628_v44 }
 0x1de   :  { %vm4657_vm0 = vmpackc.low %vm1348_vm13, %vm1332_vm10  ;;  %vm150_vm10 = vcmp.eq.s32.totalorder %v4987_v1, %v6641_v42  ;;  %vm166_vm13 = vcmp.eq.s32.totalorder %v4999_v5, %v6641_v42 }
 0x1df   :  { %4658 = vmatpush1.bf16.msk.msra.mxu1 %vm4657_vm0, %v4933_v17  ;;  %2680 = vmatmul.mubr.f32.vlgmr.msra.gmra.mrb[32].mxu0 %v4827_v47  ;;  %vm983_vm1 = vmor %vm151_vm11, %vm599_vm12  ;;  %vm598_vm11 = vcmp.eq.s32.totalorder %v4987_v1, %v6645_v46 }
 0x1e0   :  { %vm999_vm4 = vmor %vm167_vm14, %vm615_vm15  ;;  %4180 = vmatprep.mubr.msk.f32.mxu0 %vm2138_vm9, %v4828_v45  ;;  %vm614_vm14 = vcmp.eq.s32.totalorder %v4999_v5, %v6645_v46 }
 0x1e1   :  { %vm4659_vm7 = vmpackc.low %vm999_vm4, %vm983_vm1  ;;  %vm152_vm1 = vcmp.eq.s32.totalorder %v4987_v1, %v6659_v48  ;;  %vm168_vm4 = vcmp.eq.s32.totalorder %v4999_v5, %v6659_v48 }
 0x1e2   :  { %2793 = vmatmul.mubr.f32.vlgmr.msra.gmra.mrb[32].mxu1 %v4827_v47  ;;  %4660 = vmatprep.subr.msk.bf16.mxu0 %vm4659_vm7, %v4933_v17  ;;  %vm985_vm8 = vmor %vm153_vm2, %vm601_vm3  ;;  %vm600_vm2 = vcmp.eq.s32.totalorder %v4987_v1, %v6663_v50 }
 0x1e3   :  { %vm1001_vm12 = vmor %vm169_vm5, %vm617_vm6  ;;  %4236 = vmatprep.mubr.msk.f32.mxu1 %vm2138_vm9, %v4828_v45  ;;  %2686 = vmatmul.mubr.f32.gmra.mrb[34].mxu0 %v4829_v49  ;;  %vm616_vm5 = vcmp.eq.s32.totalorder %v4999_v5, %v6663_v50  ;;  %v4833_v5 = vld [vmem:[#allocation6 + $0x30] sm:$0xff] }
 0x1e4   :  { %vm4707_vm15 = vmpackc.low %vm1001_vm12, %vm985_vm8  ;;  %4181 = vmatprep.mubr.msk.f32.mxu0 %vm2138_vm9, %v4830_v51  ;;  %vm183_vm8 = vcmp.eq.s32.totalorder %v5066_v18, %v6607_v24  ;;  %vm199_vm12 = vcmp.eq.s32.totalorder %v5074_v19, %v6607_v24 }
 0x1e5   :  { %4708 = vmatprep.subr.msk.bf16.mxu1 %vm4707_vm15, %v4933_v17  ;;  %vm982_vm0 = vmor %vm150_vm10, %vm598_vm11  ;;  %vm631_vm10 = vcmp.eq.s32.totalorder %v5066_v18, %v6611_v43 }
 0x1e6   :  { %vm998_vm3 = vmor %vm166_vm13, %vm614_vm14  ;;  %2799 = vmatmul.mubr.f32.gmra.mrb[34].mxu1 %v4829_v49  ;;  %vm647_vm13 = vcmp.eq.s32.totalorder %v5074_v19, %v6611_v43 }
 0x1e7   :  { %vm4661_vm6 = vmpackc.low %vm998_vm3, %vm982_vm0  ;;  %4237 = vmatprep.mubr.msk.f32.mxu1 %vm2138_vm9, %v4830_v51  ;;  %2692 = vmatmul.mubr.f32.gmra.mrb[36].mxu0 %v4831_v52  ;;  %vm185_vm0 = vcmp.eq.s32.totalorder %v5066_v18, %v6624_v41  ;;  %vm201_vm3 = vcmp.eq.s32.totalorder %v5074_v19, %v6624_v41 }
 0x1e8   :  { %4662 = vmatpush1.bf16.msk.msra.mxu0 %vm4661_vm6, %v4933_v17  ;;  %vm984_vm7 = vmor %vm152_vm1, %vm600_vm2  ;;  %4182 = vmatprep.mubr.msk.f32.mxu0 %vm2138_vm9, %v4832_v53  ;;  %vm633_vm1 = vcmp.eq.s32.totalorder %v5066_v18, %v6628_v44 }
 0x1e9   :  { %vm1000_vm11 = vmor %vm168_vm4, %vm616_vm5  ;;  %vm649_vm4 = vcmp.eq.s32.totalorder %v5074_v19, %v6628_v44 }
 0x1ea   :  { %vm4709_vm14 = vmpackc.low %vm1000_vm11, %vm984_vm7  ;;  %2805 = vmatmul.mubr.f32.gmra.mrb[36].mxu1 %v4831_v52  ;;  %vm182_vm7 = vcmp.eq.s32.totalorder %v5066_v18, %v6641_v42  ;;  %vm198_vm11 = vcmp.eq.s32.totalorder %v5074_v19, %v6641_v42 }
 0x1eb   :  { %4710 = vmatpush1.bf16.msk.msra.mxu1 %vm4709_vm14, %v4933_v17  ;;  %vm1015_vm15 = vmor %vm183_vm8, %vm631_vm10  ;;  %4238 = vmatprep.mubr.msk.f32.mxu1 %vm2138_vm9, %v4832_v53  ;;  %vm630_vm8 = vcmp.eq.s32.totalorder %v5066_v18, %v6645_v46 }
 0x1ec   :  { %vm1031_vm2 = vmor %vm199_vm12, %vm647_vm13  ;;  %2698 = vmatmul.mubr.f32.gmra.mrb[38].mxu0 %v4833_v5  ;;  %vm646_vm12 = vcmp.eq.s32.totalorder %v5074_v19, %v6645_v46 }
 0x1ed   :  { %vm4663_vm5 = vmpackc.low %vm1031_vm2, %vm1015_vm15  ;;  %4183 = vmatprep.mubr.msk.f32.mxu0 %vm2138_vm9, %v4834_v54  ;;  %vm184_vm15 = vcmp.eq.s32.totalorder %v5066_v18, %v6659_v48  ;;  %vm200_vm2 = vcmp.eq.s32.totalorder %v5074_v19, %v6659_v48 }
 0x1ee   :  { %4664 = vmatprep.subr.msk.bf16.mxu0 %vm4663_vm5, %v4933_v17  ;;  %vm1017_vm6 = vmor %vm185_vm0, %vm633_vm1  ;;  %2811 = vmatmul.mubr.f32.gmra.mrb[38].mxu1 %v4833_v5  ;;  %vm632_vm0 = vcmp.eq.s32.totalorder %v5066_v18, %v6663_v50  ;;  %v4837_v18 = vld [vmem:[#allocation6 + $0x50] sm:$0xff] }
 0x1ef   :  { %vm1033_vm10 = vmor %vm201_vm3, %vm649_vm4  ;;  %4239 = vmatprep.mubr.msk.f32.mxu1 %vm2138_vm9, %v4834_v54  ;;  %vm648_vm3 = vcmp.eq.s32.totalorder %v5074_v19, %v6663_v50  ;;  %v4838_v19 = vld [vmem:[#allocation6 + $0x68] sm:$0xff] }
 0x1f0   :  { %vm4711_vm13 = vmpackc.low %vm1033_vm10, %vm1017_vm6  ;;  %2704 = vmatmul.mubr.f32.gmra.mrb[40].mxu0 %v4835_v55  ;;  %vm215_vm6 = vcmp.eq.s32.totalorder %v5108_v20, %v6607_v24  ;;  %vm231_vm10 = vcmp.eq.s32.totalorder %v5116_v21, %v6607_v24 }
 0x1f1   :  { %4712 = vmatprep.subr.msk.bf16.mxu1 %vm4711_vm13, %v4933_v17  ;;  %vm1014_vm14 = vmor %vm182_vm7, %vm630_vm8  ;;  %4184 = vmatprep.mubr.msk.f32.mxu0 %vm2138_vm9, %v4836_v56  ;;  %vm663_vm7 = vcmp.eq.s32.totalorder %v5108_v20, %v6611_v43 }
 0x1f2   :  { %vm1030_vm1 = vmor %vm198_vm11, %vm646_vm12  ;;  %2817 = vmatmul.mubr.f32.gmra.mrb[40].mxu1 %v4835_v55  ;;  %vm679_vm11 = vcmp.eq.s32.totalorder %v5116_v21, %v6611_v43 }
 0x1f3   :  { %vm4665_vm4 = vmpackc.low %vm1030_vm1, %vm1014_vm14  ;;  %4240 = vmatprep.mubr.msk.f32.mxu1 %vm2138_vm9, %v4836_v56  ;;  %vm217_vm14 = vcmp.eq.s32.totalorder %v5108_v20, %v6624_v41  ;;  %vm233_vm1 = vcmp.eq.s32.totalorder %v5116_v21, %v6624_v41 }
 0x1f4   :  { %4666 = vmatpush1.bf16.msk.msra.mxu0 %vm4665_vm4, %v4933_v17  ;;  %vm1016_vm5 = vmor %vm184_vm15, %vm632_vm0  ;;  %vm665_vm15 = vcmp.eq.s32.totalorder %v5108_v20, %v6628_v44 }
 0x1f5   :  { %vm1032_vm8 = vmor %vm200_vm2, %vm648_vm3  ;;  %2710 = vmatmul.mubr.f32.gmra.mrb[42].mxu0 %v4837_v18  ;;  %vm681_vm2 = vcmp.eq.s32.totalorder %v5116_v21, %v6628_v44 }
 0x1f6   :  { %vm4713_vm12 = vmpackc.low %vm1032_vm8, %vm1016_vm5  ;;  %2823 = vmatmul.mubr.f32.gmra.mrb[42].mxu1 %v4837_v18  ;;  %4185 = vmatprep.mubr.msk.f32.mxu0 %vm2138_vm9, %v4838_v19  ;;  %vm214_vm5 = vcmp.eq.s32.totalorder %v5108_v20, %v6641_v42  ;;  %vm230_vm8 = vcmp.eq.s32.totalorder %v5116_v21, %v6641_v42 }
 0x1f7   :  { %4714 = vmatpush1.bf16.msk.msra.mxu1 %vm4713_vm12, %v4933_v17  ;;  %vm1047_vm13 = vmor %vm215_vm6, %vm663_vm7  ;;  %4241 = vmatprep.mubr.msk.f32.mxu1 %vm2138_vm9, %v4838_v19  ;;  %vm662_vm6 = vcmp.eq.s32.totalorder %v5108_v20, %v6645_v46 }
 0x1f8   :  { %vm1063_vm0 = vmor %vm231_vm10, %vm679_vm11  ;;  %vm678_vm10 = vcmp.eq.s32.totalorder %v5116_v21, %v6645_v46 }
 0x1f9   :  { %vm4667_vm3 = vmpackc.low %vm1063_vm0, %vm1047_vm13  ;;  %2716 = vmatmul.mubr.f32.gmra.mrb[44].mxu0 %v4839_v57  ;;  %vm216_vm13 = vcmp.eq.s32.totalorder %v5108_v20, %v6659_v48  ;;  %vm232_vm0 = vcmp.eq.s32.totalorder %v5116_v21, %v6659_v48 }
 0x1fa   :  { %4668 = vmatprep.subr.msk.bf16.mxu0 %vm4667_vm3, %v4933_v17  ;;  %vm1049_vm4 = vmor %vm217_vm14, %vm665_vm15  ;;  %2829 = vmatmul.mubr.f32.gmra.mrb[44].mxu1 %v4839_v57  ;;  %vm664_vm14 = vcmp.eq.s32.totalorder %v5108_v20, %v6663_v50  ;;  %v2229_v20 = vpop.f32.mrb[0].mxu0 }
 0x1fb   :  { %vm1065_vm7 = vmor %vm233_vm1, %vm681_vm2  ;;  %4186 = vmatprep.mubr.msk.f32.mxu0 %vm2138_vm9, %v4840_v58  ;;  %4242 = vmatprep.mubr.msk.f32.mxu1 %vm2138_vm9, %v4840_v58  ;;  %vm680_vm1 = vcmp.eq.s32.totalorder %v5116_v21, %v6663_v50  ;;  %v2342_v21 = vpop.f32.mrb[0].mxu1 }
 0x1fc   :  { %vm4715_vm11 = vmpackc.low %vm1065_vm7, %vm1049_vm4  ;;  %vm247_vm4 = vcmp.eq.s32.totalorder %v5150_v22, %v6607_v24  ;;  %vm263_vm7 = vcmp.eq.s32.totalorder %v5158_v23, %v6607_v24 }
 0x1fd   :  { %4716 = vmatprep.subr.msk.bf16.mxu1 %vm4715_vm11, %v4933_v17  ;;  %vm1046_vm12 = vmor %vm214_vm5, %vm662_vm6  ;;  %2722 = vmatmul.mubr.f32.gmra.mrb[46].mxu0 %v4841_v59  ;;  %vm695_vm5 = vcmp.eq.s32.totalorder %v5150_v22, %v6611_v43 }
 0x1fe   :  { %vm1062_vm15 = vmor %vm230_vm8, %vm678_vm10  ;;  %2835 = vmatmul.mubr.f32.gmra.mrb[46].mxu1 %v4841_v59  ;;  %4291 = vmatprep.mubr.msk.f32.mxu0 %vm2138_vm9, %v6284_v14  ;;  %vm711_vm8 = vcmp.eq.s32.totalorder %v5158_v23, %v6611_v43 }
 0x1ff   :  { %vm4669_vm2 = vmpackc.low %vm1062_vm15, %vm1046_vm12  ;;  %4347 = vmatprep.mubr.msk.f32.mxu1 %vm2138_vm9, %v6284_v14  ;;  %vm249_vm12 = vcmp.eq.s32.totalorder %v5150_v22, %v6624_v41  ;;  %vm265_vm15 = vcmp.eq.s32.totalorder %v5158_v23, %v6624_v41 }
 0x200   :  { %4670 = vmatpush1.bf16.msk.msra.mxu0 %vm4669_vm2, %v4933_v17  ;;  %vm1048_vm3 = vmor %vm216_vm13, %vm664_vm14  ;;  %vm697_vm13 = vcmp.eq.s32.totalorder %v5150_v22, %v6628_v44 }
 0x201   :  { %vm1064_vm6 = vmor %vm232_vm0, %vm680_vm1  ;;  %vm713_vm0 = vcmp.eq.s32.totalorder %v5158_v23, %v6628_v44 }
 0x202   :  { %vm4717_vm10 = vmpackc.low %vm1064_vm6, %vm1048_vm3  ;;  %vm246_vm3 = vcmp.eq.s32.totalorder %v5150_v22, %v6641_v42  ;;  %vm262_vm6 = vcmp.eq.s32.totalorder %v5158_v23, %v6641_v42 }
 0x203   :  { %4718 = vmatpush1.bf16.msk.msra.mxu1 %vm4717_vm10, %v4933_v17  ;;  %vm1079_vm11 = vmor %vm247_vm4, %vm695_vm5  ;;  %vm694_vm4 = vcmp.eq.s32.totalorder %v5150_v22, %v6645_v46 }
 0x204   :  { %vm1095_vm14 = vmor %vm263_vm7, %vm711_vm8  ;;  %vm710_vm7 = vcmp.eq.s32.totalorder %v5158_v23, %v6645_v46 }
 0x205   :  { %vm4671_vm1 = vmpackc.low %vm1095_vm14, %vm1079_vm11  ;;  %vm248_vm11 = vcmp.eq.s32.totalorder %v5150_v22, %v6659_v48  ;;  %vm264_vm14 = vcmp.eq.s32.totalorder %v5158_v23, %v6659_v48 }
 0x206   :  { %4672 = vmatprep.subr.msk.bf16.mxu0 %vm4671_vm1, %v4933_v17  ;;  %vm1081_vm2 = vmor %vm249_vm12, %vm697_vm13  ;;  %vm696_vm12 = vcmp.eq.s32.totalorder %v5150_v22, %v6663_v50  ;;  %v2231_v22 = vpop.f32.mrb[1].mxu0 }
 0x207   :  { %vm1097_vm5 = vmor %vm265_vm15, %vm713_vm0  ;;  %vm712_vm15 = vcmp.eq.s32.totalorder %v5158_v23, %v6663_v50  ;;  %v2344_v23 = vpop.f32.mrb[1].mxu1  ;;  %v2235_v60 = vpop.f32.mrb[2].mxu0 }
 0x208   :  { %vm4719_vm8 = vmpackc.low %vm1097_vm5, %vm1081_vm2  ;;  %vm279_vm2 = vcmp.eq.s32.totalorder %v5194_v25, %v6607_v24  ;;  %vm295_vm5 = vcmp.eq.s32.totalorder %v5202_v26, %v6607_v24  ;;  %v2348_v61 = vpop.f32.mrb[2].mxu1  ;;  %v2237_v62 = vpop.f32.mrb[3].mxu0 }
 0x209   :  { %4720 = vmatprep.subr.msk.bf16.mxu1 %vm4719_vm8, %v4933_v17  ;;  %vm1078_vm10 = vmor %vm246_vm3, %vm694_vm4  ;;  %vm727_vm3 = vcmp.eq.s32.totalorder %v5194_v25, %v6611_v43  ;;  %v2350_v63 = vpop.f32.mrb[3].mxu1  ;;  %v2241_v0 = vpop.f32.mrb[4].mxu0 }
 0x20a   :  { %vm1094_vm13 = vmor %vm262_vm6, %vm710_vm7  ;;  %vm743_vm6 = vcmp.eq.s32.totalorder %v5202_v26, %v6611_v43  ;;  %v2354_v6 = vpop.f32.mrb[4].mxu1  ;;  %v2243_v7 = vpop.f32.mrb[5].mxu0 }
 0x20b   :  { %vm4673_vm0 = vmpackc.low %vm1094_vm13, %vm1078_vm10  ;;  %vm281_vm10 = vcmp.eq.s32.totalorder %v5194_v25, %v6624_v41  ;;  %vm297_vm13 = vcmp.eq.s32.totalorder %v5202_v26, %v6624_v41  ;;  %v2356_v8 = vpop.f32.mrb[5].mxu1  ;;  %v2247_v9 = vpop.f32.mrb[6].mxu0 }
 0x20c   :  { %4674 = vmatpush1.bf16.msk.msra.mxu0 %vm4673_vm0, %v4933_v17  ;;  %vm1080_vm1 = vmor %vm248_vm11, %vm696_vm12  ;;  %vm729_vm11 = vcmp.eq.s32.totalorder %v5194_v25, %v6628_v44  ;;  %v2360_v10 = vpop.f32.mrb[6].mxu1  ;;  %v6844_v12 = vpop.f32.mrb[7].mxu0 }
 0x20d   :  { %vm1096_vm4 = vmor %vm264_vm14, %vm712_vm15  ;;  %vm745_vm14 = vcmp.eq.s32.totalorder %v5202_v26, %v6628_v44  ;;  %v6846_v2 = vpop.f32.mrb[7].mxu1  ;;  %v2253_v13 = vpop.f32.mrb[8].mxu0 }
 0x20e   :  { %vm4721_vm7 = vmpackc.low %vm1096_vm4, %vm1080_vm1  ;;  %vm278_vm1 = vcmp.eq.s32.totalorder %v5194_v25, %v6641_v42  ;;  %vm294_vm4 = vcmp.eq.s32.totalorder %v5202_v26, %v6641_v42  ;;  %v2366_v3 = vpop.f32.mrb[8].mxu1  ;;  %v3067_v15 = vmul.f32 %v2253_v13, %v2229_v20  ;;  %v2255_v16 = vpop.f32.mrb[9].mxu0 }
 0x20f   :  { %4722 = vmatpush1.bf16.msk.msra.mxu1 %vm4721_vm7, %v4933_v17  ;;  %vm1111_vm8 = vmor %vm279_vm2, %vm727_vm3  ;;  %vm726_vm2 = vcmp.eq.s32.totalorder %v5194_v25, %v6645_v46  ;;  %v3069_v4 = vmul.f32 %v2366_v3, %v2342_v21  ;;  %v2368_v14 = vpop.f32.mrb[9].mxu1  ;;  %v3068_v45 = vmul.f32 %v2255_v16, %v2231_v22  ;;  %v2259_v51 = vpop.f32.mrb[10].mxu0 }
 0x210   :  { %vm1127_vm12 = vmor %vm295_vm5, %vm743_vm6  ;;  %vm742_vm5 = vcmp.eq.s32.totalorder %v5202_v26, %v6645_v46  ;;  %v3070_v49 = vmul.f32 %v2368_v14, %v2344_v23  ;;  %v2372_v52 = vpop.f32.mrb[10].mxu1  ;;  %v2261_v5 = vpop.f32.mrb[11].mxu0 }
 0x211   :  { %vm4675_vm15 = vmpackc.low %vm1127_vm12, %vm1111_vm8  ;;  %vm280_vm8 = vcmp.eq.s32.totalorder %v5194_v25, %v6659_v48  ;;  %vm296_vm12 = vcmp.eq.s32.totalorder %v5202_v26, %v6659_v48  ;;  %v3085_v53 = vmul.f32 %v2372_v52, %v2348_v61  ;;  %v2374_v54 = vpop.f32.mrb[11].mxu1  ;;  %v2265_v56 = vpop.f32.mrb[12].mxu0 }
 0x212   :  { %4676 = vmatprep.subr.msk.bf16.mxu0 %vm4675_vm15, %v4933_v17  ;;  %vm1113_vm0 = vmor %vm281_vm10, %vm729_vm11  ;;  %vm728_vm10 = vcmp.eq.s32.totalorder %v5194_v25, %v6663_v50  ;;  %vm327_vm15 = vcmp.eq.s32.totalorder %v5248_v28, %v6607_v24  ;;  %v3083_v25 = vmul.f32 %v2259_v51, %v2235_v60  ;;  %v3086_v55 = vmul.f32 %v2374_v54, %v2350_v63  ;;  %v2378_v18 = vpop.f32.mrb[12].mxu1  ;;  %v2267_v21 = vpop.f32.mrb[13].mxu0 }
 0x213   :  { %vm1129_vm3 = vmor %vm297_vm13, %vm745_vm14  ;;  %vm744_vm13 = vcmp.eq.s32.totalorder %v5202_v26, %v6663_v50  ;;  %vm311_vm14 = vcmp.eq.s32.totalorder %v5240_v27, %v6607_v24  ;;  %v3084_v26 = vmul.f32 %v2261_v5, %v2237_v62  ;;  %v3149_v58 = vadd.f32 %v3085_v53, %v3069_v4  ;;  %v2380_v22 = vpop.f32.mrb[13].mxu1  ;;  %v2271_v63 = vpop.f32.mrb[14].mxu0 }
 0x214   :  { %vm4723_vm6 = vmpackc.low %vm1129_vm3, %vm1113_vm0  ;;  %v3131_v57 = vadd.f32 %v3083_v25, %v3067_v15  ;;  %v3099_v59 = vmul.f32 %v2265_v56, %v2241_v0  ;;  %v3101_v20 = vmul.f32 %v2378_v18, %v2354_v6  ;;  %v3158_v60 = vadd.f32 %v3086_v55, %v3070_v49  ;;  %v2384_v11 = vpop.f32.mrb[14].mxu1  ;;  %v2273_v15 = vpop.f32.mrb[15].mxu0 }
 0x215   :  { %4724 = vmatprep.subr.msk.bf16.mxu1 %vm4723_vm6, %v4933_v17  ;;  %vm6836_vm7 = vmor %vm278_vm1, %vm726_vm2  ;;  %vm759_vm1 = vcmp.eq.s32.totalorder %v5240_v27, %v6611_v43  ;;  %vm775_vm2 = vcmp.eq.s32.totalorder %v5248_v28, %v6611_v43  ;;  %v3140_v23 = vadd.f32 %v3084_v26, %v3068_v45  ;;  %v3100_v61 = vmul.f32 %v2267_v21, %v2243_v7  ;;  %v2386_v4 = vpop.f32.mrb[15].mxu1 }
 0x216   :  { %vm1126_vm11 = vmor %vm294_vm4, %vm742_vm5  ;;  %vm313_vm4 = vcmp.eq.s32.totalorder %v5240_v27, %v6624_v41  ;;  %vm329_vm5 = vcmp.eq.s32.totalorder %v5248_v28, %v6624_v41  ;;  %v3102_v62 = vmul.f32 %v2380_v22, %v2356_v8  ;;  %v3132_v0 = vadd.f32 %v3131_v57, %v3099_v59 }
 0x217   :  { %vm4677_vm0 = vmpackc.low %vm1126_vm11, %vm6836_vm7  ;;  %vm761_vm7 = vcmp.eq.s32.totalorder %v5240_v27, %v6628_v44  ;;  %vm310_vm11 = vcmp.eq.s32.totalorder %v5240_v27, %v6641_v42  ;;  %v3150_v6 = vadd.f32 %v3149_v58, %v3101_v20  ;;  %v3115_v13 = vmul.f32 %v2271_v63, %v2247_v9 }
 0x218   :  { %4678 = vmatpush1.bf16.msk.msra.mxu0 %vm4677_vm0, %v4933_v17  ;;  %vm6869_vm3 = vmor %vm280_vm8, %vm728_vm10  ;;  %vm777_vm8 = vcmp.eq.s32.totalorder %v5248_v28, %v6628_v44  ;;  %vm758_vm0 = vcmp.eq.s32.totalorder %v5240_v27, %v6645_v46  ;;  %v3117_v3 = vmul.f32 %v2384_v11, %v2360_v10  ;;  %v3141_v7 = vadd.f32 %v3140_v23, %v3100_v61 }
 0x219   :  { %vm1128_vm6 = vmor %vm296_vm12, %vm744_vm13  ;;  %v3159_v8 = vadd.f32 %v3158_v60, %v3102_v62  ;;  %v3116_v16 = vmul.f32 %v2273_v15, %v6844_v12  ;;  %v3118_v14 = vmul.f32 %v2386_v4, %v6846_v2  ;;  %v6931_v9 = vadd.f32 %v3132_v0, %v3115_v13 }
 0x21a   :  { %vm4725_vm10 = vmpackc.low %vm1128_vm6, %vm6869_vm3  ;;  %vm774_vm3 = vcmp.eq.s32.totalorder %v5248_v28, %v6645_v46  ;;  %v6933_v10 = vadd.f32 %v3150_v6, %v3117_v3  ;;  %vm312_vm6 = vcmp.eq.s32.totalorder %v5240_v27, %v6659_v48 }
 0x21b   :  { %4726 = vmatpush1.bf16.msk.msra.mxu1 %vm4725_vm10, %v4933_v17  ;;  %vm6900_vm12 = vmor %vm311_vm14, %vm759_vm1  ;;  %v6935_v12 = vadd.f32 %v3141_v7, %v3116_v16  ;;  %v6937_v2 = vadd.f32 %v3159_v8, %v3118_v14  ;;  %vm328_vm10 = vcmp.eq.s32.totalorder %v5248_v28, %v6659_v48 }
 0x21c   :  { %vm1159_vm13 = vmor %vm327_vm15, %vm775_vm2  ;;  %vm326_vm2 = vcmp.eq.s32.totalorder %v5248_v28, %v6641_v42 }
 0x21d   :  { %vm4679_vm14 = vmpackc.low %vm1159_vm13, %vm6900_vm12  ;;  %vm776_vm12 = vcmp.eq.s32.totalorder %v5248_v28, %v6663_v50 }
 0x21e   :  { %4680 = vmatprep.subr.msk.bf16.mxu0 %vm4679_vm14, %v4933_v17  ;;  %vm1145_vm15 = vmor %vm313_vm4, %vm761_vm7  ;;  %vm760_vm7 = vcmp.eq.s32.totalorder %v5240_v27, %v6663_v50  ;;  %vm791_vm14 = vcmp.eq.s32.totalorder %v5282_v29, %v6611_v43 }
 0x21f   :  { %vm1161_vm1 = vmor %vm329_vm5, %vm777_vm8 }
 0x220   :  { %vm4727_vm4 = vmpackc.low %vm1161_vm1, %vm1145_vm15  ;;  %vm359_vm1 = vcmp.eq.s32.totalorder %v5290_v30, %v6607_v24 }
 0x221   :  { %4728 = vmatprep.subr.msk.bf16.mxu1 %vm4727_vm4, %v4933_v17  ;;  %vm1142_vm5 = vmor %vm310_vm11, %vm758_vm0  ;;  %vm343_vm0 = vcmp.eq.s32.totalorder %v5282_v29, %v6607_v24 }
 0x222   :  { %vm1158_vm8 = vmor %vm326_vm2, %vm774_vm3  ;;  %v6954_v47 = vpop.f32.mrb[16].mxu0  ;;  %vm807_vm2 = vcmp.eq.s32.totalorder %v5290_v30, %v6611_v43 }
 0x223   :  { %vm4681_vm13 = vmpackc.low %vm1158_vm8, %vm1142_vm5  ;;  %v6956_v45 = vpop.f32.mrb[17].mxu0  ;;  %vm345_vm5 = vcmp.eq.s32.totalorder %v5282_v29, %v6624_v41  ;;  %vm361_vm8 = vcmp.eq.s32.totalorder %v5290_v30, %v6624_v41 }
 0x224   :  { %4682 = vmatpush1.bf16.msk.msra.mxu0 %vm4681_vm13, %v4933_v17  ;;  %vm1144_vm11 = vmor %vm312_vm6, %vm760_vm7  ;;  %vm793_vm6 = vcmp.eq.s32.totalorder %v5282_v29, %v6628_v44 }
 0x225   :  { %vm1160_vm15 = vmor %vm328_vm10, %vm776_vm12  ;;  %v6967_v27 = vpop.f32.mrb[16].mxu1  ;;  %vm809_vm10 = vcmp.eq.s32.totalorder %v5290_v30, %v6628_v44 }
 0x226   :  { %vm4729_vm3 = vmpackc.low %vm1160_vm15, %vm1144_vm11  ;;  %v6969_v28 = vpop.f32.mrb[17].mxu1  ;;  %v6971_v49 = vpop.f32.mrb[18].mxu0  ;;  %vm342_vm11 = vcmp.eq.s32.totalorder %v5282_v29, %v6641_v42  ;;  %vm358_vm15 = vcmp.eq.s32.totalorder %v5290_v30, %v6641_v42 }
 0x227   :  { %4730 = vmatpush1.bf16.msk.msra.mxu1 %vm4729_vm3, %v4933_v17  ;;  %vm1175_vm4 = vmor %vm343_vm0, %vm791_vm14  ;;  %v6978_v51 = vpop.f32.mrb[19].mxu0  ;;  %vm790_vm0 = vcmp.eq.s32.totalorder %v5282_v29, %v6645_v46 }
 0x228   :  { %vm1191_vm7 = vmor %vm359_vm1, %vm807_vm2  ;;  %vm806_vm1 = vcmp.eq.s32.totalorder %v5290_v30, %v6645_v46 }
 0x229   :  { %vm4683_vm12 = vmpackc.low %vm1191_vm7, %vm1175_vm4  ;;  %v6984_v52 = vpop.f32.mrb[18].mxu1  ;;  %vm344_vm4 = vcmp.eq.s32.totalorder %v5282_v29, %v6659_v48  ;;  %vm360_vm7 = vcmp.eq.s32.totalorder %v5290_v30, %v6659_v48 }
 0x22a   :  { %4684 = vmatprep.subr.msk.bf16.mxu0 %vm4683_vm12, %v4933_v17  ;;  %vm1177_vm13 = vmor %vm345_vm5, %vm793_vm6  ;;  %v6991_v25 = vpop.f32.mrb[19].mxu1  ;;  %v6993_v53 = vpop.f32.mrb[20].mxu0  ;;  %vm792_vm5 = vcmp.eq.s32.totalorder %v5282_v29, %v6663_v50 }
 0x22b   :  { %vm1193_vm14 = vmor %vm361_vm8, %vm809_vm10  ;;  %v6999_v5 = vpop.f32.mrb[21].mxu0  ;;  %vm808_vm8 = vcmp.eq.s32.totalorder %v5290_v30, %v6663_v50 }
 0x22c   :  { %vm4731_vm2 = vmpackc.low %vm1193_vm14, %vm1177_vm13  ;;  %vm375_vm13 = vcmp.eq.s32.totalorder %v5324_v31, %v6607_v24  ;;  %vm391_vm14 = vcmp.eq.s32.totalorder %v5332_v32, %v6607_v24 }
 0x22d   :  { %4732 = vmatprep.subr.msk.bf16.mxu1 %vm4731_vm2, %v4933_v17  ;;  %vm1174_vm3 = vmor %vm342_vm11, %vm790_vm0  ;;  %v7006_v54 = vpop.f32.mrb[20].mxu1  ;;  %vm823_vm11 = vcmp.eq.s32.totalorder %v5324_v31, %v6611_v43 }
 0x22e   :  { %vm1190_vm6 = vmor %vm358_vm15, %vm806_vm1  ;;  %v7012_v26 = vpop.f32.mrb[21].mxu1  ;;  %vm839_vm15 = vcmp.eq.s32.totalorder %v5332_v32, %v6611_v43 }
 0x22f   :  { %vm4685_vm10 = vmpackc.low %vm1190_vm6, %vm1174_vm3  ;;  %v7014_v55 = vpop.f32.mrb[22].mxu0  ;;  %vm377_vm3 = vcmp.eq.s32.totalorder %v5324_v31, %v6624_v41  ;;  %vm393_vm6 = vcmp.eq.s32.totalorder %v5332_v32, %v6624_v41 }
 0x230   :  { %4686 = vmatpush1.bf16.msk.msra.mxu0 %vm4685_vm10, %v4933_v17  ;;  %vm1176_vm12 = vmor %vm344_vm4, %vm792_vm5  ;;  %v7021_v29 = vpop.f32.mrb[23].mxu0  ;;  %vm825_vm4 = vcmp.eq.s32.totalorder %v5324_v31, %v6628_v44 }
 0x231   :  { %vm1192_vm0 = vmor %vm360_vm7, %vm808_vm8  ;;  %v7027_v30 = vpop.f32.mrb[22].mxu1  ;;  %vm841_vm7 = vcmp.eq.s32.totalorder %v5332_v32, %v6628_v44 }
 0x232   :  { %vm4733_vm1 = vmpackc.low %vm1192_vm0, %vm1176_vm12  ;;  %v7029_v56 = vpop.f32.mrb[23].mxu1  ;;  %vm374_vm12 = vcmp.eq.s32.totalorder %v5324_v31, %v6641_v42  ;;  %vm390_vm0 = vcmp.eq.s32.totalorder %v5332_v32, %v6641_v42 }
 0x233   :  { %4734 = vmatpush1.bf16.msk.msra.mxu1 %vm4733_vm1, %v4933_v17  ;;  %vm1207_vm2 = vmor %vm375_vm13, %vm823_vm11  ;;  %v2479_v18 = vpop.f32.mrb[24].mxu0  ;;  %vm822_vm13 = vcmp.eq.s32.totalorder %v5324_v31, %v6645_v46 }
 0x234   :  { %vm1223_vm5 = vmor %vm391_vm14, %vm839_vm15  ;;  %v3071_v19 = vmul.f32 %v2479_v18, %v6954_v47  ;;  %v2481_v57 = vpop.f32.mrb[25].mxu0  ;;  %vm838_vm14 = vcmp.eq.s32.totalorder %v5332_v32, %v6645_v46 }
 0x235   :  { %vm4687_vm8 = vmpackc.low %vm1223_vm5, %vm1207_vm2  ;;  %v2592_v58 = vpop.f32.mrb[24].mxu1  ;;  %v3072_v59 = vmul.f32 %v2481_v57, %v6956_v45  ;;  %vm376_vm2 = vcmp.eq.s32.totalorder %v5324_v31, %v6659_v48  ;;  %vm392_vm5 = vcmp.eq.s32.totalorder %v5332_v32, %v6659_v48 }
 0x236   :  { %4688 = vmatprep.subr.msk.bf16.mxu0 %vm4687_vm8, %v4933_v17  ;;  %vm1209_vm10 = vmor %vm377_vm3, %vm825_vm4  ;;  %v3073_v20 = vmul.f32 %v2592_v58, %v6967_v27  ;;  %v2594_v21 = vpop.f32.mrb[25].mxu1  ;;  %vm824_vm3 = vcmp.eq.s32.totalorder %v5324_v31, %v6663_v50  ;;  %vm407_vm8 = vcmp.eq.s32.totalorder %v5366_v33, %v6607_v24 }
 0x237   :  { %vm1225_vm11 = vmor %vm393_vm6, %vm841_vm7  ;;  %v3074_v22 = vmul.f32 %v2594_v21, %v6969_v28  ;;  %vm840_vm6 = vcmp.eq.s32.totalorder %v5332_v32, %v6663_v50  ;;  %v3134_v32 = vrot.slane %v6931_v9, 4 }
 0x238   :  { %vm4735_vm15 = vmpackc.low %vm1225_vm11, %vm1209_vm10  ;;  %v2485_v23 = vpop.f32.mrb[26].mxu0  ;;  %vm423_vm10 = vcmp.eq.s32.totalorder %v5374_v34, %v6607_v24  ;;  %vm871_vm11 = vcmp.eq.s32.totalorder %v5374_v34, %v6611_v43 }
 0x239   :  { %4736 = vmatprep.subr.msk.bf16.mxu1 %vm4735_vm15, %v4933_v17  ;;  %vm7054_vm1 = vmor %vm374_vm12, %vm822_vm13  ;;  %v3087_v61 = vmul.f32 %v2485_v23, %v6971_v49  ;;  %v2598_v62 = vpop.f32.mrb[26].mxu1  ;;  %v2487_v63 = vpop.f32.mrb[27].mxu0  ;;  %vm855_vm13 = vcmp.eq.s32.totalorder %v5366_v33, %v6611_v43  ;;  %vm425_vm15 = vcmp.eq.s32.totalorder %v5374_v34, %v6624_v41  ;;  %v3135_v21 = vadd.f32 %v3134_v32, %v6931_v9 }
 0x23a   :  { %vm1222_vm4 = vmor %vm390_vm0, %vm838_vm14  ;;  %v3089_v11 = vmul.f32 %v2598_v62, %v6984_v52  ;;  %v3088_v0 = vmul.f32 %v2487_v63, %v6978_v51  ;;  %v2600_v6 = vpop.f32.mrb[27].mxu1  ;;  %vm409_vm14 = vcmp.eq.s32.totalorder %v5366_v33, %v6624_v41  ;;  %v3152_v51 = vrot.slane %v6933_v10, 4 }
 0x23b   :  { %vm4689_vm7 = vmpackc.low %vm1222_vm4, %vm7054_vm1  ;;  %v3167_v13 = vadd.f32 %v3087_v61, %v3071_v19  ;;  %v3090_v3 = vmul.f32 %v2600_v6, %v6991_v25  ;;  %vm873_vm4 = vcmp.eq.s32.totalorder %v5374_v34, %v6628_v44 }
 0x23c   :  { %4690 = vmatpush1.bf16.msk.msra.mxu0 %vm4689_vm7, %v4933_v17  ;;  %vm7083_vm12 = vmor %vm376_vm2, %vm824_vm3  ;;  %v3185_v4 = vadd.f32 %v3089_v11, %v3073_v20  ;;  %v3176_v7 = vadd.f32 %v3088_v0, %v3072_v59  ;;  %v2491_v8 = vpop.f32.mrb[28].mxu0  ;;  %vm857_vm2 = vcmp.eq.s32.totalorder %v5366_v33, %v6628_v44  ;;  %v3153_v60 = vadd.f32 %v3152_v51, %v6933_v10  ;;  %v4842_v51 = vld [vmem:[#allocation6] sm:$0xff] }
 0x23d   :  { %vm1224_vm0 = vmor %vm392_vm5, %vm840_vm6  ;;  %v3194_v31 = vadd.f32 %v3090_v3, %v3074_v22  ;;  %v3103_v16 = vmul.f32 %v2491_v8, %v6993_v53  ;;  %v2604_v14 = vpop.f32.mrb[28].mxu1  ;;  %v2493_v47 = vpop.f32.mrb[29].mxu0  ;;  %vm406_vm6 = vcmp.eq.s32.totalorder %v5366_v33, %v6641_v42  ;;  %v3143_v53 = vrot.slane %v6935_v12, 4 }
 0x23e   :  { %vm4737_vm1 = vmpackc.low %vm1224_vm0, %vm7083_vm12  ;;  %v3105_v45 = vmul.f32 %v2604_v14, %v7006_v54  ;;  %v3104_v27 = vmul.f32 %v2493_v47, %v6999_v5  ;;  %v2606_v28 = vpop.f32.mrb[29].mxu1  ;;  %vm854_vm12 = vcmp.eq.s32.totalorder %v5366_v33, %v6645_v46  ;;  %v3154_v63 = vrot.slane %v3153_v60, 2 }
 0x23f   :  { %4738 = vmatpush1.bf16.msk.msra.mxu1 %vm4737_vm1, %v4933_v17  ;;  %vm7116_vm3 = vmor %vm407_vm8, %vm855_vm13  ;;  %v3168_v52 = vadd.f32 %v3167_v13, %v3103_v16  ;;  %v3106_v25 = vmul.f32 %v2606_v28, %v7012_v26  ;;  %vm422_vm8 = vcmp.eq.s32.totalorder %v5374_v34, %v6641_v42  ;;  %v3161_v26 = vrot.slane %v6937_v2, 4 }
 0x240   :  { %vm1255_vm5 = vmor %vm423_vm10, %vm871_vm11  ;;  %v3186_v5 = vadd.f32 %v3185_v4, %v3105_v45  ;;  %v3177_v54 = vadd.f32 %v3176_v7, %v3104_v27  ;;  %v2497_v18 = vpop.f32.mrb[30].mxu0  ;;  %vm870_vm11 = vcmp.eq.s32.totalorder %v5374_v34, %v6645_v46  ;;  %vm856_vm1 = vcmp.eq.s32.totalorder %v5366_v33, %v6663_v50 }
 0x241   :  { %vm4691_vm7 = vmpackc.low %vm1255_vm5, %vm7116_vm3  ;;  %v3195_v19 = vadd.f32 %v3194_v31, %v3106_v25  ;;  %v3119_v57 = vmul.f32 %v2497_v18, %v7014_v55  ;;  %v2610_v58 = vpop.f32.mrb[30].mxu1  ;;  %v2499_v59 = vpop.f32.mrb[31].mxu0  ;;  %v3162_v10 = vadd.f32 %v3161_v26, %v6937_v2  ;;  %vm424_vm3 = vcmp.eq.s32.totalorder %v5374_v34, %v6659_v48 }
 0x242   :  { %4692 = vmatprep.subr.msk.bf16.mxu0 %vm4691_vm7, %v4933_v17  ;;  %vm7146_vm10 = vmor %vm409_vm14, %vm857_vm2  ;;  %v3121_v55 = vmul.f32 %v2610_v58, %v7027_v30  ;;  %v3120_v22 = vmul.f32 %v2499_v59, %v7021_v29  ;;  %v2612_v23 = vpop.f32.mrb[31].mxu1  ;;  %v3144_v29 = vadd.f32 %v3143_v53, %v6935_v12  ;;  %vm439_vm7 = vcmp.eq.s32.totalorder %v5408_v35, %v6607_v24  ;;  %v4847_v58 = vld [vmem:[#allocation6 + $0x38] sm:$0xff] }
 0x243   :  { %vm1257_vm13 = vmor %vm425_vm15, %vm873_vm4  ;;  %v7164_v61 = vadd.f32 %v3168_v52, %v3119_v57  ;;  %v3122_v9 = vmul.f32 %v2612_v23, %v7029_v56  ;;  %vm408_vm15 = vcmp.eq.s32.totalorder %v5366_v33, %v6659_v48  ;;  %vm872_vm4 = vcmp.eq.s32.totalorder %v5374_v34, %v6663_v50 }
 0x244   :  { %vm4739_vm0 = vmpackc.low %vm1257_vm13, %vm7146_vm10  ;;  %v7170_v30 = vadd.f32 %v3186_v5, %v3121_v55  ;;  %v7172_v62 = vadd.f32 %v3177_v54, %v3120_v22  ;;  %v3136_v56 = vrot.slane %v3135_v21, 2  ;;  %vm887_vm10 = vcmp.eq.s32.totalorder %v5408_v35, %v6611_v43  ;;  %v4845_v5 = vld [vmem:[#allocation6 + $0x28] sm:$0xff] }
 0x245   :  { %4740 = vmatprep.subr.msk.bf16.mxu1 %vm4739_vm0, %v4933_v17  ;;  %vm1238_vm14 = vmor %vm406_vm6, %vm854_vm12  ;;  %v7186_v12 = vadd.f32 %v3195_v19, %v3122_v9  ;;  %v3145_v33 = vrot.slane %v3144_v29, 2  ;;  %vm455_vm12 = vcmp.eq.s32.totalorder %v5416_v36, %v6607_v24  ;;  %vm903_vm13 = vcmp.eq.s32.totalorder %v5416_v36, %v6611_v43  ;;  %v4846_v19 = vld [vmem:[#allocation6 + $0x20] sm:$0xff] }
 0x246   :  { %vm1254_vm2 = vmor %vm422_vm8, %vm870_vm11  ;;  %v3163_v34 = vrot.slane %v3162_v10, 2  ;;  %v3137_v2 = vadd.f32 %v3136_v56, %v3135_v21  ;;  %v3155_v11 = vadd.f32 %v3154_v63, %v3153_v60  ;;  %v7234_v8 = vstv %s7386_s2  ;;  %v4848_v60 = vld [vmem:[#allocation6 + $0x30] sm:$0xff]  ;;  %s4935_s2 = smov [#allocation8]  }
 0x247   :  { %vm4693_vm5 = vmpackc.low %vm1254_vm2, %vm1238_vm14  ;;  %vm441_vm14 = vcmp.eq.s32.totalorder %v5408_v35, %v6624_v41  ;;  %vm457_vm2 = vcmp.eq.s32.totalorder %v5416_v36, %v6624_v41  ;;  %v3146_v0 = vadd.f32 %v3145_v33, %v3144_v29  ;;  %v3197_v52 = vrot.slane %v7186_v12, 4  ;;  %v4850_v33 = vld [vmem:[#allocation6 + $0x40] sm:$0xff]  ;;  %s3513_s11 = sshll.u32 %s4935_s2, 4  ;;  %s3514_s11 = int_to_ptr.vmem [resolvable:$true] %s3513_s11 }
 0x248   :  { %4694 = vmatpush1.bf16.msk.msra.mxu0 %vm4693_vm5, %v4933_v17  ;;  %vm1240_vm6 = vmor %vm408_vm15, %vm856_vm1  ;;  %vm889_vm15 = vcmp.eq.s32.totalorder %v5408_v35, %v6628_v44  ;;  %v3164_v6 = vadd.f32 %v3163_v34, %v3162_v10  ;;  %v3138_v13 = vrot.slane %v3137_v2, 1  ;;  %v3156_v3 = vrot.slane %v3155_v11, 1  ;;  %s4901_s12 = scalar_lea.vmem %s3514_s11, 256  ;;  %p4906_p3 = scmp.lt.s32.totalorder %s3514_s11, %s3514_s11 }
 0x249   :  { %vm1256_vm8 = vmor %vm424_vm3, %vm872_vm4  ;;  %vm905_vm3 = vcmp.eq.s32.totalorder %v5416_v36, %v6628_v44  ;;  %v3147_v15 = vrot.slane %v3146_v0, 1  ;;  %v3198_v18 = vadd.f32 %v3197_v52, %v7186_v12  ;;  %v4934_v9 = vmov 1966171168   ;;  %p4902_p2 = scmp.ne.s32.totalorder %s3514_s11, %s4901_s12  ;;  %p4907_p4 = scmp.lt.s32.totalorder %s4901_s12, %s4901_s12 }
 0x24a   :  { %vm4741_vm11 = vmpackc.low %vm1256_vm8, %vm1240_vm6  ;;  %vm438_vm6 = vcmp.eq.s32.totalorder %v5408_v35, %v6641_v42  ;;  %vm454_vm8 = vcmp.eq.s32.totalorder %v5416_v36, %v6641_v42  ;;  %v3165_v4 = vrot.slane %v3164_v6, 1  ;;  %v3139_v7 = vadd.f32 %v3138_v13, %v3137_v2 }
 0x24b   :  { %4742 = vmatpush1.bf16.msk.msra.mxu1 %vm4741_vm11, %v4933_v17  ;;  %vm1271_vm0 = vmor %vm439_vm7, %vm887_vm10  ;;  %vm886_vm7 = vcmp.eq.s32.totalorder %v5408_v35, %v6645_v46  ;;  %v3157_v31 = vadd.f32 %v3156_v3, %v3155_v11  ;;  %v3199_v21 = vrot.slane %v3198_v18, 2  ;;  %v3410_v29 = vunpack.c.l.s4 %v4934_v9  ;;  %p4908_p5 = por %p4907_p4, %p4906_p3 }
 0x24c   :  { %vm1287_vm1 = vmor %vm455_vm12, %vm903_vm13  ;;  %vm902_vm12 = vcmp.eq.s32.totalorder %v5416_v36, %v6645_v46  ;;  %v3277_v16 = vadd.f32 %v7234_v8, %v3139_v7 }
 0x24d   :  { %vm4695_vm4 = vmpackc.low %vm1287_vm1, %vm1271_vm0  ;;  %vm440_vm0 = vcmp.eq.s32.totalorder %v5408_v35, %v6659_v48  ;;  %vm456_vm1 = vcmp.eq.s32.totalorder %v5416_v36, %v6659_v48  ;;  %v3279_v14 = vadd.f32 %v7234_v8, %v3157_v31  ;;  %v3200_v12 = vadd.f32 %v3199_v21, %v3198_v18  ;;  %v4852_v31 = vld [vmem:[#allocation6 + $0x50] sm:$0xff]  ;;  %p4909_p6 = pnand %p4908_p5, %p4902_p2 }
 0x24e   :  { %4696 = vmatprep.subr.msk.bf16.mxu0 %vm4695_vm4, %v4933_v17  ;;  %vm1273_vm5 = vmor %vm441_vm14, %vm889_vm15  ;;  %vm888_vm14 = vcmp.eq.s32.totalorder %v5408_v35, %v6663_v50  ;;  %v3148_v35 = vadd.f32 %v3147_v15, %v3146_v0  ;;  %v4355_v45 = vmul.f32 -1.442695, %v3277_v16  ;;  %v3411_v56 = vunpack.c.0.s8 %v3410_v29  ;;  %v4853_v16 = vld [vmem:[#allocation6 + $0x68] sm:$0xff] }
 0x24f   :  { %vm1289_vm10 = vmor %vm457_vm2, %vm905_vm3  ;;  %vm904_vm2 = vcmp.eq.s32.totalorder %v5416_v36, %v6663_v50  ;;  %v3166_v36 = vadd.f32 %v3165_v4, %v3164_v6  ;;  %v4357_v27 = vmul.f32 -1.442695, %v3279_v14  ;;  %v4851_v6 = vld [vmem:[#allocation6 + $0x58] sm:$0xff]  ;;  %v3201_v3 = vrot.slane %v3200_v12, 1 }
 0x250   :  { %vm4743_vm13 = vmpackc.low %vm1289_vm10, %vm1273_vm5  ;;  %vm471_vm5 = vcmp.eq.s32.totalorder %v5450_v37, %v6607_v24  ;;  %vm487_vm10 = vcmp.eq.s32.totalorder %v5458_v38, %v6607_v24  ;;  %v3278_v47 = vadd.f32 %v7234_v8, %v3148_v35  ;;  %4762 = vpow2.f32 %v4355_v45 }
 0x251   :  { %4744 = vmatprep.subr.msk.bf16.mxu1 %vm4743_vm13, %v4933_v17  ;;  %vm1270_vm11 = vmor %vm438_vm6, %vm886_vm7  ;;  %vm919_vm6 = vcmp.eq.s32.totalorder %v5450_v37, %v6611_v43  ;;  %v3280_v32 = vadd.f32 %v7234_v8, %v3166_v36  ;;  %4764 = vpow2.f32 %v4357_v27  ;;  %v7331_v0 = vsub.s32 %v3411_v56, %v4987_v1  ;;  %v4855_v27 = vld [vmem:[#allocation6 + $0x78] sm:$0xff] }
 0x252   :  { %vm1286_vm15 = vmor %vm454_vm8, %vm902_vm12  ;;  %vm935_vm8 = vcmp.eq.s32.totalorder %v5458_v38, %v6611_v43  ;;  %v4356_v28 = vmul.f32 -1.442695, %v3278_v47  ;;  %v3202_v14 = vadd.f32 %v3201_v3, %v3200_v12 }
 0x253   :  { %vm4697_vm3 = vmpackc.low %vm1286_vm15, %vm1270_vm11  ;;  %vm473_vm11 = vcmp.eq.s32.totalorder %v5450_v37, %v6624_v41  ;;  %vm489_vm15 = vcmp.eq.s32.totalorder %v5458_v38, %v6624_v41  ;;  %v4358_v49 = vmul.f32 -1.442695, %v3280_v32  ;;  %v4854_v32 = vld [vmem:[#allocation6 + $0x60] sm:$0xff] }
 0x254   :  { %4698 = vmatpush1.bf16.msk.msra.mxu0 %vm4697_vm3, %v4933_v17  ;;  %vm1272_vm4 = vmor %vm440_vm0, %vm888_vm14  ;;  %vm921_vm0 = vcmp.eq.s32.totalorder %v5450_v37, %v6628_v44  ;;  %4766 = vpow2.f32 %v4356_v28 }
 0x255   :  { %vm1288_vm7 = vmor %vm456_vm1, %vm904_vm2  ;;  %vm937_vm1 = vcmp.eq.s32.totalorder %v5458_v38, %v6628_v44  ;;  %4768 = vpow2.f32 %v4358_v49  ;;  %v3284_v49 = vadd.f32 %v7234_v8, %v3202_v14 }
 0x256   :  { %vm4745_vm12 = vmpackc.low %vm1288_vm7, %vm1272_vm4  ;;  %vm470_vm4 = vcmp.eq.s32.totalorder %v5450_v37, %v6641_v42  ;;  %vm486_vm7 = vcmp.eq.s32.totalorder %v5458_v38, %v6641_v42 }
 0x257   :  { %4746 = vmatpush1.bf16.msk.msra.mxu1 %vm4745_vm12, %v4933_v17  ;;  %vm1303_vm13 = vmor %vm471_vm5, %vm919_vm6  ;;  %vm918_vm5 = vcmp.eq.s32.totalorder %v5450_v37, %v6645_v46 }
 0x258   :  { %vm1319_vm14 = vmor %vm487_vm10, %vm935_vm8  ;;  %vm934_vm10 = vcmp.eq.s32.totalorder %v5458_v38, %v6645_v46 }
 0x259   :  { %vm4699_vm2 = vmpackc.low %vm1319_vm14, %vm1303_vm13  ;;  %vm472_vm13 = vcmp.eq.s32.totalorder %v5450_v37, %v6659_v48  ;;  %vm488_vm14 = vcmp.eq.s32.totalorder %v5458_v38, %v6659_v48 }
 0x25a   :  { %4700 = vmatprep.subr.msk.bf16.mxu0 %vm4699_vm2, %v4933_v17  ;;  %vm1305_vm3 = vmor %vm473_vm11, %vm921_vm0  ;;  %vm920_vm11 = vcmp.eq.s32.totalorder %v5450_v37, %v6663_v50  ;;  %v4763_v37 = vpop.eup %4762 }
 0x25b   :  { %vm1321_vm6 = vmor %vm489_vm15, %vm937_vm1  ;;  %vm936_vm15 = vcmp.eq.s32.totalorder %v5458_v38, %v6663_v50  ;;  %v4765_v38 = vpop.eup %4764 }
 0x25c   :  { %vm4747_vm8 = vmpackc.low %vm1321_vm6, %vm1305_vm3  ;;  %vm503_vm3 = vcmp.eq.s32.totalorder %v5492_v39, %v6607_v24  ;;  %vm519_vm6 = vcmp.eq.s32.totalorder %v5500_v40, %v6607_v24 }
 0x25d   :  { %4748 = vmatprep.subr.msk.bf16.mxu1 %vm4747_vm8, %v4933_v17  ;;  %vm1302_vm12 = vmor %vm470_vm4, %vm918_vm5  ;;  %vm951_vm4 = vcmp.eq.s32.totalorder %v5492_v39, %v6611_v43 }
 0x25e   :  { %vm1318_vm0 = vmor %vm486_vm7, %vm934_vm10  ;;  %vm967_vm7 = vcmp.eq.s32.totalorder %v5500_v40, %v6611_v43  ;;  %v4767_v24 = vpop.eup %4766 }
 0x25f   :  { %vm4701_vm1 = vmpackc.low %vm1318_vm0, %vm1302_vm12  ;;  %vm505_vm12 = vcmp.eq.s32.totalorder %v5492_v39, %v6624_v41  ;;  %vm521_vm0 = vcmp.eq.s32.totalorder %v5500_v40, %v6624_v41  ;;  %v4769_v43 = vpop.eup %4768  ;;  %v3341_v41 = vadd.f32 1.0, %v4763_v37 }
 0x260   :  { %4702 = vmatpush1.bf16.msk.msra.mxu0 %vm4701_vm1, %v4933_v17  ;;  %vm1304_vm2 = vmor %vm472_vm13, %vm920_vm11  ;;  %vm953_vm13 = vcmp.eq.s32.totalorder %v5492_v39, %v6628_v44 }
 0x261   :  { %vm1320_vm5 = vmor %vm488_vm14, %vm936_vm15  ;;  %vm969_vm14 = vcmp.eq.s32.totalorder %v5500_v40, %v6628_v44  ;;  %v3343_v44 = vadd.f32 1.0, %v4765_v38  ;;  %4770 = vrcp.f32 %v3341_v41  ;;  %v4856_v38 = vld [vmem:[#allocation6 + $0x70] sm:$0xff]  ;;  %v4362_v41 = vmul.f32 -1.442695, %v3284_v49 }
 0x262   :  { %vm4749_vm10 = vmpackc.low %vm1320_vm5, %vm1304_vm2  ;;  %vm502_vm2 = vcmp.eq.s32.totalorder %v5492_v39, %v6641_v42  ;;  %vm518_vm5 = vcmp.eq.s32.totalorder %v5500_v40, %v6641_v42  ;;  %v3342_v42 = vadd.f32 1.0, %v4767_v24 }
 0x263   :  { %4750 = vmatpush1.bf16.msk.msra.mxu1 %vm4749_vm10, %v4933_v17  ;;  %vm1335_vm8 = vmor %vm503_vm3, %vm951_vm4  ;;  %vm950_vm3 = vcmp.eq.s32.totalorder %v5492_v39, %v6645_v46  ;;  %4772 = vrcp.f32 %v3343_v44 }
 0x264   :  { %vm1351_vm11 = vmor %vm519_vm6, %vm967_vm7  ;;  %vm966_vm6 = vcmp.eq.s32.totalorder %v5500_v40, %v6645_v46  ;;  %v3344_v46 = vadd.f32 1.0, %v4769_v43  ;;  %4774 = vrcp.f32 %v3342_v42 }
 0x265   :  { %vm4703_vm15 = vmpackc.low %vm1351_vm11, %vm1335_vm8  ;;  %vm504_vm8 = vcmp.eq.s32.totalorder %v5492_v39, %v6659_v48  ;;  %vm520_vm11 = vcmp.eq.s32.totalorder %v5500_v40, %v6659_v48  ;;  %v4843_v48 = vld [vmem:[#allocation6 + $0x18] sm:$0xff] }
 0x266   :  { %4704 = vmatprep.subr.msk.bf16.mxu0 %vm4703_vm15, %v4933_v17  ;;  %vm1337_vm1 = vmor %vm505_vm12, %vm953_vm13  ;;  %vm952_vm12 = vcmp.eq.s32.totalorder %v5492_v39, %v6663_v50  ;;  %v3170_v39 = vrot.slane %v7164_v61, 4  ;;  %4776 = vrcp.f32 %v3344_v46 }
 0x267   :  { %vm1353_vm4 = vmor %vm521_vm0, %vm969_vm14  ;;  %vm968_vm0 = vcmp.eq.s32.totalorder %v5500_v40, %v6663_v50  ;;  %v3188_v40 = vrot.slane %v7170_v30, 4  ;;  %v3179_v50 = vrot.slane %v7172_v62, 4 }
 0x268   :  { %vm4751_vm7 = vmpackc.low %vm1353_vm4, %vm1337_vm1  ;;  %v3171_v25 = vadd.f32 %v3170_v39, %v7164_v61 }
 0x269   :  { %4752 = vmatprep.subr.msk.bf16.mxu1 %vm4751_vm7, %v4933_v17  ;;  %vm1334_vm10 = vmor %vm502_vm2, %vm950_vm3  ;;  %v3189_v53 = vadd.f32 %v3188_v40, %v7170_v30  ;;  %v3180_v54 = vadd.f32 %v3179_v50, %v7172_v62  ;;  %v4849_v62 = vld [vmem:[#allocation6 + $0x48] sm:$0xff] }
 0x26a   :  { %vm1350_vm13 = vmor %vm518_vm5, %vm966_vm6  ;;  %v3172_v26 = vrot.slane %v3171_v25, 2 }
 0x26b   :  { %vm4705_vm14 = vmpackc.low %vm1350_vm13, %vm1334_vm10  ;;  %v3190_v57 = vrot.slane %v3189_v53, 2  ;;  %v3181_v59 = vrot.slane %v3180_v54, 2  ;;  %v4771_v20 = vpop.eup %4770 }
 0x26c   :  { %4706 = vmatpush1.bf16.msk.msra.mxu0 %vm4705_vm14, %v4933_v17  ;;  %vm1336_vm15 = vmor %vm504_vm8, %vm952_vm12  ;;  %v3173_v22 = vadd.f32 %v3172_v26, %v3171_v25 }
 0x26d   :  { %vm1352_vm1 = vmor %vm520_vm11, %vm968_vm0  ;;  %v4773_v55 = vpop.eup %4772  ;;  %v3191_v61 = vadd.f32 %v3190_v57, %v3189_v53  ;;  %v3182_v10 = vadd.f32 %v3181_v59, %v3180_v54 }
 0x26e   :  { %vm4753_vm2 = vmpackc.low %vm1352_vm1, %vm1336_vm15  ;;  %v4775_v23 = vpop.eup %4774  ;;  %v3174_v63 = vrot.slane %v3173_v22, 1 }
 0x26f   :  { %4754 = vmatpush1.bf16.msk.msra.mxu1 %vm4753_vm2, %v4933_v17  ;;  %2906 = vmatmul.mubr.f32.vlgmr.msra.gmra.mrb[48].mxu0 %v4842_v51  ;;  %v4844_v17 = vld [vmem:[#allocation6 + $0x10] sm:$0xff]  ;;  %v3192_v34 = vrot.slane %v3191_v61, 1  ;;  %v3405_v2 = vcombine.low %v4771_v20, %v4775_v23  ;;  %v3183_v13 = vrot.slane %v3182_v10, 1 }
 0x270   :  { %4292 = vmatprep.mubr.msk.f32.mxu0 %vm2138_vm9, %v4843_v48  ;;  %v4777_v30 = vpop.eup %4776  ;;  %v3175_v7 = vadd.f32 %v3174_v63, %v3173_v22 }
 0x271   :  { %v3406_v11 = vcombine.low %v4773_v55, %v4777_v30  ;;  %v3415_v15 = vrot.slane %v3405_v2, %v7331_v0  ;;  %v3193_v35 = vadd.f32 %v3192_v34, %v3191_v61  ;;  %v3184_v1 = vadd.f32 %v3183_v13, %v3182_v10 }
 0x272   :  { %3019 = vmatmul.mubr.f32.vlgmr.msra.gmra.mrb[48].mxu1 %v4842_v51  ;;  %v3281_v47 = vadd.f32 %v7234_v8, %v3175_v7 }
 0x273   :  { %4348 = vmatprep.mubr.msk.f32.mxu1 %vm2138_vm9, %v4843_v48  ;;  %2912 = vmatmul.mubr.f32.gmra.mrb[50].mxu0 %v4844_v17  ;;  %v3422_v4 = vrot.slane %v3406_v11, %v7331_v0  ;;  %v3283_v45 = vadd.f32 %v7234_v8, %v3193_v35  ;;  %v3282_v28 = vadd.f32 %v7234_v8, %v3184_v1 }
 0x274   :  { %4293 = vmatprep.mubr.msk.f32.mxu0 %vm2138_vm9, %v4845_v5  ;;  %v4359_v37 = vmul.f32 -1.442695, %v3281_v47 }
 0x275   :  { %v3437_v36 = vcombine.low %v3415_v15, %v3422_v4  ;;  %v4361_v24 = vmul.f32 -1.442695, %v3283_v45  ;;  %v4360_v43 = vmul.f32 -1.442695, %v3282_v28 }
 0x276   :  { %3025 = vmatmul.mubr.f32.gmra.mrb[50].mxu1 %v4844_v17  ;;  %4778 = vpow2.f32 %v4359_v37 }
 0x277   :  { %4349 = vmatprep.mubr.msk.f32.mxu1 %vm2138_vm9, %v4845_v5  ;;  %2918 = vmatmul.mubr.f32.gmra.mrb[52].mxu0 %v4846_v19  ;;  %4780 = vpow2.f32 %v4361_v24  ;;  %v3445_v20 = vrot.slane %v3437_v36, %v7331_v0 }
 0x278   :  { %4294 = vmatprep.mubr.msk.f32.mxu0 %vm2138_vm9, %v4847_v58  ;;  %4782 = vpow2.f32 %v4360_v43 }
 0x279   :  { %4784 = vpow2.f32 %v4362_v41 }
 0x27a   :  { %3031 = vmatmul.mubr.f32.gmra.mrb[52].mxu1 %v4846_v19 }
 0x27b   :  { %4350 = vmatprep.mubr.msk.f32.mxu1 %vm2138_vm9, %v4847_v58  ;;  %2924 = vmatmul.mubr.f32.gmra.mrb[54].mxu0 %v4848_v60 }
 0x27c   :  { %4295 = vmatprep.mubr.msk.f32.mxu0 %vm2138_vm9, %v4849_v62 }
 0x27e   :  { %3037 = vmatmul.mubr.f32.gmra.mrb[54].mxu1 %v4848_v60 }
 0x27f   :  { %4351 = vmatprep.mubr.msk.f32.mxu1 %vm2138_vm9, %v4849_v62  ;;  %2930 = vmatmul.mubr.f32.gmra.mrb[56].mxu0 %v4850_v33 }
 0x280   :  { %4296 = vmatprep.mubr.msk.f32.mxu0 %vm2138_vm9, %v4851_v6  ;;  %v4779_v44 = vpop.eup %4778 }
 0x281   :  { %v4781_v42 = vpop.eup %4780  ;;  %v3345_v51 = vadd.f32 1.0, %v4779_v44 }
 0x282   :  { %3043 = vmatmul.mubr.f32.gmra.mrb[56].mxu1 %v4850_v33  ;;  %v4783_v46 = vpop.eup %4782  ;;  %v3347_v40 = vadd.f32 1.0, %v4781_v42 }
 0x283   :  { %4352 = vmatprep.mubr.msk.f32.mxu1 %vm2138_vm9, %v4851_v6  ;;  %2936 = vmatmul.mubr.f32.gmra.mrb[58].mxu0 %v4852_v31  ;;  %v4785_v39 = vpop.eup %4784  ;;  %v3346_v48 = vadd.f32 1.0, %v4783_v46  ;;  %4786 = vrcp.f32 %v3345_v51 }
 0x284   :  { %4297 = vmatprep.mubr.msk.f32.mxu0 %vm2138_vm9, %v4853_v16  ;;  %v3348_v50 = vadd.f32 1.0, %v4785_v39  ;;  %4788 = vrcp.f32 %v3347_v40 }
 0x285   :  { %4790 = vrcp.f32 %v3346_v48 }
 0x286   :  { %3049 = vmatmul.mubr.f32.gmra.mrb[58].mxu1 %v4852_v31  ;;  %4792 = vrcp.f32 %v3348_v50 }
 0x287   :  { %4353 = vmatprep.mubr.msk.f32.mxu1 %vm2138_vm9, %v4853_v16  ;;  %2942 = vmatmul.mubr.f32.gmra.mrb[60].mxu0 %v4854_v32 }
 0x288   :  { %4298 = vmatprep.mubr.msk.f32.mxu0 %vm2138_vm9, %v4855_v27 }
 0x28a   :  { %3055 = vmatmul.mubr.f32.gmra.mrb[60].mxu1 %v4854_v32 }
 0x28b   :  { %4354 = vmatprep.mubr.msk.f32.mxu1 %vm2138_vm9, %v4855_v27  ;;  %2948 = vmatmul.mubr.f32.gmra.mrb[62].mxu0 %v4856_v38 }
 0x28d   :  { %v4787_v52 = vpop.eup %4786 }
 0x28e   :  { %3061 = vmatmul.mubr.f32.gmra.mrb[62].mxu1 %v4856_v38  ;;  %v4789_v25 = vpop.eup %4788 }
 0x28f   :  { %v4791_v17 = vpop.eup %4790 }
 0x290   :  { %v4793_v53 = vpop.eup %4792  ;;  %v3407_v5 = vcombine.low %v4787_v52, %v4791_v17 }
 0x291   :  { %v3408_v54 = vcombine.low %v4789_v25, %v4793_v53 }
 0x292   :  { %v3429_v18 = vrot.slane %v3407_v5, %v7331_v0 }
 0x293   :  { %v3436_v26 = vrot.slane %v3408_v54, %v7331_v0 }
 0x295   :  { %v3438_v58 = vcombine.low %v3429_v18, %v3436_v26 }
 0x297   :  { %v3452_v21 = vrot.slane %v3438_v58, %v7331_v0 }
 0x299   :  { %v3453_v60 = vcombine.low %v3445_v20, %v3452_v21 }
 0x29b   :  { %3505 = vst [vmem:[#allocation8] sm:$0xff] %v3453_v60 }
 0x2b2   :  { %v2681_v19 = vpop.f32.mrb[32].mxu0 }
 0x2b3   :  { %v2683_v57 = vpop.f32.mrb[33].mxu0 }
 0x2b5   :  { %v2794_v59 = vpop.f32.mrb[32].mxu1 }
 0x2b6   :  { %v2796_v55 = vpop.f32.mrb[33].mxu1  ;;  %v2687_v22 = vpop.f32.mrb[34].mxu0 }
 0x2b7   :  { %v2689_v23 = vpop.f32.mrb[35].mxu0 }
 0x2b9   :  { %v2800_v61 = vpop.f32.mrb[34].mxu1 }
 0x2ba   :  { %v2802_v9 = vpop.f32.mrb[35].mxu1  ;;  %v2693_v29 = vpop.f32.mrb[36].mxu0 }
 0x2bb   :  { %v2695_v30 = vpop.f32.mrb[37].mxu0 }
 0x2bd   :  { %v2806_v62 = vpop.f32.mrb[36].mxu1 }
 0x2be   :  { %v2808_v10 = vpop.f32.mrb[37].mxu1 }
 0x2bf   :  { %v2699_v12 = vpop.f32.mrb[38].mxu0 }
 0x2c0   :  { %v2701_v56 = vpop.f32.mrb[39].mxu0 }
 0x2c1   :  { %v2812_v63 = vpop.f32.mrb[38].mxu1 }
 0x2c2   :  { %v2814_v33 = vpop.f32.mrb[39].mxu1 }
 0x2c3   :  { %v2705_v34 = vpop.f32.mrb[40].mxu0 }
 0x2c4   :  { %v3075_v2 = vmul.f32 %v2705_v34, %v2681_v19  ;;  %v2707_v11 = vpop.f32.mrb[41].mxu0 }
 0x2c5   :  { %v2818_v6 = vpop.f32.mrb[40].mxu1  ;;  %v3076_v13 = vmul.f32 %v2707_v11, %v2683_v57 }
 0x2c6   :  { %v3077_v3 = vmul.f32 %v2818_v6, %v2794_v59  ;;  %v2820_v15 = vpop.f32.mrb[41].mxu1 }
 0x2c7   :  { %v3078_v4 = vmul.f32 %v2820_v15, %v2796_v55 }
 0x2c8   :  { %v2711_v7 = vpop.f32.mrb[42].mxu0 }
 0x2c9   :  { %v3091_v31 = vmul.f32 %v2711_v7, %v2687_v22  ;;  %v2824_v35 = vpop.f32.mrb[42].mxu1  ;;  %v2713_v36 = vpop.f32.mrb[43].mxu0 }
 0x2ca   :  { %v3093_v16 = vmul.f32 %v2824_v35, %v2800_v61  ;;  %v3092_v1 = vmul.f32 %v2713_v36, %v2689_v23  ;;  %v2826_v14 = vpop.f32.mrb[43].mxu1 }
 0x2cb   :  { %v3203_v47 = vadd.f32 %v3091_v31, %v3075_v2  ;;  %v3094_v32 = vmul.f32 %v2826_v14, %v2802_v9 }
 0x2cc   :  { %v3221_v45 = vadd.f32 %v3093_v16, %v3077_v3  ;;  %v3212_v27 = vadd.f32 %v3092_v1, %v3076_v13  ;;  %v2717_v28 = vpop.f32.mrb[44].mxu0 }
 0x2cd   :  { %v3230_v49 = vadd.f32 %v3094_v32, %v3078_v4  ;;  %v3107_v37 = vmul.f32 %v2717_v28, %v2693_v29  ;;  %v2830_v38 = vpop.f32.mrb[44].mxu1  ;;  %v2719_v24 = vpop.f32.mrb[45].mxu0 }
 0x2ce   :  { %v3109_v43 = vmul.f32 %v2830_v38, %v2806_v62  ;;  %v3108_v41 = vmul.f32 %v2719_v24, %v2695_v30  ;;  %v2832_v44 = vpop.f32.mrb[45].mxu1 }
 0x2cf   :  { %v3204_v42 = vadd.f32 %v3203_v47, %v3107_v37  ;;  %v3110_v46 = vmul.f32 %v2832_v44, %v2808_v10 }
 0x2d0   :  { %v3222_v39 = vadd.f32 %v3221_v45, %v3109_v43  ;;  %v3213_v51 = vadd.f32 %v3212_v27, %v3108_v41  ;;  %v2723_v40 = vpop.f32.mrb[46].mxu0 }
 0x2d1   :  { %v3231_v48 = vadd.f32 %v3230_v49, %v3110_v46  ;;  %v3123_v50 = vmul.f32 %v2723_v40, %v2699_v12  ;;  %v2836_v52 = vpop.f32.mrb[46].mxu1  ;;  %v2725_v25 = vpop.f32.mrb[47].mxu0 }
 0x2d2   :  { %v3125_v17 = vmul.f32 %v2836_v52, %v2812_v63  ;;  %v3124_v53 = vmul.f32 %v2725_v25, %v2701_v56  ;;  %v2838_v5 = vpop.f32.mrb[47].mxu1 }
 0x2d3   :  { %v3205_v54 = vadd.f32 %v3204_v42, %v3123_v50  ;;  %v3126_v18 = vmul.f32 %v2838_v5, %v2814_v33 }
 0x2d4   :  { %v3223_v26 = vadd.f32 %v3222_v39, %v3125_v17  ;;  %v3214_v19 = vadd.f32 %v3213_v51, %v3124_v53 }
 0x2d5   :  { %v3206_v57 = vrot.slane %v3205_v54, 4  ;;  %v3232_v58 = vadd.f32 %v3231_v48, %v3126_v18 }
 0x2d6   :  { %v3224_v59 = vrot.slane %v3223_v26, 4  ;;  %v3215_v20 = vrot.slane %v3214_v19, 4 }
 0x2d7   :  { %v3207_v21 = vadd.f32 %v3206_v57, %v3205_v54  ;;  %v3233_v55 = vrot.slane %v3232_v58, 4 }
 0x2d8   :  { %v3225_v22 = vadd.f32 %v3224_v59, %v3223_v26  ;;  %v3216_v23 = vadd.f32 %v3215_v20, %v3214_v19 }
 0x2d9   :  { %v3208_v60 = vrot.slane %v3207_v21, 2  ;;  %v3234_v61 = vadd.f32 %v3233_v55, %v3232_v58 }
 0x2da   :  { %v3226_v9 = vrot.slane %v3225_v22, 2  ;;  %v3217_v29 = vrot.slane %v3216_v23, 2 }
 0x2db   :  { %v3209_v30 = vadd.f32 %v3208_v60, %v3207_v21  ;;  %v3235_v62 = vrot.slane %v3234_v61, 2 }
 0x2dc   :  { %v3227_v10 = vadd.f32 %v3226_v9, %v3225_v22  ;;  %v3218_v12 = vadd.f32 %v3217_v29, %v3216_v23 }
 0x2dd   :  { %v3210_v56 = vrot.slane %v3209_v30, 1  ;;  %v3236_v63 = vadd.f32 %v3235_v62, %v3234_v61 }
 0x2de   :  { %v3228_v33 = vrot.slane %v3227_v10, 1  ;;  %v3219_v34 = vrot.slane %v3218_v12, 1 }
 0x2df   :  { %v3211_v2 = vadd.f32 %v3210_v56, %v3209_v30  ;;  %v3237_v11 = vrot.slane %v3236_v63, 1 }
 0x2e0   :  { %v3229_v6 = vadd.f32 %v3228_v33, %v3227_v10  ;;  %v3220_v13 = vadd.f32 %v3219_v34, %v3218_v12 }
 0x2e1   :  { %v3285_v3 = vadd.f32 %v7234_v8, %v3211_v2  ;;  %v3238_v15 = vadd.f32 %v3237_v11, %v3236_v63 }
 0x2e2   :  { %v3287_v4 = vadd.f32 %v7234_v8, %v3229_v6  ;;  %v3286_v7 = vadd.f32 %v7234_v8, %v3220_v13 }
 0x2e3   :  { %v4363_v31 = vmul.f32 -1.442695, %v3285_v3  ;;  %v3288_v35 = vadd.f32 %v7234_v8, %v3238_v15 }
 0x2e4   :  { %v4365_v36 = vmul.f32 -1.442695, %v3287_v4  ;;  %v4364_v16 = vmul.f32 -1.442695, %v3286_v7 }
 0x2e5   :  { %4794 = vpow2.f32 %v4363_v31  ;;  %v4366_v1 = vmul.f32 -1.442695, %v3288_v35 }
 0x2e6   :  { %4796 = vpow2.f32 %v4365_v36 }
 0x2e7   :  { %4798 = vpow2.f32 %v4364_v16 }
 0x2e8   :  { %4800 = vpow2.f32 %v4366_v1 }
 0x2ef   :  { %v4795_v14 = vpop.eup %4794 }
 0x2f0   :  { %v4797_v47 = vpop.eup %4796  ;;  %v3349_v32 = vadd.f32 1.0, %v4795_v14 }
 0x2f1   :  { %v4799_v45 = vpop.eup %4798  ;;  %v3351_v27 = vadd.f32 1.0, %v4797_v47 }
 0x2f2   :  { %v4801_v28 = vpop.eup %4800  ;;  %4802 = vrcp.f32 %v3349_v32  ;;  %v3350_v49 = vadd.f32 1.0, %v4799_v45 }
 0x2f3   :  { %4804 = vrcp.f32 %v3351_v27  ;;  %v3352_v37 = vadd.f32 1.0, %v4801_v28 }
 0x2f4   :  { %4806 = vrcp.f32 %v3350_v49 }
 0x2f5   :  { %4808 = vrcp.f32 %v3352_v37 }
 0x2fc   :  { %v4803_v38 = vpop.eup %4802 }
 0x2fd   :  { %v4805_v24 = vpop.eup %4804 }
 0x2fe   :  { %v4807_v43 = vpop.eup %4806 }
 0x2ff   :  { %v4809_v41 = vpop.eup %4808  ;;  %v3454_v44 = vcombine.low %v4803_v38, %v4807_v43 }
 0x300   :  { %v3455_v42 = vcombine.low %v4805_v24, %v4809_v41 }
 0x301   :  { %v7354_v46 = vrot.slane %v3454_v44, %v7331_v0 }
 0x302   :  { %v7357_v39 = vrot.slane %v3455_v42, %v7331_v0 }
 0x304   :  { %v3486_v51 = vcombine.low %v7354_v46, %v7357_v39 }
 0x342   :  { %v2907_v40 = vpop.f32.mrb[48].mxu0 }
 0x343   :  { %v2909_v48 = vpop.f32.mrb[49].mxu0 }
 0x345   :  { %v3020_v50 = vpop.f32.mrb[48].mxu1 }
 0x346   :  { %v3022_v52 = vpop.f32.mrb[49].mxu1  ;;  %v2913_v25 = vpop.f32.mrb[50].mxu0 }
 0x347   :  { %v2915_v17 = vpop.f32.mrb[51].mxu0 }
 0x349   :  { %v3026_v53 = vpop.f32.mrb[50].mxu1 }
 0x34a   :  { %v3028_v5 = vpop.f32.mrb[51].mxu1  ;;  %v2919_v54 = vpop.f32.mrb[52].mxu0 }
 0x34b   :  { %v2921_v18 = vpop.f32.mrb[53].mxu0 }
 0x34d   :  { %v3032_v26 = vpop.f32.mrb[52].mxu1 }
 0x34e   :  { %v3034_v19 = vpop.f32.mrb[53].mxu1  ;;  %v2925_v57 = vpop.f32.mrb[54].mxu0 }
 0x34f   :  { %v2927_v58 = vpop.f32.mrb[55].mxu0 }
 0x351   :  { %v3038_v59 = vpop.f32.mrb[54].mxu1 }
 0x352   :  { %v3040_v20 = vpop.f32.mrb[55].mxu1  ;;  %v2931_v21 = vpop.f32.mrb[56].mxu0 }
 0x353   :  { %v3079_v55 = vmul.f32 %v2931_v21, %v2907_v40  ;;  %v2933_v22 = vpop.f32.mrb[57].mxu0 }
 0x354   :  { %v3080_v23 = vmul.f32 %v2933_v22, %v2909_v48 }
 0x355   :  { %v3044_v60 = vpop.f32.mrb[56].mxu1 }
 0x356   :  { %v3081_v61 = vmul.f32 %v3044_v60, %v3020_v50  ;;  %v3046_v9 = vpop.f32.mrb[57].mxu1  ;;  %v2937_v29 = vpop.f32.mrb[58].mxu0 }
 0x357   :  { %v3082_v30 = vmul.f32 %v3046_v9, %v3022_v52  ;;  %v3095_v62 = vmul.f32 %v2937_v29, %v2913_v25  ;;  %v2939_v10 = vpop.f32.mrb[59].mxu0 }
 0x358   :  { %v3096_v12 = vmul.f32 %v2939_v10, %v2915_v17 }
 0x359   :  { %v3239_v56 = vadd.f32 %v3095_v62, %v3079_v55  ;;  %v3050_v63 = vpop.f32.mrb[58].mxu1 }
 0x35a   :  { %v3097_v33 = vmul.f32 %v3050_v63, %v3026_v53  ;;  %v3248_v34 = vadd.f32 %v3096_v12, %v3080_v23  ;;  %v3052_v2 = vpop.f32.mrb[59].mxu1  ;;  %v2943_v11 = vpop.f32.mrb[60].mxu0 }
 0x35b   :  { %v3098_v6 = vmul.f32 %v3052_v2, %v3028_v5  ;;  %v3111_v13 = vmul.f32 %v2943_v11, %v2919_v54  ;;  %v2945_v3 = vpop.f32.mrb[61].mxu0 }
 0x35c   :  { %v3257_v15 = vadd.f32 %v3097_v33, %v3081_v61  ;;  %v3112_v4 = vmul.f32 %v2945_v3, %v2921_v18 }
 0x35d   :  { %v3266_v7 = vadd.f32 %v3098_v6, %v3082_v30  ;;  %v3240_v31 = vadd.f32 %v3239_v56, %v3111_v13  ;;  %v3056_v35 = vpop.f32.mrb[60].mxu1 }
 0x35e   :  { %v3113_v36 = vmul.f32 %v3056_v35, %v3032_v26  ;;  %v3249_v16 = vadd.f32 %v3248_v34, %v3112_v4  ;;  %v3058_v1 = vpop.f32.mrb[61].mxu1  ;;  %v2949_v14 = vpop.f32.mrb[62].mxu0 }
 0x35f   :  { %v3114_v47 = vmul.f32 %v3058_v1, %v3034_v19  ;;  %v3127_v32 = vmul.f32 %v2949_v14, %v2925_v57  ;;  %v2951_v45 = vpop.f32.mrb[63].mxu0 }
 0x360   :  { %v3258_v27 = vadd.f32 %v3257_v15, %v3113_v36  ;;  %v3128_v28 = vmul.f32 %v2951_v45, %v2927_v58 }
 0x361   :  { %v3267_v49 = vadd.f32 %v3266_v7, %v3114_v47  ;;  %v3241_v37 = vadd.f32 %v3240_v31, %v3127_v32  ;;  %v3062_v38 = vpop.f32.mrb[62].mxu1 }
 0x362   :  { %v3129_v24 = vmul.f32 %v3062_v38, %v3038_v59  ;;  %v3250_v43 = vadd.f32 %v3249_v16, %v3128_v28  ;;  %v3064_v41 = vpop.f32.mrb[63].mxu1 }
 0x363   :  { %v3242_v44 = vrot.slane %v3241_v37, 4  ;;  %v3130_v42 = vmul.f32 %v3064_v41, %v3040_v20 }
 0x364   :  { %v3259_v40 = vadd.f32 %v3258_v27, %v3129_v24  ;;  %v3251_v48 = vrot.slane %v3250_v43, 4  ;;  %v3494_v27 = vrot.slane %v3486_v51, %v7331_v0 }
 0x365   :  { %v3243_v50 = vadd.f32 %v3242_v44, %v3241_v37  ;;  %v3268_v52 = vadd.f32 %v3267_v49, %v3130_v42 }
 0x366   :  { %v3260_v25 = vrot.slane %v3259_v40, 4  ;;  %v3252_v17 = vadd.f32 %v3251_v48, %v3250_v43 }
 0x367   :  { %v3244_v53 = vrot.slane %v3243_v50, 2  ;;  %v3269_v5 = vrot.slane %v3268_v52, 4 }
 0x368   :  { %v3261_v54 = vadd.f32 %v3260_v25, %v3259_v40  ;;  %v3253_v18 = vrot.slane %v3252_v17, 2 }
 0x369   :  { %v3245_v26 = vadd.f32 %v3244_v53, %v3243_v50  ;;  %v3270_v19 = vadd.f32 %v3269_v5, %v3268_v52 }
 0x36a   :  { %v3262_v57 = vrot.slane %v3261_v54, 2  ;;  %v3254_v58 = vadd.f32 %v3253_v18, %v3252_v17 }
 0x36b   :  { %v3246_v21 = vrot.slane %v3245_v26, 1  ;;  %v3271_v59 = vrot.slane %v3270_v19, 2 }
 0x36c   :  { %v3263_v55 = vadd.f32 %v3262_v57, %v3261_v54  ;;  %v3255_v22 = vrot.slane %v3254_v58, 1 }
 0x36d   :  { %v3247_v23 = vadd.f32 %v3246_v21, %v3245_v26  ;;  %v3272_v20 = vadd.f32 %v3271_v59, %v3270_v19 }
 0x36e   :  { %v3264_v60 = vrot.slane %v3263_v55, 1  ;;  %v3256_v61 = vadd.f32 %v3255_v22, %v3254_v58 }
 0x36f   :  { %v3289_v9 = vadd.f32 %v7234_v8, %v3247_v23  ;;  %v3273_v29 = vrot.slane %v3272_v20, 1 }
 0x370   :  { %v3265_v30 = vadd.f32 %v3264_v60, %v3263_v55  ;;  %v3290_v62 = vadd.f32 %v7234_v8, %v3256_v61 }
 0x371   :  { %v4367_v10 = vmul.f32 -1.442695, %v3289_v9  ;;  %v3274_v12 = vadd.f32 %v3273_v29, %v3272_v20 }
 0x372   :  { %v3291_v56 = vadd.f32 %v7234_v8, %v3265_v30  ;;  %v4368_v63 = vmul.f32 -1.442695, %v3290_v62 }
 0x373   :  { %4810 = vpow2.f32 %v4367_v10  ;;  %v3292_v33 = vadd.f32 %v7234_v8, %v3274_v12 }
 0x374   :  { %v4369_v34 = vmul.f32 -1.442695, %v3291_v56  ;;  %4812 = vpow2.f32 %v4368_v63 }
 0x375   :  { %v4370_v2 = vmul.f32 -1.442695, %v3292_v33 }
 0x376   :  { %4814 = vpow2.f32 %v4369_v34 }
 0x377   :  { %4816 = vpow2.f32 %v4370_v2 }
 0x37d   :  { %v4811_v11 = vpop.eup %4810 }
 0x37e   :  { %v4813_v6 = vpop.eup %4812  ;;  %v3353_v13 = vadd.f32 1.0, %v4811_v11 }
 0x37f   :  { %v3354_v3 = vadd.f32 1.0, %v4813_v6 }
 0x380   :  { %v4815_v15 = vpop.eup %4814  ;;  %4818 = vrcp.f32 %v3353_v13 }
 0x381   :  { %v4817_v4 = vpop.eup %4816  ;;  %v3355_v7 = vadd.f32 1.0, %v4815_v15  ;;  %4820 = vrcp.f32 %v3354_v3 }
 0x382   :  { %v3356_v31 = vadd.f32 1.0, %v4817_v4 }
 0x383   :  { %4822 = vrcp.f32 %v3355_v7 }
 0x384   :  { %4824 = vrcp.f32 %v3356_v31 }
 0x38a   :  { %v4819_v35 = vpop.eup %4818 }
 0x38b   :  { %v4821_v36 = vpop.eup %4820 }
 0x38c   :  { %v3456_v8 = vcombine.low %v4819_v35, %v4821_v36 }
 0x38d   :  { %v4823_v16 = vpop.eup %4822 }
 0x38e   :  { %v4825_v1 = vpop.eup %4824  ;;  %v3478_v47 = vrot.slane %v3456_v8, %v7331_v0 }
 0x38f   :  { %v3457_v14 = vcombine.low %v4823_v16, %v4825_v1 }
 0x391   :  { %v3485_v32 = vrot.slane %v3457_v14, %v7331_v0 }
 0x393   :  { %v3487_v45 = vcombine.low %v3478_v47, %v3485_v32 }
 0x395   :  { %v3501_v28 = vrot.slane %v3487_v45, %v7331_v0 }
 0x397   :  { %v3502_v49 = vcombine.low %v3494_v27, %v3501_v28 }
 0x399   :  { %3506 = vst [vmem:[#allocation8 + $0x8] sm:$0xff] %v3502_v49 }
 0x39a   :  { %4912 = shalt.err (!%p4909_p6)
}
 0x39b   :  { %s4913_s15 = scalar_lea.hbm %s7387_s3, 256 }
 0x39c   :  { %p4914_p7 = scmp.ne.s32.totalorder %s7387_s3, %s4913_s15  ;;  %p4917_p8 = scmp.lt.u32.totalorder %s4913_s15, %s7387_s3 }
 0x39e   :  { %p4919_p9 = pnand %p4917_p8, %p4914_p7 }
 0x3a0   :  { %4922 = shalt.err (!%p4919_p9)
}
 0x3a1   :  { %3516 = dma.vmem_to_hbm [thread:$0]  %s3514_s11, 256, %s7387_s3, [#allocation5]  }
 0x3a2   :  { %4927 = dma.done.wait [#allocation5], 256  }
 0x3a3   :  { %4928 = vsyncadd [#allocation5], 4294967040 }
 0x3a4   :  { %3520 = vsyncpa [#allocation4], 1 }
 0x3a5   :  { %3521 = vsyncpa [#allocation7], 1 }
 0x3a6   :  { %3522 = vsyncpa [#allocation5], 1 }

</bundles_post_ra>
